<compile_context>
chip_gen: v6e
topology: v6e:2x2x1
jax: 0.10.0
libtpu: 0.0.40
codegen_flags: <defaults>
</compile_context>

<pallas_src>
import functools

import jax
import jax.numpy as jnp
from jax.experimental import pallas as pl
from jax.experimental.pallas import tpu as pltpu

D_MODEL = 256
N_HEAD = 8
HEAD_DIM = D_MODEL // N_HEAD
D_FF = 2048
KSIZE = 9
IN_CH = 2
N_LAYERS = 3
VOCAB = 512
LN_EPS = 1e-5


# ----------------------------------------------------------------------------
# Fused kernel: conv-embed prologue + one encoder layer per grid step +
# fc-head epilogue.  Eval mode (dropout = identity).
# ----------------------------------------------------------------------------
def fused_transformer_kernel(
    # grid-invariant inputs (same block index every step -> VMEM/SMEM resident)
    patches_ref, conv_w_ref, conv_b_ref, pos_ref, mask_ref, fcw_ref, fcb_ref,
    # per-layer stacked weights (one layer slice per grid step; big ones bf16)
    wqkv_ref, bqkv_ref, wo_ref, bo_ref, ln1g_ref, ln1b_ref,
    w1_ref, b1_ref, w2_ref, b2_ref, ln2g_ref, ln2b_ref,
    # output
    out_ref,
    # scratch
    h_ref,
    *, batch, seq):
    layer = pl.program_id(0)
    n_rows = batch * seq

    # ---- layer-0 prologue: causal conv (im2col matmul) + tanh + pos add ----
    @pl.when(layer == 0)
    def _():
        emb = jnp.dot(patches_ref[...], conv_w_ref[...],
                      preferred_element_type=jnp.float32)
        h_ref[...] = jnp.tanh(emb + conv_b_ref[...]) + pos_ref[...]

    x2 = h_ref[...]                                   # (N, D) f32, N = B*S

    # ---- fused Q|K|V projection: one (N,256)@(256,768) bf16 MXU pass ----
    # 1/sqrt(HEAD_DIM) is pre-folded into the Q columns of wqkv/bqkv.
    qkv = jnp.dot(x2.astype(jnp.bfloat16), wqkv_ref[...],
                  preferred_element_type=jnp.float32) + bqkv_ref[...]

    mask = mask_ref[...]                              # (S, S); implicit bcast

    # Per-head scores/softmax (static unroll); head outputs stay in registers
    # and are concatenated so the output projection is ONE full-width matmul.
    # TODO(synk): a fully batched 'bhqd,bhkd->bhqk' contraction would remove
    # the 32-lane head slices but needs an in-kernel (B,S,H,Dh)->(B,H,S,Dh)
    # transpose; kept the proven per-head form for lowering safety.
    # TODO(synk): switch to flash-style online-softmax KV tiling if S grows
    # beyond ~128 (full (B,S,S) scores do not scale in VMEM).
    head_outs = []
    for h in range(N_HEAD):
        lo = h * HEAD_DIM
        hi = lo + HEAD_DIM
        qh = qkv[:, lo:hi].reshape(batch, seq, HEAD_DIM)
        kh = qkv[:, D_MODEL + lo:D_MODEL + hi].reshape(batch, seq, HEAD_DIM)
        vh = qkv[:, 2 * D_MODEL + lo:2 * D_MODEL + hi].reshape(
            batch, seq, HEAD_DIM)
        s = jnp.einsum('bqd,bkd->bqk', qh, kh,
                       preferred_element_type=jnp.float32) + mask
        m = jnp.max(s, axis=-1, keepdims=True)
        p = jnp.exp(s - m)
        p = p * pl.reciprocal(jnp.sum(p, axis=-1, keepdims=True), approx=True)
        oh = jnp.einsum('bqk,bkd->bqd', p, vh,
                        preferred_element_type=jnp.float32)
        head_outs.append(oh.reshape(n_rows, HEAD_DIM))

    attn_heads = jnp.concatenate(head_outs, axis=-1)          # (N, 256) f32
    attn = jnp.dot(attn_heads.astype(jnp.bfloat16), wo_ref[...],
                   preferred_element_type=jnp.float32) + bo_ref[...]

    # residual + LayerNorm 1 (post-norm, as in nn.TransformerEncoderLayer)
    h1 = x2 + attn
    mu = jnp.mean(h1, axis=-1, keepdims=True)
    var = jnp.mean((h1 - mu) ** 2, axis=-1, keepdims=True)
    h1 = (h1 - mu) * jax.lax.rsqrt(var + LN_EPS) * ln1g_ref[...] + ln1b_ref[...]

    # feed-forward (ReLU); bf16 MXU operands, f32 accumulation + elementwise
    # TODO(synk): int8 w1/w2 (v5e/v6e) / fp8 (v7x) would further halve the
    # dominant FFN weight stream; not implemented here.
    ff = jnp.dot(h1.astype(jnp.bfloat16), w1_ref[...],
                 preferred_element_type=jnp.float32) + b1_ref[...]
    ff = jnp.maximum(ff, 0.0)
    ff = jnp.dot(ff.astype(jnp.bfloat16), w2_ref[...],
                 preferred_element_type=jnp.float32) + b2_ref[...]

    # residual + LayerNorm 2
    h2 = h1 + ff
    mu2 = jnp.mean(h2, axis=-1, keepdims=True)
    var2 = jnp.mean((h2 - mu2) ** 2, axis=-1, keepdims=True)
    h2 = (h2 - mu2) * jax.lax.rsqrt(var2 + LN_EPS) * ln2g_ref[...] + ln2b_ref[...]

    h_ref[...] = h2

    # ---- last-layer epilogue: fc head 256 -> 1, lane-dense (1, N) output ----
    @pl.when(layer == N_LAYERS - 1)
    def _():
        out_ref[...] = jax.lax.dot_general(
            fcw_ref[...], h2, (((1,), (1,)), ((), ())),
            preferred_element_type=jnp.float32) + fcb_ref[0, 0]


# ----------------------------------------------------------------------------
# Forward pass (JAX glue + single pallas_call).  `prep` = prepare_params(...)
# ----------------------------------------------------------------------------
@jax.jit
def transformer_time_series_forward(prep, x, y, attention_mask):
    B, T = x.shape
    N = B * T

    # z = cat((y.unsqueeze(1), x.unsqueeze(1)), dim=1) -> (B, 2, T)
    z = jnp.stack([y, x], axis=1)
    # causal Conv1d(2, 256, 9): left-pad by k-1 then im2col patches
    z_pad = jnp.pad(z, ((0, 0), (0, 0), (KSIZE - 1, 0)))
    idx = jnp.arange(T)[:, None] + jnp.arange(KSIZE)[None, :]      # (T, K)
    patches = z_pad[:, :, idx]                                      # (B, C, T, K)
    patches = jnp.transpose(patches, (0, 2, 1, 3)).reshape(N, IN_CH * KSIZE)

    # positional embedding gather (JAX glue), clamped to the table size
    pos_idx = jnp.clip(x.astype(jnp.int32), 0, VOCAB - 1)
    pos_flat = prep['pos_emb'][pos_idx].reshape(N, D_MODEL)

    kernel = functools.partial(fused_transformer_kernel, batch=B, seq=T)

    def const_spec(shape):
        return pl.BlockSpec(shape, lambda l, _n=len(shape): (0,) * _n)

    def layer_spec(shape):
        # shape = (N_LAYERS, ...); squeeze the layer axis, index it by l.
        nrest = len(shape) - 1
        return pl.BlockSpec((None,) + tuple(shape[1:]),
                            lambda l, _n=nrest: (l,) + (0,) * _n)

    out = pl.pallas_call(
        kernel,
        out_shape=jax.ShapeDtypeStruct((1, N), jnp.float32),
        grid_spec=pltpu.PrefetchScalarGridSpec(
            num_scalar_prefetch=0,
            grid=(N_LAYERS,),
            in_specs=[
                const_spec((N, IN_CH * KSIZE)),        # patches
                const_spec((IN_CH * KSIZE, D_MODEL)),  # conv_w
                const_spec((1, D_MODEL)),              # conv_b
                const_spec((N, D_MODEL)),              # pos
                const_spec((T, T)),                    # additive causal mask
                const_spec((1, D_MODEL)),              # fc_w
                pl.BlockSpec(memory_space=pltpu.MemorySpace.SMEM),  # fc_b scalar
                layer_spec(prep['wqkv'].shape),
                layer_spec(prep['bqkv'].shape),
                layer_spec(prep['wo'].shape),
                layer_spec(prep['bo'].shape),
                layer_spec(prep['ln1_g'].shape),
                layer_spec(prep['ln1_b'].shape),
                layer_spec(prep['w1'].shape),
                layer_spec(prep['b1'].shape),
                layer_spec(prep['w2'].shape),
                layer_spec(prep['b2'].shape),
                layer_spec(prep['ln2_g'].shape),
                layer_spec(prep['ln2_b'].shape),
            ],
            out_specs=pl.BlockSpec((1, N), lambda l: (0, 0)),
            scratch_shapes=[
                pltpu.VMEM((N, D_MODEL), jnp.float32),   # resident activation
            ]),
        compiler_params=pltpu.CompilerParams(
            dimension_semantics=("arbitrary",),          # layers are sequential
            vmem_limit_bytes=32 * 1024 * 1024),
    )(patches, prep['conv_w'], prep['conv_b'], pos_flat, attention_mask,
      prep['fc_w'], prep['fc_b'],
      prep['wqkv'], prep['bqkv'], prep['wo'], prep['bo'],
      prep['ln1_g'], prep['ln1_b'],
      prep['w1'], prep['b1'], prep['w2'], prep['b2'],
      prep['ln2_g'], prep['ln2_b'])

    # (1, B*T) lane-dense kernel output -> (B, T, 1)
    return out.reshape(B, T, 1)


# ----------------------------------------------------------------------------
# Parameters: synthetic init in PyTorch-equivalent layout, plus a ONE-TIME
# prep step (outside the forward pass) that folds the attention scale, builds
# the im2col conv weight, and casts the large streamed matrices to bf16.
# ----------------------------------------------------------------------------
def init_params(key):
    keys = iter(jax.random.split(key, 16))

    def nrm(shape, scale):
        return jax.random.normal(next(keys), shape, jnp.float32) * scale

    return {
        'conv_w': nrm((D_MODEL, IN_CH, KSIZE), 0.1),     # Conv1d(2, 256, 9)
        'conv_b': nrm((D_MODEL,), 0.02),
        'pos_emb': nrm((VOCAB, D_MODEL), 0.02),          # Embedding(512, 256)
        'fc_w': nrm((1, D_MODEL), 0.05),                 # Linear(256, 1)
        'fc_b': jnp.zeros((1, 1), jnp.float32),
        'wqkv': nrm((N_LAYERS, D_MODEL, 3 * D_MODEL), 0.05),
        'bqkv': jnp.zeros((N_LAYERS, 1, 3 * D_MODEL), jnp.float32),
        'wo': nrm((N_LAYERS, D_MODEL, D_MODEL), 0.05),
        'bo': jnp.zeros((N_LAYERS, 1, D_MODEL), jnp.float32),
        'ln1_g': jnp.ones((N_LAYERS, 1, D_MODEL), jnp.float32),
        'ln1_b': jnp.zeros((N_LAYERS, 1, D_MODEL), jnp.float32),
        'w1': nrm((N_LAYERS, D_MODEL, D_FF), 0.03),
        'b1': jnp.zeros((N_LAYERS, 1, D_FF), jnp.float32),
        'w2': nrm((N_LAYERS, D_FF, D_MODEL), 0.03),
        'b2': jnp.zeros((N_LAYERS, 1, D_MODEL), jnp.float32),
        'ln2_g': jnp.ones((N_LAYERS, 1, D_MODEL), jnp.float32),
        'ln2_b': jnp.zeros((N_LAYERS, 1, D_MODEL), jnp.float32),
    }


def prepare_params(p):
    """One-time weight prep (NOT in the per-call path):
    - fold 1/sqrt(HEAD_DIM) into the Q columns of the fused QKV weight/bias,
    - reshape the conv weight for the im2col matmul,
    - cast the big per-layer streamed matrices to bf16 (halves HBM traffic
      of the weight-DMA-bound layer loop); biases/LN params stay f32."""
    scale = 1.0 / (HEAD_DIM ** 0.5)
    wqkv = p['wqkv'].at[:, :, :D_MODEL].multiply(scale)
    bqkv = p['bqkv'].at[:, :, :D_MODEL].multiply(scale)
    return {
        'conv_w': jnp.transpose(p['conv_w'].reshape(D_MODEL, IN_CH * KSIZE)),
        'conv_b': p['conv_b'].reshape(1, D_MODEL),
        'pos_emb': p['pos_emb'],
        'fc_w': p['fc_w'],
        'fc_b': p['fc_b'].reshape(1, 1),
        'wqkv': wqkv.astype(jnp.bfloat16),
        'bqkv': bqkv,
        'wo': p['wo'].astype(jnp.bfloat16),
        'bo': p['bo'],
        'ln1_g': p['ln1_g'], 'ln1_b': p['ln1_b'],
        'w1': p['w1'].astype(jnp.bfloat16),
        'b1': p['b1'],
        'w2': p['w2'].astype(jnp.bfloat16),
        'b2': p['b2'],
        'ln2_g': p['ln2_g'], 'ln2_b': p['ln2_b'],
    }


if __name__ == "__main__":
    B, T = 2, 16
    key = jax.random.PRNGKey(0)
    kp, ky = jax.random.split(key)

    params = init_params(kp)
    prep = prepare_params(params)   # one-time; not in the forward path

    # x: time indices (also the Embedding indices); y: series values.
    x = jnp.broadcast_to(jnp.arange(T, dtype=jnp.float32), (B, T))
    y = jax.random.normal(ky, (B, T), jnp.float32)
    # causal additive attention mask (0 on/below diagonal, -1e9 above)
    attention_mask = jnp.where(
        jnp.arange(T)[None, :] <= jnp.arange(T)[:, None], 0.0, -1e9
    ).astype(jnp.float32)

    out = transformer_time_series_forward(prep, x, y, attention_mask)
    out = jax.block_until_ready(out)
    assert out.shape == (B, T, 1), out.shape
    assert bool(jnp.all(jnp.isfinite(out)))
    print("KERNEL_OK")
</pallas_src>

<mosaic_0001>
module attributes {stable_mosaic.version = 11 : i64} {
  func.func @fused_transformer_kernel(%arg0: i32, %arg1: memref<32x18xf32, #tpu.memory_space<vmem>>, %arg2: memref<18x256xf32, #tpu.memory_space<vmem>>, %arg3: memref<1x256xf32, #tpu.memory_space<vmem>>, %arg4: memref<32x256xf32, #tpu.memory_space<vmem>>, %arg5: memref<16x16xf32, #tpu.memory_space<vmem>>, %arg6: memref<1x256xf32, #tpu.memory_space<vmem>>, %arg7: memref<1x1xf32, #tpu.memory_space<smem>>, %arg8: memref<1x256x768xbf16, #tpu.memory_space<vmem>>, %arg9: memref<1x1x768xf32, #tpu.memory_space<vmem>>, %arg10: memref<1x256x256xbf16, #tpu.memory_space<vmem>>, %arg11: memref<1x1x256xf32, #tpu.memory_space<vmem>>, %arg12: memref<1x1x256xf32, #tpu.memory_space<vmem>>, %arg13: memref<1x1x256xf32, #tpu.memory_space<vmem>>, %arg14: memref<1x256x2048xbf16, #tpu.memory_space<vmem>>, %arg15: memref<1x1x2048xf32, #tpu.memory_space<vmem>>, %arg16: memref<1x2048x256xbf16, #tpu.memory_space<vmem>>, %arg17: memref<1x1x256xf32, #tpu.memory_space<vmem>>, %arg18: memref<1x1x256xf32, #tpu.memory_space<vmem>>, %arg19: memref<1x1x256xf32, #tpu.memory_space<vmem>>, %arg20: memref<1x32xf32, #tpu.memory_space<vmem>>, %arg21: memref<32x256xf32, #tpu.memory_space<vmem>>) attributes {dimension_semantics = [#tpu.dimension_semantics<arbitrary>], iteration_bounds = array<i64: 3>, scalar_prefetch = 0 : i64, scratch_operands = 1 : i64, tpu.core_type = #tpu.core_type<tc>, window_params = [{pipeline_mode = #tpu.pipeline_mode<synchronous>, transform_indices = @transform_0, window_bounds = array<i64: 32, 18>}, {pipeline_mode = #tpu.pipeline_mode<synchronous>, transform_indices = @transform_1, window_bounds = array<i64: 18, 256>}, {pipeline_mode = #tpu.pipeline_mode<synchronous>, transform_indices = @transform_2, window_bounds = array<i64: 1, 256>}, {pipeline_mode = #tpu.pipeline_mode<synchronous>, transform_indices = @transform_3, window_bounds = array<i64: 32, 256>}, {pipeline_mode = #tpu.pipeline_mode<synchronous>, transform_indices = @transform_4, window_bounds = array<i64: 16, 16>}, {pipeline_mode = #tpu.pipeline_mode<synchronous>, transform_indices = @transform_5, window_bounds = array<i64: 1, 256>}, {transform_indices = @transform_6, window_bounds = array<i64: 1, 1>}, {transform_indices = @transform_7, window_bounds = array<i64: 1, 256, 768>}, {transform_indices = @transform_8, window_bounds = array<i64: 1, 1, 768>}, {transform_indices = @transform_9, window_bounds = array<i64: 1, 256, 256>}, {transform_indices = @transform_10, window_bounds = array<i64: 1, 1, 256>}, {transform_indices = @transform_11, window_bounds = array<i64: 1, 1, 256>}, {transform_indices = @transform_12, window_bounds = array<i64: 1, 1, 256>}, {transform_indices = @transform_13, window_bounds = array<i64: 1, 256, 2048>}, {transform_indices = @transform_14, window_bounds = array<i64: 1, 1, 2048>}, {transform_indices = @transform_15, window_bounds = array<i64: 1, 2048, 256>}, {transform_indices = @transform_16, window_bounds = array<i64: 1, 1, 256>}, {transform_indices = @transform_17, window_bounds = array<i64: 1, 1, 256>}, {transform_indices = @transform_18, window_bounds = array<i64: 1, 1, 256>}, {pipeline_mode = #tpu.pipeline_mode<synchronous>, transform_indices = @transform_19, window_bounds = array<i64: 1, 32>}]} {
    %c0_i32 = arith.constant 0 : i32
    %0 = arith.cmpi eq, %arg0, %c0_i32 : i32
    %1 = arith.extui %0 : i1 to i32
    %c0_i32_0 = arith.constant 0 : i32
    %2 = arith.cmpi ne, %1, %c0_i32_0 : i32
    scf.if %2 {
      %c0_89 = arith.constant 0 : index
      %c0_90 = arith.constant 0 : index
      %274 = vector.load %arg1[%c0_89, %c0_90] : memref<32x18xf32, #tpu.memory_space<vmem>>, vector<32x18xf32>
      %c0_91 = arith.constant 0 : index
      %c0_92 = arith.constant 0 : index
      %275 = vector.load %arg2[%c0_91, %c0_92] : memref<18x256xf32, #tpu.memory_space<vmem>>, vector<18x256xf32>
      %cst_93 = arith.constant dense<0.000000e+00> : vector<32x256xf32>
      %276 = tpu.matmul %274, %275, %cst_93 {dimension_numbers = #tpu.dot_dimension_numbers<[1], [0], [0], [1], [0, 0, 1, 1], [], []>} : vector<32x18xf32>, vector<18x256xf32>, vector<32x256xf32> -> vector<32x256xf32>
      %c0_94 = arith.constant 0 : index
      %c0_95 = arith.constant 0 : index
      %277 = vector.load %arg3[%c0_94, %c0_95] : memref<1x256xf32, #tpu.memory_space<vmem>>, vector<1x256xf32>
      %278 = vector.broadcast %277 : vector<1x256xf32> to vector<32x256xf32>
      %279 = arith.addf %276, %278 : vector<32x256xf32>
      %280 = math.tanh %279 : vector<32x256xf32>
      %c0_96 = arith.constant 0 : index
      %c0_97 = arith.constant 0 : index
      %281 = vector.load %arg4[%c0_96, %c0_97] : memref<32x256xf32, #tpu.memory_space<vmem>>, vector<32x256xf32>
      %282 = arith.addf %280, %281 : vector<32x256xf32>
      %c0_98 = arith.constant 0 : index
      %c0_99 = arith.constant 0 : index
      %283 = vector.load %arg21[%c0_98, %c0_99] : memref<32x256xf32, #tpu.memory_space<vmem>>, vector<32x256xf32>
      tpu.vector_store %arg21[%c0_98, %c0_99], %282 {strides = array<i32>} : memref<32x256xf32, #tpu.memory_space<vmem>>, vector<32x256xf32>,
    } else {
    }
    %c0 = arith.constant 0 : index
    %c0_1 = arith.constant 0 : index
    %3 = vector.load %arg21[%c0, %c0_1] : memref<32x256xf32, #tpu.memory_space<vmem>>, vector<32x256xf32>
    %4 = arith.truncf %3 : vector<32x256xf32> to vector<32x256xbf16>
    %c0_2 = arith.constant 0 : index
    %c0_3 = arith.constant 0 : index
    %c0_4 = arith.constant 0 : index
    %5 = vector.load %arg8[%c0_2, %c0_3, %c0_4] : memref<1x256x768xbf16, #tpu.memory_space<vmem>>, vector<1x256x768xbf16>
    %6 = vector.shape_cast %5 : vector<1x256x768xbf16> to vector<256x768xbf16>
    %cst = arith.constant dense<0.000000e+00> : vector<32x768xf32>
    %7 = tpu.matmul %4, %6, %cst {dimension_numbers = #tpu.dot_dimension_numbers<[1], [0], [0], [1], [0, 0, 1, 1], [], []>} : vector<32x256xbf16>, vector<256x768xbf16>, vector<32x768xf32> -> vector<32x768xf32>
    %c0_5 = arith.constant 0 : index
    %c0_6 = arith.constant 0 : index
    %c0_7 = arith.constant 0 : index
    %8 = vector.load %arg9[%c0_5, %c0_6, %c0_7] : memref<1x1x768xf32, #tpu.memory_space<vmem>>, vector<1x1x768xf32>
    %9 = vector.shape_cast %8 : vector<1x1x768xf32> to vector<1x768xf32>
    %10 = vector.broadcast %9 : vector<1x768xf32> to vector<32x768xf32>
    %11 = arith.addf %7, %10 : vector<32x768xf32>
    %c0_8 = arith.constant 0 : index
    %c0_9 = arith.constant 0 : index
    %12 = vector.load %arg5[%c0_8, %c0_9] : memref<16x16xf32, #tpu.memory_space<vmem>>, vector<16x16xf32>
    %13 = vector.extract_strided_slice %11 {offsets = [0, 0], sizes = [32, 32], strides = [1, 1]} : vector<32x768xf32> to vector<32x32xf32>
    %14 = vector.shape_cast %13 : vector<32x32xf32> to vector<2x16x32xf32>
    %15 = vector.extract_strided_slice %11 {offsets = [0, 256], sizes = [32, 32], strides = [1, 1]} : vector<32x768xf32> to vector<32x32xf32>
    %16 = vector.shape_cast %15 : vector<32x32xf32> to vector<2x16x32xf32>
    %17 = vector.extract_strided_slice %11 {offsets = [0, 512], sizes = [32, 32], strides = [1, 1]} : vector<32x768xf32> to vector<32x32xf32>
    %18 = vector.shape_cast %17 : vector<32x32xf32> to vector<2x16x32xf32>
    "tpu.trace_start"() <{level = 10 : i32, message = "bqd,bkd->bqk"}> : () -> ()
    %cst_10 = arith.constant dense<0.000000e+00> : vector<2x16x16xf32>
    %19 = tpu.matmul %14, %16, %cst_10 {dimension_numbers = #tpu.dot_dimension_numbers<[2], [2], [1], [1], [0, 0, 0, 1, 1, 1], [0], [0]>} : vector<2x16x32xf32>, vector<2x16x32xf32>, vector<2x16x16xf32> -> vector<2x16x16xf32>
    "tpu.trace_stop"() : () -> ()
    %20 = vector.shape_cast %12 : vector<16x16xf32> to vector<1x16x16xf32>
    %21 = vector.broadcast %20 : vector<1x16x16xf32> to vector<2x16x16xf32>
    %22 = arith.addf %19, %21 : vector<2x16x16xf32>
    %cst_11 = arith.constant dense<0xFF800000> : vector<2x16xf32>
    %23 = vector.multi_reduction <maximumf>, %22, %cst_11 [2] : vector<2x16x16xf32> to vector<2x16xf32>
    %24 = vector.shape_cast %23 : vector<2x16xf32> to vector<2x16x1xf32>
    %25 = vector.broadcast %24 : vector<2x16x1xf32> to vector<2x16x16xf32>
    %26 = arith.subf %22, %25 : vector<2x16x16xf32>
    %27 = math.exp %26 : vector<2x16x16xf32>
    %cst_12 = arith.constant dense<0.000000e+00> : vector<2x16xf32>
    %28 = vector.multi_reduction <add>, %27, %cst_12 [2] : vector<2x16x16xf32> to vector<2x16xf32>
    %29 = vector.shape_cast %28 : vector<2x16xf32> to vector<2x16x1xf32>
    %30 = tpu.reciprocal %29 {approx = true} : vector<2x16x1xf32> -> vector<2x16x1xf32>
    %31 = vector.broadcast %30 : vector<2x16x1xf32> to vector<2x16x16xf32>
    %32 = arith.mulf %27, %31 : vector<2x16x16xf32>
    "tpu.trace_start"() <{level = 10 : i32, message = "bqk,bkd->bqd"}> : () -> ()
    %cst_13 = arith.constant dense<0.000000e+00> : vector<2x16x32xf32>
    %33 = tpu.matmul %32, %18, %cst_13 {dimension_numbers = #tpu.dot_dimension_numbers<[2], [1], [1], [2], [0, 0, 0, 1, 1, 2], [0], [0]>} : vector<2x16x16xf32>, vector<2x16x32xf32>, vector<2x16x32xf32> -> vector<2x16x32xf32>
    "tpu.trace_stop"() : () -> ()
    %34 = vector.shape_cast %33 : vector<2x16x32xf32> to vector<32x32xf32>
    %35 = vector.extract_strided_slice %11 {offsets = [0, 32], sizes = [32, 32], strides = [1, 1]} : vector<32x768xf32> to vector<32x32xf32>
    %36 = vector.shape_cast %35 : vector<32x32xf32> to vector<2x16x32xf32>
    %37 = vector.extract_strided_slice %11 {offsets = [0, 288], sizes = [32, 32], strides = [1, 1]} : vector<32x768xf32> to vector<32x32xf32>
    %38 = vector.shape_cast %37 : vector<32x32xf32> to vector<2x16x32xf32>
    %39 = vector.extract_strided_slice %11 {offsets = [0, 544], sizes = [32, 32], strides = [1, 1]} : vector<32x768xf32> to vector<32x32xf32>
    %40 = vector.shape_cast %39 : vector<32x32xf32> to vector<2x16x32xf32>
    "tpu.trace_start"() <{level = 10 : i32, message = "bqd,bkd->bqk"}> : () -> ()
    %cst_14 = arith.constant dense<0.000000e+00> : vector<2x16x16xf32>
    %41 = tpu.matmul %36, %38, %cst_14 {dimension_numbers = #tpu.dot_dimension_numbers<[2], [2], [1], [1], [0, 0, 0, 1, 1, 1], [0], [0]>} : vector<2x16x32xf32>, vector<2x16x32xf32>, vector<2x16x16xf32> -> vector<2x16x16xf32>
    "tpu.trace_stop"() : () -> ()
    %42 = vector.shape_cast %12 : vector<16x16xf32> to vector<1x16x16xf32>
    %43 = vector.broadcast %42 : vector<1x16x16xf32> to vector<2x16x16xf32>
    %44 = arith.addf %41, %43 : vector<2x16x16xf32>
    %cst_15 = arith.constant dense<0xFF800000> : vector<2x16xf32>
    %45 = vector.multi_reduction <maximumf>, %44, %cst_15 [2] : vector<2x16x16xf32> to vector<2x16xf32>
    %46 = vector.shape_cast %45 : vector<2x16xf32> to vector<2x16x1xf32>
    %47 = vector.broadcast %46 : vector<2x16x1xf32> to vector<2x16x16xf32>
    %48 = arith.subf %44, %47 : vector<2x16x16xf32>
    %49 = math.exp %48 : vector<2x16x16xf32>
    %cst_16 = arith.constant dense<0.000000e+00> : vector<2x16xf32>
    %50 = vector.multi_reduction <add>, %49, %cst_16 [2] : vector<2x16x16xf32> to vector<2x16xf32>
    %51 = vector.shape_cast %50 : vector<2x16xf32> to vector<2x16x1xf32>
    %52 = tpu.reciprocal %51 {approx = true} : vector<2x16x1xf32> -> vector<2x16x1xf32>
    %53 = vector.broadcast %52 : vector<2x16x1xf32> to vector<2x16x16xf32>
    %54 = arith.mulf %49, %53 : vector<2x16x16xf32>
    "tpu.trace_start"() <{level = 10 : i32, message = "bqk,bkd->bqd"}> : () -> ()
    %cst_17 = arith.constant dense<0.000000e+00> : vector<2x16x32xf32>
    %55 = tpu.matmul %54, %40, %cst_17 {dimension_numbers = #tpu.dot_dimension_numbers<[2], [1], [1], [2], [0, 0, 0, 1, 1, 2], [0], [0]>} : vector<2x16x16xf32>, vector<2x16x32xf32>, vector<2x16x32xf32> -> vector<2x16x32xf32>
    "tpu.trace_stop"() : () -> ()
    %56 = vector.shape_cast %55 : vector<2x16x32xf32> to vector<32x32xf32>
    %57 = vector.extract_strided_slice %11 {offsets = [0, 64], sizes = [32, 32], strides = [1, 1]} : vector<32x768xf32> to vector<32x32xf32>
    %58 = vector.shape_cast %57 : vector<32x32xf32> to vector<2x16x32xf32>
    %59 = vector.extract_strided_slice %11 {offsets = [0, 320], sizes = [32, 32], strides = [1, 1]} : vector<32x768xf32> to vector<32x32xf32>
    %60 = vector.shape_cast %59 : vector<32x32xf32> to vector<2x16x32xf32>
    %61 = vector.extract_strided_slice %11 {offsets = [0, 576], sizes = [32, 32], strides = [1, 1]} : vector<32x768xf32> to vector<32x32xf32>
    %62 = vector.shape_cast %61 : vector<32x32xf32> to vector<2x16x32xf32>
    "tpu.trace_start"() <{level = 10 : i32, message = "bqd,bkd->bqk"}> : () -> ()
    %cst_18 = arith.constant dense<0.000000e+00> : vector<2x16x16xf32>
    %63 = tpu.matmul %58, %60, %cst_18 {dimension_numbers = #tpu.dot_dimension_numbers<[2], [2], [1], [1], [0, 0, 0, 1, 1, 1], [0], [0]>} : vector<2x16x32xf32>, vector<2x16x32xf32>, vector<2x16x16xf32> -> vector<2x16x16xf32>
    "tpu.trace_stop"() : () -> ()
    %64 = vector.shape_cast %12 : vector<16x16xf32> to vector<1x16x16xf32>
    %65 = vector.broadcast %64 : vector<1x16x16xf32> to vector<2x16x16xf32>
    %66 = arith.addf %63, %65 : vector<2x16x16xf32>
    %cst_19 = arith.constant dense<0xFF800000> : vector<2x16xf32>
    %67 = vector.multi_reduction <maximumf>, %66, %cst_19 [2] : vector<2x16x16xf32> to vector<2x16xf32>
    %68 = vector.shape_cast %67 : vector<2x16xf32> to vector<2x16x1xf32>
    %69 = vector.broadcast %68 : vector<2x16x1xf32> to vector<2x16x16xf32>
    %70 = arith.subf %66, %69 : vector<2x16x16xf32>
    %71 = math.exp %70 : vector<2x16x16xf32>
    %cst_20 = arith.constant dense<0.000000e+00> : vector<2x16xf32>
    %72 = vector.multi_reduction <add>, %71, %cst_20 [2] : vector<2x16x16xf32> to vector<2x16xf32>
    %73 = vector.shape_cast %72 : vector<2x16xf32> to vector<2x16x1xf32>
    %74 = tpu.reciprocal %73 {approx = true} : vector<2x16x1xf32> -> vector<2x16x1xf32>
    %75 = vector.broadcast %74 : vector<2x16x1xf32> to vector<2x16x16xf32>
    %76 = arith.mulf %71, %75 : vector<2x16x16xf32>
    "tpu.trace_start"() <{level = 10 : i32, message = "bqk,bkd->bqd"}> : () -> ()
    %cst_21 = arith.constant dense<0.000000e+00> : vector<2x16x32xf32>
    %77 = tpu.matmul %76, %62, %cst_21 {dimension_numbers = #tpu.dot_dimension_numbers<[2], [1], [1], [2], [0, 0, 0, 1, 1, 2], [0], [0]>} : vector<2x16x16xf32>, vector<2x16x32xf32>, vector<2x16x32xf32> -> vector<2x16x32xf32>
    "tpu.trace_stop"() : () -> ()
    %78 = vector.shape_cast %77 : vector<2x16x32xf32> to vector<32x32xf32>
    %79 = vector.extract_strided_slice %11 {offsets = [0, 96], sizes = [32, 32], strides = [1, 1]} : vector<32x768xf32> to vector<32x32xf32>
    %80 = vector.shape_cast %79 : vector<32x32xf32> to vector<2x16x32xf32>
    %81 = vector.extract_strided_slice %11 {offsets = [0, 352], sizes = [32, 32], strides = [1, 1]} : vector<32x768xf32> to vector<32x32xf32>
    %82 = vector.shape_cast %81 : vector<32x32xf32> to vector<2x16x32xf32>
    %83 = vector.extract_strided_slice %11 {offsets = [0, 608], sizes = [32, 32], strides = [1, 1]} : vector<32x768xf32> to vector<32x32xf32>
    %84 = vector.shape_cast %83 : vector<32x32xf32> to vector<2x16x32xf32>
    "tpu.trace_start"() <{level = 10 : i32, message = "bqd,bkd->bqk"}> : () -> ()
    %cst_22 = arith.constant dense<0.000000e+00> : vector<2x16x16xf32>
    %85 = tpu.matmul %80, %82, %cst_22 {dimension_numbers = #tpu.dot_dimension_numbers<[2], [2], [1], [1], [0, 0, 0, 1, 1, 1], [0], [0]>} : vector<2x16x32xf32>, vector<2x16x32xf32>, vector<2x16x16xf32> -> vector<2x16x16xf32>
    "tpu.trace_stop"() : () -> ()
    %86 = vector.shape_cast %12 : vector<16x16xf32> to vector<1x16x16xf32>
    %87 = vector.broadcast %86 : vector<1x16x16xf32> to vector<2x16x16xf32>
    %88 = arith.addf %85, %87 : vector<2x16x16xf32>
    %cst_23 = arith.constant dense<0xFF800000> : vector<2x16xf32>
    %89 = vector.multi_reduction <maximumf>, %88, %cst_23 [2] : vector<2x16x16xf32> to vector<2x16xf32>
    %90 = vector.shape_cast %89 : vector<2x16xf32> to vector<2x16x1xf32>
    %91 = vector.broadcast %90 : vector<2x16x1xf32> to vector<2x16x16xf32>
    %92 = arith.subf %88, %91 : vector<2x16x16xf32>
    %93 = math.exp %92 : vector<2x16x16xf32>
    %cst_24 = arith.constant dense<0.000000e+00> : vector<2x16xf32>
    %94 = vector.multi_reduction <add>, %93, %cst_24 [2] : vector<2x16x16xf32> to vector<2x16xf32>
    %95 = vector.shape_cast %94 : vector<2x16xf32> to vector<2x16x1xf32>
    %96 = tpu.reciprocal %95 {approx = true} : vector<2x16x1xf32> -> vector<2x16x1xf32>
    %97 = vector.broadcast %96 : vector<2x16x1xf32> to vector<2x16x16xf32>
    %98 = arith.mulf %93, %97 : vector<2x16x16xf32>
    "tpu.trace_start"() <{level = 10 : i32, message = "bqk,bkd->bqd"}> : () -> ()
    %cst_25 = arith.constant dense<0.000000e+00> : vector<2x16x32xf32>
    %99 = tpu.matmul %98, %84, %cst_25 {dimension_numbers = #tpu.dot_dimension_numbers<[2], [1], [1], [2], [0, 0, 0, 1, 1, 2], [0], [0]>} : vector<2x16x16xf32>, vector<2x16x32xf32>, vector<2x16x32xf32> -> vector<2x16x32xf32>
    "tpu.trace_stop"() : () -> ()
    %100 = vector.shape_cast %99 : vector<2x16x32xf32> to vector<32x32xf32>
    %101 = vector.extract_strided_slice %11 {offsets = [0, 128], sizes = [32, 32], strides = [1, 1]} : vector<32x768xf32> to vector<32x32xf32>
    %102 = vector.shape_cast %101 : vector<32x32xf32> to vector<2x16x32xf32>
    %103 = vector.extract_strided_slice %11 {offsets = [0, 384], sizes = [32, 32], strides = [1, 1]} : vector<32x768xf32> to vector<32x32xf32>
    %104 = vector.shape_cast %103 : vector<32x32xf32> to vector<2x16x32xf32>
    %105 = vector.extract_strided_slice %11 {offsets = [0, 640], sizes = [32, 32], strides = [1, 1]} : vector<32x768xf32> to vector<32x32xf32>
    %106 = vector.shape_cast %105 : vector<32x32xf32> to vector<2x16x32xf32>
    "tpu.trace_start"() <{level = 10 : i32, message = "bqd,bkd->bqk"}> : () -> ()
    %cst_26 = arith.constant dense<0.000000e+00> : vector<2x16x16xf32>
    %107 = tpu.matmul %102, %104, %cst_26 {dimension_numbers = #tpu.dot_dimension_numbers<[2], [2], [1], [1], [0, 0, 0, 1, 1, 1], [0], [0]>} : vector<2x16x32xf32>, vector<2x16x32xf32>, vector<2x16x16xf32> -> vector<2x16x16xf32>
    "tpu.trace_stop"() : () -> ()
    %108 = vector.shape_cast %12 : vector<16x16xf32> to vector<1x16x16xf32>
    %109 = vector.broadcast %108 : vector<1x16x16xf32> to vector<2x16x16xf32>
    %110 = arith.addf %107, %109 : vector<2x16x16xf32>
    %cst_27 = arith.constant dense<0xFF800000> : vector<2x16xf32>
    %111 = vector.multi_reduction <maximumf>, %110, %cst_27 [2] : vector<2x16x16xf32> to vector<2x16xf32>
    %112 = vector.shape_cast %111 : vector<2x16xf32> to vector<2x16x1xf32>
    %113 = vector.broadcast %112 : vector<2x16x1xf32> to vector<2x16x16xf32>
    %114 = arith.subf %110, %113 : vector<2x16x16xf32>
    %115 = math.exp %114 : vector<2x16x16xf32>
    %cst_28 = arith.constant dense<0.000000e+00> : vector<2x16xf32>
    %116 = vector.multi_reduction <add>, %115, %cst_28 [2] : vector<2x16x16xf32> to vector<2x16xf32>
    %117 = vector.shape_cast %116 : vector<2x16xf32> to vector<2x16x1xf32>
    %118 = tpu.reciprocal %117 {approx = true} : vector<2x16x1xf32> -> vector<2x16x1xf32>
    %119 = vector.broadcast %118 : vector<2x16x1xf32> to vector<2x16x16xf32>
    %120 = arith.mulf %115, %119 : vector<2x16x16xf32>
    "tpu.trace_start"() <{level = 10 : i32, message = "bqk,bkd->bqd"}> : () -> ()
    %cst_29 = arith.constant dense<0.000000e+00> : vector<2x16x32xf32>
    %121 = tpu.matmul %120, %106, %cst_29 {dimension_numbers = #tpu.dot_dimension_numbers<[2], [1], [1], [2], [0, 0, 0, 1, 1, 2], [0], [0]>} : vector<2x16x16xf32>, vector<2x16x32xf32>, vector<2x16x32xf32> -> vector<2x16x32xf32>
    "tpu.trace_stop"() : () -> ()
    %122 = vector.shape_cast %121 : vector<2x16x32xf32> to vector<32x32xf32>
    %123 = vector.extract_strided_slice %11 {offsets = [0, 160], sizes = [32, 32], strides = [1, 1]} : vector<32x768xf32> to vector<32x32xf32>
    %124 = vector.shape_cast %123 : vector<32x32xf32> to vector<2x16x32xf32>
    %125 = vector.extract_strided_slice %11 {offsets = [0, 416], sizes = [32, 32], strides = [1, 1]} : vector<32x768xf32> to vector<32x32xf32>
    %126 = vector.shape_cast %125 : vector<32x32xf32> to vector<2x16x32xf32>
    %127 = vector.extract_strided_slice %11 {offsets = [0, 672], sizes = [32, 32], strides = [1, 1]} : vector<32x768xf32> to vector<32x32xf32>
    %128 = vector.shape_cast %127 : vector<32x32xf32> to vector<2x16x32xf32>
    "tpu.trace_start"() <{level = 10 : i32, message = "bqd,bkd->bqk"}> : () -> ()
    %cst_30 = arith.constant dense<0.000000e+00> : vector<2x16x16xf32>
    %129 = tpu.matmul %124, %126, %cst_30 {dimension_numbers = #tpu.dot_dimension_numbers<[2], [2], [1], [1], [0, 0, 0, 1, 1, 1], [0], [0]>} : vector<2x16x32xf32>, vector<2x16x32xf32>, vector<2x16x16xf32> -> vector<2x16x16xf32>
    "tpu.trace_stop"() : () -> ()
    %130 = vector.shape_cast %12 : vector<16x16xf32> to vector<1x16x16xf32>
    %131 = vector.broadcast %130 : vector<1x16x16xf32> to vector<2x16x16xf32>
    %132 = arith.addf %129, %131 : vector<2x16x16xf32>
    %cst_31 = arith.constant dense<0xFF800000> : vector<2x16xf32>
    %133 = vector.multi_reduction <maximumf>, %132, %cst_31 [2] : vector<2x16x16xf32> to vector<2x16xf32>
    %134 = vector.shape_cast %133 : vector<2x16xf32> to vector<2x16x1xf32>
    %135 = vector.broadcast %134 : vector<2x16x1xf32> to vector<2x16x16xf32>
    %136 = arith.subf %132, %135 : vector<2x16x16xf32>
    %137 = math.exp %136 : vector<2x16x16xf32>
    %cst_32 = arith.constant dense<0.000000e+00> : vector<2x16xf32>
    %138 = vector.multi_reduction <add>, %137, %cst_32 [2] : vector<2x16x16xf32> to vector<2x16xf32>
    %139 = vector.shape_cast %138 : vector<2x16xf32> to vector<2x16x1xf32>
    %140 = tpu.reciprocal %139 {approx = true} : vector<2x16x1xf32> -> vector<2x16x1xf32>
    %141 = vector.broadcast %140 : vector<2x16x1xf32> to vector<2x16x16xf32>
    %142 = arith.mulf %137, %141 : vector<2x16x16xf32>
    "tpu.trace_start"() <{level = 10 : i32, message = "bqk,bkd->bqd"}> : () -> ()
    %cst_33 = arith.constant dense<0.000000e+00> : vector<2x16x32xf32>
    %143 = tpu.matmul %142, %128, %cst_33 {dimension_numbers = #tpu.dot_dimension_numbers<[2], [1], [1], [2], [0, 0, 0, 1, 1, 2], [0], [0]>} : vector<2x16x16xf32>, vector<2x16x32xf32>, vector<2x16x32xf32> -> vector<2x16x32xf32>
    "tpu.trace_stop"() : () -> ()
    %144 = vector.shape_cast %143 : vector<2x16x32xf32> to vector<32x32xf32>
    %145 = vector.extract_strided_slice %11 {offsets = [0, 192], sizes = [32, 32], strides = [1, 1]} : vector<32x768xf32> to vector<32x32xf32>
    %146 = vector.shape_cast %145 : vector<32x32xf32> to vector<2x16x32xf32>
    %147 = vector.extract_strided_slice %11 {offsets = [0, 448], sizes = [32, 32], strides = [1, 1]} : vector<32x768xf32> to vector<32x32xf32>
    %148 = vector.shape_cast %147 : vector<32x32xf32> to vector<2x16x32xf32>
    %149 = vector.extract_strided_slice %11 {offsets = [0, 704], sizes = [32, 32], strides = [1, 1]} : vector<32x768xf32> to vector<32x32xf32>
    %150 = vector.shape_cast %149 : vector<32x32xf32> to vector<2x16x32xf32>
    "tpu.trace_start"() <{level = 10 : i32, message = "bqd,bkd->bqk"}> : () -> ()
    %cst_34 = arith.constant dense<0.000000e+00> : vector<2x16x16xf32>
    %151 = tpu.matmul %146, %148, %cst_34 {dimension_numbers = #tpu.dot_dimension_numbers<[2], [2], [1], [1], [0, 0, 0, 1, 1, 1], [0], [0]>} : vector<2x16x32xf32>, vector<2x16x32xf32>, vector<2x16x16xf32> -> vector<2x16x16xf32>
    "tpu.trace_stop"() : () -> ()
    %152 = vector.shape_cast %12 : vector<16x16xf32> to vector<1x16x16xf32>
    %153 = vector.broadcast %152 : vector<1x16x16xf32> to vector<2x16x16xf32>
    %154 = arith.addf %151, %153 : vector<2x16x16xf32>
    %cst_35 = arith.constant dense<0xFF800000> : vector<2x16xf32>
    %155 = vector.multi_reduction <maximumf>, %154, %cst_35 [2] : vector<2x16x16xf32> to vector<2x16xf32>
    %156 = vector.shape_cast %155 : vector<2x16xf32> to vector<2x16x1xf32>
    %157 = vector.broadcast %156 : vector<2x16x1xf32> to vector<2x16x16xf32>
    %158 = arith.subf %154, %157 : vector<2x16x16xf32>
    %159 = math.exp %158 : vector<2x16x16xf32>
    %cst_36 = arith.constant dense<0.000000e+00> : vector<2x16xf32>
    %160 = vector.multi_reduction <add>, %159, %cst_36 [2] : vector<2x16x16xf32> to vector<2x16xf32>
    %161 = vector.shape_cast %160 : vector<2x16xf32> to vector<2x16x1xf32>
    %162 = tpu.reciprocal %161 {approx = true} : vector<2x16x1xf32> -> vector<2x16x1xf32>
    %163 = vector.broadcast %162 : vector<2x16x1xf32> to vector<2x16x16xf32>
    %164 = arith.mulf %159, %163 : vector<2x16x16xf32>
    "tpu.trace_start"() <{level = 10 : i32, message = "bqk,bkd->bqd"}> : () -> ()
    %cst_37 = arith.constant dense<0.000000e+00> : vector<2x16x32xf32>
    %165 = tpu.matmul %164, %150, %cst_37 {dimension_numbers = #tpu.dot_dimension_numbers<[2], [1], [1], [2], [0, 0, 0, 1, 1, 2], [0], [0]>} : vector<2x16x16xf32>, vector<2x16x32xf32>, vector<2x16x32xf32> -> vector<2x16x32xf32>
    "tpu.trace_stop"() : () -> ()
    %166 = vector.shape_cast %165 : vector<2x16x32xf32> to vector<32x32xf32>
    %167 = vector.extract_strided_slice %11 {offsets = [0, 224], sizes = [32, 32], strides = [1, 1]} : vector<32x768xf32> to vector<32x32xf32>
    %168 = vector.shape_cast %167 : vector<32x32xf32> to vector<2x16x32xf32>
    %169 = vector.extract_strided_slice %11 {offsets = [0, 480], sizes = [32, 32], strides = [1, 1]} : vector<32x768xf32> to vector<32x32xf32>
    %170 = vector.shape_cast %169 : vector<32x32xf32> to vector<2x16x32xf32>
    %171 = vector.extract_strided_slice %11 {offsets = [0, 736], sizes = [32, 32], strides = [1, 1]} : vector<32x768xf32> to vector<32x32xf32>
    %172 = vector.shape_cast %171 : vector<32x32xf32> to vector<2x16x32xf32>
    "tpu.trace_start"() <{level = 10 : i32, message = "bqd,bkd->bqk"}> : () -> ()
    %cst_38 = arith.constant dense<0.000000e+00> : vector<2x16x16xf32>
    %173 = tpu.matmul %168, %170, %cst_38 {dimension_numbers = #tpu.dot_dimension_numbers<[2], [2], [1], [1], [0, 0, 0, 1, 1, 1], [0], [0]>} : vector<2x16x32xf32>, vector<2x16x32xf32>, vector<2x16x16xf32> -> vector<2x16x16xf32>
    "tpu.trace_stop"() : () -> ()
    %174 = vector.shape_cast %12 : vector<16x16xf32> to vector<1x16x16xf32>
    %175 = vector.broadcast %174 : vector<1x16x16xf32> to vector<2x16x16xf32>
    %176 = arith.addf %173, %175 : vector<2x16x16xf32>
    %cst_39 = arith.constant dense<0xFF800000> : vector<2x16xf32>
    %177 = vector.multi_reduction <maximumf>, %176, %cst_39 [2] : vector<2x16x16xf32> to vector<2x16xf32>
    %178 = vector.shape_cast %177 : vector<2x16xf32> to vector<2x16x1xf32>
    %179 = vector.broadcast %178 : vector<2x16x1xf32> to vector<2x16x16xf32>
    %180 = arith.subf %176, %179 : vector<2x16x16xf32>
    %181 = math.exp %180 : vector<2x16x16xf32>
    %cst_40 = arith.constant dense<0.000000e+00> : vector<2x16xf32>
    %182 = vector.multi_reduction <add>, %181, %cst_40 [2] : vector<2x16x16xf32> to vector<2x16xf32>
    %183 = vector.shape_cast %182 : vector<2x16xf32> to vector<2x16x1xf32>
    %184 = tpu.reciprocal %183 {approx = true} : vector<2x16x1xf32> -> vector<2x16x1xf32>
    %185 = vector.broadcast %184 : vector<2x16x1xf32> to vector<2x16x16xf32>
    %186 = arith.mulf %181, %185 : vector<2x16x16xf32>
    "tpu.trace_start"() <{level = 10 : i32, message = "bqk,bkd->bqd"}> : () -> ()
    %cst_41 = arith.constant dense<0.000000e+00> : vector<2x16x32xf32>
    %187 = tpu.matmul %186, %172, %cst_41 {dimension_numbers = #tpu.dot_dimension_numbers<[2], [1], [1], [2], [0, 0, 0, 1, 1, 2], [0], [0]>} : vector<2x16x16xf32>, vector<2x16x32xf32>, vector<2x16x32xf32> -> vector<2x16x32xf32>
    "tpu.trace_stop"() : () -> ()
    %188 = vector.shape_cast %187 : vector<2x16x32xf32> to vector<32x32xf32>
    %189 = tpu.concatenate %34, %56, %78, %100, %122, %144, %166, %188 in 1 : vector<32x32xf32>, vector<32x32xf32>, vector<32x32xf32>, vector<32x32xf32>, vector<32x32xf32>, vector<32x32xf32>, vector<32x32xf32>, vector<32x32xf32> -> vector<32x256xf32>
    %190 = arith.truncf %189 : vector<32x256xf32> to vector<32x256xbf16>
    %c0_42 = arith.constant 0 : index
    %c0_43 = arith.constant 0 : index
    %c0_44 = arith.constant 0 : index
    %191 = vector.load %arg10[%c0_42, %c0_43, %c0_44] : memref<1x256x256xbf16, #tpu.memory_space<vmem>>, vector<1x256x256xbf16>
    %192 = vector.shape_cast %191 : vector<1x256x256xbf16> to vector<256x256xbf16>
    %cst_45 = arith.constant dense<0.000000e+00> : vector<32x256xf32>
    %193 = tpu.matmul %190, %192, %cst_45 {dimension_numbers = #tpu.dot_dimension_numbers<[1], [0], [0], [1], [0, 0, 1, 1], [], []>} : vector<32x256xbf16>, vector<256x256xbf16>, vector<32x256xf32> -> vector<32x256xf32>
    %c0_46 = arith.constant 0 : index
    %c0_47 = arith.constant 0 : index
    %c0_48 = arith.constant 0 : index
    %194 = vector.load %arg11[%c0_46, %c0_47, %c0_48] : memref<1x1x256xf32, #tpu.memory_space<vmem>>, vector<1x1x256xf32>
    %195 = vector.shape_cast %194 : vector<1x1x256xf32> to vector<1x256xf32>
    %196 = vector.broadcast %195 : vector<1x256xf32> to vector<32x256xf32>
    %197 = arith.addf %193, %196 : vector<32x256xf32>
    %198 = arith.addf %3, %197 : vector<32x256xf32>
    %cst_49 = arith.constant dense<0.000000e+00> : vector<32xf32>
    %199 = vector.multi_reduction <add>, %198, %cst_49 [1] : vector<32x256xf32> to vector<32xf32>
    %200 = vector.shape_cast %199 : vector<32xf32> to vector<32x1xf32>
    %cst_50 = arith.constant 2.560000e+02 : f32
    %201 = vector.broadcast %cst_50 : f32 to vector<32x1xf32>
    %202 = arith.divf %200, %201 : vector<32x1xf32>
    %203 = vector.broadcast %202 : vector<32x1xf32> to vector<32x256xf32>
    %204 = arith.subf %198, %203 : vector<32x256xf32>
    %205 = arith.mulf %204, %204 : vector<32x256xf32>
    %cst_51 = arith.constant dense<0.000000e+00> : vector<32xf32>
    %206 = vector.multi_reduction <add>, %205, %cst_51 [1] : vector<32x256xf32> to vector<32xf32>
    %207 = vector.shape_cast %206 : vector<32xf32> to vector<32x1xf32>
    %cst_52 = arith.constant 2.560000e+02 : f32
    %208 = vector.broadcast %cst_52 : f32 to vector<32x1xf32>
    %209 = arith.divf %207, %208 : vector<32x1xf32>
    %210 = vector.broadcast %202 : vector<32x1xf32> to vector<32x256xf32>
    %211 = arith.subf %198, %210 : vector<32x256xf32>
    %cst_53 = arith.constant 9.99999974E-6 : f32
    %212 = vector.broadcast %cst_53 : f32 to vector<32x1xf32>
    %213 = arith.addf %209, %212 : vector<32x1xf32>
    %214 = math.rsqrt %213 : vector<32x1xf32>
    %215 = vector.broadcast %214 : vector<32x1xf32> to vector<32x256xf32>
    %216 = arith.mulf %211, %215 : vector<32x256xf32>
    %c0_54 = arith.constant 0 : index
    %c0_55 = arith.constant 0 : index
    %c0_56 = arith.constant 0 : index
    %217 = vector.load %arg12[%c0_54, %c0_55, %c0_56] : memref<1x1x256xf32, #tpu.memory_space<vmem>>, vector<1x1x256xf32>
    %218 = vector.shape_cast %217 : vector<1x1x256xf32> to vector<1x256xf32>
    %219 = vector.broadcast %218 : vector<1x256xf32> to vector<32x256xf32>
    %220 = arith.mulf %216, %219 : vector<32x256xf32>
    %c0_57 = arith.constant 0 : index
    %c0_58 = arith.constant 0 : index
    %c0_59 = arith.constant 0 : index
    %221 = vector.load %arg13[%c0_57, %c0_58, %c0_59] : memref<1x1x256xf32, #tpu.memory_space<vmem>>, vector<1x1x256xf32>
    %222 = vector.shape_cast %221 : vector<1x1x256xf32> to vector<1x256xf32>
    %223 = vector.broadcast %222 : vector<1x256xf32> to vector<32x256xf32>
    %224 = arith.addf %220, %223 : vector<32x256xf32>
    %225 = arith.truncf %224 : vector<32x256xf32> to vector<32x256xbf16>
    %c0_60 = arith.constant 0 : index
    %c0_61 = arith.constant 0 : index
    %c0_62 = arith.constant 0 : index
    %226 = vector.load %arg14[%c0_60, %c0_61, %c0_62] : memref<1x256x2048xbf16, #tpu.memory_space<vmem>>, vector<1x256x2048xbf16>
    %227 = vector.shape_cast %226 : vector<1x256x2048xbf16> to vector<256x2048xbf16>
    %cst_63 = arith.constant dense<0.000000e+00> : vector<32x2048xf32>
    %228 = tpu.matmul %225, %227, %cst_63 {dimension_numbers = #tpu.dot_dimension_numbers<[1], [0], [0], [1], [0, 0, 1, 1], [], []>} : vector<32x256xbf16>, vector<256x2048xbf16>, vector<32x2048xf32> -> vector<32x2048xf32>
    %c0_64 = arith.constant 0 : index
    %c0_65 = arith.constant 0 : index
    %c0_66 = arith.constant 0 : index
    %229 = vector.load %arg15[%c0_64, %c0_65, %c0_66] : memref<1x1x2048xf32, #tpu.memory_space<vmem>>, vector<1x1x2048xf32>
    %230 = vector.shape_cast %229 : vector<1x1x2048xf32> to vector<1x2048xf32>
    %231 = vector.broadcast %230 : vector<1x2048xf32> to vector<32x2048xf32>
    %232 = arith.addf %228, %231 : vector<32x2048xf32>
    %cst_67 = arith.constant 0.000000e+00 : f32
    %233 = vector.broadcast %cst_67 : f32 to vector<32x2048xf32>
    %234 = arith.maximumf %232, %233 : vector<32x2048xf32>
    %235 = arith.truncf %234 : vector<32x2048xf32> to vector<32x2048xbf16>
    %c0_68 = arith.constant 0 : index
    %c0_69 = arith.constant 0 : index
    %c0_70 = arith.constant 0 : index
    %236 = vector.load %arg16[%c0_68, %c0_69, %c0_70] : memref<1x2048x256xbf16, #tpu.memory_space<vmem>>, vector<1x2048x256xbf16>
    %237 = vector.shape_cast %236 : vector<1x2048x256xbf16> to vector<2048x256xbf16>
    %cst_71 = arith.constant dense<0.000000e+00> : vector<32x256xf32>
    %238 = tpu.matmul %235, %237, %cst_71 {dimension_numbers = #tpu.dot_dimension_numbers<[1], [0], [0], [1], [0, 0, 1, 1], [], []>} : vector<32x2048xbf16>, vector<2048x256xbf16>, vector<32x256xf32> -> vector<32x256xf32>
    %c0_72 = arith.constant 0 : index
    %c0_73 = arith.constant 0 : index
    %c0_74 = arith.constant 0 : index
    %239 = vector.load %arg17[%c0_72, %c0_73, %c0_74] : memref<1x1x256xf32, #tpu.memory_space<vmem>>, vector<1x1x256xf32>
    %240 = vector.shape_cast %239 : vector<1x1x256xf32> to vector<1x256xf32>
    %241 = vector.broadcast %240 : vector<1x256xf32> to vector<32x256xf32>
    %242 = arith.addf %238, %241 : vector<32x256xf32>
    %243 = arith.addf %224, %242 : vector<32x256xf32>
    %cst_75 = arith.constant dense<0.000000e+00> : vector<32xf32>
    %244 = vector.multi_reduction <add>, %243, %cst_75 [1] : vector<32x256xf32> to vector<32xf32>
    %245 = vector.shape_cast %244 : vector<32xf32> to vector<32x1xf32>
    %cst_76 = arith.constant 2.560000e+02 : f32
    %246 = vector.broadcast %cst_76 : f32 to vector<32x1xf32>
    %247 = arith.divf %245, %246 : vector<32x1xf32>
    %248 = vector.broadcast %247 : vector<32x1xf32> to vector<32x256xf32>
    %249 = arith.subf %243, %248 : vector<32x256xf32>
    %250 = arith.mulf %249, %249 : vector<32x256xf32>
    %cst_77 = arith.constant dense<0.000000e+00> : vector<32xf32>
    %251 = vector.multi_reduction <add>, %250, %cst_77 [1] : vector<32x256xf32> to vector<32xf32>
    %252 = vector.shape_cast %251 : vector<32xf32> to vector<32x1xf32>
    %cst_78 = arith.constant 2.560000e+02 : f32
    %253 = vector.broadcast %cst_78 : f32 to vector<32x1xf32>
    %254 = arith.divf %252, %253 : vector<32x1xf32>
    %255 = vector.broadcast %247 : vector<32x1xf32> to vector<32x256xf32>
    %256 = arith.subf %243, %255 : vector<32x256xf32>
    %cst_79 = arith.constant 9.99999974E-6 : f32
    %257 = vector.broadcast %cst_79 : f32 to vector<32x1xf32>
    %258 = arith.addf %254, %257 : vector<32x1xf32>
    %259 = math.rsqrt %258 : vector<32x1xf32>
    %260 = vector.broadcast %259 : vector<32x1xf32> to vector<32x256xf32>
    %261 = arith.mulf %256, %260 : vector<32x256xf32>
    %c0_80 = arith.constant 0 : index
    %c0_81 = arith.constant 0 : index
    %c0_82 = arith.constant 0 : index
    %262 = vector.load %arg18[%c0_80, %c0_81, %c0_82] : memref<1x1x256xf32, #tpu.memory_space<vmem>>, vector<1x1x256xf32>
    %263 = vector.shape_cast %262 : vector<1x1x256xf32> to vector<1x256xf32>
    %264 = vector.broadcast %263 : vector<1x256xf32> to vector<32x256xf32>
    %265 = arith.mulf %261, %264 : vector<32x256xf32>
    %c0_83 = arith.constant 0 : index
    %c0_84 = arith.constant 0 : index
    %c0_85 = arith.constant 0 : index
    %266 = vector.load %arg19[%c0_83, %c0_84, %c0_85] : memref<1x1x256xf32, #tpu.memory_space<vmem>>, vector<1x1x256xf32>
    %267 = vector.shape_cast %266 : vector<1x1x256xf32> to vector<1x256xf32>
    %268 = vector.broadcast %267 : vector<1x256xf32> to vector<32x256xf32>
    %269 = arith.addf %265, %268 : vector<32x256xf32>
    %c0_86 = arith.constant 0 : index
    %c0_87 = arith.constant 0 : index
    %270 = vector.load %arg21[%c0_86, %c0_87] : memref<32x256xf32, #tpu.memory_space<vmem>>, vector<32x256xf32>
    tpu.vector_store %arg21[%c0_86, %c0_87], %269 {strides = array<i32>} : memref<32x256xf32, #tpu.memory_space<vmem>>, vector<32x256xf32>,
    %c2_i32 = arith.constant 2 : i32
    %271 = arith.cmpi eq, %arg0, %c2_i32 : i32
    %272 = arith.extui %271 : i1 to i32
    %c0_i32_88 = arith.constant 0 : i32
    %273 = arith.cmpi ne, %272, %c0_i32_88 : i32
    scf.if %273 {
      %c0_89 = arith.constant 0 : index
      %c0_90 = arith.constant 0 : index
      %274 = vector.load %arg6[%c0_89, %c0_90] : memref<1x256xf32, #tpu.memory_space<vmem>>, vector<1x256xf32>
      %cst_91 = arith.constant dense<0.000000e+00> : vector<1x32xf32>
      %275 = tpu.matmul %274, %269, %cst_91 {dimension_numbers = #tpu.dot_dimension_numbers<[1], [1], [0], [0], [0, 0, 1, 0], [], []>} : vector<1x256xf32>, vector<32x256xf32>, vector<1x32xf32> -> vector<1x32xf32>
      %c0_92 = arith.constant 0 : index
      %c0_93 = arith.constant 0 : index
      %276 = memref.load %arg7[%c0_92, %c0_93] : memref<1x1xf32, #tpu.memory_space<smem>>
      %277 = vector.broadcast %276 : f32 to vector<1x32xf32>
      %278 = arith.addf %275, %277 : vector<1x32xf32>
      %c0_94 = arith.constant 0 : index
      %c0_95 = arith.constant 0 : index
      %279 = vector.load %arg20[%c0_94, %c0_95] : memref<1x32xf32, #tpu.memory_space<vmem>>, vector<1x32xf32>
      tpu.vector_store %arg20[%c0_94, %c0_95], %278 {strides = array<i32>} : memref<1x32xf32, #tpu.memory_space<vmem>>, vector<1x32xf32>,
    } else {
    }
    return
  }
  func.func @transform_0(%arg0: i32) -> (i32, i32) {
    %c0_i32 = arith.constant 0 : i32
    %c0_i32_0 = arith.constant 0 : i32
    %c0_i32_1 = arith.constant 0 : i32
    return %c0_i32, %c0_i32_0 : i32, i32
  }
  func.func @transform_1(%arg0: i32) -> (i32, i32) {
    %c0_i32 = arith.constant 0 : i32
    %c0_i32_0 = arith.constant 0 : i32
    %c0_i32_1 = arith.constant 0 : i32
    return %c0_i32, %c0_i32_0 : i32, i32
  }
  func.func @transform_2(%arg0: i32) -> (i32, i32) {
    %c0_i32 = arith.constant 0 : i32
    %c0_i32_0 = arith.constant 0 : i32
    %c0_i32_1 = arith.constant 0 : i32
    return %c0_i32, %c0_i32_0 : i32, i32
  }
  func.func @transform_3(%arg0: i32) -> (i32, i32) {
    %c0_i32 = arith.constant 0 : i32
    %c0_i32_0 = arith.constant 0 : i32
    %c0_i32_1 = arith.constant 0 : i32
    return %c0_i32, %c0_i32_0 : i32, i32
  }
  func.func @transform_4(%arg0: i32) -> (i32, i32) {
    %c0_i32 = arith.constant 0 : i32
    %c0_i32_0 = arith.constant 0 : i32
    %c0_i32_1 = arith.constant 0 : i32
    return %c0_i32, %c0_i32_0 : i32, i32
  }
  func.func @transform_5(%arg0: i32) -> (i32, i32) {
    %c0_i32 = arith.constant 0 : i32
    %c0_i32_0 = arith.constant 0 : i32
    %c0_i32_1 = arith.constant 0 : i32
    return %c0_i32, %c0_i32_0 : i32, i32
  }
  func.func @transform_6(%arg0: i32) -> (i32, i32) {
    %c0_i32 = arith.constant 0 : i32
    %c0_i32_0 = arith.constant 0 : i32
    %c0_i32_1 = arith.constant 0 : i32
    return %c0_i32, %c0_i32_0 : i32, i32
  }
  func.func @transform_7(%arg0: i32) -> (i32, i32, i32) {
    %c0_i32 = arith.constant 0 : i32
    %c0_i32_0 = arith.constant 0 : i32
    %c0_i32_1 = arith.constant 0 : i32
    return %arg0, %c0_i32, %c0_i32_0 : i32, i32, i32
  }
  func.func @transform_8(%arg0: i32) -> (i32, i32, i32) {
    %c0_i32 = arith.constant 0 : i32
    %c0_i32_0 = arith.constant 0 : i32
    %c0_i32_1 = arith.constant 0 : i32
    return %arg0, %c0_i32, %c0_i32_0 : i32, i32, i32
  }
  func.func @transform_9(%arg0: i32) -> (i32, i32, i32) {
    %c0_i32 = arith.constant 0 : i32
    %c0_i32_0 = arith.constant 0 : i32
    %c0_i32_1 = arith.constant 0 : i32
    return %arg0, %c0_i32, %c0_i32_0 : i32, i32, i32
  }
  func.func @transform_10(%arg0: i32) -> (i32, i32, i32) {
    %c0_i32 = arith.constant 0 : i32
    %c0_i32_0 = arith.constant 0 : i32
    %c0_i32_1 = arith.constant 0 : i32
    return %arg0, %c0_i32, %c0_i32_0 : i32, i32, i32
  }
  func.func @transform_11(%arg0: i32) -> (i32, i32, i32) {
    %c0_i32 = arith.constant 0 : i32
    %c0_i32_0 = arith.constant 0 : i32
    %c0_i32_1 = arith.constant 0 : i32
    return %arg0, %c0_i32, %c0_i32_0 : i32, i32, i32
  }
  func.func @transform_12(%arg0: i32) -> (i32, i32, i32) {
    %c0_i32 = arith.constant 0 : i32
    %c0_i32_0 = arith.constant 0 : i32
    %c0_i32_1 = arith.constant 0 : i32
    return %arg0, %c0_i32, %c0_i32_0 : i32, i32, i32
  }
  func.func @transform_13(%arg0: i32) -> (i32, i32, i32) {
    %c0_i32 = arith.constant 0 : i32
    %c0_i32_0 = arith.constant 0 : i32
    %c0_i32_1 = arith.constant 0 : i32
    return %arg0, %c0_i32, %c0_i32_0 : i32, i32, i32
  }
  func.func @transform_14(%arg0: i32) -> (i32, i32, i32) {
    %c0_i32 = arith.constant 0 : i32
    %c0_i32_0 = arith.constant 0 : i32
    %c0_i32_1 = arith.constant 0 : i32
    return %arg0, %c0_i32, %c0_i32_0 : i32, i32, i32
  }
  func.func @transform_15(%arg0: i32) -> (i32, i32, i32) {
    %c0_i32 = arith.constant 0 : i32
    %c0_i32_0 = arith.constant 0 : i32
    %c0_i32_1 = arith.constant 0 : i32
    return %arg0, %c0_i32, %c0_i32_0 : i32, i32, i32
  }
  func.func @transform_16(%arg0: i32) -> (i32, i32, i32) {
    %c0_i32 = arith.constant 0 : i32
    %c0_i32_0 = arith.constant 0 : i32
    %c0_i32_1 = arith.constant 0 : i32
    return %arg0, %c0_i32, %c0_i32_0 : i32, i32, i32
  }
  func.func @transform_17(%arg0: i32) -> (i32, i32, i32) {
    %c0_i32 = arith.constant 0 : i32
    %c0_i32_0 = arith.constant 0 : i32
    %c0_i32_1 = arith.constant 0 : i32
    return %arg0, %c0_i32, %c0_i32_0 : i32, i32, i32
  }
  func.func @transform_18(%arg0: i32) -> (i32, i32, i32) {
    %c0_i32 = arith.constant 0 : i32
    %c0_i32_0 = arith.constant 0 : i32
    %c0_i32_1 = arith.constant 0 : i32
    return %arg0, %c0_i32, %c0_i32_0 : i32, i32, i32
  }
  func.func @transform_19(%arg0: i32) -> (i32, i32) {
    %c0_i32 = arith.constant 0 : i32
    %c0_i32_0 = arith.constant 0 : i32
    %c0_i32_1 = arith.constant 0 : i32
    return %c0_i32, %c0_i32_0 : i32, i32
  }
}

</mosaic_0001>

<bundles_post_ra>
// kernel: transformer_time_series_forward.1
= control target key start
LH: loop header
LB: loop body
LE: loop exit
PB: predicated region body
PF: predicated region fallthrough
CT: control target
= control target key end

     0   :  { %s15354_s0 = inlined_call_operand.vmem [shape: f32[32,18], index: 0, kind: input, shape index: {}]   ;;  %s15355_s1 = inlined_call_operand.hbm [shape: f32[18,256], index: 1, kind: input, shape index: {}]   ;;  %s15356_s2 = inlined_call_operand.hbm [shape: f32[1,256], index: 2, kind: input, shape index: {}]   ;;  %s15357_s3 = inlined_call_operand.vmem [shape: f32[32,256], index: 3, kind: input, shape index: {}]   ;;  %s15358_s4 = inlined_call_operand.hbm [shape: f32[16,16], index: 4, kind: input, shape index: {}]   ;;  %s15359_s5 = inlined_call_operand.hbm [shape: f32[1,256], index: 5, kind: input, shape index: {}]   ;;  %s15360_s6 = inlined_call_operand.<no memory space> [shape: f32[1,1], index: 6, kind: input, shape index: {}]   ;;  %s15361_s7 = inlined_call_operand.hbm [shape: bf16[3,256,768], index: 7, kind: input, shape index: {}]   ;;  %s15362_s8 = inlined_call_operand.hbm [shape: f32[3,1,768], index: 8, kind: input, shape index: {}]   ;;  %s15363_s9 = inlined_call_operand.hbm [shape: bf16[3,256,256], index: 9, kind: input, shape index: {}]   ;;  %s15364_s10 = inlined_call_operand.hbm [shape: f32[3,1,256], index: 10, kind: input, shape index: {}]   ;;  %s15365_s11 = inlined_call_operand.hbm [shape: f32[3,1,256], index: 11, kind: input, shape index: {}]   ;;  %s15366_s12 = inlined_call_operand.hbm [shape: f32[3,1,256], index: 12, kind: input, shape index: {}]   ;;  %s15367_s13 = inlined_call_operand.hbm [shape: bf16[3,256,2048], index: 13, kind: input, shape index: {}]   ;;  %s15368_s14 = inlined_call_operand.hbm [shape: f32[3,1,2048], index: 14, kind: input, shape index: {}]   ;;  %s15369_s15 = inlined_call_operand.hbm [shape: bf16[3,2048,256], index: 15, kind: input, shape index: {}]   ;;  %s15370_s16 = inlined_call_operand.hbm [shape: f32[3,1,256], index: 16, kind: input, shape index: {}]   ;;  %s15371_s17 = inlined_call_operand.hbm [shape: f32[3,1,256], index: 17, kind: input, shape index: {}]   ;;  %s15372_s18 = inlined_call_operand.hbm [shape: f32[3,1,256], index: 18, kind: input, shape index: {}]   ;;  %s15373_s19 = inlined_call_operand.vmem [shape: f32[1,32], index: 19, kind: output, shape index: {}]  }
   0x1   :  { %15413 = sst [smem:[#allocation44_spill]] %s15354_s0 }
   0x2   :  { %15414 = sst [smem:[#allocation45_spill]] %s15355_s1 }
   0x3   :  { %15415 = sst [smem:[#allocation46_spill]] %s15356_s2 }
   0x4   :  { %15416 = sst [smem:[#allocation47_spill]] %s15357_s3 }
   0x5   :  { %15417 = sst [smem:[#allocation48_spill]] %s15358_s4 }
   0x6   :  { %15418 = sst [smem:[#allocation49_spill]] %s15359_s5 }
   0x7   :  { %15419 = sst [smem:[#allocation50_spill]] %s15361_s7 }
   0x8   :  { %15420 = sst [smem:[#allocation51_spill]] %s15362_s8 }
   0x9   :  { %15421 = sst [smem:[#allocation52_spill]] %s15371_s17 }
   0xa   :  { %15422 = sst [smem:[#allocation53_spill]] %s15372_s18 }
   0xb   :  { %15423 = sst [smem:[#allocation54_spill]] %s15373_s19 }
   0xc   :  { %24 = sst [smem:[#allocation3]] %s15360_s6 }
   0xd   :  { %25 = vsyncpa [#allocation5], 0 }
   0xe   :  { %26 = vsyncpa [#allocation7], 0 }
   0xf   :  { %27 = vsyncpa [#allocation10], 0  ;;  %s13035_s20 = smov 0   ;;  %s13037_s21 = smov 0  }
  0x10   :  { %s13039_s1 = smov 0   ;;  %s13041_s22 = smov 0  }
  0x11 LB: > { %15424 = sst [smem:[#allocation27_spill]] %s12894_s21  ;;  %s13054_s6 = sadd.s32 4294967295, %s12902_s22   ;;  %s12902_s22 = sphi %s13041_s22, %s15497_s22   ;;  %s12898_s1 = sphi %s13039_s1, %s15500_s1   ;;  %s12894_s21 = sphi %s13037_s21, %s15499_s21   ;;  %s12890_s20 = sphi %s13035_s20, %s15498_s20  }
  0x12   : > { %15425 = sst [smem:[#allocation28_spill]] %s12898_s1  ;;  %s13057_s2 = sadd.s32 1, %s12902_s22  }
  0x13   : > { %15426 = sst [smem:[#allocation29_spill]] %s13054_s6  ;;  %s184_s23 = ssub.s32 %s12902_s22, %s13057_s2 }
  0x14   : > { %15427 = sst [smem:[#allocation30_spill]] %s13057_s2  ;;  %s187_s24 = sadd.s32 1, %s12898_s1 }
  0x15   : > { %p185_p0 = scmp.eq.s32.totalorder %s184_s23, 0  ;;  %p194_p1 = scmp.ne.s32.totalorder %s12898_s1, %s12894_s21 }
  0x16   : > { %p195_p2 = scmp.eq.s32.totalorder %s12902_s22, 0  ;;  %p200_p3 = scmp.ne.s32.totalorder %s12894_s21, %s12890_s20 }
  0x17   : > { %s13067_s25 = scalar_select %p185_p0, %s12898_s1, %s187_s24  }
  0x18   : > { %p13069_p4 = por %p195_p2, %p194_p1  ;;  %p15376_p5 = scmp.eq.s32.totalorder %s13054_s6, 0 }
  0x19   : > { %15428 = sst [smem:[#allocation31_spill]] %s13067_s25  ;;  %p10290_p6 = scmp.ge.s32.totalorder %s12902_s22, 1 }
  0x1a   : > { %p518_p7 = scmp.lt.s32.totalorder %s12902_s22, 4  ;;  %p13078_p8 = por %p15376_p5, %p200_p3 }
  0x1b   : > { %s12904_s28 = smov [#allocation4]   ;;  %p11557_p13 = scmp.lt.s32.totalorder %s12902_s22, 3 }
  0x1c   : > { %s15430_s26 = scalar_select %p13078_p8, 1, 0 }
  0x1d   : > { %p13083_p10 = pnand %p10290_p6, %p518_p7  ;;  %s533_s29 = sshll.u32 %s12904_s28, 4  ;;  %s534_s29 = int_to_ptr.vmem [resolvable:$true] %s533_s29 }
  0x1e   : > { %15431 = sst [smem:[#allocation32_spill]] %s15430_s26  ;;  %s588_s30 = sand.u32 1, %s12902_s22  }
  0x1f   : > { %s15432_s27 = scalar_select %p13083_p10, 1, 0 }
  0x20   : > { %p11503_p11 = pneg %p13083_p10  ;;  %s13098_s20 = sand.u32 1, %s12898_s1  }
  0x21   : > { %15433 = sst [smem:[#allocation33_spill]] %s15432_s27  ;;  %p13102_p0 = pnand %p11557_p13, %p13069_p4 }
  0x22   : > { %p13091_p12 = pnand %p11503_p11, %p15376_p5  ;;  %s12427_s24 = scalar_lea.vmem %s534_s29, 768 }
  0x23   : > { %p12428_p2 = scmp.ne.s32.totalorder %s534_s29, %s12427_s24  ;;  %p12435_p7 = scmp.lt.s32.totalorder %s534_s29, %s534_s29 }
  0x24   : > { %s15434_s0 = scalar_select %p13091_p12, 1, 0 }
  0x25   : > { %p15388_p1 = pneg %p13091_p12  ;;  %p12436_p11 = scmp.lt.s32.totalorder %s12427_s24, %s12427_s24 }
  0x27   : > { %p12430_p3 = pnand %p12428_p2, %p15388_p1  ;;  %p12437_p9 = por %p12436_p11, %p12435_p7 }
  0x29   : > { %p12431_p6 = pneg %p12430_p3 }
  0x2b   : > { %p12438_p5 = pnand %p12437_p9, %p12431_p6 }
  0x2d   : > { %12441 = shalt.err (!%p12438_p5)
}
  0x2e   : > { %s12905_s28 = smov 256   ;;  %s12906_s3 = smov 16  }
  0x2f   : > { %s15436_s2 = sld [smem:[#allocation45_spill]]  ;;  %s11457_s19 = smul.u32 768, %s13098_s20 }
  0x30   : > { %s11458_s26 = smul.u32 12288, %s12902_s22  ;;  %s15437_s7 = sld [smem:[#allocation50_spill]] }
  0x31   : > { %s11459_s21 = smul.u32 6, %s13098_s20  ;;  %s592_s18 = scalar_lea.vmem [#allocation11], %s11457_s19 }
  0x32   : > { %s599_s5 = sshll.u32 %s592_s18, 4  ;;  %s13126_s4 = scalar_lea.sflag [#allocation5], %s588_s30  ;;  %s13124_s5 = int_to_ptr.vmem [resolvable:$true] %s599_s5 }
  0x33   : > { %p13132_p5 = pneg %p13102_p0 }
  0x35   : > { %11506 = dma.hbm_to_vmem [thread:$0]  (!%p13091_p12), %s15436_s2, 768, %s534_s29, [#allocation5], %s12905_s28, %s12905_s28, %s12906_s3  }
  0x36   : > { %s13122_s27 = scalar_lea.hbm %s15437_s7, %s11458_s26  ;;  %s12447_s19 = scalar_lea.hbm %s15437_s7, 36864 }
  0x37   : > { %s12442_s17 = scalar_lea.hbm %s13122_s27, 12288  ;;  %p12448_p2 = scmp.lt.s32.totalorder %s13122_s27, %s15437_s7 }
  0x38   : > { %p12443_p4 = scmp.ne.s32.totalorder %s13122_s27, %s12442_s17  ;;  %p12449_p3 = scmp.lt.s32.totalorder %s12447_s19, %s12442_s17 }
  0x39   : > { %s15438_s1 = scalar_select %p13132_p5, 1, 0 }
  0x3a   : > { %p12445_p9 = pnand %p13132_p5, %p12443_p4  ;;  %p12450_p6 = por %p12449_p3, %p12448_p2 }
  0x3c   : > { %p12446_p13 = pneg %p12445_p9 }
  0x3e   : > { %p12451_p7 = pnand %p12450_p6, %p12446_p13 }
  0x40   : > { %12454 = shalt.err (!%p12451_p7)
}
  0x41   : > { %s12455_s26 = scalar_lea.vmem %s13124_s5, 12288  ;;  %s12907_s29 = smov [#allocation11]  }
  0x42   : > { %p12456_p11 = scmp.ne.s32.totalorder %s13124_s5, %s12455_s26  ;;  %s12460_s30 = sshll.u32 %s12907_s29, 4  ;;  %s12461_s30 = int_to_ptr.vmem [resolvable:$false] %s12460_s30 }
  0x43   : > { %s12462_s28 = scalar_lea.vmem %s12461_s30, 24576  ;;  %p12463_p1 = scmp.lt.s32.totalorder %s13124_s5, %s12461_s30 }
  0x44   : > { %p12458_p4 = pnand %p12456_p11, %p13132_p5  ;;  %p12464_p8 = scmp.lt.s32.totalorder %s12462_s28, %s12455_s26 }
  0x46   : > { %p12459_p9 = pneg %p12458_p4  ;;  %p12465_p10 = por %p12464_p8, %p12463_p1 }
  0x48   : > { %p12466_p12 = pnand %p12465_p10, %p12459_p9 }
  0x4a   : > { %12469 = shalt.err (!%p12466_p12)
}
  0x4b   : > { %s12908_s17 = smov 384   ;;  %s12909_s3 = smov 24  }
  0x4c   : > { %11519 = dma.hbm_to_vmem [thread:$0]  (!%p13102_p0), %s13122_s27, 12288, %s13124_s5, %s13126_s4, %s12908_s17, %s12908_s17, %s12909_s3  }
  0x4d   : > { %s11460_s24 = smul.u32 96, %s12902_s22  ;;  %s613_s6 = scalar_lea.vmem [#allocation12], %s11459_s21 }
  0x4e   : > { %s621_s2 = sshll.u32 %s613_s6, 4  ;;  %s15439_s8 = sld [smem:[#allocation51_spill]]  ;;  %s622_s2 = int_to_ptr.vmem [resolvable:$true] %s621_s2 }
  0x54   : > { %s619_s25 = scalar_lea.hbm %s15439_s8, %s11460_s24  ;;  %s12475_s28 = scalar_lea.hbm %s15439_s8, 288 }
  0x55   : > { %s12470_s26 = scalar_lea.hbm %s619_s25, 96  ;;  %p12476_p1 = scmp.lt.s32.totalorder %s619_s25, %s15439_s8 }
  0x56   : > { %p12471_p8 = scmp.ne.s32.totalorder %s619_s25, %s12470_s26  ;;  %p12477_p13 = scmp.lt.s32.totalorder %s12475_s28, %s12470_s26 }
  0x58   : > { %p12473_p10 = pnand %p12471_p8, %p13132_p5  ;;  %p12478_p2 = por %p12477_p13, %p12476_p1 }
  0x5a   : > { %p12474_p12 = pneg %p12473_p10 }
  0x5c   : > { %p12479_p3 = pnand %p12478_p2, %p12474_p12 }
  0x5e   : > { %12482 = shalt.err (!%p12479_p3)
}
  0x5f   : > { %s12483_s21 = scalar_lea.vmem %s622_s2, 96  ;;  %s12910_s27 = smov [#allocation12]  }
  0x60   : > { %p12484_p6 = scmp.ne.s32.totalorder %s622_s2, %s12483_s21  ;;  %s12488_s17 = sshll.u32 %s12910_s27, 4  ;;  %s12489_s17 = int_to_ptr.vmem [resolvable:$false] %s12488_s17 }
  0x61   : > { %s12490_s3 = scalar_lea.vmem %s12489_s17, 192  ;;  %p12491_p4 = scmp.lt.s32.totalorder %s622_s2, %s12489_s17 }
  0x62   : > { %p12486_p7 = pnand %p12484_p6, %p13132_p5  ;;  %p12492_p9 = scmp.lt.s32.totalorder %s12490_s3, %s12483_s21 }
  0x64   : > { %p12487_p11 = pneg %p12486_p7  ;;  %p12493_p8 = por %p12492_p9, %p12491_p4 }
  0x66   : > { %p12494_p10 = pnand %p12493_p8, %p12487_p11 }
  0x68   : > { %12497 = shalt.err (!%p12494_p10)
}
  0x69   : > { %11522 = dma.hbm_to_vmem [thread:$0]  (!%p13102_p0), %s619_s25, 96, %s622_s2, %s13126_s4  }
  0x6a   : > { %s10298_s7 = sshll.u32 %s13098_s20, 8  ;;  %s11089_s24 = sshll.u32 %s12902_s22, 12 }
  0x6b   : > { %s13179_s18 = scalar_lea.hbm %s15363_s9, %s11089_s24  ;;  %s632_s26 = scalar_lea.vmem [#allocation13], %s10298_s7 }
  0x6c   : > { %s639_s29 = sshll.u32 %s632_s26, 4  ;;  %s13182_s30 = sshll.u32 %s13098_s20, 1  ;;  %s13184_s29 = int_to_ptr.vmem [resolvable:$true] %s639_s29 }
  0x6d   : > { %s12498_s28 = scalar_lea.hbm %s13179_s18, 4096  ;;  %s12503_s5 = scalar_lea.hbm %s15363_s9, 12288 }
  0x6e   : > { %p12499_p12 = scmp.ne.s32.totalorder %s13179_s18, %s12498_s28  ;;  %p12504_p2 = scmp.lt.s32.totalorder %s13179_s18, %s15363_s9 }
  0x6f   : > { %p12505_p3 = scmp.lt.s32.totalorder %s12503_s5, %s12498_s28 }
  0x70   : > { %p12501_p1 = pnand %p12499_p12, %p13132_p5 }
  0x71   : > { %p12506_p6 = por %p12505_p3, %p12504_p2 }
  0x72   : > { %p12502_p13 = pneg %p12501_p1 }
  0x74   : > { %p12507_p7 = pnand %p12506_p6, %p12502_p13 }
  0x76   : > { %12510 = shalt.err (!%p12507_p7)
}
  0x77   : > { %s12511_s17 = scalar_lea.vmem %s13184_s29, 4096  ;;  %s12911_s3 = smov [#allocation13]  }
  0x78   : > { %p12512_p11 = scmp.ne.s32.totalorder %s13184_s29, %s12511_s17  ;;  %s12516_s7 = sshll.u32 %s12911_s3, 4  ;;  %s12517_s7 = int_to_ptr.vmem [resolvable:$false] %s12516_s7 }
  0x79   : > { %s12518_s24 = scalar_lea.vmem %s12517_s7, 8192  ;;  %p12519_p8 = scmp.lt.s32.totalorder %s13184_s29, %s12517_s7 }
  0x7a   : > { %p12514_p4 = pnand %p12512_p11, %p13132_p5  ;;  %p12520_p10 = scmp.lt.s32.totalorder %s12518_s24, %s12511_s17 }
  0x7c   : > { %p12515_p9 = pneg %p12514_p4  ;;  %p12521_p12 = por %p12520_p10, %p12519_p8 }
  0x7e   : > { %p12522_p1 = pnand %p12521_p12, %p12515_p9 }
  0x80   : > { %12525 = shalt.err (!%p12522_p1)
}
  0x81   : > { %s15393_s6 = smov 128   ;;  %s15395_s19 = smov 8  }
  0x82   : > { %11525 = dma.hbm_to_vmem [thread:$0]  (!%p13102_p0), %s13179_s18, 4096, %s13184_s29, %s13126_s4, %s15393_s6, %s15393_s6, %s15395_s19  }
  0x83   : > { %s13211_s26 = sshll.u32 %s12902_s22, 5  ;;  %s653_s28 = scalar_lea.vmem [#allocation14], %s13182_s30 }
  0x84   : > { %s661_s2 = sshll.u32 %s653_s28, 4  ;;  %s659_s21 = scalar_lea.hbm %s15364_s10, %s13211_s26  ;;  %s662_s2 = int_to_ptr.vmem [resolvable:$true] %s661_s2 }
  0x85   : > { %s12526_s27 = scalar_lea.hbm %s659_s21, 32  ;;  %s12531_s7 = scalar_lea.hbm %s15364_s10, 96 }
  0x86   : > { %p12527_p13 = scmp.ne.s32.totalorder %s659_s21, %s12526_s27  ;;  %p12532_p6 = scmp.lt.s32.totalorder %s659_s21, %s15364_s10 }
  0x87   : > { %p12533_p7 = scmp.lt.s32.totalorder %s12531_s7, %s12526_s27 }
  0x88   : > { %p12529_p2 = pnand %p12527_p13, %p13132_p5 }
  0x89   : > { %p12534_p11 = por %p12533_p7, %p12532_p6 }
  0x8a   : > { %p12530_p3 = pneg %p12529_p2 }
  0x8c   : > { %p12535_p4 = pnand %p12534_p11, %p12530_p3 }
  0x8e   : > { %12538 = shalt.err (!%p12535_p4)
}
  0x8f   : > { %s12539_s24 = scalar_lea.vmem %s662_s2, 32  ;;  %s12914_s28 = smov [#allocation14]  }
  0x90   : > { %p12540_p9 = scmp.ne.s32.totalorder %s662_s2, %s12539_s24  ;;  %s12544_s25 = sshll.u32 %s12914_s28, 4  ;;  %s12545_s25 = int_to_ptr.vmem [resolvable:$false] %s12544_s25 }
  0x91   : > { %s12546_s5 = scalar_lea.vmem %s12545_s25, 64  ;;  %p12547_p12 = scmp.lt.s32.totalorder %s662_s2, %s12545_s25 }
  0x92   : > { %p12542_p8 = pnand %p12540_p9, %p13132_p5  ;;  %p12548_p1 = scmp.lt.s32.totalorder %s12546_s5, %s12539_s24 }
  0x94   : > { %p12543_p10 = pneg %p12542_p8  ;;  %p12549_p13 = por %p12548_p1, %p12547_p12 }
  0x96   : > { %p12550_p2 = pnand %p12549_p13, %p12543_p10 }
  0x98   : > { %12553 = shalt.err (!%p12550_p2)
}
  0x99   : > { %11528 = dma.hbm_to_vmem [thread:$0]  (!%p13102_p0), %s659_s21, 32, %s662_s2, %s13126_s4  }
  0x9a   : > { %s13235_s3 = scalar_lea.hbm %s15365_s11, %s13211_s26  ;;  %s672_s7 = scalar_lea.vmem [#allocation15], %s13182_s30 }
  0x9b   : > { %s680_s18 = sshll.u32 %s672_s7, 4  ;;  %s13242_s28 = scalar_lea.hbm %s15366_s12, %s13211_s26  ;;  %s681_s18 = int_to_ptr.vmem [resolvable:$true] %s680_s18 }
  0x9c   : > { %s12554_s25 = scalar_lea.hbm %s13235_s3, 32  ;;  %s12559_s5 = scalar_lea.hbm %s15365_s11, 96 }
  0x9d   : > { %p12555_p3 = scmp.ne.s32.totalorder %s13235_s3, %s12554_s25  ;;  %p12560_p11 = scmp.lt.s32.totalorder %s13235_s3, %s15365_s11 }
  0x9e   : > { %p12561_p4 = scmp.lt.s32.totalorder %s12559_s5, %s12554_s25 }
  0x9f   : > { %p12557_p6 = pnand %p12555_p3, %p13132_p5 }
  0xa0   : > { %p12562_p9 = por %p12561_p4, %p12560_p11 }
  0xa1   : > { %p12558_p7 = pneg %p12557_p6 }
  0xa3   : > { %p12563_p8 = pnand %p12562_p9, %p12558_p7 }
  0xa5   : > { %12566 = shalt.err (!%p12563_p8)
}
  0xa6   : > { %s12567_s7 = scalar_lea.vmem %s681_s18, 32  ;;  %s12915_s29 = smov [#allocation15]  }
  0xa7   : > { %p12568_p10 = scmp.ne.s32.totalorder %s681_s18, %s12567_s7  ;;  %s12572_s24 = sshll.u32 %s12915_s29, 4  ;;  %s12573_s24 = int_to_ptr.vmem [resolvable:$false] %s12572_s24 }
  0xa8   : > { %s12574_s6 = scalar_lea.vmem %s12573_s24, 64  ;;  %p12575_p13 = scmp.lt.s32.totalorder %s681_s18, %s12573_s24 }
  0xa9   : > { %p12570_p12 = pnand %p12568_p10, %p13132_p5  ;;  %p12576_p2 = scmp.lt.s32.totalorder %s12574_s6, %s12567_s7 }
  0xab   : > { %p12571_p1 = pneg %p12570_p12  ;;  %p12577_p3 = por %p12576_p2, %p12575_p13 }
  0xad   : > { %p12578_p6 = pnand %p12577_p3, %p12571_p1 }
  0xaf   : > { %12581 = shalt.err (!%p12578_p6)
}
  0xb0   : > { %11531 = dma.hbm_to_vmem [thread:$0]  (!%p13102_p0), %s13235_s3, 32, %s681_s18, %s13126_s4  }
  0xb1   : > { %s691_s25 = scalar_lea.vmem [#allocation16], %s13182_s30  ;;  %s15397_s21 = sshll.u32 %s13098_s20, 11 }
  0xb2   : > { %s699_s2 = sshll.u32 %s691_s25, 4  ;;  %s12582_s5 = scalar_lea.hbm %s13242_s28, 32  ;;  %s700_s2 = int_to_ptr.vmem [resolvable:$true] %s699_s2 }
  0xb3   : > { %p12583_p7 = scmp.ne.s32.totalorder %s13242_s28, %s12582_s5  ;;  %s12587_s17 = scalar_lea.hbm %s15366_s12, 96 }
  0xb4   : > { %p12588_p9 = scmp.lt.s32.totalorder %s13242_s28, %s15366_s12  ;;  %p12589_p8 = scmp.lt.s32.totalorder %s12587_s17, %s12582_s5 }
  0xb5   : > { %p12585_p11 = pnand %p12583_p7, %p13132_p5 }
  0xb6   : > { %p12590_p10 = por %p12589_p8, %p12588_p9 }
  0xb7   : > { %p12586_p4 = pneg %p12585_p11 }
  0xb9   : > { %p12591_p12 = pnand %p12590_p10, %p12586_p4 }
  0xbb   : > { %12594 = shalt.err (!%p12591_p12)
}
  0xbc   : > { %s12595_s3 = scalar_lea.vmem %s700_s2, 32  ;;  %s12916_s18 = smov [#allocation16]  }
  0xbd   : > { %p12596_p1 = scmp.ne.s32.totalorder %s700_s2, %s12595_s3  ;;  %s12600_s24 = sshll.u32 %s12916_s18, 4  ;;  %s12601_s24 = int_to_ptr.vmem [resolvable:$false] %s12600_s24 }
  0xbe   : > { %s12602_s25 = scalar_lea.vmem %s12601_s24, 64  ;;  %p12603_p3 = scmp.lt.s32.totalorder %s700_s2, %s12601_s24 }
  0xbf   : > { %p12598_p13 = pnand %p12596_p1, %p13132_p5  ;;  %p12604_p6 = scmp.lt.s32.totalorder %s12602_s25, %s12595_s3 }
  0xc1   : > { %p12599_p2 = pneg %p12598_p13  ;;  %p12605_p7 = por %p12604_p6, %p12603_p3 }
  0xc3   : > { %p12606_p11 = pnand %p12605_p7, %p12599_p2 }
  0xc5   : > { %12609 = shalt.err (!%p12606_p11)
}
  0xc6   : > { %11534 = dma.hbm_to_vmem [thread:$0]  (!%p13102_p0), %s13242_s28, 32, %s700_s2, %s13126_s4  }
  0xc7   : > { %s11093_s5 = sshll.u32 %s12902_s22, 15  ;;  %s710_s6 = scalar_lea.vmem [#allocation17], %s15397_s21 }
  0xc8   : > { %s717_s27 = sshll.u32 %s710_s6, 4  ;;  %s13288_s29 = scalar_lea.hbm %s15367_s13, %s11093_s5  ;;  %s13290_s27 = int_to_ptr.vmem [resolvable:$true] %s717_s27 }
  0xc9   : > { %s12610_s3 = scalar_lea.hbm %s13288_s29, 32768  ;;  %s12615_s18 = scalar_lea.hbm %s15367_s13, 98304 }
  0xca   : > { %p12611_p4 = scmp.ne.s32.totalorder %s13288_s29, %s12610_s3  ;;  %p12616_p10 = scmp.lt.s32.totalorder %s13288_s29, %s15367_s13 }
  0xcb   : > { %p12617_p12 = scmp.lt.s32.totalorder %s12615_s18, %s12610_s3 }
  0xcc   : > { %p12613_p9 = pnand %p12611_p4, %p13132_p5 }
  0xcd   : > { %p12618_p1 = por %p12617_p12, %p12616_p10 }
  0xce   : > { %p12614_p8 = pneg %p12613_p9 }
  0xd0   : > { %p12619_p13 = pnand %p12618_p1, %p12614_p8 }
  0xd2   : > { %12622 = shalt.err (!%p12619_p13)
}
  0xd3   : > { %s12623_s6 = scalar_lea.vmem %s13290_s27, 32768  ;;  %s12917_s17 = smov [#allocation17]  }
  0xd4   : > { %p12624_p2 = scmp.ne.s32.totalorder %s13290_s27, %s12623_s6  ;;  %s12628_s7 = sshll.u32 %s12917_s17, 4  ;;  %s12629_s7 = int_to_ptr.vmem [resolvable:$false] %s12628_s7 }
  0xd5   : > { %s12630_s28 = scalar_lea.vmem %s12629_s7, 65536  ;;  %p12631_p7 = scmp.lt.s32.totalorder %s13290_s27, %s12629_s7 }
  0xd6   : > { %p12626_p3 = pnand %p12624_p2, %p13132_p5  ;;  %p12632_p11 = scmp.lt.s32.totalorder %s12630_s28, %s12623_s6 }
  0xd8   : > { %p12627_p6 = pneg %p12626_p3  ;;  %p12633_p4 = por %p12632_p11, %p12631_p7 }
  0xda   : > { %p12634_p9 = pnand %p12633_p4, %p12627_p6 }
  0xdc   : > { %12637 = shalt.err (!%p12634_p9)
}
  0xdd   : > { %s12918_s3 = smov 1024   ;;  %s12919_s2 = smov 64  }
  0xde   : > { %11537 = dma.hbm_to_vmem [thread:$0]  (!%p13102_p0), %s13288_s29, 32768, %s13290_s27, %s13126_s4, %s12918_s3, %s12918_s3, %s12919_s2  }
  0xdf   : > { %s10313_s18 = sshll.u32 %s13098_s20, 4  ;;  %s11094_s24 = sshll.u32 %s12902_s22, 8 }
  0xe0   : > { %s13318_s6 = scalar_lea.hbm %s15368_s14, %s11094_s24  ;;  %s731_s7 = scalar_lea.vmem [#allocation18], %s10313_s18 }
  0xe1   : > { %s739_s28 = sshll.u32 %s731_s7, 4  ;;  %s13325_s8 = scalar_lea.hbm %s15369_s15, %s11093_s5  ;;  %s740_s28 = int_to_ptr.vmem [resolvable:$true] %s739_s28 }
  0xe2   : > { %s12638_s27 = scalar_lea.hbm %s13318_s6, 256  ;;  %s12643_s2 = scalar_lea.hbm %s15368_s14, 768 }
  0xe3   : > { %p12639_p8 = scmp.ne.s32.totalorder %s13318_s6, %s12638_s27  ;;  %p12644_p1 = scmp.lt.s32.totalorder %s13318_s6, %s15368_s14 }
  0xe4   : > { %p12645_p13 = scmp.lt.s32.totalorder %s12643_s2, %s12638_s27 }
  0xe5   : > { %p12641_p10 = pnand %p12639_p8, %p13132_p5 }
  0xe6   : > { %p12646_p2 = por %p12645_p13, %p12644_p1 }
  0xe7   : > { %p12642_p12 = pneg %p12641_p10 }
  0xe9   : > { %p12647_p3 = pnand %p12646_p2, %p12642_p12 }
  0xeb   : > { %12650 = shalt.err (!%p12647_p3)
}
  0xec   : > { %s12651_s22 = scalar_lea.vmem %s740_s28, 256  ;;  %s12920_s19 = smov [#allocation18]  }
  0xed   : > { %p12652_p6 = scmp.ne.s32.totalorder %s740_s28, %s12651_s22  ;;  %s12656_s21 = sshll.u32 %s12920_s19, 4  ;;  %s12657_s21 = int_to_ptr.vmem [resolvable:$false] %s12656_s21 }
  0xee   : > { %s12658_s5 = scalar_lea.vmem %s12657_s21, 512  ;;  %p12659_p4 = scmp.lt.s32.totalorder %s740_s28, %s12657_s21 }
  0xef   : > { %p12654_p7 = pnand %p12652_p6, %p13132_p5  ;;  %p12660_p9 = scmp.lt.s32.totalorder %s12658_s5, %s12651_s22 }
  0xf1   : > { %p12655_p11 = pneg %p12654_p7  ;;  %p12661_p8 = por %p12660_p9, %p12659_p4 }
  0xf3   : > { %p12662_p10 = pnand %p12661_p8, %p12655_p11 }
  0xf5   : > { %12665 = shalt.err (!%p12662_p10)
}
  0xf6   : > { %11540 = dma.hbm_to_vmem [thread:$0]  (!%p13102_p0), %s13318_s6, 256, %s740_s28, %s13126_s4  }
  0xf7   : > { %s15440_s18 = sshll.u32 %s13098_s20, 11  ;;  %s13352_s3 = scalar_lea.hbm %s15370_s16, %s13211_s26 }
  0xf8   : > { %s750_s17 = scalar_lea.vmem [#allocation19], %s15440_s18  ;;  %s12666_s2 = scalar_lea.hbm %s13325_s8, 32768 }
  0xf9   : > { %s757_s7 = sshll.u32 %s750_s17, 4  ;;  %p12667_p12 = scmp.ne.s32.totalorder %s13325_s8, %s12666_s2  ;;  %s13346_s7 = int_to_ptr.vmem [resolvable:$true] %s757_s7 }
  0xfa   : > { %s12671_s22 = scalar_lea.hbm %s15369_s15, 98304  ;;  %p12672_p2 = scmp.lt.s32.totalorder %s13325_s8, %s15369_s15 }
  0xfb   : > { %p12669_p1 = pnand %p12667_p12, %p13132_p5  ;;  %p12673_p3 = scmp.lt.s32.totalorder %s12671_s22, %s12666_s2 }
  0xfd   : > { %p12670_p13 = pneg %p12669_p1  ;;  %p12674_p6 = por %p12673_p3, %p12672_p2 }
  0xff   : > { %p12675_p7 = pnand %p12674_p6, %p12670_p13 }
 0x101   : > { %12678 = shalt.err (!%p12675_p7)
}
 0x102   : > { %s12679_s28 = scalar_lea.vmem %s13346_s7, 32768  ;;  %s12921_s19 = smov [#allocation19]  }
 0x103   : > { %p12680_p11 = scmp.ne.s32.totalorder %s13346_s7, %s12679_s28  ;;  %s12684_s21 = sshll.u32 %s12921_s19, 4  ;;  %s12685_s21 = int_to_ptr.vmem [resolvable:$false] %s12684_s21 }
 0x104   : > { %s12686_s5 = scalar_lea.vmem %s12685_s21, 65536  ;;  %p12687_p8 = scmp.lt.s32.totalorder %s13346_s7, %s12685_s21 }
 0x105   : > { %p12682_p4 = pnand %p12680_p11, %p13132_p5  ;;  %p12688_p10 = scmp.lt.s32.totalorder %s12686_s5, %s12679_s28 }
 0x107   : > { %p12683_p9 = pneg %p12682_p4  ;;  %p12689_p12 = por %p12688_p10, %p12687_p8 }
 0x109   : > { %p12690_p1 = pnand %p12689_p12, %p12683_p9 }
 0x10b   : > { %12693 = shalt.err (!%p12690_p1)
}
 0x10c   : > { %s15441_s18 = smov 8   ;;  %s15442_s17 = smov 128  }
 0x10d   : > { %11543 = dma.hbm_to_vmem [thread:$0]  (!%p13102_p0), %s13325_s8, 32768, %s13346_s7, %s13126_s4, %s15442_s17, %s15442_s17, %s15441_s18  }
 0x10e   : > { %s771_s27 = scalar_lea.vmem [#allocation20], %s13182_s30  ;;  %s12922_s2 = smov [#allocation6]  }
 0x10f   : > { %s779_s29 = sshll.u32 %s771_s27, 4  ;;  %s547_s24 = sshll.u32 %s12922_s2, 4  ;;  %s780_s29 = int_to_ptr.vmem [resolvable:$true] %s779_s29  ;;  %s548_s24 = int_to_ptr.vmem [resolvable:$true] %s547_s24 }
 0x110   : > { %s12694_s25 = scalar_lea.hbm %s13352_s3, 32  ;;  %s12699_s20 = scalar_lea.hbm %s15370_s16, 96 }
 0x111   : > { %p12695_p13 = scmp.ne.s32.totalorder %s13352_s3, %s12694_s25  ;;  %p12700_p6 = scmp.lt.s32.totalorder %s13352_s3, %s15370_s16 }
 0x112   : > { %p12701_p7 = scmp.lt.s32.totalorder %s12699_s20, %s12694_s25 }
 0x113   : > { %p12697_p2 = pnand %p12695_p13, %p13132_p5 }
 0x114   : > { %p12702_p11 = por %p12701_p7, %p12700_p6 }
 0x115   : > { %p12698_p3 = pneg %p12697_p2 }
 0x117   : > { %p12703_p4 = pnand %p12702_p11, %p12698_p3 }
 0x119   : > { %12706 = shalt.err (!%p12703_p4)
}
 0x11a   : > { %s12707_s8 = scalar_lea.vmem %s780_s29, 32  ;;  %s12923_s7 = smov [#allocation20]  }
 0x11b   : > { %p12708_p9 = scmp.ne.s32.totalorder %s780_s29, %s12707_s8  ;;  %s12712_s21 = sshll.u32 %s12923_s7, 4  ;;  %s12713_s21 = int_to_ptr.vmem [resolvable:$false] %s12712_s21 }
 0x11c   : > { %s12714_s5 = scalar_lea.vmem %s12713_s21, 64  ;;  %p12715_p12 = scmp.lt.s32.totalorder %s780_s29, %s12713_s21 }
 0x11d   : > { %p12710_p8 = pnand %p12708_p9, %p13132_p5  ;;  %p12716_p1 = scmp.lt.s32.totalorder %s12714_s5, %s12707_s8 }
 0x11f   : > { %p12711_p10 = pneg %p12710_p8  ;;  %p12717_p13 = por %p12716_p1, %p12715_p12 }
 0x121   : > { %p12718_p2 = pnand %p12717_p13, %p12711_p10 }
 0x123   : > { %12721 = shalt.err (!%p12718_p2)
}
 0x124   : > { %11546 = dma.hbm_to_vmem [thread:$0]  (!%p13102_p0), %s13352_s3, 32, %s780_s29, %s13126_s4  }
 0x125   : > { %s12733_s27 = scalar_lea.vmem %s548_s24, 32  ;;  %p15443_p6 = scmp.ne.s32.totalorder %s15434_s0, 0 }
 0x126   : > { %p12734_p3 = scmp.ne.s32.totalorder %s548_s24, %s12733_s27  ;;  %p12741_p9 = scmp.lt.s32.totalorder %s548_s24, %s548_s24 }
 0x127   : > { %p15444_p7 = pneg %p15443_p6  ;;  %p12742_p8 = scmp.lt.s32.totalorder %s12733_s27, %s12733_s27 }
 0x129   : > { %p12736_p11 = pnand %p12734_p3, %p15444_p7  ;;  %p12743_p5 = por %p12742_p8, %p12741_p9 }
 0x12b   : > { %p12737_p4 = pneg %p12736_p11 }
 0x12d   : > { %p12744_p1 = pnand %p12743_p5, %p12737_p4 }
 0x12f   : > { %12747 = shalt.err (!%p12744_p1)
}
 0x130   : > { %s15445_s22 = sld [smem:[#allocation46_spill]]  ;;  %s790_s28 = scalar_lea.vmem [#allocation21], %s13182_s30 }
 0x131   : > { %s15446_s6 = sld [smem:[#allocation52_spill]]  ;;  %s798_s19 = sshll.u32 %s790_s28, 4  ;;  %s799_s19 = int_to_ptr.vmem [resolvable:$true] %s798_s19 }
 0x132   : > { %p15447_p5 = scmp.ne.s32.totalorder %s15438_s1, 0 }
 0x136   : > { %11509 = dma.hbm_to_vmem [thread:$0]  (!%p15443_p6), %s15445_s22, 32, %s548_s24, [#allocation7]  }
 0x137   : > { %s796_s20 = scalar_lea.hbm %s15446_s6, %s13211_s26  ;;  %s12753_s5 = scalar_lea.hbm %s15446_s6, 96 }
 0x138   : > { %s12748_s8 = scalar_lea.hbm %s796_s20, 32  ;;  %p12754_p2 = scmp.lt.s32.totalorder %s796_s20, %s15446_s6 }
 0x139   : > { %p12749_p10 = scmp.ne.s32.totalorder %s796_s20, %s12748_s8  ;;  %p12755_p3 = scmp.lt.s32.totalorder %s12753_s5, %s12748_s8 }
 0x13b   : > { %p12751_p12 = pnand %p12749_p10, %p15447_p5  ;;  %p12756_p7 = por %p12755_p3, %p12754_p2 }
 0x13d   : > { %p12752_p13 = pneg %p12751_p12 }
 0x13f   : > { %p12757_p11 = pnand %p12756_p7, %p12752_p13 }
 0x141   : > { %12760 = shalt.err (!%p12757_p11)
}
 0x142   : > { %s12761_s24 = scalar_lea.vmem %s799_s19, 32  ;;  %s12924_s25 = smov [#allocation21]  }
 0x143   : > { %p12762_p4 = scmp.ne.s32.totalorder %s799_s19, %s12761_s24  ;;  %s12766_s22 = sshll.u32 %s12924_s25, 4  ;;  %s12767_s22 = int_to_ptr.vmem [resolvable:$false] %s12766_s22 }
 0x144   : > { %s12768_s3 = scalar_lea.vmem %s12767_s22, 64  ;;  %p12769_p1 = scmp.lt.s32.totalorder %s799_s19, %s12767_s22 }
 0x145   : > { %p12764_p9 = pnand %p12762_p4, %p15447_p5  ;;  %p12770_p10 = scmp.lt.s32.totalorder %s12768_s3, %s12761_s24 }
 0x147   : > { %p12765_p8 = pneg %p12764_p9  ;;  %p12771_p12 = por %p12770_p10, %p12769_p1 }
 0x149   : > { %p12772_p6 = pnand %p12771_p12, %p12765_p8 }
 0x14b   : > { %12775 = shalt.err (!%p12772_p6)
}
 0x14c   : > { %11549 = dma.hbm_to_vmem [thread:$0]  (!%p13102_p0), %s796_s20, 32, %s799_s19, %s13126_s4  }
 0x14d   : > { %s12925_s29 = smov [#allocation8]   ;;  %s12926_s8 = smov [#allocation9]  }
 0x14e   : > { %s560_s28 = sshll.u32 %s12925_s29, 4  ;;  %s574_s7 = sshll.u32 %s12926_s8, 4  ;;  %s561_s28 = int_to_ptr.vmem [resolvable:$true] %s560_s28  ;;  %s575_s7 = int_to_ptr.vmem [resolvable:$true] %s574_s7 }
 0x14f   : > { %s12787_s21 = scalar_lea.vmem %s561_s28, 256  ;;  %p15448_p2 = scmp.ne.s32.totalorder %s15434_s0, 0 }
 0x150   : > { %p12788_p13 = scmp.ne.s32.totalorder %s561_s28, %s12787_s21  ;;  %p12795_p4 = scmp.lt.s32.totalorder %s561_s28, %s561_s28 }
 0x151   : > { %p15449_p3 = pneg %p15448_p2  ;;  %p12796_p9 = scmp.lt.s32.totalorder %s12787_s21, %s12787_s21 }
 0x153   : > { %p12790_p7 = pnand %p12788_p13, %p15449_p3  ;;  %p12797_p8 = por %p12796_p9, %p12795_p4 }
 0x155   : > { %p12791_p11 = pneg %p12790_p7 }
 0x157   : > { %p12798_p6 = pnand %p12797_p8, %p12791_p11 }
 0x159   : > { %12801 = shalt.err (!%p12798_p6)
}
 0x15a   : > { %s15450_s5 = sld [smem:[#allocation48_spill]]  ;;  %s12813_s27 = scalar_lea.vmem %s575_s7, 32 }
 0x15b   : > { %p12814_p1 = scmp.ne.s32.totalorder %s575_s7, %s12813_s27  ;;  %p15451_p10 = pmov %p15449_p3 }
 0x15c   : > { %p12821_p3 = scmp.lt.s32.totalorder %s575_s7, %s575_s7  ;;  %p12822_p7 = scmp.lt.s32.totalorder %s12813_s27, %s12813_s27 }
 0x15d   : > { %p12816_p12 = pnand %p12814_p1, %p15451_p10 }
 0x15e   : > { %p12823_p11 = por %p12822_p7, %p12821_p3 }
 0x15f   : > { %p12817_p13 = pneg %p12816_p12 }
 0x160   : > { %11512 = dma.hbm_to_vmem [thread:$0]  (!%p15448_p2), %s15450_s5, 256, %s561_s28, [#allocation7], %s15442_s17, %s15442_s17, %s15441_s18  }
 0x161   : > { %p12824_p4 = pnand %p12823_p11, %p12817_p13 }
 0x163   : > { %12827 = shalt.err (!%p12824_p4)
}
 0x164   : > { %s15452_s25 = sld [smem:[#allocation49_spill]]  ;;  %s809_s28 = scalar_lea.vmem [#allocation22], %s13182_s30 }
 0x165   : > { %s15453_s22 = sld [smem:[#allocation53_spill]]  ;;  %s817_s8 = sshll.u32 %s809_s28, 4  ;;  %s818_s8 = int_to_ptr.vmem [resolvable:$true] %s817_s8 }
 0x16a   : > { %11515 = dma.hbm_to_vmem [thread:$0]  (!%p15448_p2), %s15452_s25, 32, %s575_s7, [#allocation10]  }
 0x16b   : > { %s15454_s3 = smov %s15453_s22  ;;  %s815_s29 = scalar_lea.hbm %s15453_s22, %s13211_s26 }
 0x16c   : > { %s12828_s21 = scalar_lea.hbm %s815_s29, 32  ;;  %s12833_s19 = scalar_lea.hbm %s15454_s3, 96 }
 0x16d   : > { %p12829_p9 = scmp.ne.s32.totalorder %s815_s29, %s12828_s21  ;;  %p12834_p2 = scmp.lt.s32.totalorder %s815_s29, %s15454_s3 }
 0x16e   : > { %p12835_p1 = scmp.lt.s32.totalorder %s12833_s19, %s12828_s21 }
 0x16f   : > { %p12831_p8 = pnand %p12829_p9, %p15447_p5 }
 0x170   : > { %p12836_p10 = por %p12835_p1, %p12834_p2 }
 0x171   : > { %p12832_p6 = pneg %p12831_p8 }
 0x173   : > { %p12837_p12 = pnand %p12836_p10, %p12832_p6 }
 0x175   : > { %12840 = shalt.err (!%p12837_p12)
}
 0x176   : > { %s12841_s30 = scalar_lea.vmem %s818_s8, 32  ;;  %s12927_s26 = smov [#allocation22]  }
 0x177   : > { %p12842_p13 = scmp.ne.s32.totalorder %s818_s8, %s12841_s30  ;;  %s12846_s7 = sshll.u32 %s12927_s26, 4  ;;  %s12847_s7 = int_to_ptr.vmem [resolvable:$false] %s12846_s7 }
 0x178   : > { %s12848_s2 = scalar_lea.vmem %s12847_s7, 64  ;;  %p12849_p11 = scmp.lt.s32.totalorder %s818_s8, %s12847_s7 }
 0x179   : > { %p12844_p3 = pnand %p12842_p13, %p15447_p5  ;;  %p12850_p4 = scmp.lt.s32.totalorder %s12848_s2, %s12841_s30 }
 0x17b   : > { %p12845_p7 = pneg %p12844_p3  ;;  %p12851_p9 = por %p12850_p4, %p12849_p11 }
 0x17d   : > { %p12852_p8 = pnand %p12851_p9, %p12845_p7 }
 0x17f   : > { %12855 = shalt.err (!%p12852_p8)
}
 0x180   : > { %11552 = dma.hbm_to_vmem [thread:$0]  (!%p13102_p0), %s815_s29, 32, %s818_s8, %s13126_s4  }
 0x181   : > { %s15455_s24 = sld [smem:[#allocation33_spill]] }
 0x187   : > { %p15456_p6 = scmp.ne.s32.totalorder %s15455_s24, 0 }
 0x189   : > { %826 = sbr.rel (%p15456_p6) target bundleno = 6719 (0x1a3f), region = 96 }
 0x18e   : > { %s15457_s25 = sld [smem:[#allocation29_spill]] }
 0x194   : > { %p15458_p2 = scmp.eq.s32.totalorder %s15457_s25, 0 }
 0x196   : > { %12873 = dma.done.wait (%p15458_p2), [#allocation5], 768   ;;  %p15459_p5 = pmov %p15458_p2 }
 0x197   : > { %p15460_p1 = pmov %p15458_p2 }
 0x198   : > { %12875 = vsyncadd (%p15459_p5), [#allocation5], 4294966528 }
 0x199   : > { %12877 = dma.done.wait (%p15460_p1), [#allocation7], 288   ;;  %p15461_p10 = pmov %p15460_p1 }
 0x19a   : > { %p15462_p12 = pmov %p15460_p1 }
 0x19b   : > { %12879 = vsyncadd (%p15461_p10), [#allocation7], 4294967008 }
 0x19c   : > { %12881 = dma.done.wait (%p15462_p12), [#allocation10], 32   ;;  %p15463_p0 = pmov %p15460_p1 }
 0x19d   : > { %s15464_s4 = sld [smem:[#allocation27_spill]]  ;;  %s844_s1 = sand.u32 1, %s15457_s25  }
 0x19e   : > { %12883 = vsyncadd (%p15463_p0), [#allocation10], 4294967264  ;;  %s15465_s23 = sld [smem:[#allocation32_spill]]  ;;  %s845_s22 = scalar_lea.sflag [#allocation5], %s844_s1 }
 0x1a3   : > { %s846_s18 = sand.u32 1, %s15464_s4  }
 0x1a4   : > { %s11461_s17 = smul.u32 768, %s846_s18  ;;  %p15466_p13 = scmp.ne.s32.totalorder %s15465_s23, 0 }
 0x1a6   : > { %s13475_s29 = scalar_lea.vmem [#allocation11], %s11461_s17 }
 0x1a7   : > { %12885 = dma.done.wait (%p15466_p13), %s845_s22, 82464  }
 0x1a8   : > { %12887 = vsyncadd (%p15466_p13), %s845_s22, 4294884832  ;;  %s11462_s28 = smul.u32 6, %s846_s18  ;;  %s10333_s8 = sshll.u32 %s846_s18, 8 }
 0x1a9   : > { %s13481_s21 = sshll.u32 %s846_s18, 1  ;;  %s10337_s0 = sshll.u32 %s846_s18, 11 }
 0x1aa   : > { %s10338_s20 = sshll.u32 %s846_s18, 4  ;;  %s13483_s19 = scalar_lea.vmem [#allocation12], %s11462_s28 }
 0x1ab   : > { %s13485_s5 = scalar_lea.vmem [#allocation13], %s10333_s8  ;;  %s875_s27 = scalar_lea.vmem [#allocation14], %s13481_s21 }
 0x1ac   : > { %s884_s30 = scalar_lea.vmem [#allocation15], %s13481_s21  ;;  %s893_s26 = scalar_lea.vmem [#allocation16], %s13481_s21 }
 0x1ad   : > { %s13490_s7 = scalar_lea.vmem [#allocation17], %s10337_s0  ;;  %s13492_s2 = scalar_lea.vmem [#allocation18], %s10338_s20 }
 0x1ae   : > { %s13494_s24 = scalar_lea.vmem [#allocation19], %s10337_s0  ;;  %p15467_p3 = scmp.ne.s32.totalorder %s15457_s25, 0 }
 0x1af   : > { %s15468_s17 = sld [smem:[#allocation44_spill]] (!%p15467_p3) }
 0x1b0   : > { %1055 = sbr.rel (%p15467_p3) target bundleno = 664 (0x298), region = 164  ;;  %s15469_s28 = sld [smem:[#allocation47_spill]] (!%p15467_p3) }
 0x1b5   : > { %v1065_v0 = vld [vmem:[#allocation4 + $0x28] sm:$0x3]  ;;  %vm1091_vm0 = vcmask 1041408   ;;  %v1064_v1 = vld [vmem:[#allocation4 + $0x20] sm:$0x3]  ;;  %v1063_v2 = vld [vmem:[#allocation4 + $0x18] sm:$0xff]  ;;  %v1068_v11 = vlaneseq }
 0x1b6   : > { %10344 = vmatprep.subr.msk.mxu0 %vm1091_vm0, %v1065_v0  ;;  %11451 = vmatprep.subr.msk.mxu1 %vm1091_vm0, %v1065_v0  ;;  %v1062_v3 = vld [vmem:[#allocation4 + $0x10] sm:$0xff]  ;;  %v1061_v4 = vld [vmem:[#allocation4 + $0x8] sm:$0xff]  ;;  %v1060_v5 = vld [vmem:[#allocation4] sm:$0xff]  ;;  %vm1078_vm1 = vcmask 146432   ;;  %v12928_v8 = vmov 0.0  }
 0x1b7   : > { %10345 = vmatpush1.msk.msra.mxu0 %vm1091_vm0, %v1064_v1  ;;  %11454 = vmatpush1.msk.msra.mxu1 %vm1091_vm0, %v1064_v1  ;;  %v1056_v6 = vld [vmem:[%s15468_s17] sm:$0xff]  ;;  %v1058_v7 = vld [vmem:[%s15468_s17 + $0x10] sm:$0xff]  ;;  %v1057_v9 = vld [vmem:[%s15468_s17 + $0x8] sm:$0xff]  ;;  %v1069_v12 = vshrl.u32 %v1068_v11, 7 }
 0x1b8   : > { %1126 = vmatprep.subr.mxu0 %v1063_v2  ;;  %11452 = vmatprep.subr.mxu1 %v1063_v2  ;;  %v1059_v10 = vld [vmem:[%s15468_s17 + $0x18] sm:$0xff]  ;;  %v1066_v14 = vld [vmem:[#allocation6] sm:$0x3]  ;;  %v1195_v34 = vld [vmem:[%s15469_s28] sm:$0xff] }
 0x1b9   : > { %1127 = vmatpush1.msra.mxu0 %v1062_v3  ;;  %11455 = vmatpush1.msra.mxu1 %v1062_v3  ;;  %v1070_v13 = vsub.s32 0, %v1069_v12  ;;  %v1074_v15 = vsub.s32 1, %v1069_v12  ;;  %v1199_v35 = vld [vmem:[%s15469_s28 + $0x20] sm:$0xff]  ;;  %v1196_v37 = vld [vmem:[%s15469_s28 + $0x8] sm:$0xff]  ;;  %v1197_v43 = vld [vmem:[%s15469_s28 + $0x10] sm:$0xff] }
 0x1ba   : > { %1128 = vmatprep.subr.mxu0 %v1061_v4  ;;  %11453 = vmatprep.subr.mxu1 %v1061_v4  ;;  %v1200_v40 = vld [vmem:[%s15469_s28 + $0x28] sm:$0xff]  ;;  %v1201_v46 = vld [vmem:[%s15469_s28 + $0x30] sm:$0xff]  ;;  %v1198_v49 = vld [vmem:[%s15469_s28 + $0x18] sm:$0xff] }
 0x1bb   : > { %1129 = vmatpush1.msra.mxu0 %v1060_v5  ;;  %11456 = vmatpush1.msra.mxu1 %v1060_v5  ;;  %v1071_v16 = vrot.slane %v1066_v14, %v1070_v13  ;;  %v1075_v17 = vrot.slane %v1066_v14, %v1074_v15  ;;  %v1202_v52 = vld [vmem:[%s15469_s28 + $0x38] sm:$0xff] }
 0x1bc   : > { %1162 = vmatprep.mubr.f32.mxu0 %v12928_v8  ;;  %1174 = vmatprep.mubr.f32.mxu1 %v12928_v8 }
 0x1bd   : > { %10346 = vmatmul.mubr.msk.f32.vlgmr.msra.gmra.mxu0 %vm1078_vm1, %v1056_v6  ;;  %10348 = vmatmul.mubr.msk.f32.vlgmr.msra.gmra.mxu1 %vm1078_vm1, %v1058_v7 }
 0x1be   : > { %1168 = vmatprep.mubr.f32.mxu0 %v12928_v8  ;;  %1180 = vmatprep.mubr.f32.mxu1 %v12928_v8 }
 0x1c1   : > { %10347 = vmatmul.mubr.msk.f32.gmra.mxu0 %vm1078_vm1, %v1057_v9  ;;  %10349 = vmatmul.mubr.msk.f32.gmra.mxu1 %vm1078_vm1, %v1059_v10 }
 0x27d   : > { %v1164_v18 = vpop.f32.mrf.mxu0  ;;  %v1176_v19 = vpop.f32.mrf.mxu1 }
 0x27e   : > { %v1165_v20 = vadd.f32 %v1164_v18, %v1071_v16  ;;  %v1177_v21 = vadd.f32 %v1176_v19, %v1071_v16 }
 0x27f   : > { %v1166_v22 = vpop.f32.mrf.mxu0  ;;  %v1178_v23 = vpop.f32.mrf.mxu1 }
 0x280   : > { %11610 = vtanh.f32 %v1165_v20  ;;  %v1167_v24 = vadd.f32 %v1166_v22, %v1075_v17  ;;  %v1179_v25 = vadd.f32 %v1178_v23, %v1075_v17 }
 0x281   : > { %11612 = vtanh.f32 %v1177_v21  ;;  %v1170_v26 = vpop.f32.mrf.mxu0  ;;  %v1182_v27 = vpop.f32.mrf.mxu1 }
 0x282   : > { %11614 = vtanh.f32 %v1167_v24  ;;  %v1171_v28 = vadd.f32 %v1170_v26, %v1071_v16  ;;  %v1183_v29 = vadd.f32 %v1182_v27, %v1071_v16 }
 0x283   : > { %11616 = vtanh.f32 %v1179_v25  ;;  %v1172_v30 = vpop.f32.mrf.mxu0  ;;  %v1184_v31 = vpop.f32.mrf.mxu1 }
 0x284   : > { %11618 = vtanh.f32 %v1171_v28  ;;  %v1173_v32 = vadd.f32 %v1172_v30, %v1075_v17  ;;  %v1185_v33 = vadd.f32 %v1184_v31, %v1075_v17 }
 0x285   : > { %11620 = vtanh.f32 %v1183_v29 }
 0x286   : > { %11622 = vtanh.f32 %v1173_v32 }
 0x287   : > { %11624 = vtanh.f32 %v1185_v33 }
 0x28d   : > { %v11611_v36 = vpop.eup %11610 }
 0x28e   : > { %v11613_v38 = vpop.eup %11612  ;;  %v1203_v39 = vadd.f32 %v11611_v36, %v1195_v34 }
 0x28f   : > { %v11615_v41 = vpop.eup %11614  ;;  %v1207_v42 = vadd.f32 %v11613_v38, %v1199_v35 }
 0x290   : > { %v11617_v44 = vpop.eup %11616  ;;  %1211 = vst [vmem:[#allocation2 + $0x30] sm:$0xff] %v1203_v39  ;;  %v1204_v45 = vadd.f32 %v11615_v41, %v1196_v37 }
 0x291   : > { %v11619_v47 = vpop.eup %11618  ;;  %1215 = vst [vmem:[#allocation2 + $0x8] sm:$0xff] %v1207_v42  ;;  %v1208_v48 = vadd.f32 %v11617_v44, %v1200_v40 }
 0x292   : > { %v11621_v50 = vpop.eup %11620  ;;  %1212 = vst [vmem:[#allocation2] sm:$0xff] %v1204_v45  ;;  %v1205_v51 = vadd.f32 %v11619_v47, %v1197_v43 }
 0x293   : > { %v11623_v53 = vpop.eup %11622  ;;  %1216 = vst [vmem:[#allocation2 + $0x20] sm:$0xff] %v1208_v48  ;;  %v1209_v54 = vadd.f32 %v11621_v50, %v1201_v46 }
 0x294   : > { %v11625_v55 = vpop.eup %11624  ;;  %1213 = vst [vmem:[#allocation2 + $0x18] sm:$0xff] %v1205_v51  ;;  %v1206_v56 = vadd.f32 %v11623_v53, %v1198_v49 }
 0x295   : > { %1217 = vst [vmem:[#allocation2 + $0x28] sm:$0xff] %v1209_v54  ;;  %v1210_v57 = vadd.f32 %v11625_v55, %v1202_v52 }
 0x296   : > { %1214 = vst [vmem:[#allocation2 + $0x10] sm:$0xff] %v1206_v56 }
 0x297   : > { %1218 = vst [vmem:[#allocation2 + $0x38] sm:$0xff] %v1210_v57 }
 0x298 PF: > { %v11686_v58 = vld [vmem:[%s13475_s29 + $0x15c] ss:$24 sps:$4 sm:$0xff]   ;;  %v11688_v59 = vld [vmem:[%s13475_s29 + $0x158] ss:$24 sps:$4 sm:$0xff]   ;;  %v11692_v62 = vld [vmem:[%s13475_s29 + $0x12c] ss:$24 sps:$4 sm:$0xff]  }
 0x299   : > { %1892 = vmatprep.subr.bf16.mxu1 %v11686_v58  ;;  %v11689_v60 = vld [vmem:[%s13475_s29 + $0x154] ss:$24 sps:$4 sm:$0xff]   ;;  %v11691_v61 = vld [vmem:[%s13475_s29 + $0x150] ss:$24 sps:$4 sm:$0xff]   ;;  %v11695_v0 = vld [vmem:[%s13475_s29 + $0x124] ss:$24 sps:$4 sm:$0xff]  }
 0x29a   : > { %1893 = vmatpush1.bf16.msra.mxu1 %v11688_v59  ;;  %v11694_v63 = vld [vmem:[%s13475_s29 + $0x128] ss:$24 sps:$4 sm:$0xff]   ;;  %1839 = vmatprep.subr.bf16.mxu0 %v11689_v60  ;;  %v11698_v2 = vld [vmem:[%s13475_s29 + $0xfc] ss:$24 sps:$4 sm:$0xff]   ;;  %v11700_v3 = vld [vmem:[%s13475_s29 + $0xf8] ss:$24 sps:$4 sm:$0xff]  }
 0x29b   : > { %1840 = vmatpush1.bf16.msra.mxu0 %v11691_v61  ;;  %1894 = vmatprep.subr.bf16.mxu1 %v11692_v62  ;;  %v11697_v1 = vld [vmem:[%s13475_s29 + $0x120] ss:$24 sps:$4 sm:$0xff]   ;;  %v11701_v4 = vld [vmem:[%s13475_s29 + $0xf4] ss:$24 sps:$4 sm:$0xff]   ;;  %v11703_v6 = vld [vmem:[%s13475_s29 + $0xf0] ss:$24 sps:$4 sm:$0xff]  }
 0x29c   : > { %1841 = vmatprep.subr.bf16.mxu0 %v11695_v0  ;;  %v11704_v5 = vld [vmem:[%s13475_s29 + $0xcc] ss:$24 sps:$4 sm:$0xff]   ;;  %v11706_v8 = vld [vmem:[%s13475_s29 + $0xc8] ss:$24 sps:$4 sm:$0xff]   ;;  %v11710_v9 = vld [vmem:[%s13475_s29 + $0x9c] ss:$24 sps:$4 sm:$0xff]  }
 0x29d   : > { %v11707_v7 = vld [vmem:[%s13475_s29 + $0xc4] ss:$24 sps:$4 sm:$0xff]   ;;  %v11709_v10 = vld [vmem:[%s13475_s29 + $0xc0] ss:$24 sps:$4 sm:$0xff]   ;;  %v11713_v11 = vld [vmem:[%s13475_s29 + $0x94] ss:$24 sps:$4 sm:$0xff]  }
 0x29e   : > { %1895 = vmatpush1.bf16.msra.mxu1 %v11694_v63  ;;  %v11712_v12 = vld [vmem:[%s13475_s29 + $0x98] ss:$24 sps:$4 sm:$0xff]   ;;  %v11716_v13 = vld [vmem:[%s13475_s29 + $0x6c] ss:$24 sps:$4 sm:$0xff]   ;;  %v11718_v16 = vld [vmem:[%s13475_s29 + $0x68] ss:$24 sps:$4 sm:$0xff]  }
 0x29f   : > { %1896 = vmatprep.subr.bf16.mxu1 %v11698_v2  ;;  %1842 = vmatpush1.bf16.msra.mxu0 %v11697_v1  ;;  %v11715_v14 = vld [vmem:[%s13475_s29 + $0x90] ss:$24 sps:$4 sm:$0xff]   ;;  %v11719_v15 = vld [vmem:[%s13475_s29 + $0x64] ss:$24 sps:$4 sm:$0xff]   ;;  %v11721_v18 = vld [vmem:[%s13475_s29 + $0x60] ss:$24 sps:$4 sm:$0xff]  }
 0x2a0   : > { %1843 = vmatprep.subr.bf16.mxu0 %v11701_v4  ;;  %v11722_v17 = vld [vmem:[%s13475_s29 + $0x3c] ss:$24 sps:$4 sm:$0xff]   ;;  %v11724_v20 = vld [vmem:[%s13475_s29 + $0x38] ss:$24 sps:$4 sm:$0xff]   ;;  %v11728_v21 = vld [vmem:[%s13475_s29 + $0xc] ss:$24 sps:$4 sm:$0xff]  }
 0x2a1   : > { %v11725_v19 = vld [vmem:[%s13475_s29 + $0x34] ss:$24 sps:$4 sm:$0xff]   ;;  %v11727_v22 = vld [vmem:[%s13475_s29 + $0x30] ss:$24 sps:$4 sm:$0xff]   ;;  %v11731_v23 = vld [vmem:[%s13475_s29 + $0x4] ss:$24 sps:$4 sm:$0xff]  }
 0x2a2   : > { %1897 = vmatpush1.bf16.msra.mxu1 %v11700_v3  ;;  %v11730_v24 = vld [vmem:[%s13475_s29 + $0x8] ss:$24 sps:$4 sm:$0xff]   ;;  %v11734_v25 = vld [vmem:[%s13475_s29 + $0x2dc] ss:$24 sps:$4 sm:$0xff]   ;;  %v11736_v28 = vld [vmem:[%s13475_s29 + $0x2d8] ss:$24 sps:$4 sm:$0xff]  }
 0x2a3   : > { %1898 = vmatprep.subr.bf16.mxu1 %v11704_v5  ;;  %1844 = vmatpush1.bf16.msra.mxu0 %v11703_v6  ;;  %v11733_v26 = vld [vmem:[%s13475_s29] ss:$24 sps:$4 sm:$0xff]   ;;  %v11737_v27 = vld [vmem:[%s13475_s29 + $0x2d4] ss:$24 sps:$4 sm:$0xff]   ;;  %v11739_v30 = vld [vmem:[%s13475_s29 + $0x2d0] ss:$24 sps:$4 sm:$0xff]  }
 0x2a4   : > { %1845 = vmatprep.subr.bf16.mxu0 %v11707_v7  ;;  %v11740_v29 = vld [vmem:[%s13475_s29 + $0x2ac] ss:$24 sps:$4 sm:$0xff]   ;;  %v11742_v32 = vld [vmem:[%s13475_s29 + $0x2a8] ss:$24 sps:$4 sm:$0xff]   ;;  %v11746_v33 = vld [vmem:[%s13475_s29 + $0x27c] ss:$24 sps:$4 sm:$0xff]  }
 0x2a5   : > { %v11743_v31 = vld [vmem:[%s13475_s29 + $0x2a4] ss:$24 sps:$4 sm:$0xff]   ;;  %v11745_v34 = vld [vmem:[%s13475_s29 + $0x2a0] ss:$24 sps:$4 sm:$0xff]   ;;  %v11749_v35 = vld [vmem:[%s13475_s29 + $0x274] ss:$24 sps:$4 sm:$0xff]  }
 0x2a6   : > { %1899 = vmatpush1.bf16.msra.mxu1 %v11706_v8  ;;  %v11748_v36 = vld [vmem:[%s13475_s29 + $0x278] ss:$24 sps:$4 sm:$0xff]   ;;  %v11752_v37 = vld [vmem:[%s13475_s29 + $0x24c] ss:$24 sps:$4 sm:$0xff]   ;;  %v1220_v40 = vld [vmem:[#allocation2] sm:$0xff]  ;;  %vm2000_vm2 = vcmask 261120  }
 0x2a7   : > { %1900 = vmatprep.subr.bf16.mxu1 %v11710_v9  ;;  %1846 = vmatpush1.bf16.msra.mxu0 %v11709_v10  ;;  %v11751_v38 = vld [vmem:[%s13475_s29 + $0x270] ss:$24 sps:$4 sm:$0xff]   ;;  %v11755_v39 = vld [vmem:[%s13475_s29 + $0x244] ss:$24 sps:$4 sm:$0xff]   ;;  %v11757_v45 = vld [vmem:[%s13475_s29 + $0x240] ss:$24 sps:$4 sm:$0xff]  }
 0x2a8   : > { %1847 = vmatprep.subr.bf16.mxu0 %v11713_v11  ;;  %v11754_v41 = vld [vmem:[%s13475_s29 + $0x248] ss:$24 sps:$4 sm:$0xff]   ;;  %v1222_v42 = vld [vmem:[#allocation2 + $0x10] sm:$0xff]  ;;  %v11758_v43 = vld [vmem:[%s13475_s29 + $0x21c] ss:$24 sps:$4 sm:$0xff]   ;;  %vm2175_vm3 = vcmask 130048  }
 0x2a9   : > { %v13585_v44 = vpack.c.bf16 %v1222_v42, %v1220_v40  ;;  %v11761_v46 = vld [vmem:[%s13475_s29 + $0x214] ss:$24 sps:$4 sm:$0xff]   ;;  %v11760_v47 = vld [vmem:[%s13475_s29 + $0x218] ss:$24 sps:$4 sm:$0xff]   ;;  %v11767_v50 = vld [vmem:[%s13475_s29 + $0x1e4] ss:$24 sps:$4 sm:$0xff]  }
 0x2aa   : > { %1901 = vmatpush1.bf16.msra.mxu1 %v11712_v12  ;;  %v11764_v48 = vld [vmem:[%s13475_s29 + $0x1ec] ss:$24 sps:$4 sm:$0xff]   ;;  %v11763_v49 = vld [vmem:[%s13475_s29 + $0x210] ss:$24 sps:$4 sm:$0xff]   ;;  %v11770_v52 = vld [vmem:[%s13475_s29 + $0x1bc] ss:$24 sps:$4 sm:$0xff]  }
 0x2ab   : > { %1902 = vmatprep.subr.bf16.mxu1 %v11716_v13  ;;  %1848 = vmatpush1.bf16.msra.mxu0 %v11715_v14  ;;  %v11766_v51 = vld [vmem:[%s13475_s29 + $0x1e8] ss:$24 sps:$4 sm:$0xff]   ;;  %v11773_v54 = vld [vmem:[%s13475_s29 + $0x1b4] ss:$24 sps:$4 sm:$0xff]   ;;  %v11772_v55 = vld [vmem:[%s13475_s29 + $0x1b8] ss:$24 sps:$4 sm:$0xff]  }
 0x2ac   : > { %1849 = vmatprep.subr.bf16.mxu0 %v11719_v15  ;;  %1924 = vmatprep.mubr.bf16.mxu1 %v13585_v44  ;;  %v11769_v53 = vld [vmem:[%s13475_s29 + $0x1e0] ss:$24 sps:$4 sm:$0xff]   ;;  %v11775_v56 = vld [vmem:[%s13475_s29 + $0x1b0] ss:$24 sps:$4 sm:$0xff]   ;;  %v11776_v57 = vld [vmem:[%s13475_s29 + $0x18c] ss:$24 sps:$4 sm:$0xff]  }
 0x2ad   : > { %1871 = vmatprep.mubr.bf16.mxu0 %v13585_v44  ;;  %v11778_v58 = vld [vmem:[%s13475_s29 + $0x188] ss:$24 sps:$4 sm:$0xff]   ;;  %v11779_v59 = vld [vmem:[%s13475_s29 + $0x184] ss:$24 sps:$4 sm:$0xff]   ;;  %v1219_v60 = vld [vmem:[#allocation2 + $0x30] sm:$0xff]  ;;  %s12931_s1 = smov 32  }
 0x2ae   : > { %1903 = vmatpush1.bf16.msra.mxu1 %v11718_v16  ;;  %v1221_v61 = vld [vmem:[#allocation2 + $0x18] sm:$0xff]  ;;  %v1224_v62 = vld [vmem:[#allocation2 + $0x20] sm:$0xff]  ;;  %v1223_v5 = vld [vmem:[#allocation2 + $0x8] sm:$0xff]  ;;  %vm5270_vm4 = vcmask 523264   ;;  %vm5275_vm5 = vcmask 785408  }
 0x2af   : > { %1904 = vmatprep.subr.bf16.mxu1 %v11722_v17  ;;  %1850 = vmatpush1.bf16.msra.mxu0 %v11721_v18  ;;  %v1226_v63 = vld [vmem:[#allocation2 + $0x38] sm:$0xff]  ;;  %v13605_v1 = vpack.c.bf16 %v1221_v61, %v1219_v60  ;;  %v11784_v2 = vld [vmem:[%s13475_s29 + $0x164] ss:$24 sps:$4 sm:$0xff]   ;;  %v11785_v8 = vld [vmem:[%s13475_s29 + $0x130] ss:$24 sps:$4 sm:$0xff]  }
 0x2b0   : > { %1851 = vmatprep.subr.bf16.mxu0 %v11725_v19  ;;  %v11781_v0 = vld [vmem:[%s13475_s29 + $0x180] ss:$24 sps:$4 sm:$0xff]   ;;  %v13608_v3 = vpack.c.bf16 %v1226_v63, %v1224_v62  ;;  %v1225_v6 = vld [vmem:[#allocation2 + $0x28] sm:$0xff]  ;;  %v11787_v7 = vld [vmem:[%s13475_s29 + $0x134] ss:$24 sps:$4 sm:$0xff]  }
 0x2b1   : > { %v11782_v4 = vld [vmem:[%s13475_s29 + $0x160] ss:$24 sps:$4 sm:$0xff]   ;;  %v11790_v9 = vld [vmem:[%s13475_s29 + $0x104] ss:$24 sps:$4 sm:$0xff]   ;;  %v1229_v10 = vpack.c.bf16 %v1225_v6, %v1223_v5  ;;  %v11793_v12 = vld [vmem:[%s13475_s29 + $0xd4] ss:$24 sps:$4 sm:$0xff]  }
 0x2b2   : > { %1905 = vmatpush1.bf16.msra.mxu1 %v11724_v20  ;;  %v11788_v11 = vld [vmem:[%s13475_s29 + $0x100] ss:$24 sps:$4 sm:$0xff]   ;;  %v11791_v13 = vld [vmem:[%s13475_s29 + $0xd0] ss:$24 sps:$4 sm:$0xff]   ;;  %v11796_v14 = vld [vmem:[%s13475_s29 + $0xa4] ss:$24 sps:$4 sm:$0xff]  }
 0x2b3   : > { %1906 = vmatprep.subr.bf16.mxu1 %v11728_v21  ;;  %1852 = vmatpush1.bf16.msra.mxu0 %v11727_v22  ;;  %v11794_v15 = vld [vmem:[%s13475_s29 + $0xa0] ss:$24 sps:$4 sm:$0xff]   ;;  %v11799_v16 = vld [vmem:[%s13475_s29 + $0x74] ss:$24 sps:$4 sm:$0xff]   ;;  %v11797_v17 = vld [vmem:[%s13475_s29 + $0x70] ss:$24 sps:$4 sm:$0xff]  }
 0x2b4   : > { %1853 = vmatprep.subr.bf16.mxu0 %v11731_v23  ;;  %v11802_v18 = vld [vmem:[%s13475_s29 + $0x44] ss:$24 sps:$4 sm:$0xff]   ;;  %v11800_v19 = vld [vmem:[%s13475_s29 + $0x40] ss:$24 sps:$4 sm:$0xff]   ;;  %v11805_v20 = vld [vmem:[%s13475_s29 + $0x14] ss:$24 sps:$4 sm:$0xff]  }
 0x2b5   : > { %v11803_v21 = vld [vmem:[%s13475_s29 + $0x10] ss:$24 sps:$4 sm:$0xff]   ;;  %v11808_v22 = vld [vmem:[%s13475_s29 + $0x2e4] ss:$24 sps:$4 sm:$0xff]   ;;  %v11806_v23 = vld [vmem:[%s13475_s29 + $0x2e0] ss:$24 sps:$4 sm:$0xff]  }
 0x2b6   : > { %1907 = vmatpush1.bf16.msra.mxu1 %v11730_v24  ;;  %v11811_v24 = vld [vmem:[%s13475_s29 + $0x2b4] ss:$24 sps:$4 sm:$0xff]  }
 0x2b7   : > { %1908 = vmatprep.subr.bf16.mxu1 %v11734_v25  ;;  %1854 = vmatpush1.bf16.msra.mxu0 %v11733_v26  ;;  %v11809_v25 = vld [vmem:[%s13475_s29 + $0x2b0] ss:$24 sps:$4 sm:$0xff]   ;;  %v11814_v26 = vld [vmem:[%s13475_s29 + $0x284] ss:$24 sps:$4 sm:$0xff]  }
 0x2b8   : > { %1855 = vmatprep.subr.bf16.mxu0 %v11737_v27  ;;  %v11812_v27 = vld [vmem:[%s13475_s29 + $0x280] ss:$24 sps:$4 sm:$0xff]  }
 0x2ba   : > { %1909 = vmatpush2.bf16.msra.mxu1 %v11736_v28  ;;  %v11817_v28 = vld [vmem:[%s13475_s29 + $0x254] ss:$24 sps:$4 sm:$0xff]  }
 0x2bb   : > { %1910 = vmatprep.subr.bf16.mxu1 %v11740_v29  ;;  %1856 = vmatpush2.bf16.msra.mxu0 %v11739_v30  ;;  %v11815_v29 = vld [vmem:[%s13475_s29 + $0x250] ss:$24 sps:$4 sm:$0xff]   ;;  %v11820_v30 = vld [vmem:[%s13475_s29 + $0x224] ss:$24 sps:$4 sm:$0xff]  }
 0x2bc   : > { %1857 = vmatprep.subr.bf16.mxu0 %v11743_v31  ;;  %v11818_v31 = vld [vmem:[%s13475_s29 + $0x220] ss:$24 sps:$4 sm:$0xff]  }
 0x2be   : > { %1911 = vmatpush2.bf16.msra.mxu1 %v11742_v32  ;;  %v11823_v32 = vld [vmem:[%s13475_s29 + $0x1f4] ss:$24 sps:$4 sm:$0xff]  }
 0x2bf   : > { %1912 = vmatprep.subr.bf16.mxu1 %v11746_v33  ;;  %1858 = vmatpush2.bf16.msra.mxu0 %v11745_v34  ;;  %v11821_v33 = vld [vmem:[%s13475_s29 + $0x1f0] ss:$24 sps:$4 sm:$0xff]   ;;  %v11826_v34 = vld [vmem:[%s13475_s29 + $0x1c4] ss:$24 sps:$4 sm:$0xff]  }
 0x2c0   : > { %1859 = vmatprep.subr.bf16.mxu0 %v11749_v35  ;;  %v11824_v35 = vld [vmem:[%s13475_s29 + $0x1c0] ss:$24 sps:$4 sm:$0xff]  }
 0x2c2   : > { %1913 = vmatpush2.bf16.msra.mxu1 %v11748_v36  ;;  %v11829_v36 = vld [vmem:[%s13475_s29 + $0x194] ss:$24 sps:$4 sm:$0xff]  }
 0x2c3   : > { %1914 = vmatprep.subr.bf16.mxu1 %v11752_v37  ;;  %1860 = vmatpush2.bf16.msra.mxu0 %v11751_v38  ;;  %v11827_v37 = vld [vmem:[%s13475_s29 + $0x190] ss:$24 sps:$4 sm:$0xff]   ;;  %v1329_v38 = vlaneseq  ;;  %s12929_s29 = smov 96  }
 0x2c4   : > { %1861 = vmatprep.subr.bf16.mxu0 %v11755_v39 }
 0x2c5   : > { %v13648_v39 = vshrl.u32 %v1329_v38, 7  ;;  %v13798_v38 = vld [vmem:[#allocation8] sm:$0xff] }
 0x2c6   : > { %1915 = vmatpush2.bf16.msra.mxu1 %v11754_v41  ;;  %v13654_v41 = vld [vmem:[%s13483_s19] sm:$0x3f]  ;;  %s12930_s19 = smov 64  }
 0x2c7   : > { %1916 = vmatprep.subr.bf16.mxu1 %v11758_v43  ;;  %1862 = vmatpush2.bf16.msra.mxu0 %v11757_v45  ;;  %v13651_v40 = vsub.s32 0, %v13648_v39  ;;  %v13657_v42 = vsub.s32 2, %v13648_v39 }
 0x2c8   : > { %1863 = vmatprep.subr.bf16.mxu0 %v11761_v46 }
 0x2c9   : > { %15470 = vst [vmem:[#allocation34_spill] sm:$0xff] %v13651_v40  ;;  %v1332_v43 = vrot.slane %v13654_v41, %v13651_v40 }
 0x2ca   : > { %1917 = vmatpush2.bf16.msra.mxu1 %v11760_v47  ;;  %v1340_v47 = vrot.slane %v13654_v41, %v13657_v42 }
 0x2cb   : > { %1918 = vmatprep.subr.bf16.mxu1 %v11764_v48  ;;  %1864 = vmatpush2.bf16.msra.mxu0 %v11763_v49 }
 0x2cc   : > { %1865 = vmatprep.subr.bf16.mxu0 %v11767_v50 }
 0x2ce   : > { %1919 = vmatpush2.bf16.msra.mxu1 %v11766_v51  ;;  %v13670_v51 = vsub.s32 3, %v13648_v39 }
 0x2cf   : > { %1920 = vmatprep.subr.bf16.mxu1 %v11770_v52  ;;  %1866 = vmatpush2.bf16.msra.mxu0 %v11769_v53 }
 0x2d0   : > { %1867 = vmatprep.subr.bf16.mxu0 %v11773_v54 }
 0x2d2   : > { %1921 = vmatpush2.bf16.msra.mxu1 %v11772_v55 }
 0x2d3   : > { %1922 = vmatprep.subr.bf16.mxu1 %v11776_v57  ;;  %1868 = vmatpush2.bf16.msra.mxu0 %v11775_v56  ;;  %v13683_v56 = vsub.s32 1, %v13648_v39 }
 0x2d4   : > { %1869 = vmatprep.subr.bf16.mxu0 %v11779_v59  ;;  %v13695_v59 = vrot.slane %v13654_v41, %v13670_v51 }
 0x2d5   : > { %15471 = vst [vmem:[#allocation35_spill] sm:$0xff] %v13683_v56  ;;  %v13701_v62 = vrot.slane %v13654_v41, %v13683_v56 }
 0x2d6   : > { %1923 = vmatpush2.bf16.msra.mxu1 %v11778_v58 }
 0x2d7   : > { %1870 = vmatpush2.bf16.msra.mxu0 %v11781_v0 }
 0x2d8   : > { %1945 = vmatprep.subr.bf16.mxu0 %v11784_v2 }
 0x2d9   : > { %1925 = vmatmul.mubr.bf16.vlgmr.msra.gmra.mxu1 %v13605_v1 }
 0x2da   : > { %1934 = vmatprep.mubr.bf16.mxu1 %v13608_v3  ;;  %1872 = vmatmul.mubr.bf16.vlgmr.msra.gmra.mxu0 %v13605_v1 }
 0x2db   : > { %1881 = vmatprep.mubr.bf16.mxu0 %v13608_v3  ;;  %1946 = vmatpush1.bf16.msra.mxu0 %v11782_v4 }
 0x2dc   : > { %1947 = vmatprep.subr.bf16.mxu0 %v11787_v7 }
 0x2df   : > { %1948 = vmatpush1.bf16.msra.mxu0 %v11785_v8 }
 0x2e0   : > { %1949 = vmatprep.subr.bf16.mxu0 %v11790_v9 }
 0x2e1   : > { %1935 = vmatmul.mubr.bf16.gmra.mxu1 %v1229_v10 }
 0x2e2   : > { %1882 = vmatmul.mubr.bf16.gmra.mxu0 %v1229_v10 }
 0x2e3   : > { %1950 = vmatpush1.bf16.msra.mxu0 %v11788_v11  ;;  %1977 = vmatprep.mubr.bf16.mxu0 %v13585_v44  ;;  %v13751_v11 = vsub.s32 4, %v13648_v39 }
 0x2e4   : > { %1951 = vmatprep.subr.bf16.mxu0 %v11793_v12 }
 0x2e7   : > { %1952 = vmatpush1.bf16.msra.mxu0 %v11791_v13  ;;  %v1348_v13 = vrot.slane %v13654_v41, %v13751_v11 }
 0x2e8   : > { %1953 = vmatprep.subr.bf16.mxu0 %v11796_v14 }
 0x2eb   : > { %1954 = vmatpush1.bf16.msra.mxu0 %v11794_v15 }
 0x2ec   : > { %1955 = vmatprep.subr.bf16.mxu0 %v11799_v16 }
 0x2ef   : > { %1956 = vmatpush1.bf16.msra.mxu0 %v11797_v17  ;;  %v13760_v17 = vsub.s32 5, %v13648_v39 }
 0x2f0   : > { %1957 = vmatprep.subr.bf16.mxu0 %v11802_v18 }
 0x2f3   : > { %1958 = vmatpush1.bf16.msra.mxu0 %v11800_v19 }
 0x2f4   : > { %1959 = vmatprep.subr.bf16.mxu0 %v11805_v20 }
 0x2f7   : > { %1960 = vmatpush1.bf16.msra.mxu0 %v11803_v21  ;;  %v13770_v21 = vrot.slane %v13654_v41, %v13760_v17 }
 0x2f8   : > { %1961 = vmatprep.subr.bf16.mxu0 %v11808_v22 }
 0x2fb   : > { %1962 = vmatpush2.bf16.msra.mxu0 %v11806_v23 }
 0x2fc   : > { %1963 = vmatprep.subr.bf16.mxu0 %v11811_v24 }
 0x2ff   : > { %1964 = vmatpush2.bf16.msra.mxu0 %v11809_v25 }
 0x300   : > { %1965 = vmatprep.subr.bf16.mxu0 %v11814_v26 }
 0x303   : > { %1966 = vmatpush2.bf16.msra.mxu0 %v11812_v27 }
 0x304   : > { %1967 = vmatprep.subr.bf16.mxu0 %v11817_v28 }
 0x307   : > { %1968 = vmatpush2.bf16.msra.mxu0 %v11815_v29 }
 0x308   : > { %1969 = vmatprep.subr.bf16.mxu0 %v11820_v30 }
 0x30b   : > { %1970 = vmatpush2.bf16.msra.mxu0 %v11818_v31 }
 0x30c   : > { %1971 = vmatprep.subr.bf16.mxu0 %v11823_v32 }
 0x30f   : > { %1972 = vmatpush2.bf16.msra.mxu0 %v11821_v33 }
 0x310   : > { %1973 = vmatprep.subr.bf16.mxu0 %v11826_v34 }
 0x313   : > { %1974 = vmatpush2.bf16.msra.mxu0 %v11824_v35 }
 0x314   : > { %1975 = vmatprep.subr.bf16.mxu0 %v11829_v36  ;;  %v13796_v36 = vld [vmem:[#allocation8 + $0x8] sm:$0xff] }
 0x317   : > { %1976 = vmatpush2.bf16.msra.mxu0 %v11827_v37 }
 0x31a   : > { %1978 = vmatmul.mubr.bf16.vlgmr.msra.gmra.mxu0 %v13605_v1 }
 0x31b   : > { %1987 = vmatprep.mubr.bf16.mxu0 %v13608_v3 }
 0x322   : > { %1988 = vmatmul.mubr.bf16.gmra.mxu0 %v1229_v10 }
 0x399   : > { %v1926_v44 = vpop.f32.mrf.mxu1 }
 0x39a   : > { %v1873_v45 = vpop.f32.mrf.mxu0  ;;  %v13680_v55 = vadd.f32 %v1926_v44, %v1340_v47 }
 0x39b   : > { %v13661_v46 = vpop.f32.mrf.mxu1  ;;  %v13665_v48 = vadd.f32 %v1873_v45, %v1332_v43 }
 0x39c   : > { %v13667_v49 = vpop.f32.mrf.mxu0 }
 0x39d   : > { %v1930_v50 = vpop.f32.mrf.mxu1  ;;  %2382 = vrot.lane.b32.xlu1 %v13665_v48, %s12929_s29  ;;  %11231 = vmatprep.mubr.msk.f32.mxu0 %vm2000_vm2, %v13665_v48 }
 0x39e   : > { %v13672_v52 = vadd.f32 %v1930_v50, %v1340_v47  ;;  %v1877_v53 = vpop.f32.mrf.mxu0 }
 0x39f   : > { %v13678_v54 = vpop.f32.mrf.mxu1  ;;  %v13712_v3 = vadd.f32 %v1877_v53, %v1332_v43 }
 0x3a0   : > { %2388 = vrot.lane.b32.xlu0 %v13672_v52, %s12929_s29  ;;  %11227 = vmatprep.subr.msk.mxu0 %vm2000_vm2, %v13672_v52  ;;  %v13689_v57 = vpop.f32.mrf.mxu0 }
 0x3a1   : > { %v1936_v58 = vpop.f32.mrf.mxu1  ;;  %11228 = vmatpush3.xpose.msk.msra.mxu0 %vm2000_vm2, %v13672_v52 }
 0x3a2   : > { %11229 = vmatprep.subr.msk.mxu0 %vm2000_vm2, %v13680_v55  ;;  %v1883_v61 = vpop.f32.mrf.mxu0  ;;  %v13721_v6 = vadd.f32 %v1936_v58, %v1340_v47 }
 0x3a3   : > { %v1938_v60 = vpop.f32.mrf.mxu1  ;;  %v13708_v0 = vadd.f32 %v1883_v61, %v1332_v43 }
 0x3a4   : > { %v13704_v63 = vadd.f32 %v1938_v60, %v13695_v59  ;;  %2386 = vrot.lane.b32.xlu0 %v13680_v55, %s12929_s29  ;;  %v1885_v2 = vpop.f32.mrf.mxu0 }
 0x3a5   : > { %v1940_v1 = vpop.f32.mrf.mxu1  ;;  %11230 = vmatpush3.xpose.msk.msra.mxu0 %vm2000_vm2, %v13680_v55  ;;  %v13717_v5 = vadd.f32 %v1885_v2, %v13701_v62  ;;  %11238 = vmatprep.mubr.msk.f32.mxu1 %vm2000_vm2, %v13708_v0 }
 0x3a6   : > { %v13714_v4 = vadd.f32 %v1940_v1, %v1340_v47  ;;  %v1887_v7 = vpop.f32.mrf.mxu0 }
 0x3a7   : > { %v13742_v10 = vadd.f32 %v1887_v7, %v1332_v43  ;;  %v13807_v50 = vpop.f32.mrf.mxu1 }
 0x3a8   : > { %11234 = vmatprep.subr.msk.mxu1 %vm2000_vm2, %v13714_v4  ;;  %2384 = vrot.lane.b32.xlu0 %v13712_v3, %s12929_s29  ;;  %v1889_v8 = vpop.f32.mrf.mxu0 }
 0x3a9   : > { %2479 = vrot.lane.b32.xlu1 %v13714_v4, %s12929_s29  ;;  %11232 = vmatmul.mubr.msk.f32.vlgmr.msra.gmra.mxu0 %vm2000_vm2, %v13712_v3  ;;  %v13734_v9 = vadd.f32 %v1889_v8, %v13701_v62 }
 0x3aa   : > { %11235 = vmatpush3.xpose.msk.msra.mxu1 %vm2000_vm2, %v13714_v4 }
 0x3ab   : > { %11236 = vmatprep.subr.msk.mxu1 %vm2000_vm2, %v13721_v6 }
 0x3ac   : > { %2473 = vrot.lane.b32.xlu0 %v13708_v0, %s12929_s29 }
 0x3ad   : > { %2477 = vrot.lane.b32.xlu1 %v13721_v6, %s12929_s29 }
 0x3ae   : > { %11237 = vmatpush3.xpose.msk.msra.mxu1 %vm2000_vm2, %v13721_v6 }
 0x3b1   : > { %11239 = vmatmul.mubr.msk.f32.vlgmr.msra.gmra.mxu1 %vm2000_vm2, %v13742_v10  ;;  %2475 = vrot.lane.b32.xlu1 %v13742_v10, %s12929_s29 }
 0x3da   : > { %v1979_v12 = vpop.f32.mrf.mxu0 }
 0x3db   : > { %v13757_v16 = vadd.f32 %v1979_v12, %v1348_v13 }
 0x3dc   : > { %v13755_v14 = vpop.f32.mrf.mxu0 }
 0x3de   : > { %v1983_v15 = vpop.f32.mrf.mxu0 }
 0x3df   : > { %v13762_v18 = vadd.f32 %v1983_v15, %v1348_v13 }
 0x3e0   : > { %v13764_v19 = vpop.f32.mrf.mxu0 }
 0x3e1   : > { %11241 = vmatprep.subr.mxu1 %v13762_v18 }
 0x3e2   : > { %v1989_v20 = vpop.f32.mrf.mxu0  ;;  %11242 = vmatpush3.msra.mxu1 %v13762_v18 }
 0x3e3   : > { %v13772_v22 = vadd.f32 %v1989_v20, %v1348_v13  ;;  %11243 = vmatprep.subr.mxu1 %v13757_v16 }
 0x3e4   : > { %v1991_v23 = vpop.f32.mrf.mxu0  ;;  %11244 = vmatpush3.msra.mxu1 %v13757_v16 }
 0x3e5   : > { %v13777_v24 = vadd.f32 %v1991_v23, %v13770_v21 }
 0x3e6   : > { %v1993_v25 = vpop.f32.mrf.mxu0 }
 0x3e7   : > { %v13779_v26 = vadd.f32 %v1993_v25, %v1348_v13 }
 0x3e8   : > { %v13794_v35 = vpop.f32.mrf.mxu0 }
 0x3e9   : > { %11248 = vmatprep.subr.mxu1 %v13779_v26 }
 0x40f   : > { %v2383_v27 = vpop.permute.xlu1 %2382 }
 0x410   : > { %11259 = vmatprep.mubr.msk.f32.mxu0 %vm2000_vm2, %v2383_v27 }
 0x412   : > { %v2389_v28 = vpop.permute.xlu0 %2388 }
 0x413   : > { %11255 = vmatprep.subr.msk.mxu0 %vm2000_vm2, %v2389_v28 }
 0x414   : > { %11256 = vmatpush3.xpose.msk.msra.mxu0 %vm2000_vm2, %v2389_v28 }
 0x416   : > { %v2387_v29 = vpop.permute.xlu0 %2386 }
 0x417   : > { %11257 = vmatprep.subr.msk.mxu0 %vm2000_vm2, %v2387_v29 }
 0x418   : > { %11258 = vmatpush3.xpose.msk.msra.mxu0 %vm2000_vm2, %v2387_v29 }
 0x41a   : > { %v2385_v30 = vpop.permute.xlu0 %2384 }
 0x41b   : > { %v2480_v31 = vpop.permute.xlu1 %2479  ;;  %11260 = vmatmul.mubr.msk.f32.vlgmr.msra.gmra.mxu0 %vm2000_vm2, %v2385_v30 }
 0x41c   : > { %11262 = vmatprep.subr.msk.mxu0 %vm2000_vm2, %v2480_v31 }
 0x41d   : > { %11263 = vmatpush3.xpose.msk.msra.mxu0 %vm2000_vm2, %v2480_v31 }
 0x41e   : > { %v2474_v32 = vpop.permute.xlu0 %2473 }
 0x41f   : > { %v2478_v33 = vpop.permute.xlu1 %2477  ;;  %11266 = vmatprep.mubr.msk.f32.mxu0 %vm2000_vm2, %v2474_v32 }
 0x420   : > { %11264 = vmatprep.subr.msk.mxu0 %vm2000_vm2, %v2478_v33 }
 0x421   : > { %11265 = vmatpush3.xpose.msk.msra.mxu0 %vm2000_vm2, %v2478_v33 }
 0x423   : > { %v2476_v34 = vpop.permute.xlu1 %2475 }
 0x424   : > { %11267 = vmatmul.mubr.msk.f32.vlgmr.msra.gmra.mxu0 %vm2000_vm2, %v2476_v34 }
 0x469   : > { %v11233_v37 = vpop.f32.mrf.mxu0 }
 0x46a   : > { %v13801_v41 = vadd.f32 %v11233_v37, %v13796_v36 }
 0x46b   : > { %v2079_v43 = vpop.f32.mrf.mxu0 }
 0x46c   : > { %v2080_v44 = vadd.f32 %v2079_v43, %v13798_v38  ;;  %v2179_v45 = vsel %vm2175_vm3, %v13801_v41, -inf }
 0x46d   : > { %2180 = vmax.xlane.f32.xlu1 %v2179_v45 }
 0x46e   : > { %v2176_v47 = vsel %vm2175_vm3, %v2080_v44, -inf }
 0x46f   : > { %2177 = vmax.xlane.f32.xlu0 %v2176_v47 }
 0x471   : > { %v11240_v53 = vpop.f32.mrf.mxu1 }
 0x472   : > { %v2172_v60 = vadd.f32 %v11240_v53, %v13796_v36 }
 0x473   : > { %v2166_v58 = vpop.f32.mrf.mxu1 }
 0x474   : > { %v2167_v61 = vadd.f32 %v2166_v58, %v13798_v38  ;;  %v2185_v2 = vsel %vm2175_vm3, %v2172_v60, -inf }
 0x476   : > { %v2182_v1 = vsel %vm2175_vm3, %v2167_v61, -inf }
 0x477   : > { %2183 = vmax.xlane.f32.xlu0 %v2182_v1 }
 0x47b   : > { %2186 = vmax.xlane.f32.xlu0 %v2185_v2 }
 0x4db   : > { %v11261_v7 = vpop.f32.mrf.mxu0 }
 0x4dc   : > { %v2470_v8 = vadd.f32 %v11261_v7, %v13796_v36 }
 0x4dd   : > { %v2464_v12 = vpop.f32.mrf.mxu0 }
 0x4de   : > { %v2465_v13 = vadd.f32 %v2464_v12, %v13798_v38  ;;  %v2567_v15 = vsel %vm2175_vm3, %v2470_v8, -inf }
 0x4df   : > { %2568 = vmax.xlane.f32.xlu0 %v2567_v15 }
 0x4e0   : > { %v2564_v20 = vsel %vm2175_vm3, %v2465_v13, -inf }
 0x4e1   : > { %2565 = vmax.xlane.f32.xlu1 %v2564_v20 }
 0x4e4   : > { %v11268_v23 = vpop.f32.mrf.mxu0 }
 0x4e5   : > { %v2561_v25 = vadd.f32 %v11268_v23, %v13796_v36 }
 0x4e6   : > { %v2555_v47 = vpop.f32.mrf.mxu0 }
 0x4e7   : > { %v2573_v27 = vsel %vm2175_vm3, %v2561_v25, -inf  ;;  %v2556_v1 = vadd.f32 %v2555_v47, %v13798_v38 }
 0x4e8   : > { %2574 = vmax.xlane.f32.xlu0 %v2573_v27 }
 0x4f2   : > { %2792 = vrot.lane.b32.xlu1 %v13672_v52, %s12930_s19 }
 0x4f6   : > { %2786 = vrot.lane.b32.xlu1 %v13665_v48, %s12930_s19  ;;  %v2181_v7 = vpop.xlane.xlu1 %2180 }
 0x4f7   : > { %v2189_v12 = vsub.f32 %v13801_v41, %v2181_v7 }
 0x4f8   : > { %v2178_v28 = vpop.xlane.xlu0 %2177 }
 0x4f9   : > { %v2188_v30 = vsub.f32 %v2080_v44, %v2178_v28  ;;  %v2194_v15 = vmul.f32 1.442695, %v2189_v12 }
 0x4fa   : > { %2788 = vrot.lane.b32.xlu1 %v13712_v3, %s12930_s19 }
 0x4fb   : > { %v2192_v32 = vmul.f32 1.442695, %v2188_v30 }
 0x4fd   : > { %12262 = vpow2.f32 %v2192_v32 }
 0x4fe   : > { %2790 = vrot.lane.b32.xlu0 %v13680_v55, %s12930_s19  ;;  %2612 = vrot.lane.b32.xlu1 %v13762_v18, %s12929_s29 }
 0x500   : > { %v2184_v29 = vpop.xlane.xlu0 %2183 }
 0x501   : > { %v2190_v34 = vsub.f32 %v2167_v61, %v2184_v29  ;;  %v2570_v61 = vsel %vm2175_vm3, %v2556_v1, -inf }
 0x502   : > { %2610 = vrot.lane.b32.xlu0 %v13757_v16, %s12929_s29  ;;  %2701 = vrot.lane.b32.xlu1 %v13779_v26, %s12929_s29 }
 0x503   : > { %v2196_v43 = vmul.f32 1.442695, %v2190_v34 }
 0x504   : > { %v2187_v31 = vpop.xlane.xlu0 %2186 }
 0x505   : > { %v2191_v33 = vsub.f32 %v2172_v60, %v2187_v31 }
 0x507   : > { %v2198_v37 = vmul.f32 1.442695, %v2191_v33 }
 0x509   : > { %12264 = vpow2.f32 %v2198_v37 }
 0x50a   : > { %12266 = vpow2.f32 %v2196_v43  ;;  %v13833_v45 = vpop.eup %12262 }
 0x50b   : > { %v2200_v53 = vsel %vm2175_vm3, %v13833_v45, 0.0  ;;  %12268 = vpow2.f32 %v2194_v15 }
 0x516   : > { %v13837_v58 = vpop.eup %12264 }
 0x517   : > { %v2209_v44 = vsel %vm2175_vm3, %v13837_v58, 0.0  ;;  %v13842_v60 = vpop.eup %12266 }
 0x518   : > { %v2206_v2 = vsel %vm2175_vm3, %v13842_v60, 0.0  ;;  %v12269_v20 = vpop.eup %12268 }
 0x519   : > { %v2203_v23 = vsel %vm2175_vm3, %v12269_v20, 0.0 }
 0x521   : > { %2201 = vadd.xlane.f32.xlu0 %v2200_v53 }
 0x525   : > { %2210 = vadd.xlane.f32.xlu0 %v2209_v44 }
 0x526   : > { %2571 = vmax.xlane.f32.xlu1 %v2570_v61 }
 0x529   : > { %2207 = vadd.xlane.f32.xlu0 %v2206_v2 }
 0x537   : > { %2699 = vrot.lane.b32.xlu1 %v13772_v22, %s12929_s29 }
 0x55b   : > { %2204 = vadd.xlane.f32.xlu1 %v2203_v23 }
 0x568   : > { %v2569_v27 = vpop.xlane.xlu0 %2568 }
 0x569   : > { %v2577_v28 = vsub.f32 %v2470_v8, %v2569_v27 }
 0x56a   : > { %v2566_v29 = vpop.xlane.xlu1 %2565 }
 0x56b   : > { %v2582_v30 = vmul.f32 1.442695, %v2577_v28  ;;  %v2576_v31 = vsub.f32 %v2465_v13, %v2566_v29 }
 0x56d   : > { %12270 = vpow2.f32 %v2582_v30  ;;  %v2580_v32 = vmul.f32 1.442695, %v2576_v31 }
 0x56e   : > { %v2793_v33 = vpop.permute.xlu1 %2792 }
 0x56f   : > { %12272 = vpow2.f32 %v2580_v32  ;;  %11283 = vmatprep.subr.msk.mxu0 %vm2000_vm2, %v2793_v33 }
 0x570   : > { %11284 = vmatpush3.xpose.msk.msra.mxu0 %vm2000_vm2, %v2793_v33 }
 0x571   : > { %v2575_v41 = vpop.xlane.xlu0 %2574 }
 0x572   : > { %v2579_v34 = vsub.f32 %v2561_v25, %v2575_v41  ;;  %v2787_v37 = vpop.permute.xlu1 %2786 }
 0x573   : > { %11287 = vmatprep.mubr.msk.f32.mxu0 %vm2000_vm2, %v2787_v37 }
 0x574   : > { %v2586_v43 = vmul.f32 1.442695, %v2579_v34 }
 0x575   : > { %v2791_v47 = vpop.permute.xlu0 %2790 }
 0x576   : > { %12274 = vpow2.f32 %v2586_v43  ;;  %11285 = vmatprep.subr.msk.mxu0 %vm2000_vm2, %v2791_v47  ;;  %v2789_v8 = vpop.permute.xlu1 %2788 }
 0x577   : > { %11286 = vmatpush3.xpose.msk.msra.mxu0 %vm2000_vm2, %v2791_v47 }
 0x579   : > { %v2611_v12 = vpop.permute.xlu0 %2610 }
 0x57a   : > { %v12271_v13 = vpop.eup %12270  ;;  %11288 = vmatmul.mubr.msk.f32.vlgmr.msra.gmra.mxu0 %vm2000_vm2, %v2789_v8  ;;  %v2613_v7 = vpop.permute.xlu1 %2612 }
 0x57b   : > { %v2591_v53 = vsel %vm2175_vm3, %v12271_v13, 0.0 }
 0x57c   : > { %v12273_v44 = vpop.eup %12272  ;;  %2592 = vadd.xlane.f32.xlu0 %v2591_v53 }
 0x57d   : > { %v2588_v25 = vsel %vm2175_vm3, %v12273_v44, 0.0 }
 0x57e   : > { %2589 = vadd.xlane.f32.xlu1 %v2588_v25  ;;  %v2702_v23 = vpop.permute.xlu1 %2701 }
 0x583   : > { %v13859_v61 = vpop.eup %12274 }
 0x584   : > { %v2597_v2 = vsel %vm2175_vm3, %v13859_v61, 0.0 }
 0x585   : > { %2598 = vadd.xlane.f32.xlu0 %v2597_v2 }
 0x58f   : > { %2881 = vrot.lane.b32.xlu1 %v13721_v6, %s12930_s19 }
 0x59b   : > { %2883 = vrot.lane.b32.xlu0 %v13714_v4, %s12930_s19 }
 0x59f   : > { %2877 = vrot.lane.b32.xlu0 %v13708_v0, %s12930_s19 }
 0x5aa   : > { %v2202_v15 = vpop.xlane.xlu0 %2201 }
 0x5ab   : > { %12276 = vrcp.f32 %v2202_v15 }
 0x5ae   : > { %v2211_v41 = vpop.xlane.xlu0 %2210 }
 0x5af   : > { %v2572_v27 = vpop.xlane.xlu1 %2571 }
 0x5b0   : > { %v2578_v28 = vsub.f32 %v2556_v1, %v2572_v27 }
 0x5b2   : > { %v2584_v29 = vmul.f32 1.442695, %v2578_v28  ;;  %v2208_v37 = vpop.xlane.xlu0 %2207 }
 0x5b3   : > { %v2700_v34 = vpop.permute.xlu1 %2699 }
 0x5b4   : > { %12278 = vpow2.f32 %v2584_v29 }
 0x5b5   : > { %12280 = vrcp.f32 %v2208_v37 }
 0x5b8   : > { %v12277_v30 = vpop.eup %12276 }
 0x5b9   : > { %v2216_v31 = vmul.f32 %v12277_v30, %v13833_v45 }
 0x5bb   : > { %11245 = vmatprep.mubr.msk.f32.mxu1 %vm2175_vm3, %v2216_v31 }
 0x5c1   : > { %v12279_v32 = vpop.eup %12278 }
 0x5c2   : > { %v2594_v33 = vsel %vm2175_vm3, %v12279_v32, 0.0  ;;  %v12281_v1 = vpop.eup %12280 }
 0x5c3   : > { %2595 = vadd.xlane.f32.xlu1 %v2594_v33  ;;  %v2218_v53 = vmul.f32 %v12281_v1, %v13842_v60 }
 0x5d4   : > { %2879 = vrot.lane.b32.xlu1 %v13742_v10, %s12930_s19 }
 0x5e4   : > { %v2205_v43 = vpop.xlane.xlu1 %2204 }
 0x5e5   : > { %12282 = vrcp.f32 %v2205_v43 }
 0x5e6   : > { %12284 = vrcp.f32 %v2211_v41 }
 0x5f2   : > { %v12283_v47 = vpop.eup %12282 }
 0x5f3   : > { %v2217_v8 = vmul.f32 %v12283_v47, %v12269_v20  ;;  %v12285_v45 = vpop.eup %12284 }
 0x5f4   : > { %v2219_v25 = vmul.f32 %v12285_v45, %v13837_v58 }
 0x5f5   : > { %11246 = vmatmul.mubr.msk.f32.vlgmr.msra.gmra.mxu1 %vm2175_vm3, %v2217_v8 }
 0x5f6   : > { %11249 = vmatpush3.msra.mxu1 %v13779_v26  ;;  %11252 = vmatprep.mubr.msk.f32.mxu1 %vm2175_vm3, %v2218_v53 }
 0x5f7   : > { %11250 = vmatprep.subr.mxu1 %v13772_v22 }
 0x5f8   : > { %11251 = vmatpush3.msra.mxu1 %v13772_v22 }
 0x5f9   : > { %11269 = vmatprep.subr.mxu1 %v2613_v7  ;;  %11253 = vmatmul.mubr.msk.f32.vlgmr.msra.gmra.mxu1 %vm2175_vm3, %v2219_v25 }
 0x5fa   : > { %11270 = vmatpush3.msra.mxu1 %v2613_v7 }
 0x5fb   : > { %11271 = vmatprep.subr.mxu1 %v2611_v12 }
 0x5fc   : > { %11272 = vmatpush3.msra.mxu1 %v2611_v12 }
 0x5fd   : > { %11276 = vmatprep.subr.mxu1 %v2702_v23 }
 0x605   : > { %v2593_v60 = vpop.xlane.xlu0 %2592 }
 0x606   : > { %12286 = vrcp.f32 %v2593_v60 }
 0x607   : > { %v2590_v20 = vpop.xlane.xlu1 %2589 }
 0x608   : > { %12288 = vrcp.f32 %v2590_v20 }
 0x60e   : > { %v2599_v27 = vpop.xlane.xlu0 %2598 }
 0x60f   : > { %12290 = vrcp.f32 %v2599_v27 }
 0x612   : > { %v2884_v58 = vpop.permute.xlu0 %2883 }
 0x613   : > { %v12287_v2 = vpop.eup %12286 }
 0x614   : > { %v2605_v29 = vmul.f32 %v12287_v2, %v12271_v13 }
 0x615   : > { %v12289_v15 = vpop.eup %12288 }
 0x616   : > { %v2604_v28 = vmul.f32 %v12289_v15, %v12273_v44  ;;  %v2882_v44 = vpop.permute.xlu1 %2881  ;;  %v2878_v1 = vpop.permute.xlu0 %2877 }
 0x618   : > { %11273 = vmatprep.mubr.msk.f32.mxu1 %vm2175_vm3, %v2604_v28 }
 0x619   : > { %11274 = vmatmul.mubr.msk.f32.vlgmr.msra.gmra.mxu1 %vm2175_vm3, %v2605_v29 }
 0x61a   : > { %11277 = vmatpush3.msra.mxu1 %v2702_v23 }
 0x61b   : > { %11278 = vmatprep.subr.mxu1 %v2700_v34 }
 0x61c   : > { %11279 = vmatpush3.msra.mxu1 %v2700_v34  ;;  %v12291_v41 = vpop.eup %12290 }
 0x61d   : > { %11290 = vmatprep.subr.msk.mxu1 %vm2000_vm2, %v2884_v58  ;;  %v2607_v43 = vmul.f32 %v12291_v41, %v13859_v61 }
 0x63a   : > { %v11289_v7 = vpop.f32.mrf.mxu0 }
 0x63b   : > { %v2874_v12 = vadd.f32 %v11289_v7, %v13796_v36 }
 0x63c   : > { %v2868_v30 = vpop.f32.mrf.mxu0 }
 0x63d   : > { %v2869_v31 = vadd.f32 %v2868_v30, %v13798_v38  ;;  %v2971_v33 = vsel %vm2175_vm3, %v2874_v12, -inf }
 0x63e   : > { %2972 = vmax.xlane.f32.xlu1 %v2971_v33 }
 0x63f   : > { %v2968_v13 = vsel %vm2175_vm3, %v2869_v31, -inf }
 0x640   : > { %2969 = vmax.xlane.f32.xlu0 %v2968_v13 }
 0x64c   : > { %v2596_v23 = vpop.xlane.xlu1 %2595 }
 0x64d   : > { %12292 = vrcp.f32 %v2596_v23 }
 0x650   : > { %v2880_v47 = vpop.permute.xlu1 %2879 }
 0x65a   : > { %v12293_v34 = vpop.eup %12292 }
 0x65b   : > { %v2606_v37 = vmul.f32 %v12293_v34, %v12279_v32 }
 0x65d   : > { %11280 = vmatprep.mubr.msk.f32.mxu1 %vm2175_vm3, %v2606_v37 }
 0x65e   : > { %11281 = vmatmul.mubr.msk.f32.vlgmr.msra.gmra.mxu1 %vm2175_vm3, %v2607_v43 }
 0x65f   : > { %11291 = vmatpush3.xpose.msk.msra.mxu1 %vm2000_vm2, %v2884_v58  ;;  %11294 = vmatprep.mubr.msk.f32.mxu1 %vm2000_vm2, %v2878_v1 }
 0x660   : > { %11292 = vmatprep.subr.msk.mxu1 %vm2000_vm2, %v2882_v44 }
 0x663   : > { %11293 = vmatpush3.xpose.msk.msra.mxu1 %vm2000_vm2, %v2882_v44 }
 0x666   : > { %11295 = vmatmul.mubr.msk.f32.vlgmr.msra.gmra.mxu1 %vm2000_vm2, %v2880_v47 }
 0x6b5   : > { %v13908_v25 = vpop.f32.mrf.mxu1 }
 0x6b7   : > { %v13910_v60 = vpop.f32.mrf.mxu1 }
 0x6b9   : > { %v13912_v20 = vpop.f32.mrf.mxu1 }
 0x6bb   : > { %v13914_v2 = vpop.f32.mrf.mxu1 }
 0x6c7   : > { %v2973_v15 = vpop.xlane.xlu1 %2972 }
 0x6c9   : > { %v2970_v8 = vpop.xlane.xlu0 %2969 }
 0x6ca   : > { %v2980_v32 = vsub.f32 %v2869_v31, %v2970_v8 }
 0x6cc   : > { %v2984_v45 = vmul.f32 1.442695, %v2980_v32 }
 0x6ce   : > { %12294 = vpow2.f32 %v2984_v45 }
 0x6d9   : > { %v13916_v27 = vpop.f32.mrf.mxu1 }
 0x6db   : > { %v12295_v61 = vpop.eup %12294  ;;  %v13918_v28 = vpop.f32.mrf.mxu1 }
 0x6dc   : > { %v2992_v53 = vsel %vm2175_vm3, %v12295_v61, 0.0 }
 0x6dd   : > { %2993 = vadd.xlane.f32.xlu1 %v2992_v53 }
 0x6ee   : > { %3014 = vrot.lane.b32.xlu1 %v13762_v18, %s12930_s19 }
 0x6f2   : > { %3192 = vrot.lane.b32.xlu1 %v13672_v52, %s12931_s1  ;;  %v2981_v52 = vsub.f32 %v2874_v12, %v2973_v15 }
 0x6f6   : > { %3190 = vrot.lane.b32.xlu1 %v13680_v55, %s12931_s1 }
 0x6fa   : > { %3188 = vrot.lane.b32.xlu1 %v13712_v3, %s12931_s1  ;;  %v2986_v3 = vmul.f32 1.442695, %v2981_v52 }
 0x6fc   : > { %12296 = vpow2.f32 %v2986_v3 }
 0x6fe   : > { %3099 = vrot.lane.b32.xlu1 %v13772_v22, %s12930_s19 }
 0x709   : > { %v12297_v44 = vpop.eup %12296 }
 0x70a   : > { %v2995_v23 = vsel %vm2175_vm3, %v12297_v44, 0.0 }
 0x71e   : > { %v13920_v55 = vpop.f32.mrf.mxu1 }
 0x720   : > { %v13922_v29 = vpop.f32.mrf.mxu1 }
 0x721   : > { %v11661_v58 = vpack.i.bf16 %v13920_v55, %v13922_v29  ;;  %v11833_v55 = vld [vmem:[%s13485_s5 + $0x60] ss:$8 sps:$4 sm:$0xff]   ;;  %v11838_v29 = vld [vmem:[%s13485_s5 + $0x54] ss:$8 sps:$4 sm:$0xff]  }
 0x726   : > { %v11296_v7 = vpop.f32.mrf.mxu1 }
 0x727   : > { %v2965_v33 = vadd.f32 %v11296_v7, %v13796_v36 }
 0x728   : > { %v2959_v30 = vpop.f32.mrf.mxu1 }
 0x729   : > { %v2960_v31 = vadd.f32 %v2959_v30, %v13798_v38  ;;  %v2977_v12 = vsel %vm2175_vm3, %v2965_v33, -inf }
 0x72b   : > { %v2974_v13 = vsel %vm2175_vm3, %v2960_v31, -inf }
 0x72c   : > { %2975 = vmax.xlane.f32.xlu0 %v2974_v13 }
 0x730   : > { %2978 = vmax.xlane.f32.xlu0 %v2977_v12 }
 0x734   : > { %2996 = vadd.xlane.f32.xlu0 %v2995_v23 }
 0x74a   : > { %3012 = vrot.lane.b32.xlu0 %v13757_v16, %s12930_s19 }
 0x74e   : > { %3186 = vrot.lane.b32.xlu0 %v13665_v48, %s12931_s1 }
 0x752   : > { %3101 = vrot.lane.b32.xlu0 %v13779_v26, %s12930_s19 }
 0x766   : > { %v2994_v41 = vpop.xlane.xlu1 %2993 }
 0x767   : > { %12298 = vrcp.f32 %v2994_v41 }
 0x76a   : > { %v3015_v34 = vpop.permute.xlu1 %3014 }
 0x76b   : > { %11297 = vmatprep.subr.mxu1 %v3015_v34 }
 0x76c   : > { %11298 = vmatpush3.msra.mxu1 %v3015_v34 }
 0x76e   : > { %v3193_v32 = vpop.permute.xlu1 %3192 }
 0x772   : > { %v3191_v52 = vpop.permute.xlu1 %3190 }
 0x774   : > { %v12299_v37 = vpop.eup %12298 }
 0x775   : > { %v3008_v43 = vmul.f32 %v12299_v37, %v12295_v61 }
 0x776   : > { %v3189_v61 = vpop.permute.xlu1 %3188 }
 0x777   : > { %11301 = vmatprep.mubr.msk.f32.mxu1 %vm2175_vm3, %v3008_v43 }
 0x7b5   : > { %v2976_v1 = vpop.xlane.xlu0 %2975 }
 0x7b6   : > { %v2982_v47 = vsub.f32 %v2960_v31, %v2976_v1 }
 0x7b8   : > { %v2988_v8 = vmul.f32 1.442695, %v2982_v47 }
 0x7b9   : > { %v2979_v45 = vpop.xlane.xlu0 %2978 }
 0x7ba   : > { %12300 = vpow2.f32 %v2988_v8  ;;  %v2983_v53 = vsub.f32 %v2965_v33, %v2979_v45  ;;  %v3100_v33 = vpop.permute.xlu1 %3099 }
 0x7bc   : > { %v2990_v48 = vmul.f32 1.442695, %v2983_v53 }
 0x7bd   : > { %v2997_v15 = vpop.xlane.xlu0 %2996 }
 0x7be   : > { %12302 = vpow2.f32 %v2990_v48 }
 0x7bf   : > { %12304 = vrcp.f32 %v2997_v15 }
 0x7c1   : > { %v3013_v3 = vpop.permute.xlu0 %3012 }
 0x7c2   : > { %11299 = vmatprep.subr.mxu1 %v3013_v3 }
 0x7c3   : > { %11300 = vmatpush3.msra.mxu1 %v3013_v3 }
 0x7c4   : > { %11311 = vmatprep.subr.msk.mxu1 %vm2000_vm2, %v3193_v32 }
 0x7c5   : > { %v3187_v7 = vpop.permute.xlu0 %3186 }
 0x7c7   : > { %v12301_v30 = vpop.eup %12300 }
 0x7c8   : > { %v2998_v31 = vsel %vm2175_vm3, %v12301_v30, 0.0 }
 0x7c9   : > { %2999 = vadd.xlane.f32.xlu0 %v2998_v31  ;;  %v3102_v13 = vpop.permute.xlu0 %3101 }
 0x7ca   : > { %11304 = vmatprep.subr.mxu0 %v3102_v13 }
 0x7cb   : > { %v12303_v12 = vpop.eup %12302  ;;  %11305 = vmatpush3.msra.mxu0 %v3102_v13 }
 0x7cc   : > { %v12305_v23 = vpop.eup %12304  ;;  %11306 = vmatprep.subr.mxu0 %v3100_v33  ;;  %v3001_v41 = vsel %vm2175_vm3, %v12303_v12, 0.0 }
 0x7cd   : > { %3002 = vadd.xlane.f32.xlu1 %v3001_v41  ;;  %11307 = vmatpush3.msra.mxu0 %v3100_v33  ;;  %v3009_v34 = vmul.f32 %v12305_v23, %v12297_v44 }
 0x7cf   : > { %11302 = vmatmul.mubr.msk.f32.vlgmr.msra.gmra.mxu1 %vm2175_vm3, %v3009_v34 }
 0x7d0   : > { %11312 = vmatpush3.xpose.msk.msra.mxu1 %vm2000_vm2, %v3193_v32  ;;  %11315 = vmatprep.mubr.msk.f32.mxu1 %vm2000_vm2, %v3187_v7 }
 0x7d1   : > { %11313 = vmatprep.subr.msk.mxu1 %vm2000_vm2, %v3191_v52 }
 0x7d4   : > { %11314 = vmatpush3.xpose.msk.msra.mxu1 %vm2000_vm2, %v3191_v52 }
 0x7d7   : > { %11316 = vmatmul.mubr.msk.f32.vlgmr.msra.gmra.mxu1 %vm2000_vm2, %v3189_v61 }
 0x7de   : > { %3281 = vrot.lane.b32.xlu1 %v13721_v6, %s12931_s1 }
 0x7df   : > { %3283 = vrot.lane.b32.xlu0 %v13714_v4, %s12931_s1 }
 0x7e2   : > { %3279 = vrot.lane.b32.xlu1 %v13742_v10, %s12931_s1 }
 0x7e3   : > { %3277 = vrot.lane.b32.xlu0 %v13708_v0, %s12931_s1 }
 0x852   : > { %v3000_v44 = vpop.xlane.xlu0 %2999 }
 0x853   : > { %12306 = vrcp.f32 %v3000_v44 }
 0x856   : > { %v3003_v37 = vpop.xlane.xlu1 %3002  ;;  %v3284_v43 = vpop.permute.xlu0 %3283 }
 0x857   : > { %12308 = vrcp.f32 %v3003_v37  ;;  %11318 = vmatprep.subr.msk.mxu0 %vm2000_vm2, %v3284_v43 }
 0x85a   : > { %v3278_v4 = vpop.permute.xlu0 %3277  ;;  %v3282_v10 = vpop.permute.xlu1 %3281 }
 0x85e   : > { %v3280_v0 = vpop.permute.xlu1 %3279 }
 0x860   : > { %v12307_v1 = vpop.eup %12306 }
 0x861   : > { %v3010_v47 = vmul.f32 %v12307_v1, %v12301_v30 }
 0x863   : > { %11308 = vmatprep.mubr.msk.f32.mxu0 %vm2175_vm3, %v3010_v47 }
 0x864   : > { %v12309_v6 = vpop.eup %12308 }
 0x865   : > { %v3011_v8 = vmul.f32 %v12309_v6, %v12303_v12 }
 0x867   : > { %11309 = vmatmul.mubr.msk.f32.vlgmr.msra.gmra.mxu0 %vm2175_vm3, %v3011_v8 }
 0x868   : > { %11319 = vmatpush3.xpose.msk.msra.mxu0 %vm2000_vm2, %v3284_v43  ;;  %11322 = vmatprep.mubr.msk.f32.mxu0 %vm2000_vm2, %v3278_v4 }
 0x869   : > { %11320 = vmatprep.subr.msk.mxu0 %vm2000_vm2, %v3282_v10 }
 0x86c   : > { %11321 = vmatpush3.xpose.msk.msra.mxu0 %vm2000_vm2, %v3282_v10 }
 0x86f   : > { %11323 = vmatmul.mubr.msk.f32.vlgmr.msra.gmra.mxu0 %vm2000_vm2, %v3280_v0 }
 0x88f   : > { %v13963_v32 = vpop.f32.mrf.mxu1 }
 0x891   : > { %v13965_v45 = vpop.f32.mrf.mxu1 }
 0x892   : > { %v11641_v53 = vpack.i.bf16 %v13963_v32, %v13965_v45  ;;  %v11841_v32 = vld [vmem:[%s13485_s5 + $0x44] ss:$8 sps:$4 sm:$0xff]   ;;  %v11839_v45 = vld [vmem:[%s13485_s5 + $0x40] ss:$8 sps:$4 sm:$0xff]  }
 0x897   : > { %v11317_v48 = vpop.f32.mrf.mxu1 }
 0x898   : > { %v3274_v15 = vadd.f32 %v11317_v48, %v13796_v36 }
 0x899   : > { %v3268_v52 = vpop.f32.mrf.mxu1 }
 0x89a   : > { %v3269_v3 = vadd.f32 %v3268_v52, %v13798_v38  ;;  %v3371_v61 = vsel %vm2175_vm3, %v3274_v15, -inf }
 0x89b   : > { %3372 = vmax.xlane.f32.xlu1 %v3371_v61 }
 0x89c   : > { %v3368_v7 = vsel %vm2175_vm3, %v3269_v3, -inf }
 0x89d   : > { %3369 = vmax.xlane.f32.xlu0 %v3368_v7 }
 0x924   : > { %v3373_v30 = vpop.xlane.xlu1 %3372 }
 0x925   : > { %v3381_v31 = vsub.f32 %v3274_v15, %v3373_v30 }
 0x926   : > { %v3370_v13 = vpop.xlane.xlu0 %3369 }
 0x927   : > { %v3380_v12 = vsub.f32 %v3269_v3, %v3370_v13  ;;  %v13973_v33 = vpop.f32.mrf.mxu0  ;;  %v3386_v23 = vmul.f32 1.442695, %v3381_v31 }
 0x929   : > { %v3384_v41 = vmul.f32 1.442695, %v3380_v12  ;;  %v13975_v34 = vpop.f32.mrf.mxu0 }
 0x92a   : > { %v11671_v44 = vpack.i.bf16 %v13973_v33, %v13975_v34  ;;  %v11842_v33 = vld [vmem:[%s13485_s5 + $0x30] ss:$8 sps:$4 sm:$0xff]   ;;  %v11847_v34 = vld [vmem:[%s13485_s5 + $0x24] ss:$8 sps:$4 sm:$0xff]  }
 0x92b   : > { %12310 = vpow2.f32 %v3384_v41 }
 0x92c   : > { %12312 = vpow2.f32 %v3386_v23 }
 0x92f   : > { %v11324_v37 = vpop.f32.mrf.mxu0 }
 0x930   : > { %v3365_v47 = vadd.f32 %v11324_v37, %v13796_v36 }
 0x931   : > { %v3359_v43 = vpop.f32.mrf.mxu0 }
 0x932   : > { %v3360_v1 = vadd.f32 %v3359_v43, %v13798_v38  ;;  %v3377_v4 = vsel %vm2175_vm3, %v3365_v47, -inf }
 0x934   : > { %v3374_v6 = vsel %vm2175_vm3, %v3360_v1, -inf }
 0x935   : > { %3375 = vmax.xlane.f32.xlu0 %v3374_v6 }
 0x938   : > { %v12311_v8 = vpop.eup %12310 }
 0x939   : > { %v12313_v10 = vpop.eup %12312  ;;  %3378 = vmax.xlane.f32.xlu0 %v3377_v4  ;;  %v3392_v0 = vsel %vm2175_vm3, %v12311_v8, 0.0  ;;  %v14000_v4 = vadd.f32 %v13667_v49, %v13701_v62  ;;  %v14026_v49 = vadd.f32 %v13755_v14, %v13770_v21 }
 0x93a   : > { %3393 = vadd.xlane.f32.xlu1 %v3392_v0  ;;  %v3395_v48 = vsel %vm2175_vm3, %v12313_v10, 0.0  ;;  %v14004_v0 = vadd.f32 %v13661_v46, %v13695_v59  ;;  %v14021_v46 = vadd.f32 %v13689_v57, %v13701_v62 }
 0x93d   : > { %3396 = vadd.xlane.f32.xlu0 %v3395_v48 }
 0x94b   : > { %3414 = vrot.lane.b32.xlu1 %v13762_v18, %s12931_s1  ;;  %v13991_v18 = vadd.f32 %v13678_v54, %v13695_v59 }
 0x953   : > { %3412 = vrot.lane.b32.xlu0 %v13757_v16, %s12931_s1 }
 0x9be   : > { %v3376_v15 = vpop.xlane.xlu0 %3375 }
 0x9bf   : > { %v3382_v52 = vsub.f32 %v3360_v1, %v3376_v15 }
 0x9c1   : > { %v3388_v3 = vmul.f32 1.442695, %v3382_v52 }
 0x9c2   : > { %v3379_v61 = vpop.xlane.xlu0 %3378 }
 0x9c3   : > { %12314 = vpow2.f32 %v3388_v3  ;;  %v3394_v7 = vpop.xlane.xlu1 %3393  ;;  %v3383_v30 = vsub.f32 %v3365_v47, %v3379_v61 }
 0x9c4   : > { %12316 = vrcp.f32 %v3394_v7 }
 0x9c5   : > { %v3390_v31 = vmul.f32 1.442695, %v3383_v30 }
 0x9c6   : > { %v3397_v13 = vpop.xlane.xlu0 %3396 }
 0x9c7   : > { %12318 = vpow2.f32 %v3390_v31  ;;  %v3415_v12 = vpop.permute.xlu1 %3414 }
 0x9c8   : > { %12320 = vrcp.f32 %v3397_v13  ;;  %11325 = vmatprep.subr.mxu1 %v3415_v12 }
 0x9c9   : > { %11326 = vmatpush3.msra.mxu1 %v3415_v12 }
 0x9ca   : > { %v3413_v23 = vpop.permute.xlu0 %3412 }
 0x9cb   : > { %11327 = vmatprep.subr.mxu1 %v3413_v23 }
 0x9cc   : > { %11328 = vmatpush3.msra.mxu1 %v3413_v23 }
 0x9cd   : > { %11339 = vmatprep.subr.msk.mxu1 %vm2000_vm2, %v13991_v18 }
 0x9d0   : > { %v12315_v16 = vpop.eup %12314 }
 0x9d1   : > { %v12317_v41 = vpop.eup %12316  ;;  %v3398_v37 = vsel %vm2175_vm3, %v12315_v16, 0.0 }
 0x9d2   : > { %3399 = vadd.xlane.f32.xlu1 %v3398_v37  ;;  %v3408_v43 = vmul.f32 %v12317_v41, %v12311_v8  ;;  %v14015_v8 = vadd.f32 %v13764_v19, %v13770_v21 }
 0x9d4   : > { %v12319_v1 = vpop.eup %12318  ;;  %11329 = vmatprep.mubr.msk.f32.mxu1 %vm2175_vm3, %v3408_v43 }
 0x9d5   : > { %v12321_v47 = vpop.eup %12320  ;;  %v3401_v6 = vsel %vm2175_vm3, %v12319_v1, 0.0 }
 0x9d6   : > { %3402 = vadd.xlane.f32.xlu0 %v3401_v6  ;;  %v3409_v54 = vmul.f32 %v12321_v47, %v12313_v10  ;;  %v14039_v10 = vadd.f32 %v13807_v50, %v13695_v59  ;;  %v14053_v59 = vadd.f32 %v13794_v35, %v13770_v21 }
 0x9d8   : > { %11330 = vmatmul.mubr.msk.f32.vlgmr.msra.gmra.mxu1 %vm2175_vm3, %v3409_v54 }
 0x9d9   : > { %11340 = vmatpush3.xpose.msk.msra.mxu1 %vm2000_vm2, %v13991_v18  ;;  %11343 = vmatprep.mubr.msk.f32.mxu1 %vm2000_vm2, %v14000_v4 }
 0x9da   : > { %11341 = vmatprep.subr.msk.mxu1 %vm2000_vm2, %v14004_v0 }
 0x9dd   : > { %11342 = vmatpush3.xpose.msk.msra.mxu1 %vm2000_vm2, %v14004_v0 }
 0x9de   : > { %11353 = vmatprep.subr.mxu1 %v14015_v8 }
 0x9e0   : > { %11344 = vmatmul.mubr.msk.f32.vlgmr.msra.gmra.mxu1 %vm2000_vm2, %v14021_v46 }
 0x9e1   : > { %11354 = vmatpush3.msra.mxu1 %v14015_v8 }
 0x9e2   : > { %11355 = vmatprep.subr.mxu1 %v14026_v49 }
 0x9e3   : > { %11356 = vmatpush3.msra.mxu1 %v14026_v49  ;;  %3501 = vrot.lane.b32.xlu1 %v13779_v26, %s12931_s1 }
 0x9ec   : > { %3499 = vrot.lane.b32.xlu0 %v13772_v22, %s12931_s1 }
 0xa5b   : > { %v3400_v57 = vpop.xlane.xlu1 %3399 }
 0xa5c   : > { %12322 = vrcp.f32 %v3400_v57 }
 0xa5f   : > { %v3502_v62 = vpop.permute.xlu1 %3501  ;;  %v3403_v14 = vpop.xlane.xlu0 %3402 }
 0xa60   : > { %12324 = vrcp.f32 %v3403_v14  ;;  %11332 = vmatprep.subr.mxu0 %v3502_v62 }
 0xa61   : > { %11333 = vmatpush3.msra.mxu0 %v3502_v62 }
 0xa63   : > { %v3500_v19 = vpop.permute.xlu0 %3499 }
 0xa64   : > { %11334 = vmatprep.subr.mxu0 %v3500_v19 }
 0xa65   : > { %11335 = vmatpush3.msra.mxu0 %v3500_v19 }
 0xa66   : > { %11346 = vmatprep.subr.msk.mxu0 %vm2000_vm2, %v14039_v10 }
 0xa69   : > { %v12323_v26 = vpop.eup %12322 }
 0xa6a   : > { %v3410_v48 = vmul.f32 %v12323_v26, %v12315_v16 }
 0xa6c   : > { %11336 = vmatprep.mubr.msk.f32.mxu0 %vm2175_vm3, %v3410_v48 }
 0xa6d   : > { %v12325_v22 = vpop.eup %12324 }
 0xa6e   : > { %v3411_v15 = vmul.f32 %v12325_v22, %v12319_v1 }
 0xa70   : > { %11337 = vmatmul.mubr.msk.f32.vlgmr.msra.gmra.mxu0 %vm2175_vm3, %v3411_v15 }
 0xa71   : > { %11347 = vmatpush3.xpose.msk.msra.mxu0 %vm2000_vm2, %v14039_v10  ;;  %11350 = vmatprep.mubr.msk.f32.mxu0 %vm2000_vm2, %v13717_v5 }
 0xa72   : > { %11348 = vmatprep.subr.msk.mxu0 %vm2000_vm2, %v13704_v63 }
 0xa75   : > { %11349 = vmatpush3.xpose.msk.msra.mxu0 %vm2000_vm2, %v13704_v63 }
 0xa76   : > { %11360 = vmatprep.subr.mxu0 %v14053_v59 }
 0xa78   : > { %11351 = vmatmul.mubr.msk.f32.vlgmr.msra.gmra.mxu0 %vm2000_vm2, %v13734_v9 }
 0xa79   : > { %11361 = vmatpush3.msra.mxu0 %v14053_v59 }
 0xa7a   : > { %11362 = vmatprep.subr.mxu0 %v13777_v24 }
 0xa7b   : > { %11363 = vmatpush3.msra.mxu0 %v13777_v24 }
 0xa98   : > { %v14063_v50 = vpop.f32.mrf.mxu1 }
 0xa9a   : > { %v14065_v52 = vpop.f32.mrf.mxu1 }
 0xa9b   : > { %v11651_v21 = vpack.i.bf16 %v14063_v50, %v14065_v52  ;;  %v11848_v50 = vld [vmem:[%s13485_s5 + $0x10] ss:$8 sps:$4 sm:$0xff]   ;;  %v11853_v52 = vld [vmem:[%s13485_s5 + $0x4] ss:$8 sps:$4 sm:$0xff]  }
 0xaa0   : > { %v11345_v35 = vpop.f32.mrf.mxu1 }
 0xaa1   : > { %v3670_v3 = vadd.f32 %v11345_v35, %v13796_v36 }
 0xaa2   : > { %v3664_v61 = vpop.f32.mrf.mxu1 }
 0xaa3   : > { %v3665_v7 = vadd.f32 %v3664_v61, %v13798_v38  ;;  %v3763_v30 = vsel %vm2175_vm3, %v3670_v3, -inf }
 0xaa4   : > { %3764 = vmax.xlane.f32.xlu0 %v3763_v30 }
 0xaa5   : > { %v3760_v31 = vsel %vm2175_vm3, %v3665_v7, -inf }
 0xaa6   : > { %3761 = vmax.xlane.f32.xlu1 %v3760_v31 }
 0xb2d   : > { %v3765_v13 = vpop.xlane.xlu0 %3764 }
 0xb2e   : > { %v3773_v12 = vsub.f32 %v3670_v3, %v3765_v13 }
 0xb2f   : > { %v3762_v23 = vpop.xlane.xlu1 %3761 }
 0xb30   : > { %v3778_v16 = vmul.f32 1.442695, %v3773_v12  ;;  %v3772_v41 = vsub.f32 %v3665_v7, %v3762_v23  ;;  %v14073_v37 = vpop.f32.mrf.mxu0 }
 0xb32   : > { %12326 = vpow2.f32 %v3778_v16  ;;  %v3776_v43 = vmul.f32 1.442695, %v3772_v41  ;;  %v14075_v1 = vpop.f32.mrf.mxu0 }
 0xb33   : > { %v11681_v47 = vpack.i.bf16 %v14073_v37, %v14075_v1  ;;  %v11856_v37 = vld [vmem:[%s13485_s5 + $0xf4] ss:$8 sps:$4 sm:$0xff]   ;;  %v11854_v1 = vld [vmem:[%s13485_s5 + $0xf0] ss:$8 sps:$4 sm:$0xff]  }
 0xb34   : > { %12328 = vpow2.f32 %v3776_v43 }
 0xb38   : > { %v11352_v6 = vpop.f32.mrf.mxu0 }
 0xb39   : > { %v3757_v54 = vadd.f32 %v11352_v6, %v13796_v36 }
 0xb3a   : > { %v3751_v57 = vpop.f32.mrf.mxu0 }
 0xb3b   : > { %v3752_v62 = vadd.f32 %v3751_v57, %v13798_v38  ;;  %v3769_v14 = vsel %vm2175_vm3, %v3757_v54, -inf }
 0xb3c   : > { %3770 = vmax.xlane.f32.xlu0 %v3769_v14 }
 0xb3d   : > { %v3766_v19 = vsel %vm2175_vm3, %v3752_v62, -inf }
 0xb3e   : > { %3767 = vmax.xlane.f32.xlu1 %v3766_v19 }
 0xb3f   : > { %v12327_v26 = vpop.eup %12326 }
 0xb40   : > { %v3787_v48 = vsel %vm2175_vm3, %v12327_v26, 0.0 }
 0xb41   : > { %v12329_v22 = vpop.eup %12328  ;;  %3788 = vadd.xlane.f32.xlu0 %v3787_v48 }
 0xb42   : > { %v3784_v15 = vsel %vm2175_vm3, %v12329_v22, 0.0 }
 0xb43   : > { %3785 = vadd.xlane.f32.xlu1 %v3784_v15 }
 0xb54   : > { %3972 = vrot.lane.b32.xlu1 %v13991_v18, %s12929_s29 }
 0xb57   : > { %3970 = vrot.lane.b32.xlu0 %v14004_v0, %s12929_s29 }
 0xb58   : > { %3966 = vrot.lane.b32.xlu1 %v14000_v4, %s12929_s29 }
 0xb5c   : > { %3968 = vrot.lane.b32.xlu1 %v14021_v46, %s12929_s29 }
 0xbc5   : > { %v3771_v36 = vpop.xlane.xlu0 %3770 }
 0xbc6   : > { %v3775_v38 = vsub.f32 %v3757_v54, %v3771_v36 }
 0xbc7   : > { %v3768_v35 = vpop.xlane.xlu1 %3767 }
 0xbc8   : > { %v3782_v3 = vmul.f32 1.442695, %v3775_v38  ;;  %v3774_v61 = vsub.f32 %v3752_v62, %v3768_v35 }
 0xbca   : > { %12330 = vpow2.f32 %v3782_v3  ;;  %v3780_v7 = vmul.f32 1.442695, %v3774_v61  ;;  %v3789_v30 = vpop.xlane.xlu0 %3788 }
 0xbcb   : > { %12332 = vrcp.f32 %v3789_v30 }
 0xbcc   : > { %12334 = vpow2.f32 %v3780_v7  ;;  %v3786_v31 = vpop.xlane.xlu1 %3785 }
 0xbcd   : > { %12336 = vrcp.f32 %v3786_v31 }
 0xbce   : > { %v3971_v14 = vpop.permute.xlu0 %3970 }
 0xbd0   : > { %v3973_v13 = vpop.permute.xlu1 %3972 }
 0xbd1   : > { %11367 = vmatprep.subr.msk.mxu1 %vm2000_vm2, %v3973_v13 }
 0xbd4   : > { %v3967_v62 = vpop.permute.xlu1 %3966 }
 0xbd7   : > { %v12331_v12 = vpop.eup %12330 }
 0xbd8   : > { %v12333_v23 = vpop.eup %12332  ;;  %v3793_v16 = vsel %vm2175_vm3, %v12331_v12, 0.0  ;;  %v3969_v19 = vpop.permute.xlu1 %3968 }
 0xbd9   : > { %v12335_v41 = vpop.eup %12334  ;;  %3794 = vadd.xlane.f32.xlu1 %v3793_v16  ;;  %v3801_v57 = vmul.f32 %v12333_v23, %v12327_v26 }
 0xbda   : > { %v12337_v43 = vpop.eup %12336  ;;  %v3790_v6 = vsel %vm2175_vm3, %v12335_v41, 0.0 }
 0xbdb   : > { %3791 = vadd.xlane.f32.xlu0 %v3790_v6  ;;  %v3800_v54 = vmul.f32 %v12337_v43, %v12329_v22 }
 0xbdd   : > { %11357 = vmatprep.mubr.msk.f32.mxu1 %vm2175_vm3, %v3800_v54 }
 0xbde   : > { %11358 = vmatmul.mubr.msk.f32.vlgmr.msra.gmra.mxu1 %vm2175_vm3, %v3801_v57 }
 0xbdf   : > { %11368 = vmatpush3.xpose.msk.msra.mxu1 %vm2000_vm2, %v3973_v13  ;;  %11371 = vmatprep.mubr.msk.f32.mxu1 %vm2000_vm2, %v3967_v62 }
 0xbe0   : > { %11369 = vmatprep.subr.msk.mxu1 %vm2000_vm2, %v3971_v14 }
 0xbe3   : > { %11370 = vmatpush3.xpose.msk.msra.mxu1 %vm2000_vm2, %v3971_v14 }
 0xbe6   : > { %11372 = vmatmul.mubr.msk.f32.vlgmr.msra.gmra.mxu1 %vm2000_vm2, %v3969_v19 }
 0xbea   : > { %4061 = vrot.lane.b32.xlu1 %v13704_v63, %s12929_s29 }
 0xbee   : > { %4059 = vrot.lane.b32.xlu1 %v13734_v9, %s12929_s29 }
 0xbf1   : > { %4063 = vrot.lane.b32.xlu0 %v14039_v10, %s12929_s29 }
 0xbf5   : > { %4057 = vrot.lane.b32.xlu0 %v13717_v5, %s12929_s29 }
 0xc62   : > { %v3795_v26 = vpop.xlane.xlu1 %3794 }
 0xc63   : > { %12338 = vrcp.f32 %v3795_v26 }
 0xc64   : > { %v3792_v48 = vpop.xlane.xlu0 %3791 }
 0xc65   : > { %12340 = vrcp.f32 %v3792_v48 }
 0xc66   : > { %v4062_v61 = vpop.permute.xlu1 %4061 }
 0xc68   : > { %v4064_v22 = vpop.permute.xlu0 %4063 }
 0xc69   : > { %11374 = vmatprep.subr.msk.mxu0 %vm2000_vm2, %v4064_v22 }
 0xc6a   : > { %v4060_v7 = vpop.permute.xlu1 %4059 }
 0xc6c   : > { %v4058_v3 = vpop.permute.xlu0 %4057 }
 0xc70   : > { %v12339_v15 = vpop.eup %12338 }
 0xc71   : > { %v3803_v35 = vmul.f32 %v12339_v15, %v12331_v12  ;;  %v14123_v12 = vld [vmem:[#allocation8 + $0x8] sm:$0xff] }
 0xc72   : > { %v12341_v36 = vpop.eup %12340 }
 0xc73   : > { %v3802_v38 = vmul.f32 %v12341_v36, %v12335_v41  ;;  %v14126_v41 = vld [vmem:[#allocation8] sm:$0xff] }
 0xc75   : > { %11364 = vmatprep.mubr.msk.f32.mxu0 %vm2175_vm3, %v3802_v38 }
 0xc76   : > { %11365 = vmatmul.mubr.msk.f32.vlgmr.msra.gmra.mxu0 %vm2175_vm3, %v3803_v35 }
 0xc77   : > { %11375 = vmatpush3.xpose.msk.msra.mxu0 %vm2000_vm2, %v4064_v22  ;;  %11378 = vmatprep.mubr.msk.f32.mxu0 %vm2000_vm2, %v4058_v3 }
 0xc78   : > { %11376 = vmatprep.subr.msk.mxu0 %vm2000_vm2, %v4062_v61 }
 0xc7b   : > { %11377 = vmatpush3.xpose.msk.msra.mxu0 %vm2000_vm2, %v4062_v61 }
 0xc7e   : > { %11379 = vmatmul.mubr.msk.f32.vlgmr.msra.gmra.mxu0 %vm2000_vm2, %v4060_v7 }
 0xc9e   : > { %v14119_v30 = vpop.f32.mrf.mxu1 }
 0xca0   : > { %v14121_v31 = vpop.f32.mrf.mxu1 }
 0xca6   : > { %v11373_v13 = vpop.f32.mrf.mxu1 }
 0xca7   : > { %v4054_v23 = vadd.f32 %v14123_v12, %v11373_v13 }
 0xca8   : > { %v4048_v16 = vpop.f32.mrf.mxu1 }
 0xca9   : > { %v4049_v43 = vadd.f32 %v14126_v41, %v4048_v16  ;;  %v4151_v6 = vsel %vm2175_vm3, %v4054_v23, -inf }
 0xcaa   : > { %4152 = vmax.xlane.f32.xlu1 %v4151_v6 }
 0xcab   : > { %v4148_v54 = vsel %vm2175_vm3, %v4049_v43, -inf }
 0xcac   : > { %4149 = vmax.xlane.f32.xlu0 %v4148_v54 }
 0xd33   : > { %v4153_v57 = vpop.xlane.xlu1 %4152 }
 0xd34   : > { %v4161_v62 = vsub.f32 %v4054_v23, %v4153_v57 }
 0xd35   : > { %v4150_v14 = vpop.xlane.xlu0 %4149 }
 0xd36   : > { %v4160_v19 = vsub.f32 %v4049_v43, %v4150_v14  ;;  %v4166_v26 = vmul.f32 1.442695, %v4161_v62  ;;  %v14131_v22 = vpop.f32.mrf.mxu0 }
 0xd38   : > { %v4164_v48 = vmul.f32 1.442695, %v4160_v19  ;;  %v14133_v15 = vpop.f32.mrf.mxu0 }
 0xd3a   : > { %12342 = vpow2.f32 %v4164_v48 }
 0xd3b   : > { %12344 = vpow2.f32 %v4166_v26 }
 0xd3e   : > { %v11380_v36 = vpop.f32.mrf.mxu0 }
 0xd3f   : > { %v4145_v3 = vadd.f32 %v14123_v12, %v11380_v36 }
 0xd40   : > { %v4139_v38 = vpop.f32.mrf.mxu0 }
 0xd41   : > { %v4140_v35 = vadd.f32 %v14126_v41, %v4139_v38  ;;  %v4157_v13 = vsel %vm2175_vm3, %v4145_v3, -inf }
 0xd43   : > { %v4154_v61 = vsel %vm2175_vm3, %v4140_v35, -inf }
 0xd44   : > { %4155 = vmax.xlane.f32.xlu0 %v4154_v61 }
 0xd47   : > { %v12343_v7 = vpop.eup %12342 }
 0xd48   : > { %v12345_v23 = vpop.eup %12344  ;;  %4158 = vmax.xlane.f32.xlu0 %v4157_v13  ;;  %v4172_v16 = vsel %vm2175_vm3, %v12343_v7, 0.0 }
 0xd49   : > { %4173 = vadd.xlane.f32.xlu1 %v4172_v16  ;;  %v4175_v43 = vsel %vm2175_vm3, %v12345_v23, 0.0 }
 0xd4c   : > { %4176 = vadd.xlane.f32.xlu0 %v4175_v43 }
 0xd5a   : > { %4196 = vrot.lane.b32.xlu1 %v14015_v8, %s12929_s29 }
 0xd5e   : > { %4376 = vrot.lane.b32.xlu1 %v13991_v18, %s12930_s19 }
 0xd62   : > { %4374 = vrot.lane.b32.xlu1 %v14004_v0, %s12930_s19  ;;  %4194 = vrot.lane.b32.xlu0 %v14026_v49, %s12929_s29 }
 0xd66   : > { %4372 = vrot.lane.b32.xlu1 %v14021_v46, %s12930_s19  ;;  %4370 = vrot.lane.b32.xlu0 %v14000_v4, %s12930_s19 }
 0xd6a   : > { %4283 = vrot.lane.b32.xlu1 %v13777_v24, %s12929_s29  ;;  %4285 = vrot.lane.b32.xlu0 %v14053_v59, %s12929_s29 }
 0xdcd   : > { %v4156_v6 = vpop.xlane.xlu0 %4155 }
 0xdce   : > { %v4162_v54 = vsub.f32 %v4140_v35, %v4156_v6 }
 0xdd0   : > { %v4168_v57 = vmul.f32 1.442695, %v4162_v54 }
 0xdd1   : > { %v4159_v62 = vpop.xlane.xlu0 %4158 }
 0xdd2   : > { %12346 = vpow2.f32 %v4168_v57  ;;  %v4174_v14 = vpop.xlane.xlu1 %4173  ;;  %v4163_v19 = vsub.f32 %v4145_v3, %v4159_v62 }
 0xdd3   : > { %12348 = vrcp.f32 %v4174_v14 }
 0xdd4   : > { %v4170_v26 = vmul.f32 1.442695, %v4163_v19 }
 0xdd5   : > { %v4177_v48 = vpop.xlane.xlu0 %4176 }
 0xdd6   : > { %12350 = vpow2.f32 %v4170_v26  ;;  %v4197_v36 = vpop.permute.xlu1 %4196 }
 0xdd7   : > { %12352 = vrcp.f32 %v4177_v48  ;;  %11381 = vmatprep.subr.mxu1 %v4197_v36 }
 0xdd8   : > { %11382 = vmatpush3.msra.mxu1 %v4197_v36 }
 0xdd9   : > { %v4195_v38 = vpop.permute.xlu0 %4194 }
 0xdda   : > { %v4377_v61 = vpop.permute.xlu1 %4376  ;;  %11383 = vmatprep.subr.mxu1 %v4195_v38 }
 0xddb   : > { %11384 = vmatpush3.msra.mxu1 %v4195_v38 }
 0xddc   : > { %11395 = vmatprep.subr.msk.mxu1 %vm2000_vm2, %v4377_v61 }
 0xddd   : > { %v4371_v35 = vpop.permute.xlu0 %4370 }
 0xdde   : > { %v4375_v13 = vpop.permute.xlu1 %4374 }
 0xddf   : > { %v12347_v16 = vpop.eup %12346 }
 0xde0   : > { %v12349_v43 = vpop.eup %12348  ;;  %v4178_v3 = vsel %vm2175_vm3, %v12347_v16, 0.0 }
 0xde1   : > { %4179 = vadd.xlane.f32.xlu0 %v4178_v3  ;;  %v4286_v6 = vpop.permute.xlu0 %4285  ;;  %v4188_v54 = vmul.f32 %v12349_v43, %v12343_v7 }
 0xde2   : > { %v4373_v57 = vpop.permute.xlu1 %4372  ;;  %11388 = vmatprep.subr.mxu0 %v4286_v6 }
 0xde3   : > { %v12351_v62 = vpop.eup %12350  ;;  %11385 = vmatprep.mubr.msk.f32.mxu1 %vm2175_vm3, %v4188_v54  ;;  %11389 = vmatpush3.msra.mxu0 %v4286_v6 }
 0xde4   : > { %v12353_v14 = vpop.eup %12352  ;;  %v4181_v19 = vsel %vm2175_vm3, %v12351_v62, 0.0 }
 0xde5   : > { %4182 = vadd.xlane.f32.xlu1 %v4181_v19  ;;  %v4189_v26 = vmul.f32 %v12353_v14, %v12345_v23 }
 0xde6   : > { %v4284_v48 = vpop.permute.xlu1 %4283 }
 0xde7   : > { %11386 = vmatmul.mubr.msk.f32.vlgmr.msra.gmra.mxu1 %vm2175_vm3, %v4189_v26  ;;  %11390 = vmatprep.subr.mxu0 %v4284_v48 }
 0xde8   : > { %11396 = vmatpush3.xpose.msk.msra.mxu1 %vm2000_vm2, %v4377_v61  ;;  %11391 = vmatpush3.msra.mxu0 %v4284_v48 }
 0xde9   : > { %11397 = vmatprep.subr.msk.mxu1 %vm2000_vm2, %v4375_v13  ;;  %11399 = vmatprep.mubr.msk.f32.mxu1 %vm2000_vm2, %v4371_v35 }
 0xdec   : > { %11398 = vmatpush3.xpose.msk.msra.mxu1 %vm2000_vm2, %v4375_v13 }
 0xdef   : > { %11400 = vmatmul.mubr.msk.f32.vlgmr.msra.gmra.mxu1 %vm2000_vm2, %v4373_v57 }
 0xdf6   : > { %4465 = vrot.lane.b32.xlu1 %v13704_v63, %s12930_s19 }
 0xdf7   : > { %4467 = vrot.lane.b32.xlu0 %v14039_v10, %s12930_s19 }
 0xdfa   : > { %4463 = vrot.lane.b32.xlu1 %v13734_v9, %s12930_s19 }
 0xdfb   : > { %4461 = vrot.lane.b32.xlu0 %v13717_v5, %s12930_s19 }
 0xe6a   : > { %v4180_v7 = vpop.xlane.xlu0 %4179 }
 0xe6b   : > { %12354 = vrcp.f32 %v4180_v7 }
 0xe6e   : > { %v4183_v23 = vpop.xlane.xlu1 %4182  ;;  %v4468_v36 = vpop.permute.xlu0 %4467 }
 0xe6f   : > { %12356 = vrcp.f32 %v4183_v23  ;;  %11402 = vmatprep.subr.msk.mxu0 %vm2000_vm2, %v4468_v36 }
 0xe72   : > { %v4462_v43 = vpop.permute.xlu0 %4461  ;;  %v4466_v3 = vpop.permute.xlu1 %4465 }
 0xe76   : > { %v4464_v6 = vpop.permute.xlu1 %4463 }
 0xe78   : > { %v12355_v38 = vpop.eup %12354 }
 0xe79   : > { %v4190_v61 = vmul.f32 %v12355_v38, %v12347_v16 }
 0xe7b   : > { %11392 = vmatprep.mubr.msk.f32.mxu0 %vm2175_vm3, %v4190_v61 }
 0xe7c   : > { %v12357_v35 = vpop.eup %12356 }
 0xe7d   : > { %v4191_v13 = vmul.f32 %v12357_v35, %v12351_v62 }
 0xe7f   : > { %11393 = vmatmul.mubr.msk.f32.vlgmr.msra.gmra.mxu0 %vm2175_vm3, %v4191_v13 }
 0xe80   : > { %11403 = vmatpush3.xpose.msk.msra.mxu0 %vm2000_vm2, %v4468_v36  ;;  %11406 = vmatprep.mubr.msk.f32.mxu0 %vm2000_vm2, %v4462_v43 }
 0xe81   : > { %11404 = vmatprep.subr.msk.mxu0 %vm2000_vm2, %v4466_v3 }
 0xe84   : > { %11405 = vmatpush3.xpose.msk.msra.mxu0 %vm2000_vm2, %v4466_v3 }
 0xe87   : > { %11407 = vmatmul.mubr.msk.f32.vlgmr.msra.gmra.mxu0 %vm2000_vm2, %v4464_v6 }
 0xea7   : > { %v14183_v16 = vpop.f32.mrf.mxu1 }
 0xea9   : > { %v14185_v54 = vpop.f32.mrf.mxu1 }
 0xeaa   : > { %v11626_v57 = vpack.i.bf16 %v14183_v16, %v14185_v54  ;;  %v11857_v16 = vld [vmem:[%s13485_s5 + $0xe0] ss:$8 sps:$4 sm:$0xff]   ;;  %v11862_v54 = vld [vmem:[%s13485_s5 + $0xd4] ss:$8 sps:$4 sm:$0xff]  }
 0xeaf   : > { %v11401_v62 = vpop.f32.mrf.mxu1 }
 0xeb0   : > { %v4458_v14 = vadd.f32 %v14123_v12, %v11401_v62 }
 0xeb1   : > { %v4452_v19 = vpop.f32.mrf.mxu1 }
 0xeb2   : > { %v4453_v26 = vadd.f32 %v14126_v41, %v4452_v19  ;;  %v4555_v48 = vsel %vm2175_vm3, %v4458_v14, -inf }
 0xeb3   : > { %4556 = vmax.xlane.f32.xlu1 %v4555_v48 }
 0xeb4   : > { %v4552_v7 = vsel %vm2175_vm3, %v4453_v26, -inf }
 0xeb5   : > { %4553 = vmax.xlane.f32.xlu0 %v4552_v7 }
 0xf3c   : > { %v4557_v23 = vpop.xlane.xlu1 %4556 }
 0xf3d   : > { %v4565_v36 = vsub.f32 %v4458_v14, %v4557_v23 }
 0xf3e   : > { %v4554_v38 = vpop.xlane.xlu0 %4553 }
 0xf3f   : > { %v4564_v61 = vsub.f32 %v4453_v26, %v4554_v38  ;;  %v14193_v35 = vpop.f32.mrf.mxu0  ;;  %v4570_v13 = vmul.f32 1.442695, %v4565_v36 }
 0xf41   : > { %v4568_v43 = vmul.f32 1.442695, %v4564_v61  ;;  %v14195_v3 = vpop.f32.mrf.mxu0 }
 0xf42   : > { %v11656_v6 = vpack.i.bf16 %v14193_v35, %v14195_v3 }
 0xf43   : > { %12358 = vpow2.f32 %v4568_v43 }
 0xf44   : > { %12360 = vpow2.f32 %v4570_v13 }
 0xf47   : > { %v11408_v62 = vpop.f32.mrf.mxu0 }
 0xf48   : > { %v4549_v7 = vadd.f32 %v14123_v12, %v11408_v62 }
 0xf49   : > { %v4543_v19 = vpop.f32.mrf.mxu0 }
 0xf4a   : > { %v4544_v48 = vadd.f32 %v14126_v41, %v4543_v19  ;;  %v4561_v23 = vsel %vm2175_vm3, %v4549_v7, -inf }
 0xf4c   : > { %v4558_v14 = vsel %vm2175_vm3, %v4544_v48, -inf }
 0xf4d   : > { %4559 = vmax.xlane.f32.xlu0 %v4558_v14 }
 0xf50   : > { %v12359_v26 = vpop.eup %12358 }
 0xf51   : > { %v12361_v36 = vpop.eup %12360  ;;  %4562 = vmax.xlane.f32.xlu0 %v4561_v23  ;;  %v4576_v38 = vsel %vm2175_vm3, %v12359_v26, 0.0 }
 0xf52   : > { %4577 = vadd.xlane.f32.xlu1 %v4576_v38  ;;  %v4579_v61 = vsel %vm2175_vm3, %v12361_v36, 0.0 }
 0xf55   : > { %4580 = vadd.xlane.f32.xlu0 %v4579_v61 }
 0xf63   : > { %4598 = vrot.lane.b32.xlu1 %v14015_v8, %s12930_s19 }
 0xf67   : > { %4776 = vrot.lane.b32.xlu1 %v13991_v18, %s12931_s1 }
 0xf6b   : > { %4774 = vrot.lane.b32.xlu1 %v14004_v0, %s12931_s1  ;;  %4596 = vrot.lane.b32.xlu0 %v14026_v49, %s12930_s19 }
 0xf6f   : > { %4772 = vrot.lane.b32.xlu1 %v14021_v46, %s12931_s1  ;;  %4770 = vrot.lane.b32.xlu0 %v14000_v4, %s12931_s1 }
 0xf73   : > { %4683 = vrot.lane.b32.xlu1 %v13777_v24, %s12930_s19  ;;  %4685 = vrot.lane.b32.xlu0 %v14053_v59, %s12930_s19 }
 0xfd6   : > { %v4560_v13 = vpop.xlane.xlu0 %4559 }
 0xfd7   : > { %v4566_v18 = vsub.f32 %v4544_v48, %v4560_v13 }
 0xfd9   : > { %v4572_v43 = vmul.f32 1.442695, %v4566_v18 }
 0xfda   : > { %v4563_v62 = vpop.xlane.xlu0 %4562 }
 0xfdb   : > { %12362 = vpow2.f32 %v4572_v43  ;;  %v4578_v0 = vpop.xlane.xlu1 %4577  ;;  %v4567_v19 = vsub.f32 %v4549_v7, %v4563_v62 }
 0xfdc   : > { %12364 = vrcp.f32 %v4578_v0 }
 0xfdd   : > { %v4574_v14 = vmul.f32 1.442695, %v4567_v19 }
 0xfde   : > { %v4581_v23 = vpop.xlane.xlu0 %4580 }
 0xfdf   : > { %12366 = vpow2.f32 %v4574_v14  ;;  %v4599_v46 = vpop.permute.xlu1 %4598 }
 0xfe0   : > { %12368 = vrcp.f32 %v4581_v23  ;;  %11409 = vmatprep.subr.mxu1 %v4599_v46 }
 0xfe1   : > { %11410 = vmatpush3.msra.mxu1 %v4599_v46 }
 0xfe2   : > { %v4597_v4 = vpop.permute.xlu0 %4596 }
 0xfe3   : > { %v4777_v38 = vpop.permute.xlu1 %4776  ;;  %11411 = vmatprep.subr.mxu1 %v4597_v4 }
 0xfe4   : > { %11412 = vmatpush3.msra.mxu1 %v4597_v4 }
 0xfe5   : > { %11423 = vmatprep.subr.msk.mxu1 %vm2000_vm2, %v4777_v38 }
 0xfe6   : > { %v4771_v48 = vpop.permute.xlu0 %4770 }
 0xfe7   : > { %v4775_v61 = vpop.permute.xlu1 %4774 }
 0xfe8   : > { %v12363_v13 = vpop.eup %12362 }
 0xfe9   : > { %v12365_v18 = vpop.eup %12364  ;;  %v4582_v7 = vsel %vm2175_vm3, %v12363_v13, 0.0 }
 0xfea   : > { %4583 = vadd.xlane.f32.xlu0 %v4582_v7  ;;  %v4686_v43 = vpop.permute.xlu0 %4685  ;;  %v4592_v62 = vmul.f32 %v12365_v18, %v12359_v26 }
 0xfeb   : > { %v4773_v0 = vpop.permute.xlu1 %4772  ;;  %11416 = vmatprep.subr.mxu0 %v4686_v43 }
 0xfec   : > { %v12367_v19 = vpop.eup %12366  ;;  %11413 = vmatprep.mubr.msk.f32.mxu1 %vm2175_vm3, %v4592_v62  ;;  %11417 = vmatpush3.msra.mxu0 %v4686_v43 }
 0xfed   : > { %v12369_v14 = vpop.eup %12368  ;;  %v4585_v23 = vsel %vm2175_vm3, %v12367_v19, 0.0 }
 0xfee   : > { %4586 = vadd.xlane.f32.xlu1 %v4585_v23  ;;  %v4593_v46 = vmul.f32 %v12369_v14, %v12361_v36 }
 0xfef   : > { %v4684_v4 = vpop.permute.xlu1 %4683 }
 0xff0   : > { %11414 = vmatmul.mubr.msk.f32.vlgmr.msra.gmra.mxu1 %vm2175_vm3, %v4593_v46  ;;  %11418 = vmatprep.subr.mxu0 %v4684_v4 }
 0xff1   : > { %11424 = vmatpush3.xpose.msk.msra.mxu1 %vm2000_vm2, %v4777_v38  ;;  %11419 = vmatpush3.msra.mxu0 %v4684_v4 }
 0xff2   : > { %11425 = vmatprep.subr.msk.mxu1 %vm2000_vm2, %v4775_v61  ;;  %11427 = vmatprep.mubr.msk.f32.mxu1 %vm2000_vm2, %v4771_v48 }
 0xff5   : > { %11426 = vmatpush3.xpose.msk.msra.mxu1 %vm2000_vm2, %v4775_v61 }
 0xff8   : > { %11428 = vmatmul.mubr.msk.f32.vlgmr.msra.gmra.mxu1 %vm2000_vm2, %v4773_v0 }
 0xfff   : > { %4865 = vrot.lane.b32.xlu1 %v13704_v63, %s12931_s1 }
0x1000   : > { %4867 = vrot.lane.b32.xlu0 %v14039_v10, %s12931_s1 }
0x1003   : > { %4863 = vrot.lane.b32.xlu1 %v13734_v9, %s12931_s1 }
0x1004   : > { %4861 = vrot.lane.b32.xlu0 %v13717_v5, %s12931_s1 }
0x1073   : > { %v4584_v26 = vpop.xlane.xlu0 %4583 }
0x1074   : > { %12370 = vrcp.f32 %v4584_v26 }
0x1077   : > { %v4587_v36 = vpop.xlane.xlu1 %4586  ;;  %v4868_v38 = vpop.permute.xlu0 %4867 }
0x1078   : > { %12372 = vrcp.f32 %v4587_v36  ;;  %11430 = vmatprep.subr.msk.mxu0 %vm2000_vm2, %v4868_v38 }
0x107b   : > { %v4862_v10 = vpop.permute.xlu0 %4861  ;;  %v4866_v9 = vpop.permute.xlu1 %4865 }
0x107f   : > { %v4864_v5 = vpop.permute.xlu1 %4863 }
0x1081   : > { %v12371_v48 = vpop.eup %12370 }
0x1082   : > { %v4594_v61 = vmul.f32 %v12371_v48, %v12363_v13 }
0x1084   : > { %11420 = vmatprep.mubr.msk.f32.mxu0 %vm2175_vm3, %v4594_v61 }
0x1085   : > { %v12373_v63 = vpop.eup %12372 }
0x1086   : > { %v4595_v18 = vmul.f32 %v12373_v63, %v12367_v19 }
0x1088   : > { %11421 = vmatmul.mubr.msk.f32.vlgmr.msra.gmra.mxu0 %vm2175_vm3, %v4595_v18 }
0x1089   : > { %11431 = vmatpush3.xpose.msk.msra.mxu0 %vm2000_vm2, %v4868_v38  ;;  %11434 = vmatprep.mubr.msk.f32.mxu0 %vm2000_vm2, %v4862_v10 }
0x108a   : > { %11432 = vmatprep.subr.msk.mxu0 %vm2000_vm2, %v4866_v9 }
0x108d   : > { %11433 = vmatpush3.xpose.msk.msra.mxu0 %vm2000_vm2, %v4866_v9 }
0x1090   : > { %11435 = vmatmul.mubr.msk.f32.vlgmr.msra.gmra.mxu0 %vm2000_vm2, %v4864_v5 }
0x10b0   : > { %v14247_v13 = vpop.f32.mrf.mxu1 }
0x10b2   : > { %v14249_v7 = vpop.f32.mrf.mxu1 }
0x10b3   : > { %v11636_v43 = vpack.i.bf16 %v14247_v13, %v14249_v7  ;;  %v11865_v13 = vld [vmem:[%s13485_s5 + $0xc4] ss:$8 sps:$4 sm:$0xff]   ;;  %v11863_v7 = vld [vmem:[%s13485_s5 + $0xc0] ss:$8 sps:$4 sm:$0xff]  }
0x10b8   : > { %v11429_v62 = vpop.f32.mrf.mxu1 }
0x10b9   : > { %v4858_v0 = vadd.f32 %v14123_v12, %v11429_v62 }
0x10ba   : > { %v4852_v19 = vpop.f32.mrf.mxu1 }
0x10bb   : > { %v4853_v14 = vadd.f32 %v14126_v41, %v4852_v19  ;;  %v4955_v23 = vsel %vm2175_vm3, %v4858_v0, -inf }
0x10bc   : > { %4956 = vmax.xlane.f32.xlu1 %v4955_v23 }
0x10bd   : > { %v4952_v46 = vsel %vm2175_vm3, %v4853_v14, -inf }
0x10be   : > { %4953 = vmax.xlane.f32.xlu0 %v4952_v46 }
0x1145   : > { %v4957_v4 = vpop.xlane.xlu1 %4956 }
0x1146   : > { %v4965_v26 = vsub.f32 %v4858_v0, %v4957_v4 }
0x1147   : > { %v4954_v36 = vpop.xlane.xlu0 %4953 }
0x1148   : > { %v4964_v38 = vsub.f32 %v4853_v14, %v4954_v36  ;;  %v14257_v48 = vpop.f32.mrf.mxu0  ;;  %v4970_v61 = vmul.f32 1.442695, %v4965_v26 }
0x114a   : > { %v4968_v63 = vmul.f32 1.442695, %v4964_v38  ;;  %v14259_v18 = vpop.f32.mrf.mxu0 }
0x114b   : > { %v11666_v10 = vpack.i.bf16 %v14257_v48, %v14259_v18 }
0x114c   : > { %12374 = vpow2.f32 %v4968_v63 }
0x114d   : > { %12376 = vpow2.f32 %v4970_v61 }
0x1150   : > { %v11436_v9 = vpop.f32.mrf.mxu0 }
0x1151   : > { %v4949_v19 = vadd.f32 %v14123_v12, %v11436_v9 }
0x1152   : > { %v4943_v5 = vpop.f32.mrf.mxu0 }
0x1153   : > { %v4944_v62 = vadd.f32 %v14126_v41, %v4943_v5  ;;  %v4961_v23 = vsel %vm2175_vm3, %v4949_v19, -inf }
0x1155   : > { %v4958_v0 = vsel %vm2175_vm3, %v4944_v62, -inf }
0x1156   : > { %4959 = vmax.xlane.f32.xlu0 %v4958_v0 }
0x1159   : > { %v12375_v14 = vpop.eup %12374 }
0x115a   : > { %v12377_v46 = vpop.eup %12376  ;;  %4962 = vmax.xlane.f32.xlu0 %v4961_v23  ;;  %v4976_v4 = vsel %vm2175_vm3, %v12375_v14, 0.0 }
0x115b   : > { %4977 = vadd.xlane.f32.xlu1 %v4976_v4  ;;  %v4979_v26 = vsel %vm2175_vm3, %v12377_v46, 0.0 }
0x115e   : > { %4980 = vadd.xlane.f32.xlu0 %v4979_v26 }
0x116c   : > { %4998 = vrot.lane.b32.xlu1 %v14015_v8, %s12931_s1 }
0x1174   : > { %4996 = vrot.lane.b32.xlu0 %v14026_v49, %s12931_s1 }
0x11df   : > { %v4960_v12 = vpop.xlane.xlu0 %4959 }
0x11e0   : > { %v4966_v41 = vsub.f32 %v4944_v62, %v4960_v12 }
0x11e2   : > { %v4972_v36 = vmul.f32 1.442695, %v4966_v41 }
0x11e3   : > { %v4963_v38 = vpop.xlane.xlu0 %4962 }
0x11e4   : > { %12378 = vpow2.f32 %v4972_v36  ;;  %v4978_v61 = vpop.xlane.xlu1 %4977  ;;  %v4967_v63 = vsub.f32 %v4949_v19, %v4963_v38  ;;  %v11871_v36 = vld [vmem:[%s13485_s5 + $0xa4] ss:$8 sps:$4 sm:$0xff]   ;;  %v11869_v38 = vld [vmem:[%s13485_s5 + $0xa0] ss:$8 sps:$4 sm:$0xff]  }
0x11e5   : > { %12380 = vrcp.f32 %v4978_v61  ;;  %v11874_v61 = vld [vmem:[%s13485_s5 + $0x94] ss:$8 sps:$4 sm:$0xff]  }
0x11e6   : > { %v4974_v9 = vmul.f32 1.442695, %v4967_v63 }
0x11e7   : > { %v4981_v5 = vpop.xlane.xlu0 %4980 }
0x11e8   : > { %12382 = vpow2.f32 %v4974_v9  ;;  %v4999_v0 = vpop.permute.xlu1 %4998  ;;  %v11872_v9 = vld [vmem:[%s13485_s5 + $0x90] ss:$8 sps:$4 sm:$0xff]  }
0x11e9   : > { %12384 = vrcp.f32 %v4981_v5  ;;  %11437 = vmatprep.subr.mxu1 %v4999_v0 }
0x11ea   : > { %11438 = vmatpush3.msra.mxu1 %v4999_v0 }
0x11eb   : > { %v4997_v23 = vpop.permute.xlu0 %4996 }
0x11ec   : > { %11439 = vmatprep.subr.mxu1 %v4997_v23 }
0x11ed   : > { %11440 = vmatpush3.msra.mxu1 %v4997_v23 }
0x11f1   : > { %v14273_v8 = vpop.eup %12378 }
0x11f2   : > { %v12381_v49 = vpop.eup %12380  ;;  %v4982_v62 = vsel %vm2175_vm3, %v14273_v8, 0.0 }
0x11f3   : > { %4983 = vadd.xlane.f32.xlu1 %v4982_v62  ;;  %v4992_v4 = vmul.f32 %v12381_v49, %v12375_v14  ;;  %v11631_v14 = vpack.i.bf16 %v13916_v27, %v13918_v28  ;;  %v11832_v27 = vld [vmem:[%s13485_s5 + $0x74] ss:$8 sps:$4 sm:$0xff]   ;;  %v11835_v28 = vld [vmem:[%s13485_s5 + $0x64] ss:$8 sps:$4 sm:$0xff]  }
0x11f4   : > { %5500 = vmatprep.subr.bf16.mxu1 %v11832_v27 }
0x11f5   : > { %v14277_v19 = vpop.eup %12382  ;;  %11441 = vmatprep.mubr.msk.f32.mxu1 %vm2175_vm3, %v4992_v4 }
0x11f6   : > { %v12385_v26 = vpop.eup %12384  ;;  %v4985_v12 = vsel %vm2175_vm3, %v14277_v19, 0.0 }
0x11f7   : > { %4986 = vadd.xlane.f32.xlu0 %v4985_v12  ;;  %v4993_v41 = vmul.f32 %v12385_v26, %v12377_v46  ;;  %v11866_v46 = vld [vmem:[%s13485_s5 + $0xb0] ss:$8 sps:$4 sm:$0xff]   ;;  %v11875_v12 = vld [vmem:[%s13485_s5 + $0x80] ss:$8 sps:$4 sm:$0xff]  }
0x11f9   : > { %11442 = vmatmul.mubr.msk.f32.vlgmr.msra.gmra.mxu1 %vm2175_vm3, %v4993_v41  ;;  %v11877_v41 = vld [vmem:[%s13485_s5 + $0x84] ss:$8 sps:$4 sm:$0xff]  }
0x1204   : > { %5085 = vrot.lane.b32.xlu1 %v14053_v59, %s12931_s1  ;;  %v11850_v59 = vld [vmem:[%s13485_s5 + $0x14] ss:$8 sps:$4 sm:$0xff]  }
0x1208   : > { %11627 = vrot.lane.b32.xlu1 %v11626_v57, %s12931_s1  ;;  %v11860_v57 = vld [vmem:[%s13485_s5 + $0xd0] ss:$8 sps:$4 sm:$0xff]  }
0x120c   : > { %11632 = vrot.lane.b32.xlu1 %v11631_v14, %s12931_s1 }
0x120d   : > { %5083 = vrot.lane.b32.xlu0 %v13777_v24, %s12931_s1  ;;  %v11830_v24 = vld [vmem:[%s13485_s5 + $0x70] ss:$8 sps:$4 sm:$0xff]  }
0x120e   : > { %5501 = vmatpush1.bf16.msra.mxu1 %v11830_v24 }
0x120f   : > { %5502 = vmatprep.subr.bf16.mxu1 %v11835_v28 }
0x1210   : > { %11642 = vrot.lane.b32.xlu1 %v11641_v53, %s12930_s19  ;;  %v11844_v53 = vld [vmem:[%s13485_s5 + $0x34] ss:$8 sps:$4 sm:$0xff]  }
0x1211   : > { %11637 = vrot.lane.b32.xlu0 %v11636_v43, %s12930_s19  ;;  %v11868_v43 = vld [vmem:[%s13485_s5 + $0xb4] ss:$8 sps:$4 sm:$0xff]  }
0x1212   : > { %5503 = vmatpush1.bf16.msra.mxu1 %v11833_v55 }
0x1213   : > { %5504 = vmatprep.subr.bf16.mxu1 %v11838_v29 }
0x1214   : > { %11652 = vrot.lane.b32.xlu1 %v11651_v21, %s12929_s29  ;;  %v11851_v21 = vld [vmem:[%s13485_s5] ss:$8 sps:$4 sm:$0xff]  }
0x1218   : > { %11662 = vrot.lane.b32.xlu1 %v11661_v58, %s12931_s1  ;;  %v11836_v58 = vld [vmem:[%s13485_s5 + $0x50] ss:$8 sps:$4 sm:$0xff]  }
0x1219   : > { %5505 = vmatpush1.bf16.msra.mxu1 %v11836_v58 }
0x121a   : > { %5506 = vmatprep.subr.bf16.mxu1 %v11841_v32 }
0x121c   : > { %11672 = vrot.lane.b32.xlu1 %v11671_v44, %s12930_s19  ;;  %v11845_v44 = vld [vmem:[%s13485_s5 + $0x20] ss:$8 sps:$4 sm:$0xff]  }
0x121d   : > { %5507 = vmatpush1.bf16.msra.mxu1 %v11839_v45 }
0x121e   : > { %5508 = vmatprep.subr.bf16.mxu1 %v11844_v53 }
0x1220   : > { %11682 = vrot.lane.b32.xlu1 %v11681_v47, %s12929_s29  ;;  %v11859_v47 = vld [vmem:[%s13485_s5 + $0xe4] ss:$8 sps:$4 sm:$0xff]   ;;  %s15480_s5 = scalar_lea.vmem [#allocation20], %s13481_s21 }
0x1221   : > { %5509 = vmatpush1.bf16.msra.mxu1 %v11842_v33 }
0x1222   : > { %5510 = vmatprep.subr.bf16.mxu1 %v11847_v34 }
0x1225   : > { %5511 = vmatpush1.bf16.msra.mxu1 %v11845_v44 }
0x1226   : > { %5512 = vmatprep.subr.bf16.mxu1 %v11850_v59 }
0x1229   : > { %5513 = vmatpush1.bf16.msra.mxu1 %v11848_v50 }
0x122a   : > { %5514 = vmatprep.subr.bf16.mxu1 %v11853_v52 }
0x122d   : > { %5515 = vmatpush1.bf16.msra.mxu1 %v11851_v21 }
0x122e   : > { %5516 = vmatprep.subr.bf16.mxu1 %v11856_v37 }
0x1231   : > { %5517 = vmatpush2.bf16.msra.mxu1 %v11854_v1 }
0x1232   : > { %5518 = vmatprep.subr.bf16.mxu1 %v11859_v47 }
0x1235   : > { %5519 = vmatpush2.bf16.msra.mxu1 %v11857_v16 }
0x1236   : > { %5520 = vmatprep.subr.bf16.mxu1 %v11862_v54 }
0x1239   : > { %5521 = vmatpush2.bf16.msra.mxu1 %v11860_v57 }
0x123a   : > { %5522 = vmatprep.subr.bf16.mxu1 %v11865_v13 }
0x123d   : > { %5523 = vmatpush2.bf16.msra.mxu1 %v11863_v7 }
0x123e   : > { %5524 = vmatprep.subr.bf16.mxu1 %v11868_v43 }
0x1241   : > { %5525 = vmatpush2.bf16.msra.mxu1 %v11866_v46 }
0x1242   : > { %5526 = vmatprep.subr.bf16.mxu1 %v11871_v36 }
0x1245   : > { %5527 = vmatpush2.bf16.msra.mxu1 %v11869_v38 }
0x1246   : > { %5528 = vmatprep.subr.bf16.mxu1 %v11874_v61 }
0x1249   : > { %5529 = vmatpush2.bf16.msra.mxu1 %v11872_v9 }
0x124a   : > { %5530 = vmatprep.subr.bf16.mxu1 %v11877_v41 }
0x124d   : > { %5531 = vmatpush2.bf16.msra.mxu1 %v11875_v12 }
0x127c   : > { %v4984_v63 = vpop.xlane.xlu1 %4983 }
0x127d   : > { %12386 = vrcp.f32 %v4984_v63 }
0x1280   : > { %v5086_v5 = vpop.permute.xlu1 %5085  ;;  %v4987_v0 = vpop.xlane.xlu0 %4986 }
0x1281   : > { %12388 = vrcp.f32 %v4987_v0  ;;  %11444 = vmatprep.subr.mxu0 %v5086_v5 }
0x1282   : > { %11445 = vmatpush3.msra.mxu0 %v5086_v5 }
0x1284   : > { %v5084_v23 = vpop.permute.xlu0 %5083 }
0x1285   : > { %11446 = vmatprep.subr.mxu0 %v5084_v23 }
0x1286   : > { %11447 = vmatpush3.msra.mxu0 %v5084_v23 }
0x1288   : > { %v11638_v55 = vpop.permute.xlu0 %11637 }
0x1289   : > { %v11640_v44 = vunpack.i.h.bf16 %v11638_v55  ;;  %v11639_v59 = vunpack.i.l.bf16 %v11638_v55 }
0x128a   : > { %v12387_v49 = vpop.eup %12386 }
0x128b   : > { %v4994_v62 = vmul.f32 %v12387_v49, %v14273_v8  ;;  %v11628_v8 = vpop.permute.xlu1 %11627 }
0x128c   : > { %v11630_v58 = vunpack.i.h.bf16 %v11628_v8  ;;  %v11629_v32 = vunpack.i.l.bf16 %v11628_v8 }
0x128d   : > { %11448 = vmatprep.mubr.msk.f32.mxu0 %vm2175_vm3, %v4994_v62 }
0x128e   : > { %v12389_v4 = vpop.eup %12388  ;;  %v5280_v48 = vsel %vm2000_vm2, %v14121_v31, %v11629_v32 }
0x128f   : > { %v4995_v26 = vmul.f32 %v12389_v4, %v14277_v19  ;;  %v11633_v19 = vpop.permute.xlu1 %11632 }
0x1290   : > { %v11635_v45 = vunpack.i.h.bf16 %v11633_v19  ;;  %v11634_v53 = vunpack.i.l.bf16 %v11633_v19 }
0x1291   : > { %11449 = vmatmul.mubr.msk.f32.vlgmr.msra.gmra.mxu0 %vm2175_vm3, %v4995_v26 }
0x1292   : > { %v5267_v18 = vsel %vm2000_vm2, %v13908_v25, %v11635_v45 }
0x1293   : > { %v11643_v28 = vpop.permute.xlu1 %11642 }
0x1294   : > { %v11645_v33 = vunpack.i.h.bf16 %v11643_v28  ;;  %v11644_v34 = vunpack.i.l.bf16 %v11643_v28 }
0x1296   : > { %v5272_v21 = vsel %vm5270_vm4, %v5267_v18, %v11645_v33 }
0x1297   : > { %v11653_v29 = vpop.permute.xlu1 %11652 }
0x1298   : > { %v11655_v35 = vunpack.i.h.bf16 %v11653_v29  ;;  %v11654_v3 = vunpack.i.l.bf16 %v11653_v29 }
0x129a   : > { %v5277_v31 = vsel %vm5275_vm5, %v5272_v21, %v11655_v35 }
0x129b   : > { %v11663_v46 = vpop.permute.xlu1 %11662 }
0x129c   : > { %v11665_v61 = vunpack.i.h.bf16 %v11663_v46  ;;  %v11664_v63 = vunpack.i.l.bf16 %v11663_v46 }
0x129f   : > { %v11673_v36 = vpop.permute.xlu1 %11672 }
0x12a0   : > { %v11675_v0 = vunpack.i.h.bf16 %v11673_v36  ;;  %v11674_v23 = vunpack.i.l.bf16 %v11673_v36  ;;  %v5791_v36 = vld [vmem:[%s13490_s7 + $0x3c8] sm:$0xff] }
0x12a3   : > { %v11683_v9 = vpop.permute.xlu1 %11682 }
0x12a4   : > { %v11685_v4 = vunpack.i.h.bf16 %v11683_v9  ;;  %v11684_v26 = vunpack.i.l.bf16 %v11683_v9 }
0x12b9   : > { %v11443_v14 = vpop.f32.mrf.mxu1 }
0x12bb   : > { %v5074_v24 = vpop.f32.mrf.mxu1 }
0x12bc   : > { %v11646_v27 = vpack.i.bf16 %v11443_v14, %v5074_v24  ;;  %v5269_v14 = vsel %vm2000_vm2, %v13912_v20, %v11665_v61  ;;  %v5268_v24 = vsel %vm2000_vm2, %v13914_v2, %v11664_v63  ;;  %v5774_v61 = vld [vmem:[%s13490_s7 + $0x340] sm:$0xff] }
0x12bd   : > { %v5274_v8 = vsel %vm5270_vm4, %v5269_v14, %v11675_v0  ;;  %v5767_v0 = vld [vmem:[%s13490_s7 + $0x308] sm:$0xff] }
0x12be   : > { %11647 = vrot.lane.b32.xlu0 %v11646_v27, %s12929_s29  ;;  %v5273_v27 = vsel %vm5270_vm4, %v5268_v24, %v11674_v23  ;;  %v5279_v45 = vsel %vm5275_vm5, %v5274_v8, %v11685_v4  ;;  %v5775_v23 = vld [vmem:[%s13490_s7 + $0x348] sm:$0xff]  ;;  %v5758_v4 = vld [vmem:[%s13490_s7 + $0x2c0] sm:$0xff] }
0x12bf   : > { %v5278_v2 = vsel %vm5275_vm5, %v5273_v27, %v11684_v26  ;;  %v5751_v26 = vld [vmem:[%s13490_s7 + $0x288] sm:$0xff]  ;;  %v10672_v14 = vcombine.low %v5767_v0, %v5775_v23  ;;  %v5734_v8 = vld [vmem:[%s13490_s7 + $0x200] sm:$0xff] }
0x12c2   : > { %11657 = vrot.lane.b32.xlu0 %v11656_v6, %s12931_s1  ;;  %v5281_v6 = vsel %vm2000_vm2, %v14119_v30, %v11630_v58  ;;  %v5284_v30 = vsel %vm5270_vm4, %v5280_v48, %v11639_v59 }
0x12c3   : > { %v5285_v47 = vsel %vm5270_vm4, %v5281_v6, %v11640_v44  ;;  %v5294_v44 = vpack.c.bf16 %v5279_v45, %v5278_v2  ;;  %v5718_v2 = vld [vmem:[%s13490_s7 + $0x180] sm:$0xff] }
0x12c4   : > { %v5726_v45 = vld [vmem:[%s13490_s7 + $0x1c0] sm:$0xff] }
0x12c6   : > { %11667 = vrot.lane.b32.xlu0 %v11666_v10, %s12930_s19  ;;  %v5266_v10 = vsel %vm2000_vm2, %v13910_v60, %v11634_v53 }
0x12c7   : > { %v5271_v52 = vsel %vm5270_vm4, %v5266_v10, %v11644_v34  ;;  %v12408_v10 = vld [vmem:[#allocation2 + $0x30] sm:$0xff] }
0x12c8   : > { %v5276_v16 = vsel %vm5275_vm5, %v5271_v52, %v11654_v3  ;;  %v12409_v52 = vld [vmem:[#allocation2] sm:$0xff] }
0x12c9   : > { %v5292_v57 = vpack.c.bf16 %v5277_v31, %v5276_v16  ;;  %v12410_v16 = vld [vmem:[#allocation2 + $0x18] sm:$0xff] }
0x1330   : > { %v11648_v50 = vpop.permute.xlu0 %11647 }
0x1331   : > { %v11650_v37 = vunpack.i.h.bf16 %v11648_v50  ;;  %v11649_v1 = vunpack.i.l.bf16 %v11648_v50 }
0x1333   : > { %v5288_v25 = vsel %vm5275_vm5, %v5284_v30, %v11649_v1  ;;  %v5289_v54 = vsel %vm5275_vm5, %v5285_v47, %v11650_v37 }
0x1334   : > { %v5293_v60 = vpack.c.bf16 %v5289_v54, %v5288_v25  ;;  %v11658_v38 = vpop.permute.xlu0 %11657  ;;  %v12411_v25 = vld [vmem:[#allocation2 + $0x10] sm:$0xff] }
0x1335   : > { %v11660_v49 = vunpack.i.h.bf16 %v11658_v38  ;;  %v11659_v62 = vunpack.i.l.bf16 %v11658_v38  ;;  %v5766_v38 = vld [vmem:[%s13490_s7 + $0x300] sm:$0xff] }
0x1336   : > { %5532 = vmatprep.mubr.bf16.mxu1 %v5293_v60 }
0x1337   : > { %5533 = vmatmul.mubr.bf16.vlgmr.msra.gmra.mxu1 %v5292_v57  ;;  %v5283_v28 = vsel %vm2000_vm2, %v14131_v22, %v11660_v49  ;;  %v5282_v55 = vsel %vm2000_vm2, %v14133_v15, %v11659_v62  ;;  %v5328_v22 = vld [vmem:[%s875_s27] sm:$0x3]  ;;  %v5782_v57 = vld [vmem:[%s13490_s7 + $0x380] sm:$0xff]  ;;  %v10673_v62 = vcombine.high %v5767_v0, %v5775_v23  ;;  %s15489_s27 = scalar_lea.vmem [#allocation21], %s13481_s21 }
0x1338   : > { %v11668_v5 = vpop.permute.xlu0 %11667  ;;  %v14399_v15 = vrot.slane %v5328_v22, %v13651_v40  ;;  %v14402_v59 = vrot.slane %v5328_v22, %v13683_v56  ;;  %v5750_v49 = vld [vmem:[%s13490_s7 + $0x280] sm:$0xff]  ;;  %v10623_v22 = vcombine.high %v5718_v2, %v5726_v45 }
0x1339   : > { %v11670_v12 = vunpack.i.h.bf16 %v11668_v5  ;;  %v11669_v41 = vunpack.i.l.bf16 %v11668_v5  ;;  %v10671_v5 = vcombine.high %v5766_v38, %v5774_v61  ;;  %v10655_v24 = vcombine.high %v5750_v49, %v5758_v4  ;;  %v12413_v0 = vld [vmem:[#allocation2 + $0x20] sm:$0xff] }
0x133b   : > { %v5286_v32 = vsel %vm5270_vm4, %v5282_v55, %v11669_v41  ;;  %v5287_v20 = vsel %vm5270_vm4, %v5283_v28, %v11670_v12  ;;  %v5759_v12 = vld [vmem:[%s13490_s7 + $0x2c8] sm:$0xff]  ;;  %v10670_v41 = vcombine.low %v5766_v38, %v5774_v61 }
0x133c   : > { %v10657_v27 = vcombine.high %v5751_v26, %v5759_v12  ;;  %v5735_v28 = vld [vmem:[%s13490_s7 + $0x208] sm:$0xff] }
0x133d   : > { %v5743_v55 = vld [vmem:[%s13490_s7 + $0x248] sm:$0xff] }
0x1351   : > { %v11450_v13 = vpop.f32.mrf.mxu0 }
0x1353   : > { %v5161_v7 = vpop.f32.mrf.mxu0 }
0x1354   : > { %v11676_v43 = vpack.i.bf16 %v11450_v13, %v5161_v7  ;;  %v5790_v13 = vld [vmem:[%s13490_s7 + $0x3c0] sm:$0xff]  ;;  %v5783_v7 = vld [vmem:[%s13490_s7 + $0x388] sm:$0xff] }
0x1355   : > { %v10687_v46 = vcombine.high %v5782_v57, %v5790_v13  ;;  %v10688_v63 = vcombine.low %v5783_v7, %v5791_v36  ;;  %v10689_v9 = vcombine.high %v5783_v7, %v5791_v36 }
0x1356   : > { %11677 = vrot.lane.b32.xlu0 %v11676_v43, %s12929_s29  ;;  %v10686_v43 = vcombine.low %v5782_v57, %v5790_v13 }
0x1357   : > { %7290 = vmatprep.subr.bf16.mxu0 %v10687_v46  ;;  %7343 = vmatprep.subr.bf16.mxu1 %v10689_v9 }
0x1358   : > { %7291 = vmatpush1.bf16.msra.mxu0 %v10686_v43  ;;  %7344 = vmatpush1.bf16.msra.mxu1 %v10688_v63 }
0x1359   : > { %7292 = vmatprep.subr.bf16.mxu0 %v10671_v5  ;;  %7345 = vmatprep.subr.bf16.mxu1 %v10673_v62  ;;  %v12412_v5 = vld [vmem:[#allocation2 + $0x8] sm:$0xff] }
0x135c   : > { %7293 = vmatpush1.bf16.msra.mxu0 %v10670_v41  ;;  %7346 = vmatpush1.bf16.msra.mxu1 %v10672_v14  ;;  %v12414_v14 = vld [vmem:[#allocation2 + $0x28] sm:$0xff] }
0x135d   : > { %7294 = vmatprep.subr.bf16.mxu0 %v10655_v24  ;;  %7347 = vmatprep.subr.bf16.mxu1 %v10657_v27  ;;  %v12415_v27 = vld [vmem:[#allocation2 + $0x38] sm:$0xff] }
0x13c8   : > { %v11678_v19 = vpop.permute.xlu0 %11677 }
0x13c9   : > { %v11680_v29 = vunpack.i.h.bf16 %v11678_v19  ;;  %v11679_v58 = vunpack.i.l.bf16 %v11678_v19  ;;  %v5742_v19 = vld [vmem:[%s13490_s7 + $0x240] sm:$0xff] }
0x13cb   : > { %v5290_v53 = vsel %vm5275_vm5, %v5286_v32, %v11679_v58  ;;  %v5291_v33 = vsel %vm5275_vm5, %v5287_v20, %v11680_v29  ;;  %v10654_v29 = vcombine.low %v5750_v49, %v5758_v4  ;;  %v10656_v58 = vcombine.low %v5751_v26, %v5759_v12 }
0x13cc   : > { %v5295_v34 = vpack.c.bf16 %v5291_v33, %v5290_v53  ;;  %v10639_v32 = vcombine.high %v5734_v8, %v5742_v19  ;;  %v10641_v20 = vcombine.high %v5735_v28, %v5743_v55  ;;  %v5719_v53 = vld [vmem:[%s13490_s7 + $0x188] sm:$0xff] }
0x13cd   : > { %v5727_v33 = vld [vmem:[%s13490_s7 + $0x1c8] sm:$0xff]  ;;  %7295 = vmatpush1.bf16.msra.mxu0 %v10654_v29  ;;  %7348 = vmatpush1.bf16.msra.mxu1 %v10656_v58 }
0x13ce   : > { %5542 = vmatprep.mubr.bf16.mxu1 %v5295_v34  ;;  %v10638_v34 = vcombine.low %v5734_v8, %v5742_v19  ;;  %7296 = vmatprep.subr.bf16.mxu0 %v10639_v32  ;;  %v5694_v19 = vld [vmem:[%s13490_s7 + $0xc0] sm:$0xff]  ;;  %v5695_v29 = vld [vmem:[%s13490_s7 + $0xc8] sm:$0xff] }
0x13cf   : > { %5543 = vmatmul.mubr.bf16.gmra.mxu1 %v5294_v44  ;;  %v10640_v44 = vcombine.low %v5735_v28, %v5743_v55  ;;  %7349 = vmatprep.subr.bf16.mxu1 %v10641_v20  ;;  %v5687_v28 = vld [vmem:[%s13490_s7 + $0x88] sm:$0xff] }
0x13d0   : > { %v10592_v32 = vcombine.low %v5687_v28, %v5695_v29  ;;  %v10593_v20 = vcombine.high %v5687_v28, %v5695_v29  ;;  %v5847_v28 = vld [vmem:[%s13490_s7 + $0x588] sm:$0xff] }
0x13d1   : > { %7297 = vmatpush1.bf16.msra.mxu0 %v10638_v34  ;;  %7350 = vmatpush1.bf16.msra.mxu1 %v10640_v44  ;;  %v5679_v44 = vld [vmem:[%s13490_s7 + $0x48] sm:$0xff] }
0x13d2   : > { %7298 = vmatprep.subr.bf16.mxu0 %v10623_v22  ;;  %v5855_v29 = vld [vmem:[%s13490_s7 + $0x5c8] sm:$0xff] }
0x13f7   : > { %v5534_v35 = vpop.f32.mrf.mxu1 }
0x13f8   : > { %v5535_v3 = vadd.f32 %v5534_v35, %v14399_v15  ;;  %v10625_v35 = vcombine.high %v5719_v53, %v5727_v33 }
0x13f9   : > { %v5536_v6 = vpop.f32.mrf.mxu1 }
0x13fa   : > { %v5537_v48 = vadd.f32 %v5536_v6, %v14402_v59  ;;  %v14406_v50 = vadd.f32 %v12408_v10, %v5535_v3  ;;  %v5702_v3 = vld [vmem:[%s13490_s7 + $0x100] sm:$0xff]  ;;  %v10622_v10 = vcombine.low %v5718_v2, %v5726_v45  ;;  %7351 = vmatprep.subr.bf16.mxu1 %v10625_v35 }
0x13fb   : > { %v5538_v18 = vpop.f32.mrf.mxu1  ;;  %v5710_v6 = vld [vmem:[%s13490_s7 + $0x140] sm:$0xff] }
0x13fc   : > { %v14408_v21 = vadd.f32 %v12409_v52, %v5537_v48  ;;  %v5539_v37 = vadd.f32 %v5538_v18, %v14399_v15  ;;  %v5703_v48 = vld [vmem:[%s13490_s7 + $0x108] sm:$0xff]  ;;  %v10624_v52 = vcombine.low %v5719_v53, %v5727_v33  ;;  %7299 = vmatpush1.bf16.msra.mxu0 %v10622_v10  ;;  %v5670_v45 = vld [vmem:[%s13490_s7] sm:$0xff] }
0x13fd   : > { %v5540_v1 = vpop.f32.mrf.mxu1  ;;  %v5711_v18 = vld [vmem:[%s13490_s7 + $0x148] sm:$0xff]  ;;  %v5678_v53 = vld [vmem:[%s13490_s7 + $0x40] sm:$0xff] }
0x13fe   : > { %v5541_v47 = vadd.f32 %v5540_v1, %v14402_v59  ;;  %v5561_v30 = vadd.f32 %v14408_v21, %v14406_v50  ;;  %v14414_v31 = vadd.f32 %v12410_v16, %v5539_v37  ;;  %v10607_v37 = vcombine.high %v5702_v3, %v5710_v6  ;;  %7352 = vmatpush1.bf16.msra.mxu1 %v10624_v52  ;;  %v5671_v33 = vld [vmem:[%s13490_s7 + $0x8] sm:$0xff] }
0x13ff   : > { %v10609_v1 = vcombine.high %v5703_v48, %v5711_v18  ;;  %v10575_v34 = vcombine.high %v5670_v45, %v5678_v53  ;;  %v10574_v22 = vcombine.low %v5670_v45, %v5678_v53  ;;  %v10576_v35 = vcombine.low %v5671_v33, %v5679_v44  ;;  %v5919_v52 = vld [vmem:[%s13490_s7 + $0x7c8] sm:$0xff]  ;;  %v5838_v45 = vld [vmem:[%s13490_s7 + $0x540] sm:$0xff] }
0x1400   : > { %v14416_v54 = vadd.f32 %v12411_v25, %v5541_v47  ;;  %5562 = vadd.xlane.f32.xlu0 %v5561_v30  ;;  %v10606_v47 = vcombine.low %v5702_v3, %v5710_v6  ;;  %7300 = vmatprep.subr.bf16.mxu0 %v10607_v37  ;;  %v10608_v30 = vcombine.low %v5703_v48, %v5711_v18  ;;  %v5910_v6 = vld [vmem:[%s13490_s7 + $0x780] sm:$0xff]  ;;  %v5911_v18 = vld [vmem:[%s13490_s7 + $0x788] sm:$0xff] }
0x1401   : > { %7353 = vmatprep.subr.bf16.mxu1 %v10609_v1  ;;  %v10577_v3 = vcombine.high %v5671_v33, %v5679_v44  ;;  %v5918_v48 = vld [vmem:[%s13490_s7 + $0x7c0] sm:$0xff]  ;;  %v10816_v1 = vcombine.low %v5911_v18, %v5919_v52  ;;  %v5831_v53 = vld [vmem:[%s13490_s7 + $0x508] sm:$0xff] }
0x1402   : > { %v5564_v60 = vadd.f32 %v14416_v54, %v14414_v31  ;;  %7301 = vmatpush1.bf16.msra.mxu0 %v10606_v47  ;;  %7354 = vmatpush1.bf16.msra.mxu1 %v10608_v30  ;;  %v10815_v10 = vcombine.high %v5910_v6, %v5918_v48  ;;  %v10814_v37 = vcombine.low %v5910_v6, %v5918_v48  ;;  %v5894_v30 = vld [vmem:[%s13490_s7 + $0x700] sm:$0xff]  ;;  %v5815_v48 = vld [vmem:[%s13490_s7 + $0x488] sm:$0xff] }
0x1403   : > { %7355 = vmatprep.subr.bf16.mxu1 %v10593_v20  ;;  %v10817_v47 = vcombine.high %v5911_v18, %v5919_v52  ;;  %v10753_v20 = vcombine.high %v5847_v28, %v5855_v29  ;;  %v5822_v6 = vld [vmem:[%s13490_s7 + $0x4c0] sm:$0xff] }
0x1404   : > { %5565 = vadd.xlane.f32.xlu1 %v5564_v60 }
0x1406   : > { %7356 = vmatpush1.bf16.msra.mxu1 %v10592_v32  ;;  %v10752_v32 = vcombine.low %v5847_v28, %v5855_v29 }
0x1407   : > { %7357 = vmatprep.subr.bf16.mxu1 %v10577_v3  ;;  %v5814_v3 = vld [vmem:[%s13490_s7 + $0x480] sm:$0xff] }
0x1408   : > { %v10719_v18 = vcombine.high %v5814_v3, %v5822_v6  ;;  %v10718_v52 = vcombine.low %v5814_v3, %v5822_v6 }
0x140a   : > { %7358 = vmatpush1.bf16.msra.mxu1 %v10576_v35 }
0x140b   : > { %7359 = vmatprep.subr.bf16.mxu1 %v10817_v47  ;;  %v5798_v47 = vld [vmem:[%s13490_s7 + $0x400] sm:$0xff] }
0x140e   : > { %7360 = vmatpush2.bf16.msra.mxu1 %v10816_v1 }
0x1489   : > { %v5563_v16 = vpop.xlane.xlu0 %5562 }
0x148a   : > { %v5574_v25 = vmul.f32 0.00390625, %v5563_v16  ;;  %v5902_v16 = vld [vmem:[%s13490_s7 + $0x740] sm:$0xff] }
0x148c   : > { %v14445_v60 = vsub.f32 %v14406_v50, %v5574_v25  ;;  %v14448_v57 = vsub.f32 %v14408_v21, %v5574_v25  ;;  %v5895_v25 = vld [vmem:[%s13490_s7 + $0x708] sm:$0xff] }
0x148d   : > { %v5566_v43 = vpop.xlane.xlu1 %5565 }
0x148e   : > { %v5586_v13 = vmul.f32 %v14445_v60, %v14445_v60  ;;  %v5587_v7 = vmul.f32 %v14448_v57, %v14448_v57  ;;  %v5575_v63 = vmul.f32 0.00390625, %v5566_v43  ;;  %v10798_v43 = vcombine.low %v5894_v30, %v5902_v16 }
0x148f   : > { %v5544_v46 = vpop.f32.mrf.mxu1 }
0x1490   : > { %v5545_v36 = vadd.f32 %v5544_v46, %v14399_v15  ;;  %v5594_v38 = vadd.f32 %v5587_v7, %v5586_v13  ;;  %v14462_v4 = vsub.f32 %v14414_v31, %v5575_v63  ;;  %v14465_v26 = vsub.f32 %v14416_v54, %v5575_v63  ;;  %v5686_v54 = vld [vmem:[%s13490_s7 + $0x80] sm:$0xff]  ;;  %v5903_v7 = vld [vmem:[%s13490_s7 + $0x748] sm:$0xff] }
0x1491   : > { %v5546_v61 = vpop.f32.mrf.mxu1  ;;  %v10591_v55 = vcombine.high %v5686_v54, %v5694_v19  ;;  %v10590_v58 = vcombine.low %v5686_v54, %v5694_v19  ;;  %v10799_v13 = vcombine.high %v5894_v30, %v5902_v16  ;;  %v10800_v46 = vcombine.low %v5895_v25, %v5903_v7  ;;  %v5879_v63 = vld [vmem:[%s13490_s7 + $0x688] sm:$0xff]  ;;  %v5846_v54 = vld [vmem:[%s13490_s7 + $0x580] sm:$0xff] }
0x1492   : > { %v5547_v9 = vadd.f32 %v5546_v61, %v14402_v59  ;;  %5595 = vadd.xlane.f32.xlu1 %v5594_v38  ;;  %v14456_v21 = vadd.f32 %v12412_v5, %v5545_v36  ;;  %v5589_v31 = vmul.f32 %v14465_v26, %v14465_v26  ;;  %v10801_v36 = vcombine.high %v5895_v25, %v5903_v7  ;;  %v5878_v38 = vld [vmem:[%s13490_s7 + $0x680] sm:$0xff]  ;;  %v5799_v16 = vld [vmem:[%s13490_s7 + $0x408] sm:$0xff] }
0x1493   : > { %v5548_v50 = vpop.f32.mrf.mxu1  ;;  %7302 = vmatprep.subr.bf16.mxu0 %v10591_v55  ;;  %v5886_v61 = vld [vmem:[%s13490_s7 + $0x6c0] sm:$0xff] }
0x1494   : > { %v14458_v23 = vadd.f32 %v12413_v0, %v5547_v9  ;;  %v5549_v49 = vadd.f32 %v5548_v50, %v14399_v15  ;;  %v5588_v15 = vmul.f32 %v14462_v4, %v14462_v4  ;;  %7303 = vmatpush1.bf16.msra.mxu0 %v10590_v58  ;;  %7361 = vmatprep.subr.bf16.mxu1 %v10801_v36  ;;  %v5887_v50 = vld [vmem:[%s13490_s7 + $0x6c8] sm:$0xff]  ;;  %v5854_v19 = vld [vmem:[%s13490_s7 + $0x5c0] sm:$0xff]  ;;  %v14521_v36 = vld [vmem:[%s13490_s7 + $0x390] sm:$0xff] }
0x1495   : > { %v5550_v62 = vpop.f32.mrf.mxu1  ;;  %7304 = vmatprep.subr.bf16.mxu0 %v10575_v34  ;;  %7362 = vmatpush2.bf16.msra.mxu1 %v10800_v46  ;;  %v10783_v9 = vcombine.high %v5878_v38, %v5886_v61  ;;  %v10782_v5 = vcombine.low %v5878_v38, %v5886_v61  ;;  %v10784_v0 = vcombine.low %v5879_v63, %v5887_v50  ;;  %v5839_v34 = vld [vmem:[%s13490_s7 + $0x548] sm:$0xff]  ;;  %v5806_v30 = vld [vmem:[%s13490_s7 + $0x440] sm:$0xff]  ;;  %v14524_v38 = vld [vmem:[%s13490_s7 + $0x3d0] sm:$0xff] }
0x1496   : > { %v5551_v12 = vadd.f32 %v5550_v62, %v14402_v59  ;;  %v5567_v41 = vadd.f32 %v14458_v23, %v14456_v21  ;;  %v14470_v24 = vadd.f32 %v12414_v14, %v5549_v49  ;;  %v5597_v2 = vadd.f32 %v5589_v31, %v5588_v15  ;;  %v5862_v62 = vld [vmem:[%s13490_s7 + $0x600] sm:$0xff]  ;;  %v14527_v61 = vld [vmem:[%s13490_s7 + $0x398] sm:$0xff] }
0x1497   : > { %v10785_v49 = vcombine.high %v5879_v63, %v5887_v50  ;;  %v10751_v55 = vcombine.high %v5846_v54, %v5854_v19  ;;  %v10750_v58 = vcombine.low %v5846_v54, %v5854_v19  ;;  %v10737_v35 = vcombine.high %v5831_v53, %v5839_v34  ;;  %v14534_v50 = vld [vmem:[%s13490_s7 + $0x3d8] sm:$0xff] }
0x1498   : > { %v14472_v8 = vadd.f32 %v12415_v27, %v5551_v12  ;;  %5568 = vadd.xlane.f32.xlu0 %v5567_v41  ;;  %7305 = vmatpush1.bf16.msra.mxu0 %v10574_v22  ;;  %v5870_v12 = vld [vmem:[%s13490_s7 + $0x640] sm:$0xff]  ;;  %v5863_v41 = vld [vmem:[%s13490_s7 + $0x608] sm:$0xff]  ;;  %v10736_v22 = vcombine.low %v5831_v53, %v5839_v34  ;;  %v10703_v25 = vcombine.high %v5798_v47, %v5806_v30 }
0x1499   : > { %7306 = vmatprep.subr.bf16.mxu0 %v10815_v10  ;;  %7363 = vmatprep.subr.bf16.mxu1 %v10785_v49  ;;  %v10767_v14 = vcombine.high %v5862_v62, %v5870_v12  ;;  %v5871_v27 = vld [vmem:[%s13490_s7 + $0x648] sm:$0xff]  ;;  %v10766_v15 = vcombine.low %v5862_v62, %v5870_v12  ;;  %v10702_v7 = vcombine.low %v5798_v47, %v5806_v30  ;;  %v5769_v30 = vld [vmem:[%s13490_s7 + $0x318] sm:$0xff] }
0x149a   : > { %v5570_v59 = vadd.f32 %v14472_v8, %v14470_v24  ;;  %7364 = vmatpush2.bf16.msra.mxu1 %v10784_v0  ;;  %v10768_v31 = vcombine.low %v5863_v41, %v5871_v27  ;;  %v5823_v10 = vld [vmem:[%s13490_s7 + $0x4c8] sm:$0xff]  ;;  %v10690_v63 = vcombine.low %v14521_v36, %v14524_v38  ;;  %v10693_v0 = vcombine.high %v14527_v61, %v14534_v50 }
0x149b   : > { %v10721_v1 = vcombine.high %v5815_v48, %v5823_v10 }
0x149c   : > { %5571 = vadd.xlane.f32.xlu0 %v5570_v59  ;;  %7307 = vmatpush2.bf16.msra.mxu0 %v10814_v37  ;;  %v10769_v59 = vcombine.high %v5863_v41, %v5871_v27  ;;  %v10720_v37 = vcombine.low %v5815_v48, %v5823_v10 }
0x149d   : > { %7308 = vmatprep.subr.bf16.mxu0 %v10799_v13  ;;  %v5807_v13 = vld [vmem:[%s13490_s7 + $0x448] sm:$0xff] }
0x149e   : > { %7365 = vmatprep.subr.bf16.mxu1 %v10769_v59  ;;  %v10705_v46 = vcombine.high %v5799_v16, %v5807_v13 }
0x149f   : > { %7366 = vmatpush2.bf16.msra.mxu1 %v10768_v31 }
0x14a0   : > { %5598 = vadd.xlane.f32.xlu0 %v5597_v2  ;;  %7309 = vmatpush2.bf16.msra.mxu0 %v10798_v43  ;;  %v5830_v2 = vld [vmem:[%s13490_s7 + $0x500] sm:$0xff]  ;;  %v10704_v43 = vcombine.low %v5799_v16, %v5807_v13  ;;  %v5777_v16 = vld [vmem:[%s13490_s7 + $0x358] sm:$0xff] }
0x14a1   : > { %7310 = vmatprep.subr.bf16.mxu0 %v10783_v9  ;;  %7367 = vmatprep.subr.bf16.mxu1 %v10753_v20  ;;  %v10735_v33 = vcombine.high %v5830_v2, %v5838_v45  ;;  %v10734_v44 = vcombine.low %v5830_v2, %v5838_v45  ;;  %v10691_v9 = vcombine.high %v14521_v36, %v14524_v38  ;;  %v5626_v45 = vld [vmem:[%s884_s30] sm:$0x3]  ;;  %s15490_s30 = scalar_lea.vmem [#allocation22], %s13481_s21  ;;  %s15493_s21 = sld [smem:[#allocation29_spill]] }
0x14a2   : > { %v14566_v53 = vrot.slane %v5626_v45, %v13683_v56 }
0x14a3   : > { %7368 = vmatpush2.bf16.msra.mxu1 %v10752_v32 }
0x14a4   : > { %7311 = vmatpush2.bf16.msra.mxu0 %v10782_v5  ;;  %7369 = vmatprep.subr.bf16.mxu1 %v10737_v35  ;;  %v10692_v5 = vcombine.low %v14527_v61, %v14534_v50  ;;  %v5720_v50 = vld [vmem:[%s13490_s7 + $0x190] sm:$0xff] }
0x14a5   : > { %7312 = vmatprep.subr.bf16.mxu0 %v10767_v14 }
0x14a7   : > { %7370 = vmatpush2.bf16.msra.mxu1 %v10736_v22  ;;  %p11086_p7 = scmp.ne.s32.totalorder %s15493_s21, 2 }
0x14a8   : > { %7313 = vmatpush2.bf16.msra.mxu0 %v10766_v15  ;;  %7371 = vmatprep.subr.bf16.mxu1 %v10721_v1 }
0x14a9   : > { %7314 = vmatprep.subr.bf16.mxu0 %v10751_v55 }
0x14ab   : > { %7372 = vmatpush2.bf16.msra.mxu1 %v10720_v37 }
0x14ac   : > { %7315 = vmatpush2.bf16.msra.mxu0 %v10750_v58  ;;  %7373 = vmatprep.subr.bf16.mxu1 %v10705_v46  ;;  %v5752_v46 = vld [vmem:[%s13490_s7 + $0x290] sm:$0xff] }
0x14ad   : > { %7316 = vmatprep.subr.bf16.mxu0 %v10735_v33  ;;  %v5646_v33 = vld [vmem:[%s893_s26] sm:$0x3]  ;;  %s9907_s26 = sld [smem:[#allocation3]] (!%p11086_p7) }
0x14ae   : > { %v14573_v35 = vrot.slane %v5646_v33, %v13651_v40  ;;  %v14576_v3 = vrot.slane %v5646_v33, %v13683_v56  ;;  %v5713_v33 = vld [vmem:[%s13490_s7 + $0x158] sm:$0xff] }
0x14af   : > { %7374 = vmatpush2.bf16.msra.mxu1 %v10704_v43  ;;  %v10677_v43 = vcombine.high %v5769_v30, %v5777_v16 }
0x14b0   : > { %7317 = vmatpush2.bf16.msra.mxu0 %v10734_v44  ;;  %7449 = vmatprep.subr.bf16.mxu1 %v10693_v0  ;;  %v5753_v0 = vld [vmem:[%s13490_s7 + $0x298] sm:$0xff] }
0x14b1   : > { %7318 = vmatprep.subr.bf16.mxu0 %v10719_v18 }
0x14b4   : > { %7319 = vmatpush2.bf16.msra.mxu0 %v10718_v52  ;;  %v5768_v52 = vld [vmem:[%s13490_s7 + $0x310] sm:$0xff] }
0x14b5   : > { %7320 = vmatprep.subr.bf16.mxu0 %v10703_v25 }
0x14b8   : > { %7321 = vmatpush2.bf16.msra.mxu0 %v10702_v7 }
0x14b9   : > { %7396 = vmatprep.subr.bf16.mxu0 %v10691_v9  ;;  %v5760_v9 = vld [vmem:[%s13490_s7 + $0x2d0] sm:$0xff] }
0x14ba   : > { %v10658_v36 = vcombine.low %v5752_v46, %v5760_v9 }
0x151b   : > { %v5596_v49 = vpop.xlane.xlu1 %5595 }
0x151c   : > { %v5606_v62 = vmul.f32 0.00390625, %v5596_v49  ;;  %v5761_v49 = vld [vmem:[%s13490_s7 + $0x2d8] sm:$0xff] }
0x151d   : > { %v10660_v38 = vcombine.low %v5753_v0, %v5761_v49 }
0x151e   : > { %v5610_v14 = vadd.f32 1e-05, %v5606_v62 }
0x1520   : > { %12390 = vrsqrt.f32 %v5610_v14  ;;  %v10661_v14 = vcombine.high %v5753_v0, %v5761_v49  ;;  %v5672_v0 = vld [vmem:[%s13490_s7 + $0x10] sm:$0xff] }
0x1521   : > { %v5569_v12 = vpop.xlane.xlu0 %5568 }
0x1522   : > { %v5576_v41 = vmul.f32 0.00390625, %v5569_v12  ;;  %v10676_v12 = vcombine.low %v5769_v30, %v5777_v16 }
0x1524   : > { %v14541_v27 = vsub.f32 %v14456_v21, %v5576_v41  ;;  %v14544_v15 = vsub.f32 %v14458_v23, %v5576_v41  ;;  %v10659_v41 = vcombine.high %v5752_v46, %v5760_v9 }
0x1525   : > { %v5572_v31 = vpop.xlane.xlu0 %5571 }
0x1526   : > { %v5590_v59 = vmul.f32 %v14541_v27, %v14541_v27  ;;  %v5591_v54 = vmul.f32 %v14544_v15, %v14544_v15  ;;  %v5577_v19 = vmul.f32 0.00390625, %v5572_v31  ;;  %v5736_v31 = vld [vmem:[%s13490_s7 + $0x210] sm:$0xff] }
0x1528   : > { %v14551_v28 = vsub.f32 %v14470_v24, %v5577_v19  ;;  %v14554_v21 = vsub.f32 %v14472_v8, %v5577_v19  ;;  %v5600_v55 = vadd.f32 %v5591_v54, %v5590_v59  ;;  %v14563_v8 = vrot.slane %v5626_v45, %v13651_v40  ;;  %v5744_v59 = vld [vmem:[%s13490_s7 + $0x250] sm:$0xff]  ;;  %v5737_v54 = vld [vmem:[%s13490_s7 + $0x218] sm:$0xff] }
0x1529   : > { %v5599_v23 = vpop.xlane.xlu0 %5598  ;;  %v5745_v19 = vld [vmem:[%s13490_s7 + $0x258] sm:$0xff]  ;;  %v10643_v61 = vcombine.high %v5736_v31, %v5744_v59 }
0x152a   : > { %v5592_v29 = vmul.f32 %v14551_v28, %v14551_v28  ;;  %v5593_v58 = vmul.f32 %v14554_v21, %v14554_v21  ;;  %v5607_v32 = vmul.f32 0.00390625, %v5599_v23  ;;  %5601 = vadd.xlane.f32.xlu1 %v5600_v55  ;;  %v5721_v55 = vld [vmem:[%s13490_s7 + $0x198] sm:$0xff] }
0x152b   : > { %v5729_v23 = vld [vmem:[%s13490_s7 + $0x1d8] sm:$0xff] }
0x152c   : > { %v5611_v20 = vadd.f32 1e-05, %v5607_v32  ;;  %v5603_v2 = vadd.f32 %v5593_v58, %v5592_v29  ;;  %v10642_v29 = vcombine.low %v5736_v31, %v5744_v59  ;;  %v10644_v58 = vcombine.low %v5737_v54, %v5745_v19  ;;  %v5705_v45 = vld [vmem:[%s13490_s7 + $0x118] sm:$0xff] }
0x152d   : > { %v12391_v24 = vpop.eup %12390  ;;  %v10612_v30 = vcombine.low %v5705_v45, %v5713_v33 }
0x152e   : > { %12392 = vrsqrt.f32 %v5611_v20  ;;  %5604 = vadd.xlane.f32.xlu0 %v5603_v2  ;;  %v5618_v34 = vmul.f32 %v12391_v24, %v14445_v60  ;;  %v5619_v44 = vmul.f32 %v12391_v24, %v14448_v57  ;;  %v10629_v20 = vcombine.high %v5721_v55, %v5729_v23  ;;  %v5704_v2 = vld [vmem:[%s13490_s7 + $0x110] sm:$0xff] }
0x152f   : > { %v5712_v24 = vld [vmem:[%s13490_s7 + $0x150] sm:$0xff] }
0x1530   : > { %v5638_v6 = vmul.f32 %v14563_v8, %v5618_v34  ;;  %v5639_v48 = vmul.f32 %v14566_v53, %v5619_v44  ;;  %v10628_v44 = vcombine.low %v5721_v55, %v5729_v23  ;;  %v5896_v23 = vld [vmem:[%s13490_s7 + $0x710] sm:$0xff] }
0x1532   : > { %v14586_v37 = vadd.f32 %v14573_v35, %v5638_v6  ;;  %v14589_v1 = vadd.f32 %v14576_v3, %v5639_v48  ;;  %v10613_v6 = vcombine.high %v5705_v45, %v5713_v33  ;;  %v5688_v48 = vld [vmem:[%s13490_s7 + $0x90] sm:$0xff] }
0x1533   : > { %v5880_v33 = vld [vmem:[%s13490_s7 + $0x690] sm:$0xff] }
0x1534   : > { %15472 = vst [vmem:[#allocation36_spill] sm:$0xff] %v14586_v37  ;;  %15473 = vst [vmem:[#allocation37_spill] sm:$0xff] %v14589_v1 }
0x153b   : > { %v12393_v22 = vpop.eup %12392 }
0x153c   : > { %v5620_v18 = vmul.f32 %v12393_v22, %v14462_v4  ;;  %v5621_v60 = vmul.f32 %v12393_v22, %v14465_v26  ;;  %v5776_v26 = vld [vmem:[%s13490_s7 + $0x350] sm:$0xff]  ;;  %v10611_v22 = vcombine.high %v5704_v2, %v5712_v24 }
0x153d   : > { %v10675_v7 = vcombine.high %v5768_v52, %v5776_v26  ;;  %v10674_v62 = vcombine.low %v5768_v52, %v5776_v26  ;;  %v14642_v52 = vld [vmem:[%s13490_s7 + $0x3e0] sm:$0xff]  ;;  %v10610_v26 = vcombine.low %v5704_v2, %v5712_v24 }
0x153e   : > { %v5640_v57 = vmul.f32 %v14563_v8, %v5620_v18  ;;  %v5641_v10 = vmul.f32 %v14566_v53, %v5621_v60  ;;  %v5696_v18 = vld [vmem:[%s13490_s7 + $0xd0] sm:$0xff]  ;;  %v5689_v60 = vld [vmem:[%s13490_s7 + $0x98] sm:$0xff] }
0x153f   : > { %v10595_v46 = vcombine.high %v5688_v48, %v5696_v18 }
0x1540   : > { %v14592_v47 = vadd.f32 %v14573_v35, %v5640_v57  ;;  %v14595_v4 = vadd.f32 %v14576_v3, %v5641_v10  ;;  %v5697_v57 = vld [vmem:[%s13490_s7 + $0xd8] sm:$0xff]  ;;  %v14639_v10 = vld [vmem:[%s13490_s7 + $0x3a0] sm:$0xff] }
0x1541   : > { %v10694_v16 = vcombine.low %v14639_v10, %v14642_v52  ;;  %v10597_v9 = vcombine.high %v5689_v60, %v5697_v57  ;;  %v10596_v31 = vcombine.low %v5689_v60, %v5697_v57  ;;  %v5864_v57 = vld [vmem:[%s13490_s7 + $0x610] sm:$0xff] }
0x1542   : > { %15474 = vst [vmem:[#allocation38_spill] sm:$0xff] %v14592_v47  ;;  %15475 = vst [vmem:[#allocation39_spill] sm:$0xff] %v14595_v4  ;;  %v14602_v25 = vpack.c.bf16 %v14592_v47, %v14586_v37  ;;  %v14606_v13 = vpack.c.bf16 %v14595_v4, %v14589_v1 }
0x1544   : > { %7322 = vmatprep.mubr.bf16.mxu0 %v14606_v13  ;;  %7375 = vmatprep.mubr.bf16.mxu1 %v14606_v13 }
0x1545   : > { %7323 = vmatmul.mubr.bf16.vlgmr.msra.gmra.mxu0 %v14602_v25  ;;  %7376 = vmatmul.mubr.bf16.vlgmr.msra.gmra.mxu1 %v14602_v25 }
0x1546   : > { %7397 = vmatpush1.bf16.msra.mxu0 %v10690_v63  ;;  %7450 = vmatpush1.bf16.msra.mxu1 %v10692_v5  ;;  %v10645_v63 = vcombine.high %v5737_v54, %v5745_v19  ;;  %v5728_v5 = vld [vmem:[%s13490_s7 + $0x1d0] sm:$0xff] }
0x1547   : > { %7398 = vmatprep.subr.bf16.mxu0 %v10675_v7  ;;  %7451 = vmatprep.subr.bf16.mxu1 %v10677_v43  ;;  %v10627_v32 = vcombine.high %v5720_v50, %v5728_v5  ;;  %v10626_v34 = vcombine.low %v5720_v50, %v5728_v5  ;;  %v14647_v7 = vld [vmem:[%s13490_s7 + $0x3a8] sm:$0xff]  ;;  %v5912_v19 = vld [vmem:[%s13490_s7 + $0x790] sm:$0xff] }
0x1548   : > { %v14650_v43 = vld [vmem:[%s13490_s7 + $0x3e8] sm:$0xff] }
0x1549   : > { %v10696_v49 = vcombine.low %v14647_v7, %v14650_v43 }
0x154a   : > { %7399 = vmatpush1.bf16.msra.mxu0 %v10674_v62  ;;  %7452 = vmatpush1.bf16.msra.mxu1 %v10676_v12  ;;  %v5680_v62 = vld [vmem:[%s13490_s7 + $0x50] sm:$0xff]  ;;  %v5673_v12 = vld [vmem:[%s13490_s7 + $0x18] sm:$0xff] }
0x154b   : > { %7400 = vmatprep.subr.bf16.mxu0 %v10659_v41  ;;  %7453 = vmatprep.subr.bf16.mxu1 %v10661_v14  ;;  %v5681_v41 = vld [vmem:[%s13490_s7 + $0x58] sm:$0xff]  ;;  %v10594_v14 = vcombine.low %v5688_v48, %v5696_v18  ;;  %v10579_v59 = vcombine.high %v5672_v0, %v5680_v62 }
0x154c   : > { %v10581_v54 = vcombine.high %v5673_v12, %v5681_v41  ;;  %v10580_v50 = vcombine.low %v5673_v12, %v5681_v41  ;;  %v5848_v41 = vld [vmem:[%s13490_s7 + $0x590] sm:$0xff] }
0x154e   : > { %7401 = vmatpush1.bf16.msra.mxu0 %v10658_v36  ;;  %7454 = vmatpush1.bf16.msra.mxu1 %v10660_v38  ;;  %v5920_v36 = vld [vmem:[%s13490_s7 + $0x7d0] sm:$0xff]  ;;  %v5913_v38 = vld [vmem:[%s13490_s7 + $0x798] sm:$0xff] }
0x154f   : > { %7402 = vmatprep.subr.bf16.mxu0 %v10643_v61  ;;  %7455 = vmatprep.subr.bf16.mxu1 %v10645_v63  ;;  %v5921_v61 = vld [vmem:[%s13490_s7 + $0x7d8] sm:$0xff]  ;;  %v10578_v63 = vcombine.low %v5672_v0, %v5680_v62  ;;  %v10819_v5 = vcombine.high %v5912_v19, %v5920_v36 }
0x1550   : > { %v10821_v55 = vcombine.high %v5913_v38, %v5921_v61  ;;  %v10820_v2 = vcombine.low %v5913_v38, %v5921_v61  ;;  %v5832_v61 = vld [vmem:[%s13490_s7 + $0x510] sm:$0xff] }
0x1552   : > { %7403 = vmatpush1.bf16.msra.mxu0 %v10642_v29  ;;  %7456 = vmatpush1.bf16.msra.mxu1 %v10644_v58  ;;  %v5904_v29 = vld [vmem:[%s13490_s7 + $0x750] sm:$0xff]  ;;  %v5897_v58 = vld [vmem:[%s13490_s7 + $0x718] sm:$0xff] }
0x1553   : > { %7404 = vmatprep.subr.bf16.mxu0 %v10627_v32  ;;  %7457 = vmatprep.subr.bf16.mxu1 %v10629_v20  ;;  %v5905_v32 = vld [vmem:[%s13490_s7 + $0x758] sm:$0xff]  ;;  %v10818_v20 = vcombine.low %v5912_v19, %v5920_v36  ;;  %v10803_v24 = vcombine.high %v5896_v23, %v5904_v29 }
0x1554   : > { %v10805_v45 = vcombine.high %v5897_v58, %v5905_v32  ;;  %v10804_v48 = vcombine.low %v5897_v58, %v5905_v32  ;;  %v5816_v32 = vld [vmem:[%s13490_s7 + $0x490] sm:$0xff] }
0x1556   : > { %7405 = vmatpush1.bf16.msra.mxu0 %v10626_v34  ;;  %7458 = vmatpush1.bf16.msra.mxu1 %v10628_v44  ;;  %v5888_v34 = vld [vmem:[%s13490_s7 + $0x6d0] sm:$0xff]  ;;  %v5881_v44 = vld [vmem:[%s13490_s7 + $0x698] sm:$0xff] }
0x1557   : > { %7406 = vmatprep.subr.bf16.mxu0 %v10611_v22  ;;  %7459 = vmatprep.subr.bf16.mxu1 %v10613_v6  ;;  %v5889_v22 = vld [vmem:[%s13490_s7 + $0x6d8] sm:$0xff]  ;;  %v10802_v6 = vcombine.low %v5896_v23, %v5904_v29  ;;  %v10787_v18 = vcombine.high %v5880_v33, %v5888_v34 }
0x1558   : > { %v10789_v60 = vcombine.high %v5881_v44, %v5889_v22  ;;  %v10788_v0 = vcombine.low %v5881_v44, %v5889_v22  ;;  %v5800_v22 = vld [vmem:[%s13490_s7 + $0x410] sm:$0xff] }
0x155a   : > { %7407 = vmatpush1.bf16.msra.mxu0 %v10610_v26  ;;  %7460 = vmatpush1.bf16.msra.mxu1 %v10612_v30  ;;  %v5872_v26 = vld [vmem:[%s13490_s7 + $0x650] sm:$0xff]  ;;  %v5865_v30 = vld [vmem:[%s13490_s7 + $0x618] sm:$0xff] }
0x155b   : > { %7408 = vmatprep.subr.bf16.mxu0 %v10595_v46  ;;  %7461 = vmatprep.subr.bf16.mxu1 %v10597_v9  ;;  %v5873_v46 = vld [vmem:[%s13490_s7 + $0x658] sm:$0xff]  ;;  %v10786_v9 = vcombine.low %v5880_v33, %v5888_v34  ;;  %v10771_v62 = vcombine.high %v5864_v57, %v5872_v26 }
0x155c   : > { %v10773_v12 = vcombine.high %v5865_v30, %v5873_v46  ;;  %v10772_v19 = vcombine.low %v5865_v30, %v5873_v46 }
0x155e   : > { %7409 = vmatpush1.bf16.msra.mxu0 %v10594_v14  ;;  %7462 = vmatpush1.bf16.msra.mxu1 %v10596_v31  ;;  %v5856_v14 = vld [vmem:[%s13490_s7 + $0x5d0] sm:$0xff]  ;;  %v5849_v31 = vld [vmem:[%s13490_s7 + $0x598] sm:$0xff] }
0x155f   : > { %7410 = vmatprep.subr.bf16.mxu0 %v10579_v59  ;;  %7463 = vmatprep.subr.bf16.mxu1 %v10581_v54  ;;  %v5857_v59 = vld [vmem:[%s13490_s7 + $0x5d8] sm:$0xff]  ;;  %v10770_v54 = vcombine.low %v5864_v57, %v5872_v26  ;;  %v10755_v36 = vcombine.high %v5848_v41, %v5856_v14 }
0x1560   : > { %v10757_v38 = vcombine.high %v5849_v31, %v5857_v59  ;;  %v10756_v23 = vcombine.low %v5849_v31, %v5857_v59 }
0x1562   : > { %7411 = vmatpush1.bf16.msra.mxu0 %v10578_v63  ;;  %7464 = vmatpush1.bf16.msra.mxu1 %v10580_v50  ;;  %v5840_v63 = vld [vmem:[%s13490_s7 + $0x550] sm:$0xff]  ;;  %v5833_v50 = vld [vmem:[%s13490_s7 + $0x518] sm:$0xff] }
0x1563   : > { %7412 = vmatprep.subr.bf16.mxu0 %v10819_v5  ;;  %7465 = vmatprep.subr.bf16.mxu1 %v10821_v55  ;;  %v5841_v5 = vld [vmem:[%s13490_s7 + $0x558] sm:$0xff]  ;;  %v10754_v55 = vcombine.low %v5848_v41, %v5856_v14  ;;  %v10739_v29 = vcombine.high %v5832_v61, %v5840_v63 }
0x1564   : > { %v10741_v58 = vcombine.high %v5833_v50, %v5841_v5  ;;  %v10740_v33 = vcombine.low %v5833_v50, %v5841_v5 }
0x1566   : > { %7413 = vmatpush2.bf16.msra.mxu0 %v10818_v20  ;;  %7466 = vmatpush2.bf16.msra.mxu1 %v10820_v2  ;;  %v5824_v20 = vld [vmem:[%s13490_s7 + $0x4d0] sm:$0xff]  ;;  %v5817_v2 = vld [vmem:[%s13490_s7 + $0x498] sm:$0xff] }
0x1567   : > { %7414 = vmatprep.subr.bf16.mxu0 %v10803_v24  ;;  %7467 = vmatprep.subr.bf16.mxu1 %v10805_v45  ;;  %v5825_v24 = vld [vmem:[%s13490_s7 + $0x4d8] sm:$0xff]  ;;  %v10738_v45 = vcombine.low %v5832_v61, %v5840_v63  ;;  %v10723_v34 = vcombine.high %v5816_v32, %v5824_v20 }
0x1568   : > { %v10725_v44 = vcombine.high %v5817_v2, %v5825_v24  ;;  %v10724_v57 = vcombine.low %v5817_v2, %v5825_v24 }
0x156a   : > { %7415 = vmatpush2.bf16.msra.mxu0 %v10802_v6  ;;  %7468 = vmatpush2.bf16.msra.mxu1 %v10804_v48  ;;  %v5808_v6 = vld [vmem:[%s13490_s7 + $0x450] sm:$0xff]  ;;  %v5801_v48 = vld [vmem:[%s13490_s7 + $0x418] sm:$0xff] }
0x156b   : > { %7416 = vmatprep.subr.bf16.mxu0 %v10787_v18  ;;  %7469 = vmatprep.subr.bf16.mxu1 %v10789_v60  ;;  %v5809_v18 = vld [vmem:[%s13490_s7 + $0x458] sm:$0xff]  ;;  %v10722_v60 = vcombine.low %v5816_v32, %v5824_v20  ;;  %v10707_v26 = vcombine.high %v5800_v22, %v5808_v6  ;;  %v10706_v46 = vcombine.low %v5800_v22, %v5808_v6  ;;  %v5779_v32 = vld [vmem:[%s13490_s7 + $0x368] sm:$0xff]  ;;  %v5754_v20 = vld [vmem:[%s13490_s7 + $0x2a0] sm:$0xff] }
0x156c   : > { %v10709_v30 = vcombine.high %v5801_v48, %v5809_v18 }
0x156e   : > { %7417 = vmatpush2.bf16.msra.mxu0 %v10786_v9  ;;  %7470 = vmatpush2.bf16.msra.mxu1 %v10788_v0  ;;  %v10708_v9 = vcombine.low %v5801_v48, %v5809_v18  ;;  %v10695_v0 = vcombine.high %v14639_v10, %v14642_v52  ;;  %v5738_v10 = vld [vmem:[%s13490_s7 + $0x220] sm:$0xff]  ;;  %v5747_v18 = vld [vmem:[%s13490_s7 + $0x268] sm:$0xff] }
0x156f   : > { %7418 = vmatprep.subr.bf16.mxu0 %v10771_v62  ;;  %7471 = vmatprep.subr.bf16.mxu1 %v10773_v12  ;;  %v10697_v62 = vcombine.high %v14647_v7, %v14650_v43  ;;  %v5746_v52 = vld [vmem:[%s13490_s7 + $0x260] sm:$0xff] }
0x1572   : > { %7419 = vmatpush2.bf16.msra.mxu0 %v10770_v54  ;;  %7472 = vmatpush2.bf16.msra.mxu1 %v10772_v19 }
0x1573   : > { %7420 = vmatprep.subr.bf16.mxu0 %v10755_v36  ;;  %7473 = vmatprep.subr.bf16.mxu1 %v10757_v38 }
0x1576   : > { %7421 = vmatpush2.bf16.msra.mxu0 %v10754_v55  ;;  %7474 = vmatpush2.bf16.msra.mxu1 %v10756_v23 }
0x1577   : > { %7422 = vmatprep.subr.bf16.mxu0 %v10739_v29  ;;  %7475 = vmatprep.subr.bf16.mxu1 %v10741_v58 }
0x157a   : > { %7423 = vmatpush2.bf16.msra.mxu0 %v10738_v45  ;;  %7476 = vmatpush2.bf16.msra.mxu1 %v10740_v33  ;;  %v5762_v45 = vld [vmem:[%s13490_s7 + $0x2e0] sm:$0xff]  ;;  %v5755_v33 = vld [vmem:[%s13490_s7 + $0x2a8] sm:$0xff] }
0x157b   : > { %7424 = vmatprep.subr.bf16.mxu0 %v10723_v34  ;;  %7477 = vmatprep.subr.bf16.mxu1 %v10725_v44  ;;  %v5763_v34 = vld [vmem:[%s13490_s7 + $0x2e8] sm:$0xff]  ;;  %v10663_v6 = vcombine.high %v5754_v20, %v5762_v45  ;;  %v10662_v7 = vcombine.low %v5754_v20, %v5762_v45 }
0x157c   : > { %v10665_v48 = vcombine.high %v5755_v33, %v5763_v34  ;;  %v10664_v43 = vcombine.low %v5755_v33, %v5763_v34  ;;  %v5683_v20 = vld [vmem:[%s13490_s7 + $0x68] sm:$0xff]  ;;  %v5914_v34 = vld [vmem:[%s13490_s7 + $0x7a0] sm:$0xff] }
0x157e   : > { %7425 = vmatpush2.bf16.msra.mxu0 %v10722_v60  ;;  %7478 = vmatpush2.bf16.msra.mxu1 %v10724_v57  ;;  %v10647_v60 = vcombine.high %v5738_v10, %v5746_v52 }
0x157f   : > { %7426 = vmatprep.subr.bf16.mxu0 %v10707_v26  ;;  %7479 = vmatprep.subr.bf16.mxu1 %v10709_v30  ;;  %v5730_v26 = vld [vmem:[%s13490_s7 + $0x1e0] sm:$0xff]  ;;  %v5723_v30 = vld [vmem:[%s13490_s7 + $0x1a8] sm:$0xff] }
0x1582   : > { %7427 = vmatpush2.bf16.msra.mxu0 %v10706_v46  ;;  %7480 = vmatpush2.bf16.msra.mxu1 %v10708_v9  ;;  %v5731_v46 = vld [vmem:[%s13490_s7 + $0x1e8] sm:$0xff]  ;;  %v10646_v9 = vcombine.low %v5738_v10, %v5746_v52 }
0x1583   : > { %7502 = vmatprep.subr.bf16.mxu0 %v10695_v0  ;;  %7555 = vmatprep.subr.bf16.mxu1 %v10697_v62 }
0x15b3   : > { %v5602_v12 = vpop.xlane.xlu1 %5601 }
0x15b4   : > { %v5608_v41 = vmul.f32 0.00390625, %v5602_v12  ;;  %v10633_v12 = vcombine.high %v5723_v30, %v5731_v46 }
0x15b6   : > { %v5612_v14 = vadd.f32 1e-05, %v5608_v41  ;;  %v5706_v41 = vld [vmem:[%s13490_s7 + $0x120] sm:$0xff] }
0x15b7   : > { %v5605_v31 = vpop.xlane.xlu0 %5604 }
0x15b8   : > { %12394 = vrsqrt.f32 %v5612_v14  ;;  %v5609_v59 = vmul.f32 0.00390625, %v5605_v31  ;;  %v5714_v14 = vld [vmem:[%s13490_s7 + $0x160] sm:$0xff]  ;;  %v5707_v31 = vld [vmem:[%s13490_s7 + $0x128] sm:$0xff] }
0x15ba   : > { %v5613_v54 = vadd.f32 1e-05, %v5609_v59  ;;  %v5715_v59 = vld [vmem:[%s13490_s7 + $0x168] sm:$0xff] }
0x15bc   : > { %12396 = vrsqrt.f32 %v5613_v54 }
0x15c5   : > { %v12395_v19 = vpop.eup %12394 }
0x15c6   : > { %v5622_v36 = vmul.f32 %v12395_v19, %v14541_v27  ;;  %v5623_v38 = vmul.f32 %v12395_v19, %v14544_v15  ;;  %v10632_v19 = vcombine.low %v5723_v30, %v5731_v46  ;;  %v5882_v46 = vld [vmem:[%s13490_s7 + $0x6a0] sm:$0xff] }
0x15c8   : > { %v5642_v63 = vmul.f32 %v14563_v8, %v5622_v36  ;;  %v5643_v50 = vmul.f32 %v14566_v53, %v5623_v38  ;;  %v10615_v36 = vcombine.high %v5706_v41, %v5714_v14  ;;  %v10617_v38 = vcombine.high %v5707_v31, %v5715_v59 }
0x15c9   : > { %v12397_v61 = vpop.eup %12396 }
0x15ca   : > { %v5624_v5 = vmul.f32 %v12397_v61, %v14551_v28  ;;  %v5625_v55 = vmul.f32 %v12397_v61, %v14554_v21  ;;  %v14703_v27 = vadd.f32 %v14573_v35, %v5642_v63  ;;  %v14706_v15 = vadd.f32 %v14576_v3, %v5643_v50  ;;  %v5690_v61 = vld [vmem:[%s13490_s7 + $0xa0] sm:$0xff]  ;;  %v5691_v50 = vld [vmem:[%s13490_s7 + $0xa8] sm:$0xff] }
0x15cb   : > { %v5698_v63 = vld [vmem:[%s13490_s7 + $0xe0] sm:$0xff] }
0x15cc   : > { %v5644_v23 = vmul.f32 %v14563_v8, %v5624_v5  ;;  %v5645_v29 = vmul.f32 %v14566_v53, %v5625_v55  ;;  %15476 = vst [vmem:[#allocation40_spill] sm:$0xff] %v14703_v27  ;;  %15477 = vst [vmem:[#allocation41_spill] sm:$0xff] %v14706_v15  ;;  %v5770_v53 = vld [vmem:[%s13490_s7 + $0x320] sm:$0xff]  ;;  %v5699_v5 = vld [vmem:[%s13490_s7 + $0xe8] sm:$0xff]  ;;  %v10614_v55 = vcombine.low %v5706_v41, %v5714_v14 }
0x15ce   : > { %v14709_v58 = vadd.f32 %v14573_v35, %v5644_v23  ;;  %v14712_v28 = vadd.f32 %v14576_v3, %v5645_v29  ;;  %v5778_v35 = vld [vmem:[%s13490_s7 + $0x360] sm:$0xff]  ;;  %v5771_v3 = vld [vmem:[%s13490_s7 + $0x328] sm:$0xff]  ;;  %v10616_v23 = vcombine.low %v5707_v31, %v5715_v59  ;;  %v10599_v29 = vcombine.high %v5690_v61, %v5698_v63 }
0x15cf   : > { %v10679_v2 = vcombine.high %v5770_v53, %v5778_v35  ;;  %v10681_v24 = vcombine.high %v5771_v3, %v5779_v32  ;;  %v10678_v44 = vcombine.low %v5770_v53, %v5778_v35  ;;  %v10680_v22 = vcombine.low %v5771_v3, %v5779_v32  ;;  %v5674_v35 = vld [vmem:[%s13490_s7 + $0x20] sm:$0xff]  ;;  %v5675_v32 = vld [vmem:[%s13490_s7 + $0x28] sm:$0xff] }
0x15d0   : > { %15478 = vst [vmem:[#allocation42_spill] sm:$0xff] %v14709_v58  ;;  %15479 = vst [vmem:[#allocation43_spill] sm:$0xff] %v14712_v28  ;;  %v14716_v21 = vpack.c.bf16 %v14709_v58, %v14703_v27  ;;  %v14720_v8 = vpack.c.bf16 %v14712_v28, %v14706_v15  ;;  %v10601_v53 = vcombine.high %v5691_v50, %v5699_v5  ;;  %v5682_v3 = vld [vmem:[%s13490_s7 + $0x60] sm:$0xff] }
0x15d1   : > { %v10583_v45 = vcombine.high %v5674_v35, %v5682_v3  ;;  %v10585_v33 = vcombine.high %v5675_v32, %v5683_v20  ;;  %v10584_v10 = vcombine.low %v5675_v32, %v5683_v20  ;;  %v5866_v59 = vld [vmem:[%s13490_s7 + $0x620] sm:$0xff] }
0x15d2   : > { %7332 = vmatprep.mubr.bf16.mxu0 %v14720_v8  ;;  %7385 = vmatprep.mubr.bf16.mxu1 %v14720_v8  ;;  %v5834_v20 = vld [vmem:[%s13490_s7 + $0x520] sm:$0xff] }
0x15d3   : > { %7333 = vmatmul.mubr.bf16.gmra.mxu0 %v14716_v21  ;;  %7386 = vmatmul.mubr.bf16.gmra.mxu1 %v14716_v21 }
0x15d4   : > { %7428 = vmatprep.mubr.bf16.mxu0 %v14606_v13  ;;  %7481 = vmatprep.mubr.bf16.mxu1 %v14606_v13 }
0x15db   : > { %7429 = vmatmul.mubr.bf16.vlgmr.msra.gmra.mxu0 %v14602_v25  ;;  %7482 = vmatmul.mubr.bf16.vlgmr.msra.gmra.mxu1 %v14602_v25 }
0x15dc   : > { %7503 = vmatpush1.bf16.msra.mxu0 %v10694_v16  ;;  %7556 = vmatpush1.bf16.msra.mxu1 %v10696_v49  ;;  %v5739_v16 = vld [vmem:[%s13490_s7 + $0x228] sm:$0xff]  ;;  %v5722_v49 = vld [vmem:[%s13490_s7 + $0x1a0] sm:$0xff] }
0x15dd   : > { %7438 = vmatprep.mubr.bf16.mxu0 %v14720_v8  ;;  %7491 = vmatprep.mubr.bf16.mxu1 %v14720_v8  ;;  %v10649_v57 = vcombine.high %v5739_v16, %v5747_v18  ;;  %v10648_v0 = vcombine.low %v5739_v16, %v5747_v18  ;;  %v10631_v62 = vcombine.high %v5722_v49, %v5730_v26  ;;  %v5898_v18 = vld [vmem:[%s13490_s7 + $0x720] sm:$0xff] }
0x15de   : > { %7504 = vmatprep.subr.bf16.mxu0 %v10679_v2  ;;  %7557 = vmatprep.subr.bf16.mxu1 %v10681_v24  ;;  %v10630_v54 = vcombine.low %v5722_v49, %v5730_v26  ;;  %v10598_v2 = vcombine.low %v5690_v61, %v5698_v63  ;;  %v10600_v24 = vcombine.low %v5691_v50, %v5699_v5  ;;  %v5907_v49 = vld [vmem:[%s13490_s7 + $0x768] sm:$0xff]  ;;  %v5850_v5 = vld [vmem:[%s13490_s7 + $0x5a0] sm:$0xff] }
0x15e0   : > { %7505 = vmatpush1.bf16.msra.mxu0 %v10678_v44  ;;  %7558 = vmatpush1.bf16.msra.mxu1 %v10680_v22  ;;  %v5922_v44 = vld [vmem:[%s13490_s7 + $0x7e0] sm:$0xff]  ;;  %v5915_v22 = vld [vmem:[%s13490_s7 + $0x7a8] sm:$0xff] }
0x15e1   : > { %7506 = vmatprep.subr.bf16.mxu0 %v10663_v6  ;;  %7559 = vmatprep.subr.bf16.mxu1 %v10665_v48  ;;  %v5923_v6 = vld [vmem:[%s13490_s7 + $0x7e8] sm:$0xff]  ;;  %v10582_v48 = vcombine.low %v5674_v35, %v5682_v3  ;;  %v10823_v52 = vcombine.high %v5914_v34, %v5922_v44 }
0x15e2   : > { %v10825_v16 = vcombine.high %v5915_v22, %v5923_v6 }
0x15e3   : > { %7439 = vmatmul.mubr.bf16.gmra.mxu0 %v14716_v21  ;;  %7492 = vmatmul.mubr.bf16.gmra.mxu1 %v14716_v21 }
0x15e4   : > { %7507 = vmatpush1.bf16.msra.mxu0 %v10662_v7  ;;  %7560 = vmatpush1.bf16.msra.mxu1 %v10664_v43  ;;  %v5906_v7 = vld [vmem:[%s13490_s7 + $0x760] sm:$0xff]  ;;  %v5899_v43 = vld [vmem:[%s13490_s7 + $0x728] sm:$0xff] }
0x15e5   : > { %7534 = vmatprep.mubr.bf16.mxu0 %v14606_v13  ;;  %7587 = vmatprep.mubr.bf16.mxu1 %v14606_v13  ;;  %v10807_v26 = vcombine.high %v5898_v18, %v5906_v7  ;;  %v10809_v30 = vcombine.high %v5899_v43, %v5907_v49  ;;  %v10808_v41 = vcombine.low %v5899_v43, %v5907_v49  ;;  %v5802_v49 = vld [vmem:[%s13490_s7 + $0x420] sm:$0xff] }
0x15e6   : > { %7508 = vmatprep.subr.bf16.mxu0 %v10647_v60  ;;  %7561 = vmatprep.subr.bf16.mxu1 %v10649_v57  ;;  %v10822_v60 = vcombine.low %v5914_v34, %v5922_v44  ;;  %v10824_v57 = vcombine.low %v5915_v22, %v5923_v6  ;;  %v5818_v6 = vld [vmem:[%s13490_s7 + $0x4a0] sm:$0xff] }
0x15e8   : > { %7509 = vmatpush1.bf16.msra.mxu0 %v10646_v9  ;;  %7562 = vmatpush1.bf16.msra.mxu1 %v10648_v0  ;;  %v5890_v9 = vld [vmem:[%s13490_s7 + $0x6e0] sm:$0xff]  ;;  %v5883_v0 = vld [vmem:[%s13490_s7 + $0x6a8] sm:$0xff] }
0x15e9   : > { %7510 = vmatprep.subr.bf16.mxu0 %v10631_v62  ;;  %7563 = vmatprep.subr.bf16.mxu1 %v10633_v12  ;;  %v5891_v62 = vld [vmem:[%s13490_s7 + $0x6e8] sm:$0xff]  ;;  %v10806_v12 = vcombine.low %v5898_v18, %v5906_v7  ;;  %v10791_v14 = vcombine.high %v5882_v46, %v5890_v9 }
0x15ea   : > { %v10793_v31 = vcombine.high %v5883_v0, %v5891_v62  ;;  %v10792_v61 = vcombine.low %v5883_v0, %v5891_v62  ;;  %v5788_v62 = vld [vmem:[%s13490_s7 + $0x3b0] sm:$0xff] }
0x15ec   : > { %7511 = vmatpush1.bf16.msra.mxu0 %v10630_v54  ;;  %7564 = vmatpush1.bf16.msra.mxu1 %v10632_v19  ;;  %v5874_v54 = vld [vmem:[%s13490_s7 + $0x660] sm:$0xff]  ;;  %v5867_v19 = vld [vmem:[%s13490_s7 + $0x628] sm:$0xff] }
0x15ed   : > { %7512 = vmatprep.subr.bf16.mxu0 %v10615_v36  ;;  %7565 = vmatprep.subr.bf16.mxu1 %v10617_v38  ;;  %v5875_v36 = vld [vmem:[%s13490_s7 + $0x668] sm:$0xff]  ;;  %v10790_v38 = vcombine.low %v5882_v46, %v5890_v9  ;;  %v10775_v63 = vcombine.high %v5866_v59, %v5874_v54 }
0x15ee   : > { %v10777_v50 = vcombine.high %v5867_v19, %v5875_v36  ;;  %v10776_v35 = vcombine.low %v5867_v19, %v5875_v36  ;;  %v5772_v36 = vld [vmem:[%s13490_s7 + $0x330] sm:$0xff] }
0x15f0   : > { %7513 = vmatpush1.bf16.msra.mxu0 %v10614_v55  ;;  %7566 = vmatpush1.bf16.msra.mxu1 %v10616_v23  ;;  %v5858_v55 = vld [vmem:[%s13490_s7 + $0x5e0] sm:$0xff]  ;;  %v5851_v23 = vld [vmem:[%s13490_s7 + $0x5a8] sm:$0xff] }
0x15f1   : > { %7514 = vmatprep.subr.bf16.mxu0 %v10599_v29  ;;  %7567 = vmatprep.subr.bf16.mxu1 %v10601_v53  ;;  %v5859_v29 = vld [vmem:[%s13490_s7 + $0x5e8] sm:$0xff]  ;;  %v10774_v53 = vcombine.low %v5866_v59, %v5874_v54  ;;  %v10759_v3 = vcombine.high %v5850_v5, %v5858_v55 }
0x15f2   : > { %v10761_v32 = vcombine.high %v5851_v23, %v5859_v29  ;;  %v10760_v34 = vcombine.low %v5851_v23, %v5859_v29  ;;  %v5756_v29 = vld [vmem:[%s13490_s7 + $0x2b0] sm:$0xff] }
0x15f4   : > { %7515 = vmatpush1.bf16.msra.mxu0 %v10598_v2  ;;  %7568 = vmatpush1.bf16.msra.mxu1 %v10600_v24  ;;  %v5842_v2 = vld [vmem:[%s13490_s7 + $0x560] sm:$0xff]  ;;  %v5835_v24 = vld [vmem:[%s13490_s7 + $0x528] sm:$0xff] }
0x15f5   : > { %7516 = vmatprep.subr.bf16.mxu0 %v10583_v45  ;;  %7569 = vmatprep.subr.bf16.mxu1 %v10585_v33  ;;  %v5843_v45 = vld [vmem:[%s13490_s7 + $0x568] sm:$0xff]  ;;  %v10758_v33 = vcombine.low %v5850_v5, %v5858_v55  ;;  %v10743_v44 = vcombine.high %v5834_v20, %v5842_v2 }
0x15f6   : > { %v10745_v22 = vcombine.high %v5835_v24, %v5843_v45  ;;  %v10744_v18 = vcombine.low %v5835_v24, %v5843_v45  ;;  %v5740_v45 = vld [vmem:[%s13490_s7 + $0x230] sm:$0xff] }
0x15f8   : > { %7517 = vmatpush1.bf16.msra.mxu0 %v10582_v48  ;;  %7570 = vmatpush1.bf16.msra.mxu1 %v10584_v10  ;;  %v5826_v48 = vld [vmem:[%s13490_s7 + $0x4e0] sm:$0xff]  ;;  %v5819_v10 = vld [vmem:[%s13490_s7 + $0x4a8] sm:$0xff] }
0x15f9   : > { %7518 = vmatprep.subr.bf16.mxu0 %v10823_v52  ;;  %7571 = vmatprep.subr.bf16.mxu1 %v10825_v16  ;;  %v5827_v52 = vld [vmem:[%s13490_s7 + $0x4e8] sm:$0xff]  ;;  %v10742_v16 = vcombine.low %v5834_v20, %v5842_v2  ;;  %v10727_v7 = vcombine.high %v5818_v6, %v5826_v48 }
0x15fa   : > { %v10729_v43 = vcombine.high %v5819_v10, %v5827_v52  ;;  %v10728_v46 = vcombine.low %v5819_v10, %v5827_v52  ;;  %v5724_v52 = vld [vmem:[%s13490_s7 + $0x1b0] sm:$0xff] }
0x15fc   : > { %7519 = vmatpush2.bf16.msra.mxu0 %v10822_v60  ;;  %7572 = vmatpush2.bf16.msra.mxu1 %v10824_v57  ;;  %v5810_v60 = vld [vmem:[%s13490_s7 + $0x460] sm:$0xff]  ;;  %v5803_v57 = vld [vmem:[%s13490_s7 + $0x428] sm:$0xff] }
0x15fd   : > { %7520 = vmatprep.subr.bf16.mxu0 %v10807_v26  ;;  %7573 = vmatprep.subr.bf16.mxu1 %v10809_v30  ;;  %v5811_v26 = vld [vmem:[%s13490_s7 + $0x468] sm:$0xff]  ;;  %v10726_v30 = vcombine.low %v5818_v6, %v5826_v48  ;;  %v10711_v9 = vcombine.high %v5802_v49, %v5810_v60 }
0x15fe   : > { %v10713_v0 = vcombine.high %v5803_v57, %v5811_v26  ;;  %v10712_v59 = vcombine.low %v5803_v57, %v5811_v26  ;;  %v5708_v26 = vld [vmem:[%s13490_s7 + $0x130] sm:$0xff] }
0x1600   : > { %7521 = vmatpush2.bf16.msra.mxu0 %v10806_v12  ;;  %7574 = vmatpush2.bf16.msra.mxu1 %v10808_v41  ;;  %v5796_v12 = vld [vmem:[%s13490_s7 + $0x3f0] sm:$0xff]  ;;  %v5789_v41 = vld [vmem:[%s13490_s7 + $0x3b8] sm:$0xff] }
0x1601   : > { %7522 = vmatprep.subr.bf16.mxu0 %v10791_v14  ;;  %7575 = vmatprep.subr.bf16.mxu1 %v10793_v31  ;;  %v5797_v14 = vld [vmem:[%s13490_s7 + $0x3f8] sm:$0xff]  ;;  %v10710_v31 = vcombine.low %v5802_v49, %v5810_v60  ;;  %v10699_v54 = vcombine.high %v5788_v62, %v5796_v12 }
0x1602   : > { %v10701_v19 = vcombine.high %v5789_v41, %v5797_v14  ;;  %v10700_v5 = vcombine.low %v5789_v41, %v5797_v14  ;;  %v5692_v41 = vld [vmem:[%s13490_s7 + $0xb0] sm:$0xff] }
0x1603   : > { %v5700_v14 = vld [vmem:[%s13490_s7 + $0xf0] sm:$0xff] }
0x1604   : > { %7523 = vmatpush2.bf16.msra.mxu0 %v10790_v38  ;;  %7576 = vmatpush2.bf16.msra.mxu1 %v10792_v61  ;;  %v5780_v38 = vld [vmem:[%s13490_s7 + $0x370] sm:$0xff]  ;;  %v5773_v61 = vld [vmem:[%s13490_s7 + $0x338] sm:$0xff] }
0x1605   : > { %7524 = vmatprep.subr.bf16.mxu0 %v10775_v63  ;;  %7577 = vmatprep.subr.bf16.mxu1 %v10777_v50  ;;  %v5781_v63 = vld [vmem:[%s13490_s7 + $0x378] sm:$0xff]  ;;  %v10698_v50 = vcombine.low %v5788_v62, %v5796_v12  ;;  %v10683_v55 = vcombine.high %v5772_v36, %v5780_v38 }
0x1606   : > { %v10685_v23 = vcombine.high %v5773_v61, %v5781_v63  ;;  %v10684_v20 = vcombine.low %v5773_v61, %v5781_v63  ;;  %v5676_v61 = vld [vmem:[%s13490_s7 + $0x30] sm:$0xff] }
0x1607   : > { %v5684_v63 = vld [vmem:[%s13490_s7 + $0x70] sm:$0xff] }
0x1608   : > { %7525 = vmatpush2.bf16.msra.mxu0 %v10774_v53  ;;  %7578 = vmatpush2.bf16.msra.mxu1 %v10776_v35  ;;  %v5764_v53 = vld [vmem:[%s13490_s7 + $0x2f0] sm:$0xff]  ;;  %v5757_v35 = vld [vmem:[%s13490_s7 + $0x2b8] sm:$0xff] }
0x1609   : > { %7526 = vmatprep.subr.bf16.mxu0 %v10759_v3  ;;  %7579 = vmatprep.subr.bf16.mxu1 %v10761_v32  ;;  %v5765_v3 = vld [vmem:[%s13490_s7 + $0x2f8] sm:$0xff]  ;;  %v10682_v32 = vcombine.low %v5772_v36, %v5780_v38  ;;  %v10667_v2 = vcombine.high %v5756_v29, %v5764_v53  ;;  %v10603_v36 = vcombine.high %v5692_v41, %v5700_v14 }
0x160a   : > { %v10669_v24 = vcombine.high %v5757_v35, %v5765_v3  ;;  %v10668_v6 = vcombine.low %v5757_v35, %v5765_v3  ;;  %v5916_v35 = vld [vmem:[%s13490_s7 + $0x7b0] sm:$0xff] }
0x160b   : > { %v5924_v3 = vld [vmem:[%s13490_s7 + $0x7f0] sm:$0xff] }
0x160c   : > { %7527 = vmatpush2.bf16.msra.mxu0 %v10758_v33  ;;  %7580 = vmatpush2.bf16.msra.mxu1 %v10760_v34  ;;  %v5748_v33 = vld [vmem:[%s13490_s7 + $0x270] sm:$0xff]  ;;  %v5741_v34 = vld [vmem:[%s13490_s7 + $0x238] sm:$0xff] }
0x160d   : > { %7528 = vmatprep.subr.bf16.mxu0 %v10743_v44  ;;  %7581 = vmatprep.subr.bf16.mxu1 %v10745_v22  ;;  %v5749_v44 = vld [vmem:[%s13490_s7 + $0x278] sm:$0xff]  ;;  %v10666_v22 = vcombine.low %v5756_v29, %v5764_v53  ;;  %v10651_v48 = vcombine.high %v5740_v45, %v5748_v33  ;;  %v10587_v29 = vcombine.high %v5676_v61, %v5684_v63 }
0x160e   : > { %v10653_v10 = vcombine.high %v5741_v34, %v5749_v44  ;;  %v10652_v49 = vcombine.low %v5741_v34, %v5749_v44  ;;  %v5900_v34 = vld [vmem:[%s13490_s7 + $0x730] sm:$0xff] }
0x160f   : > { %v5908_v44 = vld [vmem:[%s13490_s7 + $0x770] sm:$0xff] }
0x1610   : > { %7529 = vmatpush2.bf16.msra.mxu0 %v10742_v16  ;;  %7582 = vmatpush2.bf16.msra.mxu1 %v10744_v18  ;;  %v5732_v16 = vld [vmem:[%s13490_s7 + $0x1f0] sm:$0xff]  ;;  %v5725_v18 = vld [vmem:[%s13490_s7 + $0x1b8] sm:$0xff] }
0x1611   : > { %7530 = vmatprep.subr.bf16.mxu0 %v10727_v7  ;;  %7583 = vmatprep.subr.bf16.mxu1 %v10729_v43  ;;  %v5733_v7 = vld [vmem:[%s13490_s7 + $0x1f8] sm:$0xff]  ;;  %v10650_v43 = vcombine.low %v5740_v45, %v5748_v33  ;;  %v10635_v60 = vcombine.high %v5724_v52, %v5732_v16  ;;  %v10827_v45 = vcombine.high %v5916_v35, %v5924_v3 }
0x1612   : > { %v10637_v57 = vcombine.high %v5725_v18, %v5733_v7 }
0x1614   : > { %7531 = vmatpush2.bf16.msra.mxu0 %v10726_v30  ;;  %7584 = vmatpush2.bf16.msra.mxu1 %v10728_v46  ;;  %v5716_v30 = vld [vmem:[%s13490_s7 + $0x170] sm:$0xff]  ;;  %v5709_v46 = vld [vmem:[%s13490_s7 + $0x138] sm:$0xff] }
0x1615   : > { %7532 = vmatprep.subr.bf16.mxu0 %v10711_v9  ;;  %7585 = vmatprep.subr.bf16.mxu1 %v10713_v0  ;;  %v5717_v9 = vld [vmem:[%s13490_s7 + $0x178] sm:$0xff]  ;;  %v10634_v0 = vcombine.low %v5724_v52, %v5732_v16  ;;  %v10619_v62 = vcombine.high %v5708_v26, %v5716_v30  ;;  %v10811_v52 = vcombine.high %v5900_v34, %v5908_v44 }
0x1616   : > { %v10621_v12 = vcombine.high %v5709_v46, %v5717_v9 }
0x1618   : > { %7533 = vmatpush2.bf16.msra.mxu0 %v10710_v31  ;;  %7586 = vmatpush2.bf16.msra.mxu1 %v10712_v59  ;;  %v5693_v31 = vld [vmem:[%s13490_s7 + $0xb8] sm:$0xff] }
0x1619   : > { %7608 = vmatprep.subr.bf16.mxu0 %v10699_v54  ;;  %7661 = vmatprep.subr.bf16.mxu1 %v10701_v19  ;;  %v5701_v59 = vld [vmem:[%s13490_s7 + $0xf8] sm:$0xff]  ;;  %v10618_v54 = vcombine.low %v5708_v26, %v5716_v30  ;;  %v10620_v19 = vcombine.low %v5709_v46, %v5717_v9  ;;  %v5868_v46 = vld [vmem:[%s13490_s7 + $0x630] sm:$0xff] }
0x161a   : > { %v10605_v38 = vcombine.high %v5693_v31, %v5701_v59  ;;  %v5876_v9 = vld [vmem:[%s13490_s7 + $0x670] sm:$0xff] }
0x161b   : > { %7535 = vmatmul.mubr.bf16.vlgmr.msra.gmra.mxu0 %v14602_v25  ;;  %7588 = vmatmul.mubr.bf16.vlgmr.msra.gmra.mxu1 %v14602_v25 }
0x161c   : > { %7544 = vmatprep.mubr.bf16.mxu0 %v14720_v8  ;;  %7597 = vmatprep.mubr.bf16.mxu1 %v14720_v8 }
0x161d   : > { %7609 = vmatpush1.bf16.msra.mxu0 %v10698_v50  ;;  %7662 = vmatpush1.bf16.msra.mxu1 %v10700_v5  ;;  %v5677_v50 = vld [vmem:[%s13490_s7 + $0x38] sm:$0xff] }
0x161e   : > { %7610 = vmatprep.subr.bf16.mxu0 %v10683_v55  ;;  %7663 = vmatprep.subr.bf16.mxu1 %v10685_v23  ;;  %v5685_v5 = vld [vmem:[%s13490_s7 + $0x78] sm:$0xff]  ;;  %v10602_v55 = vcombine.low %v5692_v41, %v5700_v14  ;;  %v10604_v23 = vcombine.low %v5693_v31, %v5701_v59  ;;  %v10779_v41 = vcombine.high %v5868_v46, %v5876_v9  ;;  %v5852_v31 = vld [vmem:[%s13490_s7 + $0x5b0] sm:$0xff] }
0x161f   : > { %v10589_v53 = vcombine.high %v5677_v50, %v5685_v5  ;;  %v5860_v59 = vld [vmem:[%s13490_s7 + $0x5f0] sm:$0xff] }
0x1621   : > { %7611 = vmatpush1.bf16.msra.mxu0 %v10682_v32  ;;  %7664 = vmatpush1.bf16.msra.mxu1 %v10684_v20  ;;  %v5917_v32 = vld [vmem:[%s13490_s7 + $0x7b8] sm:$0xff] }
0x1622   : > { %7612 = vmatprep.subr.bf16.mxu0 %v10667_v2  ;;  %7665 = vmatprep.subr.bf16.mxu1 %v10669_v24  ;;  %v5925_v20 = vld [vmem:[%s13490_s7 + $0x7f8] sm:$0xff]  ;;  %v10586_v2 = vcombine.low %v5676_v61, %v5684_v63  ;;  %v10588_v24 = vcombine.low %v5677_v50, %v5685_v5  ;;  %v10763_v61 = vcombine.high %v5852_v31, %v5860_v59  ;;  %v5836_v50 = vld [vmem:[%s13490_s7 + $0x530] sm:$0xff] }
0x1623   : > { %7545 = vmatmul.mubr.bf16.gmra.mxu0 %v14716_v21  ;;  %7598 = vmatmul.mubr.bf16.gmra.mxu1 %v14716_v21  ;;  %v10829_v33 = vcombine.high %v5917_v32, %v5925_v20  ;;  %v5844_v5 = vld [vmem:[%s13490_s7 + $0x570] sm:$0xff] }
0x1624   : > { %7640 = vmatprep.mubr.bf16.mxu0 %v14606_v13  ;;  %7693 = vmatprep.mubr.bf16.mxu1 %v14606_v13  ;;  %v10636_v13 = vcombine.low %v5725_v18, %v5733_v7  ;;  %v5884_v18 = vld [vmem:[%s13490_s7 + $0x6b0] sm:$0xff] }
0x1625   : > { %7613 = vmatpush1.bf16.msra.mxu0 %v10666_v22  ;;  %7666 = vmatpush1.bf16.msra.mxu1 %v10668_v6  ;;  %v5901_v22 = vld [vmem:[%s13490_s7 + $0x738] sm:$0xff]  ;;  %v5892_v7 = vld [vmem:[%s13490_s7 + $0x6f0] sm:$0xff] }
0x1626   : > { %7614 = vmatprep.subr.bf16.mxu0 %v10651_v48  ;;  %7667 = vmatprep.subr.bf16.mxu1 %v10653_v10  ;;  %v5909_v6 = vld [vmem:[%s13490_s7 + $0x778] sm:$0xff]  ;;  %v10826_v48 = vcombine.low %v5916_v35, %v5924_v3  ;;  %v10828_v10 = vcombine.low %v5917_v32, %v5925_v20  ;;  %v10795_v26 = vcombine.high %v5884_v18, %v5892_v7  ;;  %v5820_v32 = vld [vmem:[%s13490_s7 + $0x4b0] sm:$0xff] }
0x1627   : > { %v10813_v16 = vcombine.high %v5901_v22, %v5909_v6  ;;  %v10747_v35 = vcombine.high %v5836_v50, %v5844_v5  ;;  %v5828_v20 = vld [vmem:[%s13490_s7 + $0x4f0] sm:$0xff] }
0x1629   : > { %7615 = vmatpush1.bf16.msra.mxu0 %v10650_v43  ;;  %7668 = vmatpush1.bf16.msra.mxu1 %v10652_v49  ;;  %v5885_v43 = vld [vmem:[%s13490_s7 + $0x6b8] sm:$0xff] }
0x162a   : > { %7616 = vmatprep.subr.bf16.mxu0 %v10635_v60  ;;  %7669 = vmatprep.subr.bf16.mxu1 %v10637_v57  ;;  %v5893_v49 = vld [vmem:[%s13490_s7 + $0x6f8] sm:$0xff]  ;;  %v10810_v60 = vcombine.low %v5900_v34, %v5908_v44  ;;  %v10812_v57 = vcombine.low %v5901_v22, %v5909_v6  ;;  %v10746_v34 = vcombine.low %v5836_v50, %v5844_v5  ;;  %v11884_v5 = vld [vmem:[%s13494_s24 + $0x60] ss:$8 sps:$4 sm:$0xff]  }
0x162b   : > { %v10797_v30 = vcombine.high %v5885_v43, %v5893_v49  ;;  %v10731_v22 = vcombine.high %v5820_v32, %v5828_v20 }
0x162d   : > { %7617 = vmatpush1.bf16.msra.mxu0 %v10634_v0  ;;  %7670 = vmatpush1.bf16.msra.mxu1 %v10636_v13  ;;  %v5869_v0 = vld [vmem:[%s13490_s7 + $0x638] sm:$0xff] }
0x162e   : > { %7618 = vmatprep.subr.bf16.mxu0 %v10619_v62  ;;  %7671 = vmatprep.subr.bf16.mxu1 %v10621_v12  ;;  %v5877_v13 = vld [vmem:[%s13490_s7 + $0x678] sm:$0xff]  ;;  %v10794_v62 = vcombine.low %v5884_v18, %v5892_v7  ;;  %v10796_v12 = vcombine.low %v5885_v43, %v5893_v49  ;;  %v10730_v43 = vcombine.low %v5820_v32, %v5828_v20 }
0x162f   : > { %v10781_v14 = vcombine.high %v5869_v0, %v5877_v13  ;;  %v11893_v32 = vld [vmem:[%s13494_s24 + $0x150] ss:$8 sps:$4 sm:$0xff]  }
0x1631   : > { %7619 = vmatpush1.bf16.msra.mxu0 %v10618_v54  ;;  %7672 = vmatpush1.bf16.msra.mxu1 %v10620_v19  ;;  %v5853_v54 = vld [vmem:[%s13490_s7 + $0x5b8] sm:$0xff] }
0x1632   : > { %7620 = vmatprep.subr.bf16.mxu0 %v10603_v36  ;;  %7673 = vmatprep.subr.bf16.mxu1 %v10605_v38  ;;  %v5861_v19 = vld [vmem:[%s13490_s7 + $0x5f8] sm:$0xff]  ;;  %v10778_v36 = vcombine.low %v5868_v46, %v5876_v9  ;;  %v10780_v38 = vcombine.low %v5869_v0, %v5877_v13 }
0x1633   : > { %v10765_v63 = vcombine.high %v5853_v54, %v5861_v19  ;;  %v11880_v0 = vld [vmem:[%s13494_s24 + $0x74] ss:$8 sps:$4 sm:$0xff]  }
0x1634   : > { %v11883_v13 = vld [vmem:[%s13494_s24 + $0x174] ss:$8 sps:$4 sm:$0xff]  }
0x1635   : > { %7621 = vmatpush1.bf16.msra.mxu0 %v10602_v55  ;;  %7674 = vmatpush1.bf16.msra.mxu1 %v10604_v23  ;;  %v5837_v55 = vld [vmem:[%s13490_s7 + $0x538] sm:$0xff] }
0x1636   : > { %7622 = vmatprep.subr.bf16.mxu0 %v10587_v29  ;;  %7675 = vmatprep.subr.bf16.mxu1 %v10589_v53  ;;  %v5845_v23 = vld [vmem:[%s13490_s7 + $0x578] sm:$0xff]  ;;  %v10762_v29 = vcombine.low %v5852_v31, %v5860_v59  ;;  %v10764_v53 = vcombine.low %v5853_v54, %v5861_v19 }
0x1637   : > { %v10749_v3 = vcombine.high %v5837_v55, %v5845_v23  ;;  %v10748_v44 = vcombine.low %v5837_v55, %v5845_v23  ;;  %v11878_v59 = vld [vmem:[%s13494_s24 + $0x70] ss:$8 sps:$4 sm:$0xff]   ;;  %v11887_v55 = vld [vmem:[%s13494_s24 + $0x160] ss:$8 sps:$4 sm:$0xff]  }
0x1638   : > { %v11881_v54 = vld [vmem:[%s13494_s24 + $0x170] ss:$8 sps:$4 sm:$0xff]  }
0x1639   : > { %7623 = vmatpush1.bf16.msra.mxu0 %v10586_v2  ;;  %7676 = vmatpush1.bf16.msra.mxu1 %v10588_v24  ;;  %v5821_v2 = vld [vmem:[%s13490_s7 + $0x4b8] sm:$0xff] }
0x163a   : > { %7624 = vmatprep.subr.bf16.mxu0 %v10827_v45  ;;  %7677 = vmatprep.subr.bf16.mxu1 %v10829_v33  ;;  %v5829_v24 = vld [vmem:[%s13490_s7 + $0x4f8] sm:$0xff]  ;;  %v14870_v45 = vpop.f32.mrf.mxu0  ;;  %v14872_v33 = vpop.f32.mrf.mxu1 }
0x163b   : > { %v10733_v6 = vcombine.high %v5821_v2, %v5829_v24  ;;  %v10732_v49 = vcombine.low %v5821_v2, %v5829_v24  ;;  %v11898_v24 = vld [vmem:[%s13494_s24 + $0x44] ss:$8 sps:$4 sm:$0xff]  }
0x163c   : > { %v7326_v18 = vpop.f32.mrf.mxu0  ;;  %v7379_v7 = vpop.f32.mrf.mxu1 }
0x163d   : > { %7625 = vmatpush2.bf16.msra.mxu0 %v10826_v48  ;;  %7678 = vmatpush2.bf16.msra.mxu1 %v10828_v10  ;;  %v5804_v48 = vld [vmem:[%s13490_s7 + $0x430] sm:$0xff] }
0x163e   : > { %7626 = vmatprep.subr.bf16.mxu0 %v10811_v52  ;;  %7679 = vmatprep.subr.bf16.mxu1 %v10813_v16  ;;  %v5812_v10 = vld [vmem:[%s13490_s7 + $0x470] sm:$0xff]  ;;  %v5805_v52 = vld [vmem:[%s13490_s7 + $0x438] sm:$0xff] }
0x163f   : > { %v5813_v16 = vld [vmem:[%s13490_s7 + $0x478] sm:$0xff]  ;;  %v10714_v46 = vcombine.low %v5804_v48, %v5812_v10 }
0x1640   : > { %v10716_v9 = vcombine.low %v5805_v52, %v5813_v16 }
0x1641   : > { %7627 = vmatpush2.bf16.msra.mxu0 %v10810_v60  ;;  %7680 = vmatpush2.bf16.msra.mxu1 %v10812_v57  ;;  %v10715_v60 = vcombine.high %v5804_v48, %v5812_v10  ;;  %v10717_v57 = vcombine.high %v5805_v52, %v5813_v16  ;;  %v11907_v48 = vld [vmem:[%s13494_s24 + $0x134] ss:$8 sps:$4 sm:$0xff]   ;;  %v11902_v10 = vld [vmem:[%s13494_s24 + $0x30] ss:$8 sps:$4 sm:$0xff]   ;;  %v11910_v52 = vld [vmem:[%s13494_s24 + $0x24] ss:$8 sps:$4 sm:$0xff]  }
0x1642   : > { %7628 = vmatprep.subr.bf16.mxu0 %v10795_v26  ;;  %7681 = vmatprep.subr.bf16.mxu1 %v10797_v30  ;;  %v14878_v26 = vpop.f32.mrf.mxu0  ;;  %v14880_v30 = vpop.f32.mrf.mxu1  ;;  %v11913_v16 = vld [vmem:[%s13494_s24 + $0x124] ss:$8 sps:$4 sm:$0xff]  }
0x1645   : > { %7629 = vmatpush2.bf16.msra.mxu0 %v10794_v62  ;;  %7682 = vmatpush2.bf16.msra.mxu1 %v10796_v12  ;;  %v14885_v62 = vld [vmem:[%s13492_s2] sm:$0xff]  ;;  %v7330_v12 = vpop.f32.mrf.mxu0 }
0x1646   : > { %7630 = vmatprep.subr.bf16.mxu0 %v10779_v41  ;;  %7683 = vmatprep.subr.bf16.mxu1 %v10781_v14  ;;  %v7383_v41 = vpop.f32.mrf.mxu1  ;;  %v14889_v14 = vrot.slane %v14885_v62, %v13683_v56  ;;  %v14893_v31 = vrot.slane %v14885_v62, %v13670_v51 }
0x1648   : > { %v7331_v19 = vadd.f32 %v7330_v12, %v14889_v14  ;;  %v7380_v50 = vadd.f32 %v7379_v7, %v14893_v31  ;;  %v11911_v7 = vld [vmem:[%s13494_s24 + $0x120] ss:$8 sps:$4 sm:$0xff]   ;;  %v11928_v12 = vld [vmem:[%s13494_s24 + $0xf4] ss:$8 sps:$4 sm:$0xff]  }
0x1649   : > { %7631 = vmatpush2.bf16.msra.mxu0 %v10778_v36  ;;  %7684 = vmatpush2.bf16.msra.mxu1 %v10780_v38  ;;  %v7384_v36 = vadd.f32 %v7383_v41, %v14893_v31  ;;  %v11886_v38 = vld [vmem:[%s13494_s24 + $0x64] ss:$8 sps:$4 sm:$0xff]   ;;  %v11931_v41 = vld [vmem:[%s13494_s24 + $0x1f4] ss:$8 sps:$4 sm:$0xff]  }
0x164a   : > { %7632 = vmatprep.subr.bf16.mxu0 %v10763_v61  ;;  %7685 = vmatprep.subr.bf16.mxu1 %v10765_v63  ;;  %v11889_v61 = vld [vmem:[%s13494_s24 + $0x164] ss:$8 sps:$4 sm:$0xff]   ;;  %v7327_v63 = vadd.f32 %v7326_v18, %v14889_v14  ;;  %v7731_v23 = vmax.f32 %v7331_v19, 0.0  ;;  %v11908_v18 = vld [vmem:[%s13494_s24 + $0x20] ss:$8 sps:$4 sm:$0xff]  }
0x164b   : > { %v11934_v19 = vld [vmem:[%s13494_s24 + $0xe4] ss:$8 sps:$4 sm:$0xff]  }
0x164d   : > { %7633 = vmatpush2.bf16.msra.mxu0 %v10762_v29  ;;  %7686 = vmatpush2.bf16.msra.mxu1 %v10764_v53  ;;  %v7733_v29 = vmax.f32 %v7384_v36, 0.0  ;;  %v11895_v53 = vld [vmem:[%s13494_s24 + $0x154] ss:$8 sps:$4 sm:$0xff]   ;;  %v11937_v36 = vld [vmem:[%s13494_s24 + $0x1e4] ss:$8 sps:$4 sm:$0xff]  }
0x164e   : > { %7634 = vmatprep.subr.bf16.mxu0 %v10747_v35  ;;  %7687 = vmatprep.subr.bf16.mxu1 %v10749_v3  ;;  %v7715_v35 = vmax.f32 %v7327_v63, 0.0  ;;  %v7717_v3 = vmax.f32 %v7380_v50, 0.0  ;;  %v11940_v63 = vld [vmem:[%s13494_s24 + $0xd4] ss:$8 sps:$4 sm:$0xff]  }
0x164f   : > { %v11943_v50 = vld [vmem:[%s13494_s24 + $0x1d4] ss:$8 sps:$4 sm:$0xff]  }
0x1650   : > { %v7779_v20 = vpack.c.bf16 %v7731_v23, %v7715_v35  ;;  %v7781_v2 = vpack.c.bf16 %v7733_v29, %v7717_v3  ;;  %v11946_v23 = vld [vmem:[%s13494_s24 + $0xc4] ss:$8 sps:$4 sm:$0xff]   ;;  %v11952_v35 = vld [vmem:[%s13494_s24 + $0xb4] ss:$8 sps:$4 sm:$0xff]  }
0x1651   : > { %7635 = vmatpush2.bf16.msra.mxu0 %v10746_v34  ;;  %7688 = vmatpush2.bf16.msra.mxu1 %v10748_v44  ;;  %v11901_v34 = vld [vmem:[%s13494_s24 + $0x144] ss:$8 sps:$4 sm:$0xff]   ;;  %v11896_v44 = vld [vmem:[%s13494_s24 + $0x40] ss:$8 sps:$4 sm:$0xff]   ;;  %v11955_v3 = vld [vmem:[%s13494_s24 + $0x1b4] ss:$8 sps:$4 sm:$0xff]  }
0x1652   : > { %7636 = vmatprep.subr.bf16.mxu0 %v10731_v22  ;;  %7689 = vmatprep.subr.bf16.mxu1 %v10733_v6  ;;  %v11899_v22 = vld [vmem:[%s13494_s24 + $0x140] ss:$8 sps:$4 sm:$0xff]   ;;  %v11904_v6 = vld [vmem:[%s13494_s24 + $0x34] ss:$8 sps:$4 sm:$0xff]   ;;  %v11949_v29 = vld [vmem:[%s13494_s24 + $0x1c4] ss:$8 sps:$4 sm:$0xff]  }
0x1655   : > { %7637 = vmatpush2.bf16.msra.mxu0 %v10730_v43  ;;  %7690 = vmatpush2.bf16.msra.mxu1 %v10732_v49  ;;  %v11916_v43 = vld [vmem:[%s13494_s24 + $0x14] ss:$8 sps:$4 sm:$0xff]  }
0x1656   : > { %7638 = vmatprep.subr.bf16.mxu0 %v10715_v60  ;;  %7691 = vmatprep.subr.bf16.mxu1 %v10717_v57  ;;  %v11919_v49 = vld [vmem:[%s13494_s24 + $0x114] ss:$8 sps:$4 sm:$0xff]   ;;  %v11914_v60 = vld [vmem:[%s13494_s24 + $0x10] ss:$8 sps:$4 sm:$0xff]  }
0x1657   : > { %v11917_v57 = vld [vmem:[%s13494_s24 + $0x110] ss:$8 sps:$4 sm:$0xff]  }
0x1659   : > { %7639 = vmatpush2.bf16.msra.mxu0 %v10714_v46  ;;  %7692 = vmatpush2.bf16.msra.mxu1 %v10716_v9  ;;  %v11922_v46 = vld [vmem:[%s13494_s24 + $0x4] ss:$8 sps:$4 sm:$0xff]  }
0x165a   : > { %9358 = vmatprep.subr.bf16.mxu0 %v11880_v0  ;;  %9411 = vmatprep.subr.bf16.mxu1 %v11883_v13  ;;  %v11925_v9 = vld [vmem:[%s13494_s24 + $0x104] ss:$8 sps:$4 sm:$0xff]   ;;  %v11920_v0 = vld [vmem:[%s13494_s24] ss:$8 sps:$4 sm:$0xff]  }
0x165b   : > { %v11923_v13 = vld [vmem:[%s13494_s24 + $0x100] ss:$8 sps:$4 sm:$0xff]  }
0x165c   : > { %7641 = vmatmul.mubr.bf16.vlgmr.msra.gmra.mxu0 %v14602_v25  ;;  %7694 = vmatmul.mubr.bf16.vlgmr.msra.gmra.mxu1 %v14602_v25  ;;  %v11892_v25 = vld [vmem:[%s13494_s24 + $0x54] ss:$8 sps:$4 sm:$0xff]  }
0x165d   : > { %7650 = vmatprep.mubr.bf16.mxu0 %v14720_v8  ;;  %7703 = vmatprep.mubr.bf16.mxu1 %v14720_v8  ;;  %v11890_v8 = vld [vmem:[%s13494_s24 + $0x50] ss:$8 sps:$4 sm:$0xff]  }
0x165e   : > { %9359 = vmatpush1.bf16.msra.mxu0 %v11878_v59  ;;  %9412 = vmatpush1.bf16.msra.mxu1 %v11881_v54  ;;  %v11926_v59 = vld [vmem:[%s13494_s24 + $0xf0] ss:$8 sps:$4 sm:$0xff]  }
0x165f   : > { %9360 = vmatprep.subr.bf16.mxu0 %v11886_v38  ;;  %9413 = vmatprep.subr.bf16.mxu1 %v11889_v61  ;;  %v11929_v54 = vld [vmem:[%s13494_s24 + $0x1f0] ss:$8 sps:$4 sm:$0xff]   ;;  %v11932_v38 = vld [vmem:[%s13494_s24 + $0xe0] ss:$8 sps:$4 sm:$0xff]  }
0x1660   : > { %v11935_v61 = vld [vmem:[%s13494_s24 + $0x1e0] ss:$8 sps:$4 sm:$0xff]  }
0x1662   : > { %9361 = vmatpush1.bf16.msra.mxu0 %v11884_v5  ;;  %9414 = vmatpush1.bf16.msra.mxu1 %v11887_v55  ;;  %v11938_v5 = vld [vmem:[%s13494_s24 + $0xd0] ss:$8 sps:$4 sm:$0xff]  }
0x1663   : > { %9362 = vmatprep.subr.bf16.mxu0 %v11892_v25  ;;  %9415 = vmatprep.subr.bf16.mxu1 %v11895_v53  ;;  %v11941_v55 = vld [vmem:[%s13494_s24 + $0x1d0] ss:$8 sps:$4 sm:$0xff]   ;;  %v11944_v25 = vld [vmem:[%s13494_s24 + $0xc0] ss:$8 sps:$4 sm:$0xff]  }
0x1664   : > { %7651 = vmatmul.mubr.bf16.gmra.mxu0 %v14716_v21  ;;  %7704 = vmatmul.mubr.bf16.gmra.mxu1 %v14716_v21  ;;  %v11905_v21 = vld [vmem:[%s13494_s24 + $0x130] ss:$8 sps:$4 sm:$0xff]   ;;  %v11947_v53 = vld [vmem:[%s13494_s24 + $0x1c0] ss:$8 sps:$4 sm:$0xff]  }
0x1665   : > { %9390 = vmatprep.mubr.bf16.mxu0 %v7779_v20  ;;  %9443 = vmatprep.mubr.bf16.mxu1 %v7781_v2  ;;  %v11958_v20 = vld [vmem:[%s13494_s24 + $0xa4] ss:$8 sps:$4 sm:$0xff]  }
0x1666   : > { %9363 = vmatpush1.bf16.msra.mxu0 %v11890_v8  ;;  %9416 = vmatpush1.bf16.msra.mxu1 %v11893_v32  ;;  %v11950_v8 = vld [vmem:[%s13494_s24 + $0xb0] ss:$8 sps:$4 sm:$0xff]   ;;  %v11961_v2 = vld [vmem:[%s13494_s24 + $0x1a4] ss:$8 sps:$4 sm:$0xff]  }
0x1667   : > { %9364 = vmatprep.subr.bf16.mxu0 %v11898_v24  ;;  %9417 = vmatprep.subr.bf16.mxu1 %v11901_v34  ;;  %v11953_v32 = vld [vmem:[%s13494_s24 + $0x1b0] ss:$8 sps:$4 sm:$0xff]   ;;  %v14959_v24 = vrot.slane %v14885_v62, %v13651_v40  ;;  %v11956_v34 = vld [vmem:[%s13494_s24 + $0xa0] ss:$8 sps:$4 sm:$0xff]  }
0x166a   : > { %9365 = vmatpush1.bf16.msra.mxu0 %v11896_v44  ;;  %9418 = vmatpush1.bf16.msra.mxu1 %v11899_v22  ;;  %v11959_v44 = vld [vmem:[%s13494_s24 + $0x1a0] ss:$8 sps:$4 sm:$0xff]   ;;  %v14965_v22 = vrot.slane %v14885_v62, %v13657_v42 }
0x166b   : > { %9366 = vmatprep.subr.bf16.mxu0 %v11904_v6  ;;  %9419 = vmatprep.subr.bf16.mxu1 %v11907_v48  ;;  %v11964_v6 = vld [vmem:[%s13494_s24 + $0x94] ss:$8 sps:$4 sm:$0xff]  }
0x166c   : > { %v11967_v48 = vld [vmem:[%s13494_s24 + $0x194] ss:$8 sps:$4 sm:$0xff]  }
0x166e   : > { %9367 = vmatpush1.bf16.msra.mxu0 %v11902_v10  ;;  %9420 = vmatpush1.bf16.msra.mxu1 %v11905_v21  ;;  %v7329_v10 = vadd.f32 %v14878_v26, %v14959_v24  ;;  %v7382_v21 = vadd.f32 %v14880_v30, %v14965_v22  ;;  %v11970_v26 = vld [vmem:[%s13494_s24 + $0x84] ss:$8 sps:$4 sm:$0xff]  }
0x166f   : > { %9368 = vmatprep.subr.bf16.mxu0 %v11910_v52  ;;  %9421 = vmatprep.subr.bf16.mxu1 %v11913_v16  ;;  %v7325_v52 = vadd.f32 %v14870_v45, %v14959_v24  ;;  %v11962_v16 = vld [vmem:[%s13494_s24 + $0x90] ss:$8 sps:$4 sm:$0xff]  }
0x1670   : > { %v7730_v30 = vmax.f32 %v7329_v10, 0.0 }
0x1672   : > { %9369 = vmatpush1.bf16.msra.mxu0 %v11908_v18  ;;  %9422 = vmatpush1.bf16.msra.mxu1 %v11911_v7  ;;  %v11965_v18 = vld [vmem:[%s13494_s24 + $0x190] ss:$8 sps:$4 sm:$0xff]   ;;  %v7378_v7 = vadd.f32 %v14872_v33, %v14965_v22 }
0x1673   : > { %9370 = vmatprep.subr.bf16.mxu0 %v11916_v43  ;;  %9423 = vmatprep.subr.bf16.mxu1 %v11919_v49 }
0x1676   : > { %9371 = vmatpush1.bf16.msra.mxu0 %v11914_v60  ;;  %9424 = vmatpush1.bf16.msra.mxu1 %v11917_v57  ;;  %v11973_v60 = vld [vmem:[%s13494_s24 + $0x184] ss:$8 sps:$4 sm:$0xff]   ;;  %v7732_v57 = vmax.f32 %v7382_v21, 0.0 }
0x1677   : > { %9372 = vmatprep.subr.bf16.mxu0 %v11922_v46  ;;  %9425 = vmatprep.subr.bf16.mxu1 %v11925_v9  ;;  %v7714_v9 = vmax.f32 %v7325_v52, 0.0 }
0x167a   : > { %9373 = vmatpush1.bf16.msra.mxu0 %v11920_v0  ;;  %9426 = vmatpush1.bf16.msra.mxu1 %v11923_v13  ;;  %v11968_v0 = vld [vmem:[%s13494_s24 + $0x80] ss:$8 sps:$4 sm:$0xff]  }
0x167b   : > { %9374 = vmatprep.subr.bf16.mxu0 %v11928_v12  ;;  %9427 = vmatprep.subr.bf16.mxu1 %v11931_v41  ;;  %v11971_v13 = vld [vmem:[%s13494_s24 + $0x180] ss:$8 sps:$4 sm:$0xff]   ;;  %v7716_v12 = vmax.f32 %v7378_v7, 0.0 }
0x167c   : > { %v11980_v7 = vld [vmem:[%s13494_s24 + $0x260] ss:$8 sps:$4 sm:$0xff]  }
0x167e   : > { %9375 = vmatpush2.bf16.msra.mxu0 %v11926_v59  ;;  %9428 = vmatpush2.bf16.msra.mxu1 %v11929_v54  ;;  %v11976_v59 = vld [vmem:[%s13494_s24 + $0x274] ss:$8 sps:$4 sm:$0xff]  }
0x167f   : > { %9376 = vmatprep.subr.bf16.mxu0 %v11934_v19  ;;  %9429 = vmatprep.subr.bf16.mxu1 %v11937_v36  ;;  %v11979_v54 = vld [vmem:[%s13494_s24 + $0x374] ss:$8 sps:$4 sm:$0xff]   ;;  %v5960_v19 = vsub.s32 7, %v13648_v39 }
0x1682   : > { %9377 = vmatpush2.bf16.msra.mxu0 %v11932_v38  ;;  %9430 = vmatpush2.bf16.msra.mxu1 %v11935_v61  ;;  %v7778_v61 = vpack.c.bf16 %v7730_v30, %v7714_v9 }
0x1683   : > { %9378 = vmatprep.subr.bf16.mxu0 %v11940_v63  ;;  %9431 = vmatprep.subr.bf16.mxu1 %v11943_v50  ;;  %v7780_v63 = vpack.c.bf16 %v7732_v57, %v7716_v12 }
0x1686   : > { %9379 = vmatpush2.bf16.msra.mxu0 %v11938_v5  ;;  %9432 = vmatpush2.bf16.msra.mxu1 %v11941_v55 }
0x1687   : > { %9380 = vmatprep.subr.bf16.mxu0 %v11946_v23  ;;  %9433 = vmatprep.subr.bf16.mxu1 %v11949_v29  ;;  %v11974_v29 = vld [vmem:[%s13494_s24 + $0x270] ss:$8 sps:$4 sm:$0xff]  }
0x168a   : > { %9381 = vmatpush2.bf16.msra.mxu0 %v11944_v25  ;;  %9434 = vmatpush2.bf16.msra.mxu1 %v11947_v53  ;;  %v11977_v25 = vld [vmem:[%s13494_s24 + $0x370] ss:$8 sps:$4 sm:$0xff]   ;;  %v14994_v53 = vrot.slane %v14885_v62, %v13760_v17 }
0x168b   : > { %9382 = vmatprep.subr.bf16.mxu0 %v11952_v35  ;;  %9435 = vmatprep.subr.bf16.mxu1 %v11955_v3 }
0x168e   : > { %9383 = vmatpush2.bf16.msra.mxu0 %v11950_v8  ;;  %9436 = vmatpush2.bf16.msra.mxu1 %v11953_v32 }
0x168f   : > { %9384 = vmatprep.subr.bf16.mxu0 %v11958_v20  ;;  %9437 = vmatprep.subr.bf16.mxu1 %v11961_v2  ;;  %v11985_v20 = vld [vmem:[%s13494_s24 + $0x364] ss:$8 sps:$4 sm:$0xff]  }
0x1692   : > { %9385 = vmatpush2.bf16.msra.mxu0 %v11956_v34  ;;  %9438 = vmatpush2.bf16.msra.mxu1 %v11959_v44 }
0x1693   : > { %9386 = vmatprep.subr.bf16.mxu0 %v11964_v6  ;;  %9439 = vmatprep.subr.bf16.mxu1 %v11967_v48  ;;  %v7334_v43 = vpop.f32.mrf.mxu0  ;;  %v7387_v49 = vpop.f32.mrf.mxu1 }
0x1694   : > { %v7335_v48 = vadd.f32 %v7334_v43, %v14959_v24  ;;  %v7388_v10 = vadd.f32 %v7387_v49, %v14965_v22  ;;  %v11991_v43 = vld [vmem:[%s13494_s24 + $0x354] ss:$8 sps:$4 sm:$0xff]  }
0x1695   : > { %v7336_v45 = vpop.f32.mrf.mxu0  ;;  %v7389_v46 = vpop.f32.mrf.mxu1 }
0x1696   : > { %9387 = vmatpush2.bf16.msra.mxu0 %v11962_v16  ;;  %9440 = vmatpush2.bf16.msra.mxu1 %v11965_v18  ;;  %v7337_v36 = vadd.f32 %v7336_v45, %v14889_v14  ;;  %v7390_v38 = vadd.f32 %v7389_v46, %v14893_v31  ;;  %v7746_v46 = vmax.f32 %v7335_v48, 0.0  ;;  %v7748_v9 = vmax.f32 %v7388_v10, 0.0  ;;  %v12007_v48 = vld [vmem:[%s13494_s24 + $0x320] ss:$8 sps:$4 sm:$0xff]   ;;  %v12012_v10 = vld [vmem:[%s13494_s24 + $0x214] ss:$8 sps:$4 sm:$0xff]  }
0x1697   : > { %9388 = vmatprep.subr.bf16.mxu0 %v11970_v26  ;;  %9441 = vmatprep.subr.bf16.mxu1 %v11973_v60  ;;  %v7338_v33 = vpop.f32.mrf.mxu0  ;;  %v7391_v41 = vpop.f32.mrf.mxu1  ;;  %v11983_v26 = vld [vmem:[%s13494_s24 + $0x360] ss:$8 sps:$4 sm:$0xff]  }
0x1698   : > { %v7339_v35 = vadd.f32 %v7338_v33, %v14959_v24  ;;  %v7392_v3 = vadd.f32 %v7391_v41, %v14965_v22  ;;  %v7747_v2 = vmax.f32 %v7337_v36, 0.0  ;;  %v7749_v34 = vmax.f32 %v7390_v38, 0.0  ;;  %v11988_v22 = vld [vmem:[%s13494_s24 + $0x254] ss:$8 sps:$4 sm:$0xff]   ;;  %v11986_v41 = vld [vmem:[%s13494_s24 + $0x250] ss:$8 sps:$4 sm:$0xff]  }
0x1699   : > { %v7340_v50 = vpop.f32.mrf.mxu0  ;;  %v7393_v5 = vpop.f32.mrf.mxu1  ;;  %v11994_v38 = vld [vmem:[%s13494_s24 + $0x244] ss:$8 sps:$4 sm:$0xff]  }
0x169a   : > { %9389 = vmatpush2.bf16.msra.mxu0 %v11968_v0  ;;  %9442 = vmatpush2.bf16.msra.mxu1 %v11971_v13  ;;  %v7341_v55 = vadd.f32 %v7340_v50, %v14889_v14  ;;  %v7394_v23 = vadd.f32 %v7393_v5, %v14893_v31  ;;  %v15005_v14 = vrot.slane %v14885_v62, %v5960_v19  ;;  %v11982_v31 = vld [vmem:[%s13494_s24 + $0x264] ss:$8 sps:$4 sm:$0xff]   ;;  %v7762_v60 = vmax.f32 %v7339_v35, 0.0  ;;  %v11995_v35 = vld [vmem:[%s13494_s24 + $0x340] ss:$8 sps:$4 sm:$0xff]  }
0x169b   : > { %9464 = vmatprep.subr.bf16.mxu0 %v11976_v59  ;;  %9517 = vmatprep.subr.bf16.mxu1 %v11979_v54  ;;  %v14998_v8 = vpop.f32.mrf.mxu0  ;;  %v15000_v32 = vpop.f32.mrf.mxu1  ;;  %v7764_v30 = vmax.f32 %v7392_v3, 0.0  ;;  %v11989_v59 = vld [vmem:[%s13494_s24 + $0x350] ss:$8 sps:$4 sm:$0xff]   ;;  %v12000_v3 = vld [vmem:[%s13494_s24 + $0x234] ss:$8 sps:$4 sm:$0xff]  }
0x169c   : > { %v7763_v44 = vmax.f32 %v7341_v55, 0.0  ;;  %v7765_v6 = vmax.f32 %v7394_v23, 0.0  ;;  %v7794_v54 = vpack.c.bf16 %v7762_v60, %v7746_v46  ;;  %v12019_v60 = vld [vmem:[%s13494_s24 + $0x300] ss:$8 sps:$4 sm:$0xff]   ;;  %v12033_v46 = vld [vmem:[%s13494_s24 + $0x3e4] ss:$8 sps:$4 sm:$0xff]  }
0x169d   : > { %9391 = vmatmul.mubr.bf16.vlgmr.msra.gmra.mxu0 %v7778_v61  ;;  %9444 = vmatmul.mubr.bf16.vlgmr.msra.gmra.mxu1 %v7780_v63  ;;  %v7432_v21 = vpop.f32.mrf.mxu0  ;;  %v7485_v52 = vpop.f32.mrf.mxu1  ;;  %v7796_v36 = vpack.c.bf16 %v7764_v30, %v7748_v9  ;;  %v11997_v61 = vld [vmem:[%s13494_s24 + $0x344] ss:$8 sps:$4 sm:$0xff]   ;;  %v12024_v30 = vld [vmem:[%s13494_s24 + $0x2f4] ss:$8 sps:$4 sm:$0xff]   ;;  %v12028_v9 = vld [vmem:[%s13494_s24 + $0x2e0] ss:$8 sps:$4 sm:$0xff]  }
0x169e   : > { %v7795_v16 = vpack.c.bf16 %v7763_v44, %v7747_v2  ;;  %v7797_v18 = vpack.c.bf16 %v7765_v6, %v7749_v34  ;;  %9465 = vmatpush1.bf16.msra.mxu0 %v11974_v29  ;;  %9518 = vmatpush1.bf16.msra.mxu1 %v11977_v25  ;;  %v7433_v49 = vadd.f32 %v7432_v21, %v14994_v53  ;;  %v11992_v25 = vld [vmem:[%s13494_s24 + $0x240] ss:$8 sps:$4 sm:$0xff]   ;;  %v12001_v2 = vld [vmem:[%s13494_s24 + $0x330] ss:$8 sps:$4 sm:$0xff]   ;;  %v12006_v34 = vld [vmem:[%s13494_s24 + $0x224] ss:$8 sps:$4 sm:$0xff]  }
0x169f   : > { %9466 = vmatprep.subr.bf16.mxu0 %v11982_v31  ;;  %9519 = vmatprep.subr.bf16.mxu1 %v11985_v20  ;;  %v15013_v57 = vpop.f32.mrf.mxu0  ;;  %v15015_v24 = vpop.f32.mrf.mxu1  ;;  %v7486_v45 = vadd.f32 %v7485_v52, %v15005_v14  ;;  %v12003_v31 = vld [vmem:[%s13494_s24 + $0x334] ss:$8 sps:$4 sm:$0xff]   ;;  %v11998_v20 = vld [vmem:[%s13494_s24 + $0x230] ss:$8 sps:$4 sm:$0xff]   ;;  %v12009_v44 = vld [vmem:[%s13494_s24 + $0x324] ss:$8 sps:$4 sm:$0xff]  }
0x16a0   : > { %9400 = vmatprep.mubr.bf16.mxu0 %v7795_v16  ;;  %9453 = vmatprep.mubr.bf16.mxu1 %v7797_v18  ;;  %v7719_v63 = vmax.f32 %v7433_v49, 0.0  ;;  %v12004_v6 = vld [vmem:[%s13494_s24 + $0x220] ss:$8 sps:$4 sm:$0xff]   ;;  %v12015_v21 = vld [vmem:[%s13494_s24 + $0x314] ss:$8 sps:$4 sm:$0xff]  }
0x16a1   : > { %v7436_v0 = vpop.f32.mrf.mxu0  ;;  %v7489_v13 = vpop.f32.mrf.mxu1  ;;  %v7721_v50 = vmax.f32 %v7486_v45, 0.0  ;;  %v12010_v52 = vld [vmem:[%s13494_s24 + $0x210] ss:$8 sps:$4 sm:$0xff]   ;;  %v12018_v18 = vld [vmem:[%s13494_s24 + $0x204] ss:$8 sps:$4 sm:$0xff]  }
0x16a2   : > { %9467 = vmatpush1.bf16.msra.mxu0 %v11980_v7  ;;  %9520 = vmatpush1.bf16.msra.mxu1 %v11983_v26  ;;  %v7437_v12 = vadd.f32 %v7436_v0, %v14994_v53  ;;  %v7490_v33 = vadd.f32 %v7489_v13, %v15005_v14  ;;  %v12013_v16 = vld [vmem:[%s13494_s24 + $0x310] ss:$8 sps:$4 sm:$0xff]   ;;  %v12021_v7 = vld [vmem:[%s13494_s24 + $0x304] ss:$8 sps:$4 sm:$0xff]   ;;  %v12016_v26 = vld [vmem:[%s13494_s24 + $0x200] ss:$8 sps:$4 sm:$0xff]  }
0x16a3   : > { %9468 = vmatprep.subr.bf16.mxu0 %v11988_v22  ;;  %9521 = vmatprep.subr.bf16.mxu1 %v11991_v43  ;;  %v12027_v22 = vld [vmem:[%s13494_s24 + $0x3f4] ss:$8 sps:$4 sm:$0xff]   ;;  %v12022_v43 = vld [vmem:[%s13494_s24 + $0x2f0] ss:$8 sps:$4 sm:$0xff]   ;;  %v12030_v45 = vld [vmem:[%s13494_s24 + $0x2e4] ss:$8 sps:$4 sm:$0xff]  }
0x16a4   : > { %v7735_v5 = vmax.f32 %v7437_v12, 0.0  ;;  %v7737_v55 = vmax.f32 %v7490_v33, 0.0  ;;  %v12025_v49 = vld [vmem:[%s13494_s24 + $0x3f0] ss:$8 sps:$4 sm:$0xff]   ;;  %v12031_v0 = vld [vmem:[%s13494_s24 + $0x3e0] ss:$8 sps:$4 sm:$0xff]  }
0x16a5   : > { %9401 = vmatmul.mubr.bf16.gmra.mxu0 %v7794_v54  ;;  %9454 = vmatmul.mubr.bf16.gmra.mxu1 %v7796_v36  ;;  %v12036_v13 = vld [vmem:[%s13494_s24 + $0x2d4] ss:$8 sps:$4 sm:$0xff]   ;;  %v12034_v33 = vld [vmem:[%s13494_s24 + $0x2d0] ss:$8 sps:$4 sm:$0xff]   ;;  %v12045_v54 = vld [vmem:[%s13494_s24 + $0x3c4] ss:$8 sps:$4 sm:$0xff]   ;;  %v15059_v36 = vpop.f32.mrf.mxu0 }
0x16a6   : > { %v7783_v23 = vpack.c.bf16 %v7735_v5, %v7719_v63  ;;  %v7785_v29 = vpack.c.bf16 %v7737_v55, %v7721_v50  ;;  %9469 = vmatpush1.bf16.msra.mxu0 %v11986_v41  ;;  %9522 = vmatpush1.bf16.msra.mxu1 %v11989_v59  ;;  %v12039_v12 = vld [vmem:[%s13494_s24 + $0x3d4] ss:$8 sps:$4 sm:$0xff]   ;;  %v12037_v41 = vld [vmem:[%s13494_s24 + $0x3d0] ss:$8 sps:$4 sm:$0xff]   ;;  %v12042_v59 = vld [vmem:[%s13494_s24 + $0x2c4] ss:$8 sps:$4 sm:$0xff]  }
0x16a7   : > { %9470 = vmatprep.subr.bf16.mxu0 %v11994_v38  ;;  %9523 = vmatprep.subr.bf16.mxu1 %v11997_v61  ;;  %v15061_v38 = vpop.f32.mrf.mxu1  ;;  %v12040_v61 = vld [vmem:[%s13494_s24 + $0x2c0] ss:$8 sps:$4 sm:$0xff]   ;;  %v12048_v50 = vld [vmem:[%s13494_s24 + $0x2b4] ss:$8 sps:$4 sm:$0xff]   ;;  %v7442_v55 = vpop.f32.mrf.mxu0 }
0x16a8   : > { %9496 = vmatprep.mubr.bf16.mxu0 %v7783_v23  ;;  %9549 = vmatprep.mubr.bf16.mxu1 %v7785_v29  ;;  %v12043_v63 = vld [vmem:[%s13494_s24 + $0x3c0] ss:$8 sps:$4 sm:$0xff]   ;;  %v12051_v5 = vld [vmem:[%s13494_s24 + $0x3b4] ss:$8 sps:$4 sm:$0xff]   ;;  %v12046_v29 = vld [vmem:[%s13494_s24 + $0x2b0] ss:$8 sps:$4 sm:$0xff]  }
0x16a9   : > { %v7495_v23 = vpop.f32.mrf.mxu1 }
0x16aa   : > { %9471 = vmatpush1.bf16.msra.mxu0 %v11992_v25  ;;  %9524 = vmatpush1.bf16.msra.mxu1 %v11995_v35  ;;  %v12049_v25 = vld [vmem:[%s13494_s24 + $0x3b0] ss:$8 sps:$4 sm:$0xff]   ;;  %v12054_v35 = vld [vmem:[%s13494_s24 + $0x2a4] ss:$8 sps:$4 sm:$0xff]  }
0x16ab   : > { %9472 = vmatprep.subr.bf16.mxu0 %v12000_v3  ;;  %9525 = vmatprep.subr.bf16.mxu1 %v12003_v31  ;;  %v12057_v3 = vld [vmem:[%s13494_s24 + $0x3a4] ss:$8 sps:$4 sm:$0xff]   ;;  %v5956_v31 = vsub.s32 6, %v13648_v39 }
0x16ae   : > { %9473 = vmatpush1.bf16.msra.mxu0 %v11998_v20  ;;  %9526 = vmatpush1.bf16.msra.mxu1 %v12001_v2  ;;  %v7444_v20 = vpop.f32.mrf.mxu0  ;;  %v7497_v2 = vpop.f32.mrf.mxu1 }
0x16af   : > { %9474 = vmatprep.subr.bf16.mxu0 %v12006_v34  ;;  %9527 = vmatprep.subr.bf16.mxu1 %v12009_v44  ;;  %v12052_v34 = vld [vmem:[%s13494_s24 + $0x2a0] ss:$8 sps:$4 sm:$0xff]  }
0x16b0   : > { %v12055_v44 = vld [vmem:[%s13494_s24 + $0x3a0] ss:$8 sps:$4 sm:$0xff]  }
0x16b2   : > { %9475 = vmatpush1.bf16.msra.mxu0 %v12004_v6  ;;  %9528 = vmatpush1.bf16.msra.mxu1 %v12007_v48  ;;  %v12060_v6 = vld [vmem:[%s13494_s24 + $0x294] ss:$8 sps:$4 sm:$0xff]  }
0x16b3   : > { %9476 = vmatprep.subr.bf16.mxu0 %v12012_v10  ;;  %9529 = vmatprep.subr.bf16.mxu1 %v12015_v21  ;;  %v12063_v48 = vld [vmem:[%s13494_s24 + $0x394] ss:$8 sps:$4 sm:$0xff]   ;;  %v5949_v10 = vrot.slane %v14885_v62, %v13751_v11  ;;  %v5957_v21 = vrot.slane %v14885_v62, %v5956_v31 }
0x16b5   : > { %v7431_v62 = vadd.f32 %v14998_v8, %v5949_v10  ;;  %v12072_v8 = vld [vmem:[%s13494_s24 + $0x474] ss:$8 sps:$4 sm:$0xff]  }
0x16b6   : > { %9477 = vmatpush1.bf16.msra.mxu0 %v12010_v52  ;;  %9530 = vmatpush1.bf16.msra.mxu1 %v12013_v16  ;;  %v7446_v52 = vpop.f32.mrf.mxu0  ;;  %v7499_v16 = vpop.f32.mrf.mxu1 }
0x16b7   : > { %9478 = vmatprep.subr.bf16.mxu0 %v12018_v18  ;;  %9531 = vmatprep.subr.bf16.mxu1 %v12021_v7  ;;  %v7435_v18 = vadd.f32 %v15013_v57, %v5949_v10  ;;  %v12058_v7 = vld [vmem:[%s13494_s24 + $0x290] ss:$8 sps:$4 sm:$0xff]   ;;  %v7500_v57 = vadd.f32 %v7499_v16, %v15005_v14 }
0x16ba   : > { %9479 = vmatpush1.bf16.msra.mxu0 %v12016_v26  ;;  %9532 = vmatpush1.bf16.msra.mxu1 %v12019_v60  ;;  %v12061_v26 = vld [vmem:[%s13494_s24 + $0x390] ss:$8 sps:$4 sm:$0xff]   ;;  %v7488_v60 = vadd.f32 %v15015_v24, %v5957_v21  ;;  %v12064_v24 = vld [vmem:[%s13494_s24 + $0x280] ss:$8 sps:$4 sm:$0xff]  }
0x16bb   : > { %9480 = vmatprep.subr.bf16.mxu0 %v12024_v30  ;;  %9533 = vmatprep.subr.bf16.mxu1 %v12027_v22  ;;  %v12066_v30 = vld [vmem:[%s13494_s24 + $0x284] ss:$8 sps:$4 sm:$0xff]  }
0x16bc   : > { %v12069_v22 = vld [vmem:[%s13494_s24 + $0x384] ss:$8 sps:$4 sm:$0xff]  }
0x16be   : > { %9481 = vmatpush2.bf16.msra.mxu0 %v12022_v43  ;;  %9534 = vmatpush2.bf16.msra.mxu1 %v12025_v49  ;;  %v7447_v43 = vadd.f32 %v7446_v52, %v14994_v53  ;;  %v7484_v49 = vadd.f32 %v15000_v32, %v5957_v21  ;;  %v7769_v32 = vmax.f32 %v7500_v57, 0.0 }
0x16bf   : > { %9482 = vmatprep.subr.bf16.mxu0 %v12030_v45  ;;  %9535 = vmatprep.subr.bf16.mxu1 %v12033_v46  ;;  %v7734_v45 = vmax.f32 %v7435_v18, 0.0  ;;  %v7443_v46 = vadd.f32 %v7442_v55, %v14994_v53 }
0x16c1   : > { %v7751_v53 = vmax.f32 %v7443_v46, 0.0 }
0x16c2   : > { %9483 = vmatpush2.bf16.msra.mxu0 %v12028_v9  ;;  %9536 = vmatpush2.bf16.msra.mxu1 %v12031_v0  ;;  %v7496_v9 = vadd.f32 %v7495_v23, %v15005_v14  ;;  %v12067_v0 = vld [vmem:[%s13494_s24 + $0x380] ss:$8 sps:$4 sm:$0xff]  }
0x16c3   : > { %9484 = vmatprep.subr.bf16.mxu0 %v12036_v13  ;;  %9537 = vmatprep.subr.bf16.mxu1 %v12039_v12  ;;  %v7736_v13 = vmax.f32 %v7488_v60, 0.0  ;;  %v12075_v12 = vld [vmem:[%s13494_s24 + $0x574] ss:$8 sps:$4 sm:$0xff]   ;;  %v12076_v60 = vld [vmem:[%s13494_s24 + $0x460] ss:$8 sps:$4 sm:$0xff]  }
0x16c6   : > { %9485 = vmatpush2.bf16.msra.mxu0 %v12034_v33  ;;  %9538 = vmatpush2.bf16.msra.mxu1 %v12037_v41  ;;  %v7718_v33 = vmax.f32 %v7431_v62, 0.0  ;;  %v7767_v41 = vmax.f32 %v7447_v43, 0.0 }
0x16c7   : > { %9486 = vmatprep.subr.bf16.mxu0 %v12042_v59  ;;  %9539 = vmatprep.subr.bf16.mxu1 %v12045_v54  ;;  %v7720_v59 = vmax.f32 %v7484_v49, 0.0 }
0x16c8   : > { %v7782_v54 = vpack.c.bf16 %v7734_v45, %v7718_v33 }
0x16c9   : > { %v7784_v14 = vpack.c.bf16 %v7736_v13, %v7720_v59  ;;  %v12090_v13 = vld [vmem:[%s13494_s24 + $0x444] ss:$8 sps:$4 sm:$0xff]  }
0x16ca   : > { %9487 = vmatpush2.bf16.msra.mxu0 %v12040_v61  ;;  %9540 = vmatpush2.bf16.msra.mxu1 %v12043_v63  ;;  %v7753_v61 = vmax.f32 %v7496_v9, 0.0  ;;  %v7445_v63 = vadd.f32 %v7444_v20, %v5949_v10 }
0x16cb   : > { %9488 = vmatprep.subr.bf16.mxu0 %v12048_v50  ;;  %9541 = vmatprep.subr.bf16.mxu1 %v12051_v5  ;;  %v7498_v50 = vadd.f32 %v7497_v2, %v5957_v21  ;;  %v15098_v5 = vld [vmem:[%s13492_s2 + $0x8] sm:$0xff] }
0x16cc   : > { %v15112_v20 = vrot.slane %v15098_v5, %v13670_v51  ;;  %v12078_v2 = vld [vmem:[%s13494_s24 + $0x464] ss:$8 sps:$4 sm:$0xff]   ;;  %v7766_v18 = vmax.f32 %v7445_v63, 0.0  ;;  %v12099_v63 = vld [vmem:[%s13494_s24 + $0x534] ss:$8 sps:$4 sm:$0xff]  }
0x16ce   : > { %9489 = vmatpush2.bf16.msra.mxu0 %v12046_v29  ;;  %9542 = vmatpush2.bf16.msra.mxu1 %v12049_v25  ;;  %v12070_v29 = vld [vmem:[%s13494_s24 + $0x470] ss:$8 sps:$4 sm:$0xff]  }
0x16cf   : > { %9490 = vmatprep.subr.bf16.mxu0 %v12054_v35  ;;  %9543 = vmatprep.subr.bf16.mxu1 %v12057_v3  ;;  %v12073_v25 = vld [vmem:[%s13494_s24 + $0x570] ss:$8 sps:$4 sm:$0xff]   ;;  %v7799_v35 = vpack.c.bf16 %v7767_v41, %v7751_v53  ;;  %v7801_v3 = vpack.c.bf16 %v7769_v32, %v7753_v61  ;;  %v12093_v32 = vld [vmem:[%s13494_s24 + $0x544] ss:$8 sps:$4 sm:$0xff]   ;;  %v12088_v53 = vld [vmem:[%s13494_s24 + $0x440] ss:$8 sps:$4 sm:$0xff]  }
0x16d0   : > { %v12091_v61 = vld [vmem:[%s13494_s24 + $0x540] ss:$8 sps:$4 sm:$0xff]  }
0x16d2   : > { %9491 = vmatpush2.bf16.msra.mxu0 %v12052_v34  ;;  %9544 = vmatpush2.bf16.msra.mxu1 %v12055_v44  ;;  %v15108_v34 = vrot.slane %v15098_v5, %v13683_v56  ;;  %v12081_v44 = vld [vmem:[%s13494_s24 + $0x564] ss:$8 sps:$4 sm:$0xff]  }
0x16d3   : > { %9492 = vmatprep.subr.bf16.mxu0 %v12060_v6  ;;  %9545 = vmatprep.subr.bf16.mxu1 %v12063_v48  ;;  %v7441_v6 = vadd.f32 %v15059_v36, %v5949_v10  ;;  %v7494_v48 = vadd.f32 %v15061_v38, %v5957_v21  ;;  %v12079_v36 = vld [vmem:[%s13494_s24 + $0x560] ss:$8 sps:$4 sm:$0xff]   ;;  %v12084_v21 = vld [vmem:[%s13494_s24 + $0x454] ss:$8 sps:$4 sm:$0xff]  }
0x16d5   : > { %v7752_v62 = vmax.f32 %v7494_v48, 0.0  ;;  %v12106_v48 = vld [vmem:[%s13494_s24 + $0x410] ss:$8 sps:$4 sm:$0xff]  }
0x16d6   : > { %9493 = vmatpush2.bf16.msra.mxu0 %v12058_v7  ;;  %9546 = vmatpush2.bf16.msra.mxu1 %v12061_v26  ;;  %v7768_v7 = vmax.f32 %v7498_v50, 0.0  ;;  %v12094_v50 = vld [vmem:[%s13494_s24 + $0x430] ss:$8 sps:$4 sm:$0xff]  }
0x16d7   : > { %9494 = vmatprep.subr.bf16.mxu0 %v12066_v30  ;;  %9547 = vmatprep.subr.bf16.mxu1 %v12069_v22  ;;  %v12087_v30 = vld [vmem:[%s13494_s24 + $0x554] ss:$8 sps:$4 sm:$0xff]   ;;  %v7750_v22 = vmax.f32 %v7441_v6, 0.0 }
0x16d8   : > { %v7800_v9 = vpack.c.bf16 %v7768_v7, %v7752_v62  ;;  %v12111_v6 = vld [vmem:[%s13494_s24 + $0x514] ss:$8 sps:$4 sm:$0xff]   ;;  %v12112_v7 = vld [vmem:[%s13494_s24 + $0x400] ss:$8 sps:$4 sm:$0xff]  }
0x16d9   : > { %v7798_v46 = vpack.c.bf16 %v7766_v18, %v7750_v22  ;;  %v12117_v18 = vld [vmem:[%s13494_s24 + $0x504] ss:$8 sps:$4 sm:$0xff]   ;;  %v12124_v62 = vld [vmem:[%s13494_s24 + $0x4e0] ss:$8 sps:$4 sm:$0xff]  }
0x16da   : > { %9495 = vmatpush2.bf16.msra.mxu0 %v12064_v24  ;;  %9548 = vmatpush2.bf16.msra.mxu1 %v12067_v0  ;;  %v12082_v24 = vld [vmem:[%s13494_s24 + $0x450] ss:$8 sps:$4 sm:$0xff]   ;;  %v12129_v22 = vld [vmem:[%s13494_s24 + $0x5e4] ss:$8 sps:$4 sm:$0xff]  }
0x16db   : > { %v15100_v55 = vpop.f32.mrf.mxu0  ;;  %v15102_v23 = vpop.f32.mrf.mxu1  ;;  %9570 = vmatprep.subr.bf16.mxu0 %v12072_v8  ;;  %9623 = vmatprep.subr.bf16.mxu1 %v12075_v12  ;;  %v12085_v0 = vld [vmem:[%s13494_s24 + $0x550] ss:$8 sps:$4 sm:$0xff]  }
0x16dd   : > { %9497 = vmatmul.mubr.bf16.vlgmr.msra.gmra.mxu0 %v7782_v54  ;;  %9550 = vmatmul.mubr.bf16.vlgmr.msra.gmra.mxu1 %v7784_v14  ;;  %v7538_v52 = vpop.f32.mrf.mxu0  ;;  %v7591_v16 = vpop.f32.mrf.mxu1  ;;  %v12096_v14 = vld [vmem:[%s13494_s24 + $0x434] ss:$8 sps:$4 sm:$0xff]  }
0x16de   : > { %9506 = vmatprep.mubr.bf16.mxu0 %v7799_v35  ;;  %9559 = vmatprep.mubr.bf16.mxu1 %v7801_v3  ;;  %v7539_v38 = vadd.f32 %v7538_v52, %v15108_v34  ;;  %v7592_v10 = vadd.f32 %v7591_v16, %v15112_v20  ;;  %v12105_v35 = vld [vmem:[%s13494_s24 + $0x524] ss:$8 sps:$4 sm:$0xff]   ;;  %v12100_v3 = vld [vmem:[%s13494_s24 + $0x420] ss:$8 sps:$4 sm:$0xff]   ;;  %v12109_v52 = vld [vmem:[%s13494_s24 + $0x510] ss:$8 sps:$4 sm:$0xff]  }
0x16df   : > { %9571 = vmatpush1.bf16.msra.mxu0 %v12070_v29  ;;  %9624 = vmatpush1.bf16.msra.mxu1 %v12073_v25  ;;  %v15118_v51 = vpop.f32.mrf.mxu0  ;;  %v15120_v26 = vpop.f32.mrf.mxu1  ;;  %v12097_v29 = vld [vmem:[%s13494_s24 + $0x530] ss:$8 sps:$4 sm:$0xff]   ;;  %v12102_v25 = vld [vmem:[%s13494_s24 + $0x424] ss:$8 sps:$4 sm:$0xff]  }
0x16e0   : > { %9572 = vmatprep.subr.bf16.mxu0 %v12078_v2  ;;  %9625 = vmatprep.subr.bf16.mxu1 %v12081_v44  ;;  %v7723_v8 = vmax.f32 %v7539_v38, 0.0  ;;  %v7725_v12 = vmax.f32 %v7592_v10, 0.0  ;;  %v12103_v2 = vld [vmem:[%s13494_s24 + $0x520] ss:$8 sps:$4 sm:$0xff]   ;;  %v12108_v44 = vld [vmem:[%s13494_s24 + $0x414] ss:$8 sps:$4 sm:$0xff]  }
0x16e1   : > { %v7542_v43 = vpop.f32.mrf.mxu0  ;;  %v7595_v57 = vpop.f32.mrf.mxu1  ;;  %v12114_v16 = vld [vmem:[%s13494_s24 + $0x404] ss:$8 sps:$4 sm:$0xff]   ;;  %v12123_v38 = vld [vmem:[%s13494_s24 + $0x5f4] ss:$8 sps:$4 sm:$0xff]   ;;  %v12118_v10 = vld [vmem:[%s13494_s24 + $0x4f0] ss:$8 sps:$4 sm:$0xff]  }
0x16e2   : > { %v7543_v49 = vadd.f32 %v7542_v43, %v15108_v34  ;;  %v7596_v45 = vadd.f32 %v7595_v57, %v15112_v20  ;;  %v12127_v43 = vld [vmem:[%s13494_s24 + $0x5e0] ss:$8 sps:$4 sm:$0xff]   ;;  %v12132_v57 = vld [vmem:[%s13494_s24 + $0x4d4] ss:$8 sps:$4 sm:$0xff]  }
0x16e3   : > { %9573 = vmatpush1.bf16.msra.mxu0 %v12076_v60  ;;  %9626 = vmatpush1.bf16.msra.mxu1 %v12079_v36  ;;  %v12115_v60 = vld [vmem:[%s13494_s24 + $0x500] ss:$8 sps:$4 sm:$0xff]   ;;  %v12120_v36 = vld [vmem:[%s13494_s24 + $0x4f4] ss:$8 sps:$4 sm:$0xff]  }
0x16e4   : > { %v7739_v33 = vmax.f32 %v7543_v49, 0.0  ;;  %v7741_v41 = vmax.f32 %v7596_v45, 0.0  ;;  %9574 = vmatprep.subr.bf16.mxu0 %v12084_v21  ;;  %9627 = vmatprep.subr.bf16.mxu1 %v12087_v30  ;;  %v12121_v21 = vld [vmem:[%s13494_s24 + $0x5f0] ss:$8 sps:$4 sm:$0xff]   ;;  %v12126_v30 = vld [vmem:[%s13494_s24 + $0x4e4] ss:$8 sps:$4 sm:$0xff]  }
0x16e5   : > { %9507 = vmatmul.mubr.bf16.gmra.mxu0 %v7798_v46  ;;  %9560 = vmatmul.mubr.bf16.gmra.mxu1 %v7800_v9  ;;  %v12135_v49 = vld [vmem:[%s13494_s24 + $0x5d4] ss:$8 sps:$4 sm:$0xff]   ;;  %v12130_v45 = vld [vmem:[%s13494_s24 + $0x4d0] ss:$8 sps:$4 sm:$0xff]   ;;  %v12138_v9 = vld [vmem:[%s13494_s24 + $0x4c4] ss:$8 sps:$4 sm:$0xff]  }
0x16e6   : > { %v7787_v59 = vpack.c.bf16 %v7739_v33, %v7723_v8  ;;  %v7789_v54 = vpack.c.bf16 %v7741_v41, %v7725_v12  ;;  %v12133_v46 = vld [vmem:[%s13494_s24 + $0x5d0] ss:$8 sps:$4 sm:$0xff]   ;;  %v12136_v8 = vld [vmem:[%s13494_s24 + $0x4c0] ss:$8 sps:$4 sm:$0xff]   ;;  %v12144_v33 = vld [vmem:[%s13494_s24 + $0x4b4] ss:$8 sps:$4 sm:$0xff]  }
0x16e7   : > { %9575 = vmatpush1.bf16.msra.mxu0 %v12082_v24  ;;  %9628 = vmatpush1.bf16.msra.mxu1 %v12085_v0  ;;  %v12141_v24 = vld [vmem:[%s13494_s24 + $0x5c4] ss:$8 sps:$4 sm:$0xff]   ;;  %v15166_v0 = vpop.f32.mrf.mxu0  ;;  %v12139_v12 = vld [vmem:[%s13494_s24 + $0x5c0] ss:$8 sps:$4 sm:$0xff]   ;;  %v12147_v41 = vld [vmem:[%s13494_s24 + $0x5b4] ss:$8 sps:$4 sm:$0xff]  }
0x16e8   : > { %9576 = vmatprep.subr.bf16.mxu0 %v12090_v13  ;;  %9629 = vmatprep.subr.bf16.mxu1 %v12093_v32  ;;  %v15168_v13 = vpop.f32.mrf.mxu1 }
0x16e9   : > { %9602 = vmatprep.mubr.bf16.mxu0 %v7787_v59  ;;  %9655 = vmatprep.mubr.bf16.mxu1 %v7789_v54  ;;  %v7548_v32 = vpop.f32.mrf.mxu0  ;;  %v12142_v54 = vld [vmem:[%s13494_s24 + $0x4b0] ss:$8 sps:$4 sm:$0xff]  }
0x16ea   : > { %v7601_v59 = vpop.f32.mrf.mxu1 }
0x16eb   : > { %9577 = vmatpush1.bf16.msra.mxu0 %v12088_v53  ;;  %9630 = vmatpush1.bf16.msra.mxu1 %v12091_v61  ;;  %v12145_v53 = vld [vmem:[%s13494_s24 + $0x5b0] ss:$8 sps:$4 sm:$0xff]   ;;  %v12150_v61 = vld [vmem:[%s13494_s24 + $0x4a4] ss:$8 sps:$4 sm:$0xff]  }
0x16ec   : > { %9578 = vmatprep.subr.bf16.mxu0 %v12096_v14  ;;  %9631 = vmatprep.subr.bf16.mxu1 %v12099_v63  ;;  %v12153_v14 = vld [vmem:[%s13494_s24 + $0x5a4] ss:$8 sps:$4 sm:$0xff]   ;;  %v7550_v63 = vpop.f32.mrf.mxu0 }
0x16ef   : > { %9579 = vmatpush1.bf16.msra.mxu0 %v12094_v50  ;;  %9632 = vmatpush1.bf16.msra.mxu1 %v12097_v29  ;;  %v7603_v50 = vpop.f32.mrf.mxu1  ;;  %v12148_v29 = vld [vmem:[%s13494_s24 + $0x4a0] ss:$8 sps:$4 sm:$0xff]  }
0x16f0   : > { %9580 = vmatprep.subr.bf16.mxu0 %v12102_v25  ;;  %9633 = vmatprep.subr.bf16.mxu1 %v12105_v35  ;;  %v12151_v25 = vld [vmem:[%s13494_s24 + $0x5a0] ss:$8 sps:$4 sm:$0xff]   ;;  %v12156_v35 = vld [vmem:[%s13494_s24 + $0x494] ss:$8 sps:$4 sm:$0xff]  }
0x16f3   : > { %9581 = vmatpush1.bf16.msra.mxu0 %v12100_v3  ;;  %9634 = vmatpush1.bf16.msra.mxu1 %v12103_v2  ;;  %v12159_v3 = vld [vmem:[%s13494_s24 + $0x594] ss:$8 sps:$4 sm:$0xff]   ;;  %v5965_v2 = vrot.slane %v15098_v5, %v13651_v40 }
0x16f4   : > { %9582 = vmatprep.subr.bf16.mxu0 %v12108_v44  ;;  %9635 = vmatprep.subr.bf16.mxu1 %v12111_v6  ;;  %v5973_v44 = vrot.slane %v15098_v5, %v13657_v42  ;;  %v7552_v6 = vpop.f32.mrf.mxu0 }
0x16f5   : > { %v7537_v42 = vadd.f32 %v15100_v55, %v5965_v2  ;;  %v12171_v55 = vld [vmem:[%s13494_s24 + $0x774] ss:$8 sps:$4 sm:$0xff]  }
0x16f7   : > { %9583 = vmatpush1.bf16.msra.mxu0 %v12106_v48  ;;  %9636 = vmatpush1.bf16.msra.mxu1 %v12109_v52  ;;  %v7605_v48 = vpop.f32.mrf.mxu1  ;;  %v7541_v52 = vadd.f32 %v15118_v51, %v5965_v2 }
0x16f8   : > { %9584 = vmatprep.subr.bf16.mxu0 %v12114_v16  ;;  %9637 = vmatprep.subr.bf16.mxu1 %v12117_v18  ;;  %v12154_v16 = vld [vmem:[%s13494_s24 + $0x490] ss:$8 sps:$4 sm:$0xff]   ;;  %v7606_v51 = vadd.f32 %v7605_v48, %v15112_v20 }
0x16f9   : > { %v12157_v18 = vld [vmem:[%s13494_s24 + $0x590] ss:$8 sps:$4 sm:$0xff]  }
0x16fb   : > { %9585 = vmatpush1.bf16.msra.mxu0 %v12112_v7  ;;  %9638 = vmatpush1.bf16.msra.mxu1 %v12115_v60  ;;  %v7594_v7 = vadd.f32 %v15120_v26, %v5973_v44  ;;  %v12162_v60 = vld [vmem:[%s13494_s24 + $0x484] ss:$8 sps:$4 sm:$0xff]   ;;  %v12160_v26 = vld [vmem:[%s13494_s24 + $0x480] ss:$8 sps:$4 sm:$0xff]  }
0x16fc   : > { %9586 = vmatprep.subr.bf16.mxu0 %v12120_v36  ;;  %9639 = vmatprep.subr.bf16.mxu1 %v12123_v38  ;;  %v12165_v36 = vld [vmem:[%s13494_s24 + $0x584] ss:$8 sps:$4 sm:$0xff]   ;;  %v7553_v38 = vadd.f32 %v7552_v6, %v15108_v34 }
0x16ff   : > { %9587 = vmatpush2.bf16.msra.mxu0 %v12118_v10  ;;  %9640 = vmatpush2.bf16.msra.mxu1 %v12121_v21  ;;  %v7590_v10 = vadd.f32 %v15102_v23, %v5973_v44  ;;  %v7738_v21 = vmax.f32 %v7541_v52, 0.0  ;;  %v12172_v52 = vld [vmem:[%s13494_s24 + $0x660] ss:$8 sps:$4 sm:$0xff]  }
0x1700   : > { %9588 = vmatprep.subr.bf16.mxu0 %v12126_v30  ;;  %9641 = vmatprep.subr.bf16.mxu1 %v12129_v22  ;;  %v7549_v30 = vadd.f32 %v7548_v32, %v15108_v34  ;;  %v7602_v22 = vadd.f32 %v7601_v59, %v15112_v20  ;;  %v12166_v32 = vld [vmem:[%s13494_s24 + $0x670] ss:$8 sps:$4 sm:$0xff]  }
0x1701   : > { %v7724_v23 = vmax.f32 %v7590_v10, 0.0  ;;  %v12169_v59 = vld [vmem:[%s13494_s24 + $0x770] ss:$8 sps:$4 sm:$0xff]  }
0x1702   : > { %v7757_v34 = vmax.f32 %v7602_v22, 0.0  ;;  %v12186_v22 = vld [vmem:[%s13494_s24 + $0x644] ss:$8 sps:$4 sm:$0xff]  }
0x1703   : > { %9589 = vmatpush2.bf16.msra.mxu0 %v12124_v62  ;;  %9642 = vmatpush2.bf16.msra.mxu1 %v12127_v43  ;;  %v12163_v62 = vld [vmem:[%s13494_s24 + $0x580] ss:$8 sps:$4 sm:$0xff]   ;;  %v7740_v43 = vmax.f32 %v7594_v7, 0.0 }
0x1704   : > { %9590 = vmatprep.subr.bf16.mxu0 %v12132_v57  ;;  %9643 = vmatprep.subr.bf16.mxu1 %v12135_v49  ;;  %v12168_v57 = vld [vmem:[%s13494_s24 + $0x674] ss:$8 sps:$4 sm:$0xff]   ;;  %v7722_v49 = vmax.f32 %v7537_v42, 0.0 }
0x1705   : > { %v7788_v20 = vpack.c.bf16 %v7740_v43, %v7724_v23  ;;  %v12187_v23 = vld [vmem:[%s13494_s24 + $0x740] ss:$8 sps:$4 sm:$0xff]  }
0x1707   : > { %9591 = vmatpush2.bf16.msra.mxu0 %v12130_v45  ;;  %9644 = vmatpush2.bf16.msra.mxu1 %v12133_v46  ;;  %v7771_v45 = vmax.f32 %v7553_v38, 0.0  ;;  %v7773_v46 = vmax.f32 %v7606_v51, 0.0 }
0x1708   : > { %9592 = vmatprep.subr.bf16.mxu0 %v12138_v9  ;;  %9645 = vmatprep.subr.bf16.mxu1 %v12141_v24  ;;  %v7786_v9 = vpack.c.bf16 %v7738_v21, %v7722_v49  ;;  %v7755_v24 = vmax.f32 %v7549_v30, 0.0  ;;  %v12178_v21 = vld [vmem:[%s13494_s24 + $0x650] ss:$8 sps:$4 sm:$0xff]  }
0x1709   : > { %v12181_v30 = vld [vmem:[%s13494_s24 + $0x750] ss:$8 sps:$4 sm:$0xff]  }
0x170b   : > { %9593 = vmatpush2.bf16.msra.mxu0 %v12136_v8  ;;  %9646 = vmatpush2.bf16.msra.mxu1 %v12139_v12  ;;  %v7551_v8 = vadd.f32 %v7550_v63, %v5965_v2  ;;  %v7604_v12 = vadd.f32 %v7603_v50, %v5973_v44  ;;  %v12174_v63 = vld [vmem:[%s13494_s24 + $0x664] ss:$8 sps:$4 sm:$0xff]  }
0x170c   : > { %9594 = vmatprep.subr.bf16.mxu0 %v12144_v33  ;;  %9647 = vmatprep.subr.bf16.mxu1 %v12147_v41  ;;  %v12177_v50 = vld [vmem:[%s13494_s24 + $0x764] ss:$8 sps:$4 sm:$0xff]  }
0x170d   : > { %v7772_v6 = vmax.f32 %v7604_v12, 0.0  ;;  %v12201_v12 = vld [vmem:[%s13494_s24 + $0x724] ss:$8 sps:$4 sm:$0xff]  }
0x170f   : > { %9595 = vmatpush2.bf16.msra.mxu0 %v12142_v54  ;;  %9648 = vmatpush2.bf16.msra.mxu1 %v12145_v53  ;;  %v7803_v54 = vpack.c.bf16 %v7771_v45, %v7755_v24  ;;  %v7805_v53 = vpack.c.bf16 %v7773_v46, %v7757_v34  ;;  %v12184_v46 = vld [vmem:[%s13494_s24 + $0x640] ss:$8 sps:$4 sm:$0xff]   ;;  %v12195_v24 = vld [vmem:[%s13494_s24 + $0x734] ss:$8 sps:$4 sm:$0xff]   ;;  %v12190_v34 = vld [vmem:[%s13494_s24 + $0x630] ss:$8 sps:$4 sm:$0xff]  }
0x1710   : > { %9596 = vmatprep.subr.bf16.mxu0 %v12150_v61  ;;  %9649 = vmatprep.subr.bf16.mxu1 %v12153_v14  ;;  %v15210_v61 = vrot.slane %v15098_v5, %v13760_v17  ;;  %v15215_v14 = vrot.slane %v15098_v5, %v5960_v19  ;;  %v7770_v17 = vmax.f32 %v7551_v8, 0.0  ;;  %v12198_v8 = vld [vmem:[%s13494_s24 + $0x624] ss:$8 sps:$4 sm:$0xff]  }
0x1713   : > { %9597 = vmatpush2.bf16.msra.mxu0 %v12148_v29  ;;  %9650 = vmatpush2.bf16.msra.mxu1 %v12151_v25  ;;  %v7547_v29 = vadd.f32 %v15166_v0, %v5965_v2  ;;  %v7600_v25 = vadd.f32 %v15168_v13, %v5973_v44  ;;  %v12175_v0 = vld [vmem:[%s13494_s24 + $0x760] ss:$8 sps:$4 sm:$0xff]   ;;  %v12180_v44 = vld [vmem:[%s13494_s24 + $0x654] ss:$8 sps:$4 sm:$0xff]  }
0x1714   : > { %9598 = vmatprep.subr.bf16.mxu0 %v12156_v35  ;;  %9651 = vmatprep.subr.bf16.mxu1 %v12159_v3 }
0x1715   : > { %v7756_v7 = vmax.f32 %v7600_v25, 0.0  ;;  %v12213_v25 = vld [vmem:[%s13494_s24 + $0x704] ss:$8 sps:$4 sm:$0xff]  }
0x1717   : > { %9599 = vmatpush2.bf16.msra.mxu0 %v12154_v16  ;;  %9652 = vmatpush2.bf16.msra.mxu1 %v12157_v18  ;;  %v12183_v16 = vld [vmem:[%s13494_s24 + $0x754] ss:$8 sps:$4 sm:$0xff]   ;;  %v7754_v18 = vmax.f32 %v7547_v29, 0.0  ;;  %v7804_v10 = vpack.c.bf16 %v7772_v6, %v7756_v7  ;;  %v12210_v29 = vld [vmem:[%s13494_s24 + $0x604] ss:$8 sps:$4 sm:$0xff]  }
0x1718   : > { %9600 = vmatprep.subr.bf16.mxu0 %v12162_v60  ;;  %9653 = vmatprep.subr.bf16.mxu1 %v12165_v36  ;;  %v12219_v6 = vld [vmem:[%s13494_s24 + $0x7f4] ss:$8 sps:$4 sm:$0xff]  }
0x1719   : > { %v7802_v51 = vpack.c.bf16 %v7770_v17, %v7754_v18  ;;  %v12216_v17 = vld [vmem:[%s13494_s24 + $0x6f4] ss:$8 sps:$4 sm:$0xff]  }
0x171a   : > { %v12228_v18 = vld [vmem:[%s13494_s24 + $0x6d4] ss:$8 sps:$4 sm:$0xff]  }
0x171b   : > { %9601 = vmatpush2.bf16.msra.mxu0 %v12160_v26  ;;  %9654 = vmatpush2.bf16.msra.mxu1 %v12163_v62  ;;  %v12231_v7 = vld [vmem:[%s13494_s24 + $0x7d4] ss:$8 sps:$4 sm:$0xff]  }
0x171c   : > { %v15202_v33 = vpop.f32.mrf.mxu0  ;;  %v15204_v41 = vpop.f32.mrf.mxu1  ;;  %9676 = vmatprep.subr.bf16.mxu0 %v12168_v57  ;;  %9729 = vmatprep.subr.bf16.mxu1 %v12171_v55  ;;  %v12189_v55 = vld [vmem:[%s13494_s24 + $0x744] ss:$8 sps:$4 sm:$0xff]  }
0x171e   : > { %9603 = vmatmul.mubr.bf16.vlgmr.msra.gmra.mxu0 %v7786_v9  ;;  %9656 = vmatmul.mubr.bf16.vlgmr.msra.gmra.mxu1 %v7788_v20  ;;  %v7644_v35 = vpop.f32.mrf.mxu0  ;;  %v7697_v3 = vpop.f32.mrf.mxu1  ;;  %v12192_v9 = vld [vmem:[%s13494_s24 + $0x634] ss:$8 sps:$4 sm:$0xff]   ;;  %v12193_v20 = vld [vmem:[%s13494_s24 + $0x730] ss:$8 sps:$4 sm:$0xff]  }
0x171f   : > { %9612 = vmatprep.mubr.bf16.mxu0 %v7803_v54  ;;  %9665 = vmatprep.mubr.bf16.mxu1 %v7805_v53  ;;  %v7645_v13 = vadd.f32 %v7644_v35, %v15210_v61  ;;  %v7698_v2 = vadd.f32 %v7697_v3, %v15215_v14  ;;  %v12204_v54 = vld [vmem:[%s13494_s24 + $0x614] ss:$8 sps:$4 sm:$0xff]   ;;  %v12208_v35 = vld [vmem:[%s13494_s24 + $0x600] ss:$8 sps:$4 sm:$0xff]  }
0x1720   : > { %9677 = vmatpush1.bf16.msra.mxu0 %v12166_v32  ;;  %9730 = vmatpush1.bf16.msra.mxu1 %v12169_v59  ;;  %v15221_v19 = vpop.f32.mrf.mxu0  ;;  %v15223_v48 = vpop.f32.mrf.mxu1  ;;  %v12196_v32 = vld [vmem:[%s13494_s24 + $0x620] ss:$8 sps:$4 sm:$0xff]   ;;  %v12207_v53 = vld [vmem:[%s13494_s24 + $0x714] ss:$8 sps:$4 sm:$0xff]  }
0x1721   : > { %9678 = vmatprep.subr.bf16.mxu0 %v12174_v63  ;;  %9731 = vmatprep.subr.bf16.mxu1 %v12177_v50  ;;  %v7727_v26 = vmax.f32 %v7645_v13, 0.0  ;;  %v7729_v62 = vmax.f32 %v7698_v2, 0.0  ;;  %v12199_v59 = vld [vmem:[%s13494_s24 + $0x720] ss:$8 sps:$4 sm:$0xff]   ;;  %v12202_v63 = vld [vmem:[%s13494_s24 + $0x610] ss:$8 sps:$4 sm:$0xff]  }
0x1722   : > { %v7648_v60 = vpop.f32.mrf.mxu0  ;;  %v7701_v36 = vpop.f32.mrf.mxu1  ;;  %v12205_v50 = vld [vmem:[%s13494_s24 + $0x710] ss:$8 sps:$4 sm:$0xff]   ;;  %v12211_v3 = vld [vmem:[%s13494_s24 + $0x700] ss:$8 sps:$4 sm:$0xff]   ;;  %v12222_v13 = vld [vmem:[%s13494_s24 + $0x6e4] ss:$8 sps:$4 sm:$0xff]  }
0x1723   : > { %v7649_v42 = vadd.f32 %v7648_v60, %v15210_v61  ;;  %v7702_v38 = vadd.f32 %v7701_v36, %v15215_v14  ;;  %v12225_v2 = vld [vmem:[%s13494_s24 + $0x7e4] ss:$8 sps:$4 sm:$0xff]   ;;  %v12226_v60 = vld [vmem:[%s13494_s24 + $0x6d0] ss:$8 sps:$4 sm:$0xff]  }
0x1724   : > { %9679 = vmatpush1.bf16.msra.mxu0 %v12172_v52  ;;  %9732 = vmatpush1.bf16.msra.mxu1 %v12175_v0  ;;  %v12214_v52 = vld [vmem:[%s13494_s24 + $0x6f0] ss:$8 sps:$4 sm:$0xff]  }
0x1725   : > { %v7743_v43 = vmax.f32 %v7649_v42, 0.0  ;;  %v7745_v57 = vmax.f32 %v7702_v38, 0.0  ;;  %9680 = vmatprep.subr.bf16.mxu0 %v12180_v44  ;;  %9733 = vmatprep.subr.bf16.mxu1 %v12183_v16  ;;  %v12217_v0 = vld [vmem:[%s13494_s24 + $0x7f0] ss:$8 sps:$4 sm:$0xff]   ;;  %v12220_v44 = vld [vmem:[%s13494_s24 + $0x6e0] ss:$8 sps:$4 sm:$0xff]  }
0x1726   : > { %9613 = vmatmul.mubr.bf16.gmra.mxu0 %v7802_v51  ;;  %9666 = vmatmul.mubr.bf16.gmra.mxu1 %v7804_v10  ;;  %v12223_v16 = vld [vmem:[%s13494_s24 + $0x7e0] ss:$8 sps:$4 sm:$0xff]   ;;  %v12229_v36 = vld [vmem:[%s13494_s24 + $0x7d0] ss:$8 sps:$4 sm:$0xff]   ;;  %v12234_v42 = vld [vmem:[%s13494_s24 + $0x6c4] ss:$8 sps:$4 sm:$0xff]   ;;  %v15269_v51 = vpop.f32.mrf.mxu0  ;;  %v15271_v10 = vpop.f32.mrf.mxu1 }
0x1727   : > { %v7791_v49 = vpack.c.bf16 %v7743_v43, %v7727_v26  ;;  %v7793_v45 = vpack.c.bf16 %v7745_v57, %v7729_v62  ;;  %v12237_v38 = vld [vmem:[%s13494_s24 + $0x7c4] ss:$8 sps:$4 sm:$0xff]   ;;  %v12243_v26 = vld [vmem:[%s13494_s24 + $0x7b4] ss:$8 sps:$4 sm:$0xff]   ;;  %v12238_v57 = vld [vmem:[%s13494_s24 + $0x6b0] ss:$8 sps:$4 sm:$0xff]  }
0x1728   : > { %9681 = vmatpush1.bf16.msra.mxu0 %v12178_v21  ;;  %9734 = vmatpush1.bf16.msra.mxu1 %v12181_v30  ;;  %v12232_v21 = vld [vmem:[%s13494_s24 + $0x6c0] ss:$8 sps:$4 sm:$0xff]   ;;  %v7654_v62 = vpop.f32.mrf.mxu0  ;;  %v7707_v43 = vpop.f32.mrf.mxu1 }
0x1729   : > { %9682 = vmatprep.subr.bf16.mxu0 %v12186_v22  ;;  %9735 = vmatprep.subr.bf16.mxu1 %v12189_v55  ;;  %v12235_v30 = vld [vmem:[%s13494_s24 + $0x7c0] ss:$8 sps:$4 sm:$0xff]   ;;  %v12240_v22 = vld [vmem:[%s13494_s24 + $0x6b4] ss:$8 sps:$4 sm:$0xff]   ;;  %v12241_v55 = vld [vmem:[%s13494_s24 + $0x7b0] ss:$8 sps:$4 sm:$0xff]  }
0x172a   : > { %9708 = vmatprep.mubr.bf16.mxu0 %v7791_v49  ;;  %9761 = vmatprep.mubr.bf16.mxu1 %v7793_v45  ;;  %v12246_v49 = vld [vmem:[%s13494_s24 + $0x6a4] ss:$8 sps:$4 sm:$0xff]  }
0x172b   : > { %v12249_v45 = vld [vmem:[%s13494_s24 + $0x7a4] ss:$8 sps:$4 sm:$0xff]  }
0x172c   : > { %9683 = vmatpush1.bf16.msra.mxu0 %v12184_v46  ;;  %9736 = vmatpush1.bf16.msra.mxu1 %v12187_v23  ;;  %v7656_v46 = vpop.f32.mrf.mxu0  ;;  %v7709_v23 = vpop.f32.mrf.mxu1 }
0x172d   : > { %9684 = vmatprep.subr.bf16.mxu0 %v12192_v9  ;;  %9737 = vmatprep.subr.bf16.mxu1 %v12195_v24  ;;  %v12244_v9 = vld [vmem:[%s13494_s24 + $0x6a0] ss:$8 sps:$4 sm:$0xff]  }
0x172e   : > { %v12247_v24 = vld [vmem:[%s13494_s24 + $0x7a0] ss:$8 sps:$4 sm:$0xff]  }
0x1730   : > { %9685 = vmatpush1.bf16.msra.mxu0 %v12190_v34  ;;  %9738 = vmatpush1.bf16.msra.mxu1 %v12193_v20  ;;  %v12252_v34 = vld [vmem:[%s13494_s24 + $0x694] ss:$8 sps:$4 sm:$0xff]  }
0x1731   : > { %9686 = vmatprep.subr.bf16.mxu0 %v12198_v8  ;;  %9739 = vmatprep.subr.bf16.mxu1 %v12201_v12  ;;  %v12255_v20 = vld [vmem:[%s13494_s24 + $0x794] ss:$8 sps:$4 sm:$0xff]   ;;  %v5981_v8 = vrot.slane %v15098_v5, %v13751_v11  ;;  %v5989_v12 = vrot.slane %v15098_v5, %v5956_v31  ;;  %v12261_v11 = vld [vmem:[%s13494_s24 + $0x784] ss:$8 sps:$4 sm:$0xff]  }
0x1733   : > { %v7643_v5 = vadd.f32 %v15202_v33, %v5981_v8 }
0x1734   : > { %9687 = vmatpush1.bf16.msra.mxu0 %v12196_v32  ;;  %9740 = vmatpush1.bf16.msra.mxu1 %v12199_v59  ;;  %v7658_v32 = vpop.f32.mrf.mxu0  ;;  %v7711_v59 = vpop.f32.mrf.mxu1 }
0x1735   : > { %9688 = vmatprep.subr.bf16.mxu0 %v12204_v54  ;;  %9741 = vmatprep.subr.bf16.mxu1 %v12207_v53  ;;  %v12250_v54 = vld [vmem:[%s13494_s24 + $0x690] ss:$8 sps:$4 sm:$0xff]   ;;  %v7659_v39 = vadd.f32 %v7658_v32, %v15210_v61  ;;  %v7712_v31 = vadd.f32 %v7711_v59, %v15215_v14 }
0x1736   : > { %v12253_v53 = vld [vmem:[%s13494_s24 + $0x790] ss:$8 sps:$4 sm:$0xff]  }
0x1738   : > { %9689 = vmatpush1.bf16.msra.mxu0 %v12202_v63  ;;  %9742 = vmatpush1.bf16.msra.mxu1 %v12205_v50  ;;  %v7647_v63 = vadd.f32 %v15221_v19, %v5981_v8  ;;  %v7700_v50 = vadd.f32 %v15223_v48, %v5989_v12  ;;  %v12256_v19 = vld [vmem:[%s13494_s24 + $0x680] ss:$8 sps:$4 sm:$0xff]  }
0x1739   : > { %9690 = vmatprep.subr.bf16.mxu0 %v12210_v29  ;;  %9743 = vmatprep.subr.bf16.mxu1 %v12213_v25  ;;  %v12258_v29 = vld [vmem:[%s13494_s24 + $0x684] ss:$8 sps:$4 sm:$0xff]   ;;  %v7696_v25 = vadd.f32 %v15204_v41, %v5989_v12  ;;  %v12259_v48 = vld [vmem:[%s13494_s24 + $0x780] ss:$8 sps:$4 sm:$0xff]   ;;  %s15496_s24 = sld [smem:[#allocation54_spill]] (!%p11086_p7) }
0x173c   : > { %9691 = vmatpush1.bf16.msra.mxu0 %v12208_v35  ;;  %9744 = vmatpush1.bf16.msra.mxu1 %v12211_v3  ;;  %v7655_v35 = vadd.f32 %v7654_v62, %v15210_v61  ;;  %v7708_v3 = vadd.f32 %v7707_v43, %v15215_v14  ;;  %v7710_v14 = vadd.f32 %v7709_v23, %v5989_v12 }
0x173d   : > { %9692 = vmatprep.subr.bf16.mxu0 %v12216_v17  ;;  %9745 = vmatprep.subr.bf16.mxu1 %v12219_v6  ;;  %v7742_v17 = vmax.f32 %v7647_v63, 0.0  ;;  %v7744_v6 = vmax.f32 %v7700_v50, 0.0 }
0x173e   : > { %v7761_v33 = vmax.f32 %v7708_v3, 0.0 }
0x1740   : > { %9693 = vmatpush2.bf16.msra.mxu0 %v12214_v52  ;;  %9746 = vmatpush2.bf16.msra.mxu1 %v12217_v0  ;;  %v7775_v52 = vmax.f32 %v7659_v39, 0.0  ;;  %v7777_v0 = vmax.f32 %v7712_v31, 0.0 }
0x1741   : > { %9694 = vmatprep.subr.bf16.mxu0 %v12222_v13  ;;  %9747 = vmatprep.subr.bf16.mxu1 %v12225_v2  ;;  %v7726_v13 = vmax.f32 %v7643_v5, 0.0  ;;  %v7728_v2 = vmax.f32 %v7696_v25, 0.0 }
0x1743   : > { %v7790_v41 = vpack.c.bf16 %v7742_v17, %v7726_v13  ;;  %v7792_v61 = vpack.c.bf16 %v7744_v6, %v7728_v2  ;;  %v8066_v13 = vld [vmem:[%s15480_s5] sm:$0x3] }
0x1744   : > { %9695 = vmatpush2.bf16.msra.mxu0 %v12220_v44  ;;  %9748 = vmatpush2.bf16.msra.mxu1 %v12223_v16  ;;  %v7759_v44 = vmax.f32 %v7655_v35, 0.0  ;;  %v7657_v16 = vadd.f32 %v7656_v46, %v5981_v8 }
0x1745   : > { %9696 = vmatprep.subr.bf16.mxu0 %v12228_v18  ;;  %9749 = vmatprep.subr.bf16.mxu1 %v12231_v7  ;;  %v7809_v7 = vpack.c.bf16 %v7777_v0, %v7761_v33  ;;  %v8071_v33 = vrot.slane %v8066_v13, %v13651_v40 }
0x1746   : > { %v7807_v18 = vpack.c.bf16 %v7775_v52, %v7759_v44 }
0x1748   : > { %9697 = vmatpush2.bf16.msra.mxu0 %v12226_v60  ;;  %9750 = vmatpush2.bf16.msra.mxu1 %v12229_v36  ;;  %v7653_v60 = vadd.f32 %v15269_v51, %v5981_v8  ;;  %v7706_v36 = vadd.f32 %v15271_v10, %v5989_v12 }
0x1749   : > { %9698 = vmatprep.subr.bf16.mxu0 %v12234_v42  ;;  %9751 = vmatprep.subr.bf16.mxu1 %v12237_v38  ;;  %v7774_v42 = vmax.f32 %v7657_v16, 0.0  ;;  %v7776_v38 = vmax.f32 %v7710_v14, 0.0 }
0x174c   : > { %9699 = vmatpush2.bf16.msra.mxu0 %v12232_v21  ;;  %9752 = vmatpush2.bf16.msra.mxu1 %v12235_v30  ;;  %v7758_v21 = vmax.f32 %v7653_v60, 0.0  ;;  %v7760_v30 = vmax.f32 %v7706_v36, 0.0 }
0x174d   : > { %9700 = vmatprep.subr.bf16.mxu0 %v12240_v22  ;;  %9753 = vmatprep.subr.bf16.mxu1 %v12243_v26 }
0x174e   : > { %v7806_v22 = vpack.c.bf16 %v7774_v42, %v7758_v21  ;;  %v7808_v26 = vpack.c.bf16 %v7776_v38, %v7760_v30 }
0x1750   : > { %9701 = vmatpush2.bf16.msra.mxu0 %v12238_v57  ;;  %9754 = vmatpush2.bf16.msra.mxu1 %v12241_v55 }
0x1751   : > { %9702 = vmatprep.subr.bf16.mxu0 %v12246_v49  ;;  %9755 = vmatprep.subr.bf16.mxu1 %v12249_v45 }
0x1754   : > { %9703 = vmatpush2.bf16.msra.mxu0 %v12244_v9  ;;  %9756 = vmatpush2.bf16.msra.mxu1 %v12247_v24 }
0x1755   : > { %9704 = vmatprep.subr.bf16.mxu0 %v12252_v34  ;;  %9757 = vmatprep.subr.bf16.mxu1 %v12255_v20 }
0x1758   : > { %9705 = vmatpush2.bf16.msra.mxu0 %v12250_v54  ;;  %9758 = vmatpush2.bf16.msra.mxu1 %v12253_v53 }
0x1759   : > { %9706 = vmatprep.subr.bf16.mxu0 %v12258_v29  ;;  %9759 = vmatprep.subr.bf16.mxu1 %v12261_v11 }
0x175c   : > { %9707 = vmatpush2.bf16.msra.mxu0 %v12256_v19  ;;  %9760 = vmatpush2.bf16.msra.mxu1 %v12259_v48 }
0x175d   : > { %v9392_v62 = vpop.f32.mrf.mxu0  ;;  %v9445_v43 = vpop.f32.mrf.mxu1 }
0x175e   : > { %v9393_v14 = vadd.f32 %v9392_v62, %v8071_v33 }
0x175f   : > { %9709 = vmatmul.mubr.bf16.vlgmr.msra.gmra.mxu0 %v7790_v41  ;;  %9762 = vmatmul.mubr.bf16.vlgmr.msra.gmra.mxu1 %v7792_v61  ;;  %v9394_v57 = vpop.f32.mrf.mxu0  ;;  %v9447_v55 = vpop.f32.mrf.mxu1  ;;  %v8075_v41 = vrot.slane %v8066_v13, %v13683_v56 }
0x1760   : > { %9718 = vmatprep.mubr.bf16.mxu0 %v7807_v18  ;;  %9771 = vmatprep.mubr.bf16.mxu1 %v7809_v7  ;;  %v9446_v36 = vadd.f32 %v9445_v43, %v9393_v14 }
0x1761   : > { %v9396_v49 = vpop.f32.mrf.mxu0  ;;  %v9449_v51 = vpop.f32.mrf.mxu1  ;;  %v9395_v18 = vadd.f32 %v9394_v57, %v8075_v41 }
0x1762   : > { %v9397_v42 = vadd.f32 %v9396_v49, %v8071_v33 }
0x1763   : > { %v9398_v45 = vpop.f32.mrf.mxu0  ;;  %v9451_v10 = vpop.f32.mrf.mxu1  ;;  %v9448_v38 = vadd.f32 %v9447_v55, %v9395_v18 }
0x1764   : > { %v9399_v21 = vadd.f32 %v9398_v45, %v8075_v41  ;;  %v9450_v58 = vadd.f32 %v9449_v51, %v9397_v42 }
0x1765   : > { %v9402_v46 = vpop.f32.mrf.mxu0  ;;  %v9455_v23 = vpop.f32.mrf.mxu1 }
0x1766   : > { %v9452_v40 = vadd.f32 %v9451_v10, %v9399_v21 }
0x1767   : > { %9719 = vmatmul.mubr.bf16.gmra.mxu0 %v7806_v22  ;;  %9772 = vmatmul.mubr.bf16.gmra.mxu1 %v7808_v26  ;;  %v9404_v9 = vpop.f32.mrf.mxu0  ;;  %v9457_v24 = vpop.f32.mrf.mxu1  ;;  %v9403_v22 = vadd.f32 %v9402_v46, %v8071_v33 }
0x1768   : > { %v9405_v27 = vadd.f32 %v9404_v9, %v8075_v41 }
0x1769   : > { %v9406_v34 = vpop.f32.mrf.mxu0  ;;  %v9459_v20 = vpop.f32.mrf.mxu1  ;;  %v9456_v56 = vadd.f32 %v9455_v23, %v9403_v22 }
0x176a   : > { %v9407_v47 = vadd.f32 %v9406_v34, %v8071_v33  ;;  %v9458_v49 = vadd.f32 %v9457_v24, %v9405_v27 }
0x176b   : > { %v9408_v8 = vpop.f32.mrf.mxu0  ;;  %v15306_v12 = vpop.f32.mrf.mxu1 }
0x176c   : > { %v9409_v55 = vadd.f32 %v9408_v8, %v8075_v41  ;;  %v9460_v14 = vadd.f32 %v9459_v20, %v9407_v47 }
0x179d   : > { %v9498_v32 = vpop.f32.mrf.mxu0  ;;  %v9551_v59 = vpop.f32.mrf.mxu1 }
0x179e   : > { %v9499_v30 = vadd.f32 %v9498_v32, %v9446_v36 }
0x179f   : > { %v9500_v54 = vpop.f32.mrf.mxu0  ;;  %v9553_v53 = vpop.f32.mrf.mxu1 }
0x17a0   : > { %v9501_v15 = vadd.f32 %v9500_v54, %v9448_v38  ;;  %v9552_v4 = vadd.f32 %v9551_v59, %v9499_v30 }
0x17a1   : > { %v9502_v63 = vpop.f32.mrf.mxu0  ;;  %v9555_v50 = vpop.f32.mrf.mxu1 }
0x17a2   : > { %v9503_v13 = vadd.f32 %v9502_v63, %v9450_v58  ;;  %v9554_v1 = vadd.f32 %v9553_v53, %v9501_v15  ;;  %v9462_v58 = vadd.f32 %v15306_v12, %v9409_v55 }
0x17a3   : > { %v9504_v29 = vpop.f32.mrf.mxu0  ;;  %v9557_v11 = vpop.f32.mrf.mxu1 }
0x17a4   : > { %v9505_v37 = vadd.f32 %v9504_v29, %v9452_v40  ;;  %v9556_v32 = vadd.f32 %v9555_v50, %v9503_v13 }
0x17a5   : > { %v9508_v39 = vpop.f32.mrf.mxu0  ;;  %v9561_v31 = vpop.f32.mrf.mxu1 }
0x17a6   : > { %v9509_v45 = vadd.f32 %v9508_v39, %v9456_v56  ;;  %v9558_v9 = vadd.f32 %v9557_v11, %v9505_v37 }
0x17a7   : > { %v9510_v5 = vpop.f32.mrf.mxu0  ;;  %v9563_v25 = vpop.f32.mrf.mxu1 }
0x17a8   : > { %v9511_v18 = vadd.f32 %v9510_v5, %v9458_v49  ;;  %v9562_v23 = vadd.f32 %v9561_v31, %v9509_v45 }
0x17a9   : > { %v9512_v35 = vpop.f32.mrf.mxu0  ;;  %v15308_v3 = vpop.f32.mrf.mxu1 }
0x17aa   : > { %v9513_v34 = vadd.f32 %v9512_v35, %v9460_v14  ;;  %v9564_v24 = vadd.f32 %v9563_v25, %v9511_v18  ;;  %v15485_v18 = vld [vmem:[#allocation40_spill] sm:$0xff] }
0x17ab   : > { %v9514_v19 = vpop.f32.mrf.mxu0  ;;  %v15310_v48 = vpop.f32.mrf.mxu1 }
0x17ac   : > { %v9515_v56 = vadd.f32 %v9514_v19, %v9462_v58  ;;  %v9566_v37 = vadd.f32 %v15308_v3, %v9513_v34 }
0x17ae   : > { %v9568_v35 = vadd.f32 %v15310_v48, %v9515_v56 }
0x17de   : > { %v9604_v17 = vpop.f32.mrf.mxu0  ;;  %v9657_v6 = vpop.f32.mrf.mxu1 }
0x17df   : > { %v9605_v43 = vadd.f32 %v9604_v17, %v9552_v4 }
0x17e0   : > { %v9606_v52 = vpop.f32.mrf.mxu0  ;;  %v9659_v0 = vpop.f32.mrf.mxu1 }
0x17e1   : > { %v9607_v46 = vadd.f32 %v9606_v52, %v9554_v1  ;;  %v9658_v10 = vadd.f32 %v9657_v6, %v9605_v43  ;;  %v15481_v52 = vld [vmem:[#allocation36_spill] sm:$0xff] }
0x17e2   : > { %v9608_v2 = vpop.f32.mrf.mxu0  ;;  %v9661_v44 = vpop.f32.mrf.mxu1 }
0x17e3   : > { %v9609_v59 = vadd.f32 %v9608_v2, %v9556_v32  ;;  %v9660_v40 = vadd.f32 %v9659_v0, %v9607_v46  ;;  %v15482_v2 = vld [vmem:[#allocation37_spill] sm:$0xff] }
0x17e4   : > { %v9610_v61 = vpop.f32.mrf.mxu0  ;;  %v9663_v16 = vpop.f32.mrf.mxu1 }
0x17e5   : > { %v9611_v4 = vadd.f32 %v9610_v61, %v9558_v9  ;;  %v9662_v20 = vadd.f32 %v9661_v44, %v9609_v59  ;;  %v15486_v9 = vld [vmem:[#allocation41_spill] sm:$0xff] }
0x17e6   : > { %v9614_v7 = vpop.f32.mrf.mxu0  ;;  %v9667_v60 = vpop.f32.mrf.mxu1 }
0x17e7   : > { %v9615_v8 = vadd.f32 %v9614_v7, %v9562_v23  ;;  %v9664_v39 = vadd.f32 %v9663_v16, %v9611_v4 }
0x17e8   : > { %v9616_v26 = vpop.f32.mrf.mxu0  ;;  %v9669_v28 = vpop.f32.mrf.mxu1 }
0x17e9   : > { %v9617_v29 = vadd.f32 %v9616_v26, %v9564_v24  ;;  %v9668_v17 = vadd.f32 %v9667_v60, %v9615_v8  ;;  %v15483_v60 = vld [vmem:[#allocation38_spill] sm:$0xff]  ;;  %v15484_v26 = vld [vmem:[#allocation39_spill] sm:$0xff] }
0x17ea   : > { %v9618_v62 = vpop.f32.mrf.mxu0  ;;  %v9671_v57 = vpop.f32.mrf.mxu1 }
0x17eb   : > { %v9619_v6 = vadd.f32 %v9618_v62, %v9566_v37  ;;  %v9670_v61 = vadd.f32 %v9669_v28, %v9617_v29 }
0x17ec   : > { %v9620_v51 = vpop.f32.mrf.mxu0  ;;  %v9673_v54 = vpop.f32.mrf.mxu1 }
0x17ed   : > { %v9621_v36 = vadd.f32 %v9620_v51, %v9568_v35  ;;  %v9672_v21 = vadd.f32 %v9671_v57, %v9619_v6 }
0x17ef   : > { %v9674_v45 = vadd.f32 %v9673_v54, %v9621_v36 }
0x181f   : > { %v9710_v63 = vpop.f32.mrf.mxu0  ;;  %v9763_v15 = vpop.f32.mrf.mxu1 }
0x1820   : > { %v9711_v27 = vadd.f32 %v9710_v63, %v9658_v10  ;;  %v15487_v63 = vld [vmem:[#allocation42_spill] sm:$0xff] }
0x1821   : > { %v9712_v1 = vpop.f32.mrf.mxu0  ;;  %v9765_v47 = vpop.f32.mrf.mxu1 }
0x1822   : > { %v9764_v53 = vadd.f32 %v9763_v15, %v9711_v27  ;;  %v9713_v50 = vadd.f32 %v9712_v1, %v9660_v40  ;;  %v15488_v40 = vld [vmem:[#allocation43_spill] sm:$0xff] }
0x1823   : > { %v9714_v11 = vpop.f32.mrf.mxu0  ;;  %v9767_v12 = vpop.f32.mrf.mxu1 }
0x1824   : > { %v9766_v31 = vadd.f32 %v9765_v47, %v9713_v50  ;;  %v9715_v5 = vadd.f32 %v9714_v11, %v9662_v20  ;;  %v9782_v0 = vadd.f32 %v9764_v53, %v15481_v52 }
0x1825   : > { %v9716_v25 = vpop.f32.mrf.mxu0  ;;  %v9769_v19 = vpop.f32.mrf.mxu1 }
0x1826   : > { %v9783_v44 = vadd.f32 %v9766_v31, %v15482_v2  ;;  %v9768_v33 = vadd.f32 %v9767_v12, %v9715_v5  ;;  %v9717_v41 = vadd.f32 %v9716_v25, %v9664_v39 }
0x1827   : > { %v9720_v3 = vpop.f32.mrf.mxu0  ;;  %v9773_v7 = vpop.f32.mrf.mxu1 }
0x1828   : > { %v9770_v42 = vadd.f32 %v9769_v19, %v9717_v41  ;;  %v9721_v16 = vadd.f32 %v9720_v3, %v9668_v17  ;;  %v9790_v38 = vadd.f32 %v9783_v44, %v9782_v0  ;;  %v9784_v22 = vadd.f32 %v9768_v33, %v15483_v60 }
0x1829   : > { %v9722_v30 = vpop.f32.mrf.mxu0  ;;  %v9775_v48 = vpop.f32.mrf.mxu1 }
0x182a   : > { %v9785_v13 = vadd.f32 %v9770_v42, %v15484_v26  ;;  %v9774_v62 = vadd.f32 %v9773_v7, %v9721_v16  ;;  %v9723_v43 = vadd.f32 %v9722_v30, %v9670_v61  ;;  %9791 = vadd.xlane.f32.xlu1 %v9790_v38  ;;  %v9854_v26 = vld [vmem:[%s15489_s27] sm:$0x3] }
0x182b   : > { %v9724_v49 = vpop.f32.mrf.mxu0  ;;  %v9777_v55 = vpop.f32.mrf.mxu1 }
0x182c   : > { %v9776_v28 = vadd.f32 %v9775_v48, %v9723_v43  ;;  %v9725_v32 = vadd.f32 %v9724_v49, %v9672_v21  ;;  %v9793_v46 = vadd.f32 %v9785_v13, %v9784_v22  ;;  %v9786_v51 = vadd.f32 %v9774_v62, %v15485_v18  ;;  %v9874_v62 = vld [vmem:[%s15490_s30] sm:$0x3]  ;;  %v15491_v43 = vld [vmem:[#allocation34_spill] sm:$0xff] }
0x182d   : > { %v9726_v14 = vpop.f32.mrf.mxu0  ;;  %v9779_v58 = vpop.f32.mrf.mxu1  ;;  %v9859_v49 = vrot.slane %v9854_v26, %v15491_v43 }
0x182e   : > { %v9787_v57 = vadd.f32 %v9776_v28, %v15486_v9  ;;  %v9778_v10 = vadd.f32 %v9777_v55, %v9725_v32  ;;  %v9727_v59 = vadd.f32 %v9726_v14, %v9674_v45  ;;  %9794 = vadd.xlane.f32.xlu0 %v9793_v46  ;;  %v15492_v55 = vld [vmem:[#allocation35_spill] sm:$0xff]  ;;  %v9879_v32 = vrot.slane %v9874_v62, %v15491_v43 }
0x182f   : > { %v9863_v45 = vrot.slane %v9854_v26, %v15492_v55  ;;  %v9883_v46 = vrot.slane %v9874_v62, %v15492_v55 }
0x1830   : > { %v9780_v23 = vadd.f32 %v9779_v58, %v9727_v59  ;;  %v9796_v34 = vadd.f32 %v9787_v57, %v9786_v51  ;;  %v9788_v15 = vadd.f32 %v9778_v10, %v15487_v63 }
0x1832   : > { %v9789_v4 = vadd.f32 %v9780_v23, %v15488_v40  ;;  %9797 = vadd.xlane.f32.xlu1 %v9796_v34 }
0x1834   : > { %v9799_v54 = vadd.f32 %v9789_v4, %v9788_v15 }
0x1836   : > { %9800 = vadd.xlane.f32.xlu0 %v9799_v54 }
0x18b3   : > { %v9792_v27 = vpop.xlane.xlu1 %9791 }
0x18b4   : > { %v9802_v24 = vmul.f32 0.00390625, %v9792_v27 }
0x18b6   : > { %v9806_v56 = vsub.f32 %v9782_v0, %v9802_v24  ;;  %v9807_v8 = vsub.f32 %v9783_v44, %v9802_v24 }
0x18b7   : > { %v9795_v1 = vpop.xlane.xlu0 %9794 }
0x18b8   : > { %v9814_v47 = vmul.f32 %v9806_v56, %v9806_v56  ;;  %v9815_v20 = vmul.f32 %v9807_v8, %v9807_v8  ;;  %v9803_v53 = vmul.f32 0.00390625, %v9795_v1 }
0x18ba   : > { %v9808_v50 = vsub.f32 %v9784_v22, %v9803_v53  ;;  %v9809_v37 = vsub.f32 %v9785_v13, %v9803_v53  ;;  %v9822_v29 = vadd.f32 %v9815_v20, %v9814_v47 }
0x18bb   : > { %v9798_v11 = vpop.xlane.xlu1 %9797 }
0x18bc   : > { %v9816_v12 = vmul.f32 %v9808_v50, %v9808_v50  ;;  %v9817_v39 = vmul.f32 %v9809_v37, %v9809_v37  ;;  %v9804_v31 = vmul.f32 0.00390625, %v9798_v11  ;;  %9823 = vadd.xlane.f32.xlu1 %v9822_v29 }
0x18be   : > { %v9810_v5 = vsub.f32 %v9786_v51, %v9804_v31  ;;  %v9811_v35 = vsub.f32 %v9787_v57, %v9804_v31  ;;  %v9825_v17 = vadd.f32 %v9817_v39, %v9816_v12 }
0x18bf   : > { %v9801_v6 = vpop.xlane.xlu0 %9800 }
0x18c0   : > { %v9818_v25 = vmul.f32 %v9810_v5, %v9810_v5  ;;  %v9819_v19 = vmul.f32 %v9811_v35, %v9811_v35  ;;  %v9805_v52 = vmul.f32 0.00390625, %v9801_v6  ;;  %9826 = vadd.xlane.f32.xlu0 %v9825_v17 }
0x18c2   : > { %v9812_v0 = vsub.f32 %v9788_v15, %v9805_v52  ;;  %v9813_v2 = vsub.f32 %v9789_v4, %v9805_v52  ;;  %v9828_v44 = vadd.f32 %v9819_v19, %v9818_v25 }
0x18c4   : > { %v9820_v33 = vmul.f32 %v9812_v0, %v9812_v0  ;;  %v9821_v41 = vmul.f32 %v9813_v2, %v9813_v2  ;;  %9829 = vadd.xlane.f32.xlu1 %v9828_v44 }
0x18c6   : > { %v9831_v61 = vadd.f32 %v9821_v41, %v9820_v33 }
0x18c8   : > { %9832 = vadd.xlane.f32.xlu0 %v9831_v61 }
0x1945   : > { %v9824_v3 = vpop.xlane.xlu1 %9823 }
0x1946   : > { %v9834_v7 = vmul.f32 0.00390625, %v9824_v3 }
0x1948   : > { %v9838_v36 = vadd.f32 1e-05, %v9834_v7 }
0x1949   : > { %v9827_v42 = vpop.xlane.xlu0 %9826 }
0x194a   : > { %12398 = vrsqrt.f32 %v9838_v36  ;;  %v9835_v16 = vmul.f32 0.00390625, %v9827_v42 }
0x194c   : > { %v9839_v38 = vadd.f32 1e-05, %v9835_v16 }
0x194d   : > { %v9830_v21 = vpop.xlane.xlu1 %9829 }
0x194e   : > { %12400 = vrsqrt.f32 %v9839_v38  ;;  %v9836_v30 = vmul.f32 0.00390625, %v9830_v21 }
0x1950   : > { %v9840_v48 = vadd.f32 1e-05, %v9836_v30 }
0x1951   : > { %v9833_v60 = vpop.xlane.xlu0 %9832 }
0x1952   : > { %12402 = vrsqrt.f32 %v9840_v48  ;;  %v9837_v22 = vmul.f32 0.00390625, %v9833_v60 }
0x1954   : > { %v9841_v13 = vadd.f32 1e-05, %v9837_v22 }
0x1956   : > { %12404 = vrsqrt.f32 %v9841_v13 }
0x1957   : > { %v12399_v28 = vpop.eup %12398 }
0x1958   : > { %v9846_v14 = vmul.f32 %v12399_v28, %v9806_v56  ;;  %v9847_v18 = vmul.f32 %v12399_v28, %v9807_v8 }
0x195a   : > { %v9866_v51 = vmul.f32 %v9859_v49, %v9846_v14  ;;  %v9867_v9 = vmul.f32 %v9863_v45, %v9847_v18 }
0x195b   : > { %v12401_v57 = vpop.eup %12400 }
0x195c   : > { %v9886_v10 = vadd.f32 %v9879_v32, %v9866_v51  ;;  %v9887_v59 = vadd.f32 %v9883_v46, %v9867_v9  ;;  %v9848_v58 = vmul.f32 %v12401_v57, %v9808_v50  ;;  %v9849_v23 = vmul.f32 %v12401_v57, %v9809_v37 }
0x195e   : > { %9894 = vst [vmem:[#allocation2 + $0x30] sm:$0xff] %v9886_v10  ;;  %9895 = vst [vmem:[#allocation2] sm:$0xff] %v9887_v59  ;;  %v9868_v34 = vmul.f32 %v9859_v49, %v9848_v58  ;;  %v9869_v63 = vmul.f32 %v9863_v45, %v9849_v23 }
0x195f   : > { %v12403_v15 = vpop.eup %12402 }
0x1960   : > { %v9888_v40 = vadd.f32 %v9879_v32, %v9868_v34  ;;  %v9889_v4 = vadd.f32 %v9883_v46, %v9869_v63  ;;  %v9850_v54 = vmul.f32 %v12403_v15, %v9810_v5  ;;  %v9851_v27 = vmul.f32 %v12403_v15, %v9811_v35 }
0x1962   : > { %9896 = vst [vmem:[#allocation2 + $0x18] sm:$0xff] %v9888_v40  ;;  %9897 = vst [vmem:[#allocation2 + $0x10] sm:$0xff] %v9889_v4  ;;  %v9870_v24 = vmul.f32 %v9859_v49, %v9850_v54  ;;  %v9871_v56 = vmul.f32 %v9863_v45, %v9851_v27 }
0x1963   : > { %v12405_v8 = vpop.eup %12404 }
0x1964   : > { %v9890_v1 = vadd.f32 %v9879_v32, %v9870_v24  ;;  %v9891_v47 = vadd.f32 %v9883_v46, %v9871_v56  ;;  %v9852_v20 = vmul.f32 %v12405_v8, %v9812_v0  ;;  %v9853_v53 = vmul.f32 %v12405_v8, %v9813_v2 }
0x1966   : > { %9898 = vst [vmem:[#allocation2 + $0x8] sm:$0xff] %v9890_v1  ;;  %9899 = vst [vmem:[#allocation2 + $0x20] sm:$0xff] %v9891_v47  ;;  %v9872_v50 = vmul.f32 %v9859_v49, %v9852_v20  ;;  %v9873_v37 = vmul.f32 %v9863_v45, %v9853_v53  ;;  %9905 = sbr.rel (%p11086_p7) target bundleno = 6719 (0x1a3f), region = 168 }
0x1968   : > { %v9892_v29 = vadd.f32 %v9879_v32, %v9872_v50  ;;  %v9893_v11 = vadd.f32 %v9883_v46, %v9873_v37 }
0x196a   : > { %9900 = vst [vmem:[#allocation2 + $0x28] sm:$0xff] %v9892_v29  ;;  %9901 = vst [vmem:[#allocation2 + $0x38] sm:$0xff] %v9893_v11 }
0x196b   : > { %9944 = vmatprep.subr.mxu0 %v9893_v11  ;;  %v9906_v12 = vld [vmem:[#allocation9] sm:$0x3]  ;;  %v15494_v39 = vld [vmem:[#allocation35_spill] sm:$0xff]  ;;  %v15495_v5 = vld [vmem:[#allocation34_spill] sm:$0xff]  ;;  %v9908_v17 = vstv %s9907_s26  ;;  %vm9990_vm6 = vcmask 253952  }
0x196c   : > { %9945 = vmatpush1.xpose.msra.mxu0 %v9892_v29  ;;  %v9917_v31 = vrot.slane %v9906_v12, %v15494_v39  ;;  %v9913_v35 = vrot.slane %v9906_v12, %v15495_v5 }
0x196d   : > { %9946 = vmatprep.subr.mxu0 %v9891_v47 }
0x196e   : > { %9984 = vmatprep.mubr.f32.mxu0 %v9917_v31 }
0x1970   : > { %9947 = vmatpush1.xpose.msra.mxu0 %v9890_v1 }
0x1971   : > { %9948 = vmatprep.subr.mxu0 %v9889_v4 }
0x1974   : > { %9949 = vmatpush1.xpose.msra.mxu0 %v9888_v40 }
0x1975   : > { %9950 = vmatprep.subr.mxu0 %v9887_v59 }
0x1978   : > { %9951 = vmatpush1.xpose.msra.mxu0 %v9886_v10 }
0x197b   : > { %9985 = vmatmul.mubr.f32.vlgmr.msra.gmra.mxu0 %v9913_v35 }
0x1a3b   : > { %v9986_v6 = vpop.f32.mrf.mxu0 }
0x1a3c   : > { %v9987_v25 = vadd.f32 %v9986_v6, %v9908_v17 }
0x1a3d   : > { %v9988_v19 = vpop.f32.mrf.mxu0 }
0x1a3e   : > { %9991 = vst.msk [vmem:[%s15496_s24] sm:$0x1] %vm9990_vm6, %v9987_v25 }
0x1a3f PF: > { %s15497_s22 = sld [smem:[#allocation30_spill]] }
0x1a40   : > { %s15498_s20 = sld [smem:[#allocation27_spill]] }
0x1a41   : > { %s15499_s21 = sld [smem:[#allocation28_spill]] }
0x1a42   : > { %s15500_s1 = sld [smem:[#allocation31_spill]] }
0x1a45   : > { %p30_p11 = scmp.ge.s32.totalorder %s15497_s22, 5  }
0x1a47   :  { %32 = sbr.rel (!%p30_p11) target bundleno = 17 (0x11), region = 276 }
0x1a4c   :  { %10003 = vsyncpa [#allocation5], 1 }
0x1a4d   :  { %10005 = vsyncpa [#allocation5 + $0x1], 1 }
0x1a4e   :  { %10006 = vsyncpa [#allocation7], 1 }
0x1a4f   :  { %10007 = vsyncpa [#allocation10], 1 }

</bundles_post_ra>
